<compile_context>
chip_gen: v7x
topology: tpu7x:2x2x1
jax: 0.10.0
libtpu: 0.0.40
codegen_flags: <defaults>
</compile_context>

<pallas_src>
import functools

import jax
import jax.numpy as jnp
import numpy as np
from jax.experimental import pallas as pl
from jax.experimental.pallas import tpu as pltpu

LANE = 128


def _round_up(x, m):
    return (x + m - 1) // m * m


def bridge_kernel(x_ref, w1_ref, g1_ref, b1_ref, w2_ref, g2_ref, b2_ref,
                  o_ref, xpad_ref, mid_ref, *, H, W, eps):
    """Fused Bridge forward.

    x_ref:            (N, H, W, C)        bf16  channel-padded NHWC input
    w1_ref / w2_ref:  (9, C, C)           bf16  3x3 weights, taps flattened
    g*_ref / b*_ref:  (1, C)              f32   BN gamma / beta (channel-padded)
    o_ref:            (N*H*W, C)          f32   lane-dense 2D output slab
    xpad_ref/mid_ref: (N, H+2, W+2, C)    f32   zero-halo scratch activations
    """
    N = x_ref.shape[0]
    C = x_ref.shape[3]
    M = N * H * W

    def conv_bn_relu(src_ref, w_ref, gamma_ref, beta_ref):
        # 3x3 conv as 9 shifted matmuls; lane-full C makes each
        # (N,H,W,C)->(M,C) reshape layout-preserving (no relayout copies).
        acc = jnp.zeros((M, C), jnp.float32)
        for ky in range(3):
            for kx in range(3):
                patch = src_ref[:, ky:ky + H, kx:kx + W, :]
                patch = patch.reshape(M, C).astype(jnp.bfloat16)
                acc = acc + jnp.dot(patch, w_ref[ky * 3 + kx],
                                    preferred_element_type=jnp.float32)
        # Conv bias intentionally omitted: a per-channel constant is exactly
        # cancelled by the BN mean subtraction below (training-mode stats).
        mean = jnp.mean(acc, axis=0, keepdims=True)
        centered = acc - mean
        var = jnp.mean(centered * centered, axis=0, keepdims=True)
        scale = jax.lax.rsqrt(var + eps) * gamma_ref[...]
        y = centered * scale + beta_ref[...]
        return jnp.maximum(y, 0.0)                      # (M, C) f32

    # ---- block 1: zero-pad the input inside VMEM (no jnp.pad HBM pass) ----
    xpad_ref[...] = jnp.zeros_like(xpad_ref)
    xpad_ref[:, 1:H + 1, 1:W + 1, :] = x_ref[...].astype(jnp.float32)
    y1 = conv_bn_relu(xpad_ref, w1_ref, g1_ref, b1_ref)

    # ---- block 2: intermediate activation stays in VMEM (no HBM round trip) ----
    mid_ref[...] = jnp.zeros_like(mid_ref)
    mid_ref[:, 1:H + 1, 1:W + 1, :] = y1.reshape(N, H, W, C)
    y2 = conv_bn_relu(mid_ref, w2_ref, g2_ref, b2_ref)

    o_ref[...] = y2                                     # lane-dense store


def _bridge_pallas(x_nhwc, w1, g1, b1, w2, g2, b2):
    N, H, W, C = x_nhwc.shape
    M = N * H * W
    pad_elems = N * (H + 2) * (W + 2) * C
    # Explicit scoped-VMEM budget: actual buffers + generous temp headroom,
    # clamped so it stays valid on every generation (v7x has 64 MiB physical).
    need = (M * C * 2                      # bf16 input
            + 2 * pad_elems * 4            # two f32 padded scratches
            + 2 * 9 * C * C * 2            # bf16 weights
            + M * C * 4                    # f32 output
            + 8 * M * C * 4)               # acc / temporaries
    vmem_limit = int(min(max(4 * need, 32 << 20), 48 << 20))

    kernel = functools.partial(bridge_kernel, H=H, W=W, eps=1e-5)
    return pl.pallas_call(
        kernel,
        out_shape=jax.ShapeDtypeStruct((M, C), jnp.float32),
        in_specs=[pl.BlockSpec(memory_space=pltpu.MemorySpace.VMEM)] * 7,
        out_specs=pl.BlockSpec(memory_space=pltpu.MemorySpace.VMEM),
        scratch_shapes=[
            pltpu.VMEM((N, H + 2, W + 2, C), jnp.float32),
            pltpu.VMEM((N, H + 2, W + 2, C), jnp.float32),
        ],
        compiler_params=pltpu.CompilerParams(vmem_limit_bytes=vmem_limit),
    )(x_nhwc, w1, g1, b1, w2, g2, b2)


def init_bridge_params(key, in_channels, out_channels):
    """Deterministic synthetic parameters in PyTorch layouts (fresh-module BN)."""
    def conv_params(k, cin, cout):
        k1, k2 = jax.random.split(k)
        bound = 1.0 / float(np.sqrt(cin * 9))
        return dict(
            w=jax.random.uniform(k1, (cout, cin, 3, 3), jnp.float32, -bound, bound),
            b=jax.random.uniform(k2, (cout,), jnp.float32, -bound, bound),
            gamma=jnp.ones((cout,), jnp.float32),
            beta=jnp.zeros((cout,), jnp.float32),
        )
    k1, k2 = jax.random.split(key)
    return dict(block1=conv_params(k1, in_channels, out_channels),
                block2=conv_params(k2, out_channels, out_channels))


def _prep_block(p, cin, cout, C):
    # OIHW -> HWIO, zero-pad channels to lane-full C, flatten taps, cast bf16.
    w = jnp.transpose(p["w"], (2, 3, 1, 0))                       # (3,3,cin,cout)
    w = jnp.pad(w, ((0, 0), (0, 0), (0, C - cin), (0, C - cout)))
    w = w.reshape(9, C, C).astype(jnp.bfloat16)
    g = jnp.pad(p["gamma"], (0, C - cout)).reshape(1, C)
    b = jnp.pad(p["beta"], (0, C - cout)).reshape(1, C)
    # p["b"] (conv bias) is not passed to the kernel: cancelled exactly by BN.
    return w, g, b


@jax.jit
def bridge_forward(x_nchw, params):
    x = jnp.transpose(x_nchw, (0, 2, 3, 1)).astype(jnp.float32)   # NCHW -> NHWC
    N, H, W, cin = x.shape
    cout = params["block1"]["gamma"].shape[0]
    C = _round_up(max(cin, cout), LANE)
    xp = jnp.pad(x, ((0, 0), (0, 0), (0, 0), (0, C - cin))).astype(jnp.bfloat16)
    w1, g1, b1 = _prep_block(params["block1"], cin, cout, C)
    w2, g2, b2 = _prep_block(params["block2"], cout, cout, C)
    out = _bridge_pallas(xp, w1, g1, b1, w2, g2, b2)
    out = out.reshape(N, H, W, C)[..., :cout]                     # metadata-only on HBM
    return jnp.transpose(out, (0, 3, 1, 2))                       # NHWC -> NCHW


# ------------------------- pure-JAX reference -------------------------------
def _convblock_ref(x_nhwc, p, eps=1e-5):
    w = jnp.transpose(p["w"], (2, 3, 1, 0))                       # HWIO
    y = jax.lax.conv_general_dilated(
        x_nhwc, w, window_strides=(1, 1), padding="SAME",
        dimension_numbers=("NHWC", "HWIO", "NHWC"),
        precision=jax.lax.Precision.HIGHEST)
    y = y + p["b"]
    mean = y.mean(axis=(0, 1, 2), keepdims=True)
    var = ((y - mean) ** 2).mean(axis=(0, 1, 2), keepdims=True)   # biased (training BN)
    y = (y - mean) * jax.lax.rsqrt(var + eps) * p["gamma"] + p["beta"]
    return jnp.maximum(y, 0.0)


def bridge_ref(x_nchw, params):
    x = jnp.transpose(x_nchw, (0, 2, 3, 1))
    x = _convblock_ref(x, params["block1"])
    x = _convblock_ref(x, params["block2"])
    return jnp.transpose(x, (0, 3, 1, 2))


if __name__ == "__main__":
    key = jax.random.PRNGKey(0)
    k_params, k_x = jax.random.split(key)

    N, Cin, Cout, HW = 2, 4, 8, 16
    params = init_bridge_params(k_params, Cin, Cout)
    x = jax.random.normal(k_x, (N, Cin, HW, HW), jnp.float32)

    out = bridge_forward(x, params)
    jax.block_until_ready(out)
    assert out.shape == (N, Cout, HW, HW), out.shape

    ref = bridge_ref(x, params)
    err = float(jnp.max(jnp.abs(out - ref)))
    # bf16 MXU inputs / f32 accumulation; post-BN values are O(1), so a loose
    # absolute bound still catches any structural error (which would be O(1)).
    assert np.isfinite(err) and err < 1e-1, err

    print("KERNEL_OK")
</pallas_src>

<mosaic_0001>
module attributes {stable_mosaic.version = 11 : i64} {
  func.func @bridge_kernel(%arg0: memref<2x16x16x128xbf16, #tpu.memory_space<vmem>>, %arg1: memref<9x128x128xbf16, #tpu.memory_space<vmem>>, %arg2: memref<1x128xf32, #tpu.memory_space<vmem>>, %arg3: memref<1x128xf32, #tpu.memory_space<vmem>>, %arg4: memref<9x128x128xbf16, #tpu.memory_space<vmem>>, %arg5: memref<1x128xf32, #tpu.memory_space<vmem>>, %arg6: memref<1x128xf32, #tpu.memory_space<vmem>>, %arg7: memref<512x128xf32, #tpu.memory_space<vmem>>, %arg8: memref<2x18x18x128xf32, #tpu.memory_space<vmem>>, %arg9: memref<2x18x18x128xf32, #tpu.memory_space<vmem>>) attributes {dimension_semantics = [], scalar_prefetch = 0 : i64, scratch_operands = 2 : i64, tpu.core_type = #tpu.core_type<tc>} {
    %cst = arith.constant 0.000000e+00 : f32
    %0 = vector.broadcast %cst : f32 to vector<2x18x18x128xf32>
    %c0 = arith.constant 0 : index
    %c0_0 = arith.constant 0 : index
    %c0_1 = arith.constant 0 : index
    %c0_2 = arith.constant 0 : index
    %1 = vector.load %arg8[%c0, %c0_0, %c0_1, %c0_2] : memref<2x18x18x128xf32, #tpu.memory_space<vmem>>, vector<2x18x18x128xf32>
    tpu.vector_store %arg8[%c0, %c0_0, %c0_1, %c0_2], %0 {strides = array<i32>} : memref<2x18x18x128xf32, #tpu.memory_space<vmem>>, vector<2x18x18x128xf32>,
    %c0_3 = arith.constant 0 : index
    %c0_4 = arith.constant 0 : index
    %c0_5 = arith.constant 0 : index
    %c0_6 = arith.constant 0 : index
    %2 = vector.load %arg0[%c0_3, %c0_4, %c0_5, %c0_6] : memref<2x16x16x128xbf16, #tpu.memory_space<vmem>>, vector<2x16x16x128xbf16>
    %3 = arith.extf %2 : vector<2x16x16x128xbf16> to vector<2x16x16x128xf32>
    %c0_7 = arith.constant 0 : index
    %c1 = arith.constant 1 : index
    %c1_8 = arith.constant 1 : index
    %c0_9 = arith.constant 0 : index
    %4 = vector.load %arg8[%c0_7, %c1, %c1_8, %c0_9] : memref<2x18x18x128xf32, #tpu.memory_space<vmem>>, vector<2x16x16x128xf32>
    tpu.vector_store %arg8[%c0_7, %c1, %c1_8, %c0_9], %3 {strides = array<i32>} : memref<2x18x18x128xf32, #tpu.memory_space<vmem>>, vector<2x16x16x128xf32>,
    %cst_10 = arith.constant 0.000000e+00 : f32
    %5 = vector.broadcast %cst_10 : f32 to vector<512x128xf32>
    %c0_11 = arith.constant 0 : index
    %c0_12 = arith.constant 0 : index
    %c0_13 = arith.constant 0 : index
    %c0_14 = arith.constant 0 : index
    %6 = vector.load %arg8[%c0_11, %c0_12, %c0_13, %c0_14] : memref<2x18x18x128xf32, #tpu.memory_space<vmem>>, vector<2x16x16x128xf32>
    %7 = vector.shape_cast %6 : vector<2x16x16x128xf32> to vector<512x128xf32>
    %8 = arith.truncf %7 : vector<512x128xf32> to vector<512x128xbf16>
    %c0_15 = arith.constant 0 : index
    %c0_16 = arith.constant 0 : index
    %c0_17 = arith.constant 0 : index
    %9 = vector.load %arg1[%c0_15, %c0_16, %c0_17] : memref<9x128x128xbf16, #tpu.memory_space<vmem>>, vector<1x128x128xbf16>
    %10 = vector.shape_cast %9 : vector<1x128x128xbf16> to vector<128x128xbf16>
    %cst_18 = arith.constant dense<0.000000e+00> : vector<512x128xf32>
    %11 = tpu.matmul %8, %10, %cst_18 {dimension_numbers = #tpu.dot_dimension_numbers<[1], [0], [0], [1], [0, 0, 1, 1], [], []>} : vector<512x128xbf16>, vector<128x128xbf16>, vector<512x128xf32> -> vector<512x128xf32>
    %12 = arith.addf %5, %11 : vector<512x128xf32>
    %c0_19 = arith.constant 0 : index
    %c0_20 = arith.constant 0 : index
    %c1_21 = arith.constant 1 : index
    %c0_22 = arith.constant 0 : index
    %13 = vector.load %arg8[%c0_19, %c0_20, %c1_21, %c0_22] : memref<2x18x18x128xf32, #tpu.memory_space<vmem>>, vector<2x16x16x128xf32>
    %14 = vector.shape_cast %13 : vector<2x16x16x128xf32> to vector<512x128xf32>
    %15 = arith.truncf %14 : vector<512x128xf32> to vector<512x128xbf16>
    %c1_23 = arith.constant 1 : index
    %c0_24 = arith.constant 0 : index
    %c0_25 = arith.constant 0 : index
    %16 = vector.load %arg1[%c1_23, %c0_24, %c0_25] : memref<9x128x128xbf16, #tpu.memory_space<vmem>>, vector<1x128x128xbf16>
    %17 = vector.shape_cast %16 : vector<1x128x128xbf16> to vector<128x128xbf16>
    %cst_26 = arith.constant dense<0.000000e+00> : vector<512x128xf32>
    %18 = tpu.matmul %15, %17, %cst_26 {dimension_numbers = #tpu.dot_dimension_numbers<[1], [0], [0], [1], [0, 0, 1, 1], [], []>} : vector<512x128xbf16>, vector<128x128xbf16>, vector<512x128xf32> -> vector<512x128xf32>
    %19 = arith.addf %12, %18 : vector<512x128xf32>
    %c0_27 = arith.constant 0 : index
    %c0_28 = arith.constant 0 : index
    %c2 = arith.constant 2 : index
    %c0_29 = arith.constant 0 : index
    %20 = vector.load %arg8[%c0_27, %c0_28, %c2, %c0_29] : memref<2x18x18x128xf32, #tpu.memory_space<vmem>>, vector<2x16x16x128xf32>
    %21 = vector.shape_cast %20 : vector<2x16x16x128xf32> to vector<512x128xf32>
    %22 = arith.truncf %21 : vector<512x128xf32> to vector<512x128xbf16>
    %c2_30 = arith.constant 2 : index
    %c0_31 = arith.constant 0 : index
    %c0_32 = arith.constant 0 : index
    %23 = vector.load %arg1[%c2_30, %c0_31, %c0_32] : memref<9x128x128xbf16, #tpu.memory_space<vmem>>, vector<1x128x128xbf16>
    %24 = vector.shape_cast %23 : vector<1x128x128xbf16> to vector<128x128xbf16>
    %cst_33 = arith.constant dense<0.000000e+00> : vector<512x128xf32>
    %25 = tpu.matmul %22, %24, %cst_33 {dimension_numbers = #tpu.dot_dimension_numbers<[1], [0], [0], [1], [0, 0, 1, 1], [], []>} : vector<512x128xbf16>, vector<128x128xbf16>, vector<512x128xf32> -> vector<512x128xf32>
    %26 = arith.addf %19, %25 : vector<512x128xf32>
    %c0_34 = arith.constant 0 : index
    %c1_35 = arith.constant 1 : index
    %c0_36 = arith.constant 0 : index
    %c0_37 = arith.constant 0 : index
    %27 = vector.load %arg8[%c0_34, %c1_35, %c0_36, %c0_37] : memref<2x18x18x128xf32, #tpu.memory_space<vmem>>, vector<2x16x16x128xf32>
    %28 = vector.shape_cast %27 : vector<2x16x16x128xf32> to vector<512x128xf32>
    %29 = arith.truncf %28 : vector<512x128xf32> to vector<512x128xbf16>
    %c3 = arith.constant 3 : index
    %c0_38 = arith.constant 0 : index
    %c0_39 = arith.constant 0 : index
    %30 = vector.load %arg1[%c3, %c0_38, %c0_39] : memref<9x128x128xbf16, #tpu.memory_space<vmem>>, vector<1x128x128xbf16>
    %31 = vector.shape_cast %30 : vector<1x128x128xbf16> to vector<128x128xbf16>
    %cst_40 = arith.constant dense<0.000000e+00> : vector<512x128xf32>
    %32 = tpu.matmul %29, %31, %cst_40 {dimension_numbers = #tpu.dot_dimension_numbers<[1], [0], [0], [1], [0, 0, 1, 1], [], []>} : vector<512x128xbf16>, vector<128x128xbf16>, vector<512x128xf32> -> vector<512x128xf32>
    %33 = arith.addf %26, %32 : vector<512x128xf32>
    %c0_41 = arith.constant 0 : index
    %c1_42 = arith.constant 1 : index
    %c1_43 = arith.constant 1 : index
    %c0_44 = arith.constant 0 : index
    %34 = vector.load %arg8[%c0_41, %c1_42, %c1_43, %c0_44] : memref<2x18x18x128xf32, #tpu.memory_space<vmem>>, vector<2x16x16x128xf32>
    %35 = vector.shape_cast %34 : vector<2x16x16x128xf32> to vector<512x128xf32>
    %36 = arith.truncf %35 : vector<512x128xf32> to vector<512x128xbf16>
    %c4 = arith.constant 4 : index
    %c0_45 = arith.constant 0 : index
    %c0_46 = arith.constant 0 : index
    %37 = vector.load %arg1[%c4, %c0_45, %c0_46] : memref<9x128x128xbf16, #tpu.memory_space<vmem>>, vector<1x128x128xbf16>
    %38 = vector.shape_cast %37 : vector<1x128x128xbf16> to vector<128x128xbf16>
    %cst_47 = arith.constant dense<0.000000e+00> : vector<512x128xf32>
    %39 = tpu.matmul %36, %38, %cst_47 {dimension_numbers = #tpu.dot_dimension_numbers<[1], [0], [0], [1], [0, 0, 1, 1], [], []>} : vector<512x128xbf16>, vector<128x128xbf16>, vector<512x128xf32> -> vector<512x128xf32>
    %40 = arith.addf %33, %39 : vector<512x128xf32>
    %c0_48 = arith.constant 0 : index
    %c1_49 = arith.constant 1 : index
    %c2_50 = arith.constant 2 : index
    %c0_51 = arith.constant 0 : index
    %41 = vector.load %arg8[%c0_48, %c1_49, %c2_50, %c0_51] : memref<2x18x18x128xf32, #tpu.memory_space<vmem>>, vector<2x16x16x128xf32>
    %42 = vector.shape_cast %41 : vector<2x16x16x128xf32> to vector<512x128xf32>
    %43 = arith.truncf %42 : vector<512x128xf32> to vector<512x128xbf16>
    %c5 = arith.constant 5 : index
    %c0_52 = arith.constant 0 : index
    %c0_53 = arith.constant 0 : index
    %44 = vector.load %arg1[%c5, %c0_52, %c0_53] : memref<9x128x128xbf16, #tpu.memory_space<vmem>>, vector<1x128x128xbf16>
    %45 = vector.shape_cast %44 : vector<1x128x128xbf16> to vector<128x128xbf16>
    %cst_54 = arith.constant dense<0.000000e+00> : vector<512x128xf32>
    %46 = tpu.matmul %43, %45, %cst_54 {dimension_numbers = #tpu.dot_dimension_numbers<[1], [0], [0], [1], [0, 0, 1, 1], [], []>} : vector<512x128xbf16>, vector<128x128xbf16>, vector<512x128xf32> -> vector<512x128xf32>
    %47 = arith.addf %40, %46 : vector<512x128xf32>
    %c0_55 = arith.constant 0 : index
    %c2_56 = arith.constant 2 : index
    %c0_57 = arith.constant 0 : index
    %c0_58 = arith.constant 0 : index
    %48 = vector.load %arg8[%c0_55, %c2_56, %c0_57, %c0_58] : memref<2x18x18x128xf32, #tpu.memory_space<vmem>>, vector<2x16x16x128xf32>
    %49 = vector.shape_cast %48 : vector<2x16x16x128xf32> to vector<512x128xf32>
    %50 = arith.truncf %49 : vector<512x128xf32> to vector<512x128xbf16>
    %c6 = arith.constant 6 : index
    %c0_59 = arith.constant 0 : index
    %c0_60 = arith.constant 0 : index
    %51 = vector.load %arg1[%c6, %c0_59, %c0_60] : memref<9x128x128xbf16, #tpu.memory_space<vmem>>, vector<1x128x128xbf16>
    %52 = vector.shape_cast %51 : vector<1x128x128xbf16> to vector<128x128xbf16>
    %cst_61 = arith.constant dense<0.000000e+00> : vector<512x128xf32>
    %53 = tpu.matmul %50, %52, %cst_61 {dimension_numbers = #tpu.dot_dimension_numbers<[1], [0], [0], [1], [0, 0, 1, 1], [], []>} : vector<512x128xbf16>, vector<128x128xbf16>, vector<512x128xf32> -> vector<512x128xf32>
    %54 = arith.addf %47, %53 : vector<512x128xf32>
    %c0_62 = arith.constant 0 : index
    %c2_63 = arith.constant 2 : index
    %c1_64 = arith.constant 1 : index
    %c0_65 = arith.constant 0 : index
    %55 = vector.load %arg8[%c0_62, %c2_63, %c1_64, %c0_65] : memref<2x18x18x128xf32, #tpu.memory_space<vmem>>, vector<2x16x16x128xf32>
    %56 = vector.shape_cast %55 : vector<2x16x16x128xf32> to vector<512x128xf32>
    %57 = arith.truncf %56 : vector<512x128xf32> to vector<512x128xbf16>
    %c7 = arith.constant 7 : index
    %c0_66 = arith.constant 0 : index
    %c0_67 = arith.constant 0 : index
    %58 = vector.load %arg1[%c7, %c0_66, %c0_67] : memref<9x128x128xbf16, #tpu.memory_space<vmem>>, vector<1x128x128xbf16>
    %59 = vector.shape_cast %58 : vector<1x128x128xbf16> to vector<128x128xbf16>
    %cst_68 = arith.constant dense<0.000000e+00> : vector<512x128xf32>
    %60 = tpu.matmul %57, %59, %cst_68 {dimension_numbers = #tpu.dot_dimension_numbers<[1], [0], [0], [1], [0, 0, 1, 1], [], []>} : vector<512x128xbf16>, vector<128x128xbf16>, vector<512x128xf32> -> vector<512x128xf32>
    %61 = arith.addf %54, %60 : vector<512x128xf32>
    %c0_69 = arith.constant 0 : index
    %c2_70 = arith.constant 2 : index
    %c2_71 = arith.constant 2 : index
    %c0_72 = arith.constant 0 : index
    %62 = vector.load %arg8[%c0_69, %c2_70, %c2_71, %c0_72] : memref<2x18x18x128xf32, #tpu.memory_space<vmem>>, vector<2x16x16x128xf32>
    %63 = vector.shape_cast %62 : vector<2x16x16x128xf32> to vector<512x128xf32>
    %64 = arith.truncf %63 : vector<512x128xf32> to vector<512x128xbf16>
    %c8 = arith.constant 8 : index
    %c0_73 = arith.constant 0 : index
    %c0_74 = arith.constant 0 : index
    %65 = vector.load %arg1[%c8, %c0_73, %c0_74] : memref<9x128x128xbf16, #tpu.memory_space<vmem>>, vector<1x128x128xbf16>
    %66 = vector.shape_cast %65 : vector<1x128x128xbf16> to vector<128x128xbf16>
    %cst_75 = arith.constant dense<0.000000e+00> : vector<512x128xf32>
    %67 = tpu.matmul %64, %66, %cst_75 {dimension_numbers = #tpu.dot_dimension_numbers<[1], [0], [0], [1], [0, 0, 1, 1], [], []>} : vector<512x128xbf16>, vector<128x128xbf16>, vector<512x128xf32> -> vector<512x128xf32>
    %68 = arith.addf %61, %67 : vector<512x128xf32>
    %cst_76 = arith.constant dense<0.000000e+00> : vector<128xf32>
    %69 = vector.multi_reduction <add>, %68, %cst_76 [0] : vector<512x128xf32> to vector<128xf32>
    %70 = vector.shape_cast %69 : vector<128xf32> to vector<1x128xf32>
    %cst_77 = arith.constant 5.120000e+02 : f32
    %71 = vector.broadcast %cst_77 : f32 to vector<1x128xf32>
    %72 = arith.divf %70, %71 : vector<1x128xf32>
    %73 = vector.broadcast %72 : vector<1x128xf32> to vector<512x128xf32>
    %74 = arith.subf %68, %73 : vector<512x128xf32>
    %75 = arith.mulf %74, %74 : vector<512x128xf32>
    %cst_78 = arith.constant dense<0.000000e+00> : vector<128xf32>
    %76 = vector.multi_reduction <add>, %75, %cst_78 [0] : vector<512x128xf32> to vector<128xf32>
    %77 = vector.shape_cast %76 : vector<128xf32> to vector<1x128xf32>
    %cst_79 = arith.constant 5.120000e+02 : f32
    %78 = vector.broadcast %cst_79 : f32 to vector<1x128xf32>
    %79 = arith.divf %77, %78 : vector<1x128xf32>
    %cst_80 = arith.constant 9.99999974E-6 : f32
    %80 = vector.broadcast %cst_80 : f32 to vector<1x128xf32>
    %81 = arith.addf %79, %80 : vector<1x128xf32>
    %82 = math.rsqrt %81 : vector<1x128xf32>
    %c0_81 = arith.constant 0 : index
    %c0_82 = arith.constant 0 : index
    %83 = vector.load %arg2[%c0_81, %c0_82] : memref<1x128xf32, #tpu.memory_space<vmem>>, vector<1x128xf32>
    %84 = arith.mulf %82, %83 : vector<1x128xf32>
    %85 = vector.broadcast %84 : vector<1x128xf32> to vector<512x128xf32>
    %86 = arith.mulf %74, %85 : vector<512x128xf32>
    %c0_83 = arith.constant 0 : index
    %c0_84 = arith.constant 0 : index
    %87 = vector.load %arg3[%c0_83, %c0_84] : memref<1x128xf32, #tpu.memory_space<vmem>>, vector<1x128xf32>
    %88 = vector.broadcast %87 : vector<1x128xf32> to vector<512x128xf32>
    %89 = arith.addf %86, %88 : vector<512x128xf32>
    %cst_85 = arith.constant 0.000000e+00 : f32
    %90 = vector.broadcast %cst_85 : f32 to vector<512x128xf32>
    %91 = arith.maximumf %89, %90 : vector<512x128xf32>
    %cst_86 = arith.constant 0.000000e+00 : f32
    %92 = vector.broadcast %cst_86 : f32 to vector<2x18x18x128xf32>
    %c0_87 = arith.constant 0 : index
    %c0_88 = arith.constant 0 : index
    %c0_89 = arith.constant 0 : index
    %c0_90 = arith.constant 0 : index
    %93 = vector.load %arg9[%c0_87, %c0_88, %c0_89, %c0_90] : memref<2x18x18x128xf32, #tpu.memory_space<vmem>>, vector<2x18x18x128xf32>
    tpu.vector_store %arg9[%c0_87, %c0_88, %c0_89, %c0_90], %92 {strides = array<i32>} : memref<2x18x18x128xf32, #tpu.memory_space<vmem>>, vector<2x18x18x128xf32>,
    %94 = vector.shape_cast %91 : vector<512x128xf32> to vector<2x16x16x128xf32>
    %c0_91 = arith.constant 0 : index
    %c1_92 = arith.constant 1 : index
    %c1_93 = arith.constant 1 : index
    %c0_94 = arith.constant 0 : index
    %95 = vector.load %arg9[%c0_91, %c1_92, %c1_93, %c0_94] : memref<2x18x18x128xf32, #tpu.memory_space<vmem>>, vector<2x16x16x128xf32>
    tpu.vector_store %arg9[%c0_91, %c1_92, %c1_93, %c0_94], %94 {strides = array<i32>} : memref<2x18x18x128xf32, #tpu.memory_space<vmem>>, vector<2x16x16x128xf32>,
    %cst_95 = arith.constant 0.000000e+00 : f32
    %96 = vector.broadcast %cst_95 : f32 to vector<512x128xf32>
    %c0_96 = arith.constant 0 : index
    %c0_97 = arith.constant 0 : index
    %c0_98 = arith.constant 0 : index
    %c0_99 = arith.constant 0 : index
    %97 = vector.load %arg9[%c0_96, %c0_97, %c0_98, %c0_99] : memref<2x18x18x128xf32, #tpu.memory_space<vmem>>, vector<2x16x16x128xf32>
    %98 = vector.shape_cast %97 : vector<2x16x16x128xf32> to vector<512x128xf32>
    %99 = arith.truncf %98 : vector<512x128xf32> to vector<512x128xbf16>
    %c0_100 = arith.constant 0 : index
    %c0_101 = arith.constant 0 : index
    %c0_102 = arith.constant 0 : index
    %100 = vector.load %arg4[%c0_100, %c0_101, %c0_102] : memref<9x128x128xbf16, #tpu.memory_space<vmem>>, vector<1x128x128xbf16>
    %101 = vector.shape_cast %100 : vector<1x128x128xbf16> to vector<128x128xbf16>
    %cst_103 = arith.constant dense<0.000000e+00> : vector<512x128xf32>
    %102 = tpu.matmul %99, %101, %cst_103 {dimension_numbers = #tpu.dot_dimension_numbers<[1], [0], [0], [1], [0, 0, 1, 1], [], []>} : vector<512x128xbf16>, vector<128x128xbf16>, vector<512x128xf32> -> vector<512x128xf32>
    %103 = arith.addf %96, %102 : vector<512x128xf32>
    %c0_104 = arith.constant 0 : index
    %c0_105 = arith.constant 0 : index
    %c1_106 = arith.constant 1 : index
    %c0_107 = arith.constant 0 : index
    %104 = vector.load %arg9[%c0_104, %c0_105, %c1_106, %c0_107] : memref<2x18x18x128xf32, #tpu.memory_space<vmem>>, vector<2x16x16x128xf32>
    %105 = vector.shape_cast %104 : vector<2x16x16x128xf32> to vector<512x128xf32>
    %106 = arith.truncf %105 : vector<512x128xf32> to vector<512x128xbf16>
    %c1_108 = arith.constant 1 : index
    %c0_109 = arith.constant 0 : index
    %c0_110 = arith.constant 0 : index
    %107 = vector.load %arg4[%c1_108, %c0_109, %c0_110] : memref<9x128x128xbf16, #tpu.memory_space<vmem>>, vector<1x128x128xbf16>
    %108 = vector.shape_cast %107 : vector<1x128x128xbf16> to vector<128x128xbf16>
    %cst_111 = arith.constant dense<0.000000e+00> : vector<512x128xf32>
    %109 = tpu.matmul %106, %108, %cst_111 {dimension_numbers = #tpu.dot_dimension_numbers<[1], [0], [0], [1], [0, 0, 1, 1], [], []>} : vector<512x128xbf16>, vector<128x128xbf16>, vector<512x128xf32> -> vector<512x128xf32>
    %110 = arith.addf %103, %109 : vector<512x128xf32>
    %c0_112 = arith.constant 0 : index
    %c0_113 = arith.constant 0 : index
    %c2_114 = arith.constant 2 : index
    %c0_115 = arith.constant 0 : index
    %111 = vector.load %arg9[%c0_112, %c0_113, %c2_114, %c0_115] : memref<2x18x18x128xf32, #tpu.memory_space<vmem>>, vector<2x16x16x128xf32>
    %112 = vector.shape_cast %111 : vector<2x16x16x128xf32> to vector<512x128xf32>
    %113 = arith.truncf %112 : vector<512x128xf32> to vector<512x128xbf16>
    %c2_116 = arith.constant 2 : index
    %c0_117 = arith.constant 0 : index
    %c0_118 = arith.constant 0 : index
    %114 = vector.load %arg4[%c2_116, %c0_117, %c0_118] : memref<9x128x128xbf16, #tpu.memory_space<vmem>>, vector<1x128x128xbf16>
    %115 = vector.shape_cast %114 : vector<1x128x128xbf16> to vector<128x128xbf16>
    %cst_119 = arith.constant dense<0.000000e+00> : vector<512x128xf32>
    %116 = tpu.matmul %113, %115, %cst_119 {dimension_numbers = #tpu.dot_dimension_numbers<[1], [0], [0], [1], [0, 0, 1, 1], [], []>} : vector<512x128xbf16>, vector<128x128xbf16>, vector<512x128xf32> -> vector<512x128xf32>
    %117 = arith.addf %110, %116 : vector<512x128xf32>
    %c0_120 = arith.constant 0 : index
    %c1_121 = arith.constant 1 : index
    %c0_122 = arith.constant 0 : index
    %c0_123 = arith.constant 0 : index
    %118 = vector.load %arg9[%c0_120, %c1_121, %c0_122, %c0_123] : memref<2x18x18x128xf32, #tpu.memory_space<vmem>>, vector<2x16x16x128xf32>
    %119 = vector.shape_cast %118 : vector<2x16x16x128xf32> to vector<512x128xf32>
    %120 = arith.truncf %119 : vector<512x128xf32> to vector<512x128xbf16>
    %c3_124 = arith.constant 3 : index
    %c0_125 = arith.constant 0 : index
    %c0_126 = arith.constant 0 : index
    %121 = vector.load %arg4[%c3_124, %c0_125, %c0_126] : memref<9x128x128xbf16, #tpu.memory_space<vmem>>, vector<1x128x128xbf16>
    %122 = vector.shape_cast %121 : vector<1x128x128xbf16> to vector<128x128xbf16>
    %cst_127 = arith.constant dense<0.000000e+00> : vector<512x128xf32>
    %123 = tpu.matmul %120, %122, %cst_127 {dimension_numbers = #tpu.dot_dimension_numbers<[1], [0], [0], [1], [0, 0, 1, 1], [], []>} : vector<512x128xbf16>, vector<128x128xbf16>, vector<512x128xf32> -> vector<512x128xf32>
    %124 = arith.addf %117, %123 : vector<512x128xf32>
    %c0_128 = arith.constant 0 : index
    %c1_129 = arith.constant 1 : index
    %c1_130 = arith.constant 1 : index
    %c0_131 = arith.constant 0 : index
    %125 = vector.load %arg9[%c0_128, %c1_129, %c1_130, %c0_131] : memref<2x18x18x128xf32, #tpu.memory_space<vmem>>, vector<2x16x16x128xf32>
    %126 = vector.shape_cast %125 : vector<2x16x16x128xf32> to vector<512x128xf32>
    %127 = arith.truncf %126 : vector<512x128xf32> to vector<512x128xbf16>
    %c4_132 = arith.constant 4 : index
    %c0_133 = arith.constant 0 : index
    %c0_134 = arith.constant 0 : index
    %128 = vector.load %arg4[%c4_132, %c0_133, %c0_134] : memref<9x128x128xbf16, #tpu.memory_space<vmem>>, vector<1x128x128xbf16>
    %129 = vector.shape_cast %128 : vector<1x128x128xbf16> to vector<128x128xbf16>
    %cst_135 = arith.constant dense<0.000000e+00> : vector<512x128xf32>
    %130 = tpu.matmul %127, %129, %cst_135 {dimension_numbers = #tpu.dot_dimension_numbers<[1], [0], [0], [1], [0, 0, 1, 1], [], []>} : vector<512x128xbf16>, vector<128x128xbf16>, vector<512x128xf32> -> vector<512x128xf32>
    %131 = arith.addf %124, %130 : vector<512x128xf32>
    %c0_136 = arith.constant 0 : index
    %c1_137 = arith.constant 1 : index
    %c2_138 = arith.constant 2 : index
    %c0_139 = arith.constant 0 : index
    %132 = vector.load %arg9[%c0_136, %c1_137, %c2_138, %c0_139] : memref<2x18x18x128xf32, #tpu.memory_space<vmem>>, vector<2x16x16x128xf32>
    %133 = vector.shape_cast %132 : vector<2x16x16x128xf32> to vector<512x128xf32>
    %134 = arith.truncf %133 : vector<512x128xf32> to vector<512x128xbf16>
    %c5_140 = arith.constant 5 : index
    %c0_141 = arith.constant 0 : index
    %c0_142 = arith.constant 0 : index
    %135 = vector.load %arg4[%c5_140, %c0_141, %c0_142] : memref<9x128x128xbf16, #tpu.memory_space<vmem>>, vector<1x128x128xbf16>
    %136 = vector.shape_cast %135 : vector<1x128x128xbf16> to vector<128x128xbf16>
    %cst_143 = arith.constant dense<0.000000e+00> : vector<512x128xf32>
    %137 = tpu.matmul %134, %136, %cst_143 {dimension_numbers = #tpu.dot_dimension_numbers<[1], [0], [0], [1], [0, 0, 1, 1], [], []>} : vector<512x128xbf16>, vector<128x128xbf16>, vector<512x128xf32> -> vector<512x128xf32>
    %138 = arith.addf %131, %137 : vector<512x128xf32>
    %c0_144 = arith.constant 0 : index
    %c2_145 = arith.constant 2 : index
    %c0_146 = arith.constant 0 : index
    %c0_147 = arith.constant 0 : index
    %139 = vector.load %arg9[%c0_144, %c2_145, %c0_146, %c0_147] : memref<2x18x18x128xf32, #tpu.memory_space<vmem>>, vector<2x16x16x128xf32>
    %140 = vector.shape_cast %139 : vector<2x16x16x128xf32> to vector<512x128xf32>
    %141 = arith.truncf %140 : vector<512x128xf32> to vector<512x128xbf16>
    %c6_148 = arith.constant 6 : index
    %c0_149 = arith.constant 0 : index
    %c0_150 = arith.constant 0 : index
    %142 = vector.load %arg4[%c6_148, %c0_149, %c0_150] : memref<9x128x128xbf16, #tpu.memory_space<vmem>>, vector<1x128x128xbf16>
    %143 = vector.shape_cast %142 : vector<1x128x128xbf16> to vector<128x128xbf16>
    %cst_151 = arith.constant dense<0.000000e+00> : vector<512x128xf32>
    %144 = tpu.matmul %141, %143, %cst_151 {dimension_numbers = #tpu.dot_dimension_numbers<[1], [0], [0], [1], [0, 0, 1, 1], [], []>} : vector<512x128xbf16>, vector<128x128xbf16>, vector<512x128xf32> -> vector<512x128xf32>
    %145 = arith.addf %138, %144 : vector<512x128xf32>
    %c0_152 = arith.constant 0 : index
    %c2_153 = arith.constant 2 : index
    %c1_154 = arith.constant 1 : index
    %c0_155 = arith.constant 0 : index
    %146 = vector.load %arg9[%c0_152, %c2_153, %c1_154, %c0_155] : memref<2x18x18x128xf32, #tpu.memory_space<vmem>>, vector<2x16x16x128xf32>
    %147 = vector.shape_cast %146 : vector<2x16x16x128xf32> to vector<512x128xf32>
    %148 = arith.truncf %147 : vector<512x128xf32> to vector<512x128xbf16>
    %c7_156 = arith.constant 7 : index
    %c0_157 = arith.constant 0 : index
    %c0_158 = arith.constant 0 : index
    %149 = vector.load %arg4[%c7_156, %c0_157, %c0_158] : memref<9x128x128xbf16, #tpu.memory_space<vmem>>, vector<1x128x128xbf16>
    %150 = vector.shape_cast %149 : vector<1x128x128xbf16> to vector<128x128xbf16>
    %cst_159 = arith.constant dense<0.000000e+00> : vector<512x128xf32>
    %151 = tpu.matmul %148, %150, %cst_159 {dimension_numbers = #tpu.dot_dimension_numbers<[1], [0], [0], [1], [0, 0, 1, 1], [], []>} : vector<512x128xbf16>, vector<128x128xbf16>, vector<512x128xf32> -> vector<512x128xf32>
    %152 = arith.addf %145, %151 : vector<512x128xf32>
    %c0_160 = arith.constant 0 : index
    %c2_161 = arith.constant 2 : index
    %c2_162 = arith.constant 2 : index
    %c0_163 = arith.constant 0 : index
    %153 = vector.load %arg9[%c0_160, %c2_161, %c2_162, %c0_163] : memref<2x18x18x128xf32, #tpu.memory_space<vmem>>, vector<2x16x16x128xf32>
    %154 = vector.shape_cast %153 : vector<2x16x16x128xf32> to vector<512x128xf32>
    %155 = arith.truncf %154 : vector<512x128xf32> to vector<512x128xbf16>
    %c8_164 = arith.constant 8 : index
    %c0_165 = arith.constant 0 : index
    %c0_166 = arith.constant 0 : index
    %156 = vector.load %arg4[%c8_164, %c0_165, %c0_166] : memref<9x128x128xbf16, #tpu.memory_space<vmem>>, vector<1x128x128xbf16>
    %157 = vector.shape_cast %156 : vector<1x128x128xbf16> to vector<128x128xbf16>
    %cst_167 = arith.constant dense<0.000000e+00> : vector<512x128xf32>
    %158 = tpu.matmul %155, %157, %cst_167 {dimension_numbers = #tpu.dot_dimension_numbers<[1], [0], [0], [1], [0, 0, 1, 1], [], []>} : vector<512x128xbf16>, vector<128x128xbf16>, vector<512x128xf32> -> vector<512x128xf32>
    %159 = arith.addf %152, %158 : vector<512x128xf32>
    %cst_168 = arith.constant dense<0.000000e+00> : vector<128xf32>
    %160 = vector.multi_reduction <add>, %159, %cst_168 [0] : vector<512x128xf32> to vector<128xf32>
    %161 = vector.shape_cast %160 : vector<128xf32> to vector<1x128xf32>
    %cst_169 = arith.constant 5.120000e+02 : f32
    %162 = vector.broadcast %cst_169 : f32 to vector<1x128xf32>
    %163 = arith.divf %161, %162 : vector<1x128xf32>
    %164 = vector.broadcast %163 : vector<1x128xf32> to vector<512x128xf32>
    %165 = arith.subf %159, %164 : vector<512x128xf32>
    %166 = arith.mulf %165, %165 : vector<512x128xf32>
    %cst_170 = arith.constant dense<0.000000e+00> : vector<128xf32>
    %167 = vector.multi_reduction <add>, %166, %cst_170 [0] : vector<512x128xf32> to vector<128xf32>
    %168 = vector.shape_cast %167 : vector<128xf32> to vector<1x128xf32>
    %cst_171 = arith.constant 5.120000e+02 : f32
    %169 = vector.broadcast %cst_171 : f32 to vector<1x128xf32>
    %170 = arith.divf %168, %169 : vector<1x128xf32>
    %cst_172 = arith.constant 9.99999974E-6 : f32
    %171 = vector.broadcast %cst_172 : f32 to vector<1x128xf32>
    %172 = arith.addf %170, %171 : vector<1x128xf32>
    %173 = math.rsqrt %172 : vector<1x128xf32>
    %c0_173 = arith.constant 0 : index
    %c0_174 = arith.constant 0 : index
    %174 = vector.load %arg5[%c0_173, %c0_174] : memref<1x128xf32, #tpu.memory_space<vmem>>, vector<1x128xf32>
    %175 = arith.mulf %173, %174 : vector<1x128xf32>
    %176 = vector.broadcast %175 : vector<1x128xf32> to vector<512x128xf32>
    %177 = arith.mulf %165, %176 : vector<512x128xf32>
    %c0_175 = arith.constant 0 : index
    %c0_176 = arith.constant 0 : index
    %178 = vector.load %arg6[%c0_175, %c0_176] : memref<1x128xf32, #tpu.memory_space<vmem>>, vector<1x128xf32>
    %179 = vector.broadcast %178 : vector<1x128xf32> to vector<512x128xf32>
    %180 = arith.addf %177, %179 : vector<512x128xf32>
    %cst_177 = arith.constant 0.000000e+00 : f32
    %181 = vector.broadcast %cst_177 : f32 to vector<512x128xf32>
    %182 = arith.maximumf %180, %181 : vector<512x128xf32>
    %c0_178 = arith.constant 0 : index
    %c0_179 = arith.constant 0 : index
    %183 = vector.load %arg7[%c0_178, %c0_179] : memref<512x128xf32, #tpu.memory_space<vmem>>, vector<512x128xf32>
    tpu.vector_store %arg7[%c0_178, %c0_179], %182 {strides = array<i32>} : memref<512x128xf32, #tpu.memory_space<vmem>>, vector<512x128xf32>,
    return
  }
}

</mosaic_0001>

<bundles_post_ra>
// kernel: bridge_forward.1
= control target key start
LH: loop header
LB: loop body
LE: loop exit
PB: predicated region body
PF: predicated region fallthrough
CT: control target
= control target key end

     0   :  { %v14446_v1 = vmov 0.0   ;;  %s18853_s1 = inlined_call_operand.vmem [shape: bf16[9,128,128], index: 1, kind: input, shape index: {}]   ;;  %s18854_s0 = inlined_call_operand.vmem [shape: bf16[2,16,16,128], index: 0, kind: input, shape index: {}]   ;;  %s18855_s4 = inlined_call_operand.vmem [shape: bf16[9,128,128], index: 4, kind: input, shape index: {}]   ;;  %s18856_s2 = inlined_call_operand.vmem [shape: f32[1,128], index: 2, kind: input, shape index: {}]   ;;  %s18857_s3 = inlined_call_operand.vmem [shape: f32[1,128], index: 3, kind: input, shape index: {}]   ;;  %s18858_s5 = inlined_call_operand.vmem [shape: f32[1,128], index: 5, kind: input, shape index: {}]   ;;  %s18859_s6 = inlined_call_operand.vmem [shape: f32[1,128], index: 6, kind: input, shape index: {}]   ;;  %s18860_s7 = inlined_call_operand.vmem [shape: f32[512,128], index: 7, kind: output, shape index: {}]  }
   0x1   :  { %v14490_v0 = vld [vmem:[%s18853_s1 + $0x40] sm:$0xff]   ;;  %27 = vst [vmem:[#allocation2] sm:$0xff] %v14446_v1  ;;  %28 = vst [vmem:[#allocation2 + $0x8] sm:$0xff] %v14446_v1  ;;  %v14263_v2 = vld [vmem:[%s18853_s1 + $0x48] sm:$0xff]  }
   0x2   :  { %29 = vst [vmem:[#allocation2 + $0x10] sm:$0x3] %v14446_v1  ;;  %30 = vst [vmem:[#allocation2 + $0x18] sm:$0xff] %v14446_v1  ;;  %11797 = vmatprep.subr.bf16.mxu0 %v14490_v0  ;;  %v14264_v3 = vld [vmem:[%s18853_s1 + $0x50] sm:$0xff]   ;;  %v14265_v4 = vld [vmem:[%s18853_s1 + $0x58] sm:$0xff]  }
   0x3   :  { %31 = vst [vmem:[#allocation2 + $0x20] sm:$0xff] %v14446_v1  ;;  %32 = vst [vmem:[#allocation2 + $0x28] sm:$0x3] %v14446_v1  ;;  %11798 = vmatpush3.bf16.msra.mxu0 %v14490_v0  ;;  %v10919_v7 = vld [vmem:[%s18854_s0] sm:$0xff]   ;;  %v11046_v11 = vld [vmem:[%s18854_s0 + $0x8] sm:$0xff]  }
   0x4   :  { %33 = vst [vmem:[#allocation2 + $0x30] sm:$0xff] %v14446_v1  ;;  %34 = vst [vmem:[#allocation2 + $0x38] sm:$0xff] %v14446_v1  ;;  %11799 = vmatprep.subr.bf16.mxu0 %v14263_v2  ;;  %v10920_v9 = vunpack.c.l.bf16 %v10919_v7  ;;  %v10921_v10 = vunpack.c.h.bf16 %v10919_v7  ;;  %v10924_v12 = vunpack.c.l.bf16 %v11046_v11  ;;  %v10925_v13 = vunpack.c.h.bf16 %v11046_v11  ;;  %v11047_v14 = vld [vmem:[%s18854_s0 + $0x10] sm:$0xff]   ;;  %v11048_v15 = vld [vmem:[%s18854_s0 + $0x18] sm:$0xff]  }
   0x5   :  { %35 = vst [vmem:[#allocation2 + $0x40] sm:$0x3] %v14446_v1  ;;  %36 = vst [vmem:[#allocation2 + $0x48] sm:$0xff] %v14446_v1  ;;  %v14266_v16 = vld [vmem:[%s18853_s1 + $0x60] sm:$0xff]   ;;  %v10928_v17 = vunpack.c.l.bf16 %v11047_v14  ;;  %v10929_v18 = vunpack.c.h.bf16 %v11047_v14  ;;  %v10932_v19 = vunpack.c.l.bf16 %v11048_v15  ;;  %v10933_v20 = vunpack.c.h.bf16 %v11048_v15  ;;  %v11050_v24 = vld [vmem:[%s18854_s0 + $0x28] sm:$0xff]  }
   0x6   :  { %37 = vst [vmem:[#allocation2 + $0x50] sm:$0xff] %v14446_v1  ;;  %38 = vst [vmem:[#allocation2 + $0x58] sm:$0x3] %v14446_v1  ;;  %v11049_v21 = vld [vmem:[%s18854_s0 + $0x20] sm:$0xff]   ;;  %v11051_v25 = vld [vmem:[%s18854_s0 + $0x30] sm:$0xff]   ;;  %v10940_v26 = vunpack.c.l.bf16 %v11050_v24  ;;  %v10941_v27 = vunpack.c.h.bf16 %v11050_v24 }
   0x7   :  { %39 = vst [vmem:[#allocation2 + $0x60] sm:$0xff] %v14446_v1  ;;  %40 = vst [vmem:[#allocation2 + $0x68] sm:$0xff] %v14446_v1  ;;  %11800 = vmatpush3.bf16.msra.mxu0 %v14263_v2  ;;  %v10936_v22 = vunpack.c.l.bf16 %v11049_v21  ;;  %v10937_v23 = vunpack.c.h.bf16 %v11049_v21  ;;  %v10944_v28 = vunpack.c.l.bf16 %v11051_v25  ;;  %v10945_v29 = vunpack.c.h.bf16 %v11051_v25  ;;  %v11052_v30 = vld [vmem:[%s18854_s0 + $0x38] sm:$0xff]   ;;  %v14267_v31 = vld [vmem:[%s18853_s1 + $0x68] sm:$0xff]  }
   0x8   :  { %41 = vst [vmem:[#allocation2 + $0x70] sm:$0x3] %v14446_v1  ;;  %42 = vst [vmem:[#allocation2 + $0x78] sm:$0xff] %v14446_v1  ;;  %11801 = vmatprep.subr.bf16.mxu0 %v14264_v3  ;;  %v440_v5 = vld [vmem:[#allocation2 + $0x1] sm:$0xff]  ;;  %v10948_v32 = vunpack.c.l.bf16 %v11052_v30  ;;  %v10949_v33 = vunpack.c.h.bf16 %v11052_v30  ;;  %v11055_v40 = vld [vmem:[%s18854_s0 + $0x50] sm:$0xff]  }
   0x9   :  { %43 = vst [vmem:[#allocation2 + $0x80] sm:$0xff] %v14446_v1  ;;  %44 = vst [vmem:[#allocation2 + $0x88] sm:$0x3] %v14446_v1  ;;  %v441_v6 = vld [vmem:[#allocation2 + $0x9] sm:$0xff]  ;;  %v11053_v34 = vld [vmem:[%s18854_s0 + $0x40] sm:$0xff]   ;;  %v10960_v41 = vunpack.c.l.bf16 %v11055_v40  ;;  %v10961_v42 = vunpack.c.h.bf16 %v11055_v40 }
   0xa   :  { %45 = vst [vmem:[#allocation2 + $0x90] sm:$0xff] %v14446_v1  ;;  %46 = vst [vmem:[#allocation2 + $0x98] sm:$0xff] %v14446_v1  ;;  %v504_v8 = vpack.c.bf16 %v441_v6, %v440_v5  ;;  %v10952_v35 = vunpack.c.l.bf16 %v11053_v34  ;;  %v10953_v36 = vunpack.c.h.bf16 %v11053_v34  ;;  %v11054_v37 = vld [vmem:[%s18854_s0 + $0x48] sm:$0xff]   ;;  %v11056_v43 = vld [vmem:[%s18854_s0 + $0x58] sm:$0xff]  }
   0xb   :  { %47 = vst [vmem:[#allocation2 + $0xa0] sm:$0x3] %v14446_v1  ;;  %48 = vst [vmem:[#allocation2 + $0xa8] sm:$0xff] %v14446_v1  ;;  %11802 = vmatpush3.bf16.msra.mxu0 %v14264_v3  ;;  %v10956_v38 = vunpack.c.l.bf16 %v11054_v37  ;;  %v10957_v39 = vunpack.c.h.bf16 %v11054_v37  ;;  %v11057_v44 = vld [vmem:[%s18854_s0 + $0x60] sm:$0xff]   ;;  %v14268_v45 = vld [vmem:[%s18853_s1 + $0x70] sm:$0xff]   ;;  %v10964_v46 = vunpack.c.l.bf16 %v11056_v43  ;;  %v10965_v47 = vunpack.c.h.bf16 %v11056_v43 }
   0xc   :  { %49 = vst [vmem:[#allocation2 + $0xb0] sm:$0xff] %v14446_v1  ;;  %50 = vst [vmem:[#allocation2 + $0xb8] sm:$0x3] %v14446_v1  ;;  %11813 = vmatprep.mubr.bf16.mxu0 %v504_v8  ;;  %11803 = vmatprep.subr.bf16.mxu0 %v14265_v4  ;;  %v10968_v48 = vunpack.c.l.bf16 %v11057_v44  ;;  %v10969_v49 = vunpack.c.h.bf16 %v11057_v44  ;;  %v11058_v50 = vld [vmem:[%s18854_s0 + $0x68] sm:$0xff]   ;;  %v11059_v53 = vld [vmem:[%s18854_s0 + $0x70] sm:$0xff]  }
   0xd   :  { %51 = vst [vmem:[#allocation2 + $0xc0] sm:$0xff] %v14446_v1  ;;  %52 = vst [vmem:[#allocation2 + $0xc8] sm:$0xff] %v14446_v1  ;;  %v10972_v51 = vunpack.c.l.bf16 %v11058_v50  ;;  %v10973_v52 = vunpack.c.h.bf16 %v11058_v50  ;;  %v10976_v54 = vunpack.c.l.bf16 %v11059_v53  ;;  %v10977_v55 = vunpack.c.h.bf16 %v11059_v53  ;;  %v11061_v56 = vld [vmem:[%s18854_s0 + $0x80] sm:$0xff]   ;;  %v14269_v57 = vld [vmem:[%s18853_s1 + $0x78] sm:$0xff]  }
   0xe   :  { %53 = vst [vmem:[#allocation2 + $0xd0] sm:$0x3] %v14446_v1  ;;  %54 = vst [vmem:[#allocation2 + $0xd8] sm:$0xff] %v14446_v1  ;;  %v10984_v58 = vunpack.c.l.bf16 %v11061_v56  ;;  %v10985_v59 = vunpack.c.h.bf16 %v11061_v56  ;;  %v11062_v60 = vld [vmem:[%s18854_s0 + $0x88] sm:$0xff]   ;;  %v11063_v61 = vld [vmem:[%s18854_s0 + $0x90] sm:$0xff]  }
   0xf   :  { %55 = vst [vmem:[#allocation2 + $0xe0] sm:$0xff] %v14446_v1  ;;  %56 = vst [vmem:[#allocation2 + $0xe8] sm:$0x3] %v14446_v1  ;;  %11804 = vmatpush3.bf16.msra.mxu0 %v14265_v4  ;;  %v10988_v62 = vunpack.c.l.bf16 %v11062_v60  ;;  %v10989_v63 = vunpack.c.h.bf16 %v11062_v60  ;;  %v10992_v0 = vunpack.c.l.bf16 %v11063_v61  ;;  %v11064_v2 = vld [vmem:[%s18854_s0 + $0x98] sm:$0xff]   ;;  %v11065_v5 = vld [vmem:[%s18854_s0 + $0xa0] sm:$0xff]  }
  0x10   :  { %57 = vst [vmem:[#allocation2 + $0xf0] sm:$0xff] %v14446_v1  ;;  %58 = vst [vmem:[#allocation2 + $0xf8] sm:$0xff] %v14446_v1  ;;  %11805 = vmatprep.subr.bf16.mxu0 %v14266_v16  ;;  %v10996_v3 = vunpack.c.l.bf16 %v11064_v2  ;;  %v10997_v4 = vunpack.c.h.bf16 %v11064_v2  ;;  %v14271_v6 = vld [vmem:[%s18853_s1] sm:$0xff]   ;;  %v11000_v7 = vunpack.c.l.bf16 %v11065_v5  ;;  %v11001_v8 = vunpack.c.h.bf16 %v11065_v5  ;;  %v11070_v24 = vld [vmem:[%s18854_s0 + $0xc8] sm:$0xff]  }
  0x11   :  { %59 = vst [vmem:[#allocation2 + $0x100] sm:$0x3] %v14446_v1  ;;  %60 = vst [vmem:[#allocation2 + $0x108] sm:$0xff] %v14446_v1  ;;  %v11020_v25 = vunpack.c.l.bf16 %v11070_v24  ;;  %v11074_v37 = vld [vmem:[%s18854_s0 + $0xe8] sm:$0xff]   ;;  %v14273_v43 = vld [vmem:[%s18854_s0 + $0x10] sm:$0xff] }
  0x12   :  { %61 = vst [vmem:[#allocation2 + $0x110] sm:$0xff] %v14446_v1  ;;  %62 = vst [vmem:[#allocation2 + $0x118] sm:$0x3] %v14446_v1  ;;  %v11037_v40 = vunpack.c.h.bf16 %v11074_v37  ;;  %v14274_v44 = vld [vmem:[%s18854_s0 + $0x18] sm:$0xff]  ;;  %v14300_v50 = vld [vmem:[%s18853_s1 + $0x30] sm:$0xff]  }
  0x13   :  { %63 = vst [vmem:[#allocation2 + $0x120] sm:$0xff] %v14446_v1  ;;  %64 = vst [vmem:[#allocation2 + $0x128] sm:$0xff] %v14446_v1  ;;  %11806 = vmatpush3.bf16.msra.mxu0 %v14266_v16  ;;  %v11068_v16 = vld [vmem:[%s18854_s0 + $0xb8] sm:$0xff]   ;;  %v14282_v56 = vld [vmem:[%s18854_s0 + $0x48] sm:$0xff] }
  0x14   :  { %65 = vst [vmem:[#allocation2 + $0x130] sm:$0x3] %v14446_v1  ;;  %66 = vst [vmem:[#allocation2 + $0x138] sm:$0xff] %v14446_v1  ;;  %11807 = vmatprep.subr.bf16.mxu0 %v14267_v31  ;;  %v14305_v53 = vld [vmem:[%s18853_s1 + $0x38] sm:$0xff]   ;;  %v14287_v60 = vld [vmem:[%s18854_s0 + $0x68] sm:$0xff] }
  0x15   :  { %67 = vst [vmem:[#allocation2 + $0x140] sm:$0xff] %v14446_v1  ;;  %68 = vst [vmem:[#allocation2 + $0x148] sm:$0x3] %v14446_v1  ;;  %v14291_v2 = vld [vmem:[%s18854_s0 + $0x88] sm:$0xff]  ;;  %v14294_v5 = vld [vmem:[%s18854_s0 + $0xa0] sm:$0xff] }
  0x16   :  { %69 = vst [vmem:[#allocation2 + $0x150] sm:$0xff] %v14446_v1  ;;  %70 = vst [vmem:[#allocation2 + $0x158] sm:$0xff] %v14446_v1 }
  0x17   :  { %71 = vst [vmem:[#allocation2 + $0x160] sm:$0x3] %v14446_v1  ;;  %72 = vst [vmem:[#allocation2 + $0x168] sm:$0xff] %v14446_v1  ;;  %11808 = vmatpush3.bf16.msra.mxu0 %v14267_v31 }
  0x18   :  { %73 = vst [vmem:[#allocation2 + $0x170] sm:$0xff] %v14446_v1  ;;  %74 = vst [vmem:[#allocation2 + $0x178] sm:$0x3] %v14446_v1  ;;  %11809 = vmatprep.subr.bf16.mxu0 %v14268_v45 }
  0x19   :  { %75 = vst [vmem:[#allocation2 + $0x180] sm:$0xff] %v14446_v1  ;;  %76 = vst [vmem:[#allocation2 + $0x188] sm:$0xff] %v14446_v1 }
  0x1a   :  { %77 = vst [vmem:[#allocation2 + $0x190] sm:$0x3] %v14446_v1  ;;  %78 = vst [vmem:[#allocation2 + $0x198] sm:$0xff] %v14446_v1 }
  0x1b   :  { %79 = vst [vmem:[#allocation2 + $0x1a0] sm:$0xff] %v14446_v1  ;;  %80 = vst [vmem:[#allocation2 + $0x1a8] sm:$0x3] %v14446_v1  ;;  %11810 = vmatpush3.bf16.msra.mxu0 %v14268_v45  ;;  %v14286_v45 = vld [vmem:[%s18853_s1 + $0x18] sm:$0xff]  }
  0x1c   :  { %81 = vst [vmem:[#allocation2 + $0x1b0] sm:$0xff] %v14446_v1  ;;  %82 = vst [vmem:[#allocation2 + $0x1b8] sm:$0xff] %v14446_v1  ;;  %11811 = vmatprep.subr.bf16.mxu0 %v14269_v57 }
  0x1d   :  { %83 = vst [vmem:[#allocation2 + $0x1c0] sm:$0x3] %v14446_v1  ;;  %84 = vst [vmem:[#allocation2 + $0x1c8] sm:$0xff] %v14446_v1 }
  0x1e   :  { %85 = vst [vmem:[#allocation2 + $0x1d0] sm:$0xff] %v14446_v1  ;;  %86 = vst [vmem:[#allocation2 + $0x1d8] sm:$0x3] %v14446_v1 }
  0x1f   :  { %87 = vst [vmem:[#allocation2 + $0x1e0] sm:$0xff] %v14446_v1  ;;  %88 = vst [vmem:[#allocation2 + $0x1e8] sm:$0xff] %v14446_v1  ;;  %11812 = vmatpush3.bf16.msra.mxu0 %v14269_v57  ;;  %v14283_v57 = vld [vmem:[%s18854_s0 + $0x50] sm:$0xff] }
  0x20   :  { %89 = vst [vmem:[#allocation2 + $0x1f0] sm:$0x3] %v14446_v1  ;;  %90 = vst [vmem:[#allocation2 + $0x1f8] sm:$0xff] %v14446_v1  ;;  %11877 = vmatprep.subr.bf16.mxu0 %v14271_v6 }
  0x21   :  { %91 = vst [vmem:[#allocation2 + $0x200] sm:$0xff] %v14446_v1  ;;  %92 = vst [vmem:[#allocation2 + $0x208] sm:$0x3] %v14446_v1 }
  0x22   :  { %93 = vst [vmem:[#allocation2 + $0x210] sm:$0xff] %v14446_v1  ;;  %94 = vst [vmem:[#allocation2 + $0x218] sm:$0xff] %v14446_v1 }
  0x23   :  { %95 = vst [vmem:[#allocation2 + $0x220] sm:$0x3] %v14446_v1  ;;  %96 = vst [vmem:[#allocation2 + $0x228] sm:$0xff] %v14446_v1 }
  0x24   :  { %97 = vst [vmem:[#allocation2 + $0x230] sm:$0xff] %v14446_v1  ;;  %98 = vst [vmem:[#allocation2 + $0x238] sm:$0x3] %v14446_v1 }
  0x25   :  { %99 = vst [vmem:[#allocation2 + $0x240] sm:$0xff] %v14446_v1  ;;  %100 = vst [vmem:[#allocation2 + $0x248] sm:$0xff] %v14446_v1 }
  0x26   :  { %101 = vst [vmem:[#allocation2 + $0x250] sm:$0x3] %v14446_v1  ;;  %102 = vst [vmem:[#allocation2 + $0x258] sm:$0xff] %v14446_v1 }
  0x27   :  { %103 = vst [vmem:[#allocation2 + $0x260] sm:$0xff] %v14446_v1  ;;  %104 = vst [vmem:[#allocation2 + $0x268] sm:$0x3] %v14446_v1 }
  0x28   :  { %105 = vst [vmem:[#allocation2 + $0x270] sm:$0xff] %v14446_v1  ;;  %106 = vst [vmem:[#allocation2 + $0x278] sm:$0xff] %v14446_v1 }
  0x29   :  { %107 = vst [vmem:[#allocation2 + $0x280] sm:$0x3] %v14446_v1  ;;  %108 = vst [vmem:[#allocation2 + $0x288] sm:$0xff] %v14446_v1 }
  0x2a   :  { %109 = vst [vmem:[#allocation2 + $0x290] sm:$0xff] %v14446_v1  ;;  %110 = vst [vmem:[#allocation2 + $0x298] sm:$0x3] %v14446_v1 }
  0x2b   :  { %111 = vst [vmem:[#allocation2 + $0x2a0] sm:$0xff] %v14446_v1  ;;  %112 = vst [vmem:[#allocation2 + $0x2a8] sm:$0xff] %v14446_v1 }
  0x2c   :  { %113 = vst [vmem:[#allocation2 + $0x2b0] sm:$0x3] %v14446_v1  ;;  %114 = vst [vmem:[#allocation2 + $0x2b8] sm:$0xff] %v14446_v1 }
  0x2d   :  { %115 = vst [vmem:[#allocation2 + $0x2c0] sm:$0xff] %v14446_v1  ;;  %116 = vst [vmem:[#allocation2 + $0x2c8] sm:$0x3] %v14446_v1 }
  0x2e   :  { %117 = vst [vmem:[#allocation2 + $0x2d0] sm:$0xff] %v14446_v1  ;;  %118 = vst [vmem:[#allocation2 + $0x2d8] sm:$0xff] %v14446_v1 }
  0x2f   :  { %119 = vst [vmem:[#allocation2 + $0x2e0] sm:$0x3] %v14446_v1  ;;  %120 = vst [vmem:[#allocation2 + $0x2e8] sm:$0xff] %v14446_v1 }
  0x30   :  { %121 = vst [vmem:[#allocation2 + $0x2f0] sm:$0xff] %v14446_v1  ;;  %122 = vst [vmem:[#allocation2 + $0x2f8] sm:$0x3] %v14446_v1 }
  0x31   :  { %123 = vst [vmem:[#allocation2 + $0x300] sm:$0xff] %v14446_v1  ;;  %124 = vst [vmem:[#allocation2 + $0x308] sm:$0xff] %v14446_v1 }
  0x32   :  { %125 = vst [vmem:[#allocation2 + $0x310] sm:$0x3] %v14446_v1  ;;  %126 = vst [vmem:[#allocation2 + $0x318] sm:$0xff] %v14446_v1 }
  0x33   :  { %127 = vst [vmem:[#allocation2 + $0x320] sm:$0xff] %v14446_v1  ;;  %128 = vst [vmem:[#allocation2 + $0x328] sm:$0x3] %v14446_v1 }
  0x34   :  { %129 = vst [vmem:[#allocation2 + $0x330] sm:$0xff] %v14446_v1  ;;  %130 = vst [vmem:[#allocation2 + $0x338] sm:$0xff] %v14446_v1 }
  0x35   :  { %131 = vst [vmem:[#allocation2 + $0x340] sm:$0x3] %v14446_v1  ;;  %132 = vst [vmem:[#allocation2 + $0x348] sm:$0xff] %v14446_v1 }
  0x36   :  { %133 = vst [vmem:[#allocation2 + $0x350] sm:$0xff] %v14446_v1  ;;  %134 = vst [vmem:[#allocation2 + $0x358] sm:$0x3] %v14446_v1 }
  0x37   :  { %5302 = vst [vmem:[#allocation3] sm:$0xff] %v14446_v1  ;;  %5303 = vst [vmem:[#allocation3 + $0x8] sm:$0xff] %v14446_v1 }
  0x38   :  { %5304 = vst [vmem:[#allocation3 + $0x10] sm:$0x3] %v14446_v1  ;;  %5305 = vst [vmem:[#allocation3 + $0x18] sm:$0xff] %v14446_v1 }
  0x39   :  { %5306 = vst [vmem:[#allocation3 + $0x20] sm:$0xff] %v14446_v1  ;;  %5307 = vst [vmem:[#allocation3 + $0x28] sm:$0x3] %v14446_v1 }
  0x3a   :  { %5308 = vst [vmem:[#allocation3 + $0x30] sm:$0xff] %v14446_v1  ;;  %5309 = vst [vmem:[#allocation3 + $0x38] sm:$0xff] %v14446_v1 }
  0x3b   :  { %5310 = vst [vmem:[#allocation3 + $0x40] sm:$0x3] %v14446_v1  ;;  %5311 = vst [vmem:[#allocation3 + $0x48] sm:$0xff] %v14446_v1 }
  0x3c   :  { %5312 = vst [vmem:[#allocation3 + $0x50] sm:$0xff] %v14446_v1  ;;  %5313 = vst [vmem:[#allocation3 + $0x58] sm:$0x3] %v14446_v1 }
  0x3d   :  { %5314 = vst [vmem:[#allocation3 + $0x60] sm:$0xff] %v14446_v1  ;;  %5315 = vst [vmem:[#allocation3 + $0x68] sm:$0xff] %v14446_v1 }
  0x3e   :  { %5316 = vst [vmem:[#allocation3 + $0x70] sm:$0x3] %v14446_v1  ;;  %5317 = vst [vmem:[#allocation3 + $0x78] sm:$0xff] %v14446_v1 }
  0x3f   :  { %5318 = vst [vmem:[#allocation3 + $0x80] sm:$0xff] %v14446_v1  ;;  %5319 = vst [vmem:[#allocation3 + $0x88] sm:$0x3] %v14446_v1 }
  0x40   :  { %5320 = vst [vmem:[#allocation3 + $0x90] sm:$0xff] %v14446_v1  ;;  %5321 = vst [vmem:[#allocation3 + $0x98] sm:$0xff] %v14446_v1 }
  0x41   :  { %5322 = vst [vmem:[#allocation3 + $0xa0] sm:$0x3] %v14446_v1  ;;  %5323 = vst [vmem:[#allocation3 + $0xa8] sm:$0xff] %v14446_v1 }
  0x42   :  { %5324 = vst [vmem:[#allocation3 + $0xb0] sm:$0xff] %v14446_v1  ;;  %5325 = vst [vmem:[#allocation3 + $0xb8] sm:$0x3] %v14446_v1 }
  0x43   :  { %5326 = vst [vmem:[#allocation3 + $0xc0] sm:$0xff] %v14446_v1  ;;  %5327 = vst [vmem:[#allocation3 + $0xc8] sm:$0xff] %v14446_v1 }
  0x44   :  { %5328 = vst [vmem:[#allocation3 + $0xd0] sm:$0x3] %v14446_v1  ;;  %5329 = vst [vmem:[#allocation3 + $0xd8] sm:$0xff] %v14446_v1 }
  0x45   :  { %5330 = vst [vmem:[#allocation3 + $0xe0] sm:$0xff] %v14446_v1  ;;  %5331 = vst [vmem:[#allocation3 + $0xe8] sm:$0x3] %v14446_v1 }
  0x46   :  { %5332 = vst [vmem:[#allocation3 + $0xf0] sm:$0xff] %v14446_v1  ;;  %5333 = vst [vmem:[#allocation3 + $0xf8] sm:$0xff] %v14446_v1 }
  0x47   :  { %5334 = vst [vmem:[#allocation3 + $0x100] sm:$0x3] %v14446_v1  ;;  %5335 = vst [vmem:[#allocation3 + $0x108] sm:$0xff] %v14446_v1 }
  0x48   :  { %5336 = vst [vmem:[#allocation3 + $0x110] sm:$0xff] %v14446_v1  ;;  %5337 = vst [vmem:[#allocation3 + $0x118] sm:$0x3] %v14446_v1 }
  0x49   :  { %5338 = vst [vmem:[#allocation3 + $0x120] sm:$0xff] %v14446_v1  ;;  %5339 = vst [vmem:[#allocation3 + $0x128] sm:$0xff] %v14446_v1 }
  0x4a   :  { %5340 = vst [vmem:[#allocation3 + $0x130] sm:$0x3] %v14446_v1  ;;  %5341 = vst [vmem:[#allocation3 + $0x138] sm:$0xff] %v14446_v1 }
  0x4b   :  { %5342 = vst [vmem:[#allocation3 + $0x140] sm:$0xff] %v14446_v1  ;;  %5343 = vst [vmem:[#allocation3 + $0x148] sm:$0x3] %v14446_v1 }
  0x4c   :  { %5344 = vst [vmem:[#allocation3 + $0x150] sm:$0xff] %v14446_v1  ;;  %5345 = vst [vmem:[#allocation3 + $0x158] sm:$0xff] %v14446_v1 }
  0x4d   :  { %5346 = vst [vmem:[#allocation3 + $0x160] sm:$0x3] %v14446_v1  ;;  %5347 = vst [vmem:[#allocation3 + $0x168] sm:$0xff] %v14446_v1 }
  0x4e   :  { %5348 = vst [vmem:[#allocation3 + $0x170] sm:$0xff] %v14446_v1  ;;  %5349 = vst [vmem:[#allocation3 + $0x178] sm:$0x3] %v14446_v1 }
  0x4f   :  { %5350 = vst [vmem:[#allocation3 + $0x180] sm:$0xff] %v14446_v1  ;;  %5351 = vst [vmem:[#allocation3 + $0x188] sm:$0xff] %v14446_v1 }
  0x50   :  { %5352 = vst [vmem:[#allocation3 + $0x190] sm:$0x3] %v14446_v1  ;;  %5353 = vst [vmem:[#allocation3 + $0x198] sm:$0xff] %v14446_v1 }
  0x51   :  { %5354 = vst [vmem:[#allocation3 + $0x1a0] sm:$0xff] %v14446_v1  ;;  %5355 = vst [vmem:[#allocation3 + $0x1a8] sm:$0x3] %v14446_v1 }
  0x52   :  { %5356 = vst [vmem:[#allocation3 + $0x1b0] sm:$0xff] %v14446_v1  ;;  %5357 = vst [vmem:[#allocation3 + $0x1b8] sm:$0xff] %v14446_v1 }
  0x53   :  { %5358 = vst [vmem:[#allocation3 + $0x1c0] sm:$0x3] %v14446_v1  ;;  %5359 = vst [vmem:[#allocation3 + $0x1c8] sm:$0xff] %v14446_v1 }
  0x54   :  { %5360 = vst [vmem:[#allocation3 + $0x1d0] sm:$0xff] %v14446_v1  ;;  %5361 = vst [vmem:[#allocation3 + $0x1d8] sm:$0x3] %v14446_v1 }
  0x55   :  { %5362 = vst [vmem:[#allocation3 + $0x1e0] sm:$0xff] %v14446_v1  ;;  %5363 = vst [vmem:[#allocation3 + $0x1e8] sm:$0xff] %v14446_v1 }
  0x56   :  { %5364 = vst [vmem:[#allocation3 + $0x1f0] sm:$0x3] %v14446_v1  ;;  %5365 = vst [vmem:[#allocation3 + $0x1f8] sm:$0xff] %v14446_v1 }
  0x57   :  { %5366 = vst [vmem:[#allocation3 + $0x200] sm:$0xff] %v14446_v1  ;;  %5367 = vst [vmem:[#allocation3 + $0x208] sm:$0x3] %v14446_v1 }
  0x58   :  { %5368 = vst [vmem:[#allocation3 + $0x210] sm:$0xff] %v14446_v1  ;;  %5369 = vst [vmem:[#allocation3 + $0x218] sm:$0xff] %v14446_v1 }
  0x59   :  { %5370 = vst [vmem:[#allocation3 + $0x220] sm:$0x3] %v14446_v1  ;;  %5371 = vst [vmem:[#allocation3 + $0x228] sm:$0xff] %v14446_v1 }
  0x5a   :  { %5372 = vst [vmem:[#allocation3 + $0x230] sm:$0xff] %v14446_v1  ;;  %5373 = vst [vmem:[#allocation3 + $0x238] sm:$0x3] %v14446_v1 }
  0x5b   :  { %5374 = vst [vmem:[#allocation3 + $0x240] sm:$0xff] %v14446_v1  ;;  %5375 = vst [vmem:[#allocation3 + $0x248] sm:$0xff] %v14446_v1 }
  0x5c   :  { %5376 = vst [vmem:[#allocation3 + $0x250] sm:$0x3] %v14446_v1  ;;  %5377 = vst [vmem:[#allocation3 + $0x258] sm:$0xff] %v14446_v1 }
  0x5d   :  { %5378 = vst [vmem:[#allocation3 + $0x260] sm:$0xff] %v14446_v1  ;;  %5379 = vst [vmem:[#allocation3 + $0x268] sm:$0x3] %v14446_v1 }
  0x5e   :  { %5380 = vst [vmem:[#allocation3 + $0x270] sm:$0xff] %v14446_v1  ;;  %5381 = vst [vmem:[#allocation3 + $0x278] sm:$0xff] %v14446_v1 }
  0x5f   :  { %5382 = vst [vmem:[#allocation3 + $0x280] sm:$0x3] %v14446_v1  ;;  %5383 = vst [vmem:[#allocation3 + $0x288] sm:$0xff] %v14446_v1 }
  0x60   :  { %5384 = vst [vmem:[#allocation3 + $0x290] sm:$0xff] %v14446_v1  ;;  %5385 = vst [vmem:[#allocation3 + $0x298] sm:$0x3] %v14446_v1 }
  0x61   :  { %5386 = vst [vmem:[#allocation3 + $0x2a0] sm:$0xff] %v14446_v1  ;;  %5387 = vst [vmem:[#allocation3 + $0x2a8] sm:$0xff] %v14446_v1 }
  0x62   :  { %5388 = vst [vmem:[#allocation3 + $0x2b0] sm:$0x3] %v14446_v1  ;;  %5389 = vst [vmem:[#allocation3 + $0x2b8] sm:$0xff] %v14446_v1 }
  0x63   :  { %5390 = vst [vmem:[#allocation3 + $0x2c0] sm:$0xff] %v14446_v1  ;;  %5391 = vst [vmem:[#allocation3 + $0x2c8] sm:$0x3] %v14446_v1 }
  0x64   :  { %5392 = vst [vmem:[#allocation3 + $0x2d0] sm:$0xff] %v14446_v1  ;;  %5393 = vst [vmem:[#allocation3 + $0x2d8] sm:$0xff] %v14446_v1 }
  0x65   :  { %5394 = vst [vmem:[#allocation3 + $0x2e0] sm:$0x3] %v14446_v1  ;;  %5395 = vst [vmem:[#allocation3 + $0x2e8] sm:$0xff] %v14446_v1 }
  0x66   :  { %5396 = vst [vmem:[#allocation3 + $0x2f0] sm:$0xff] %v14446_v1  ;;  %5397 = vst [vmem:[#allocation3 + $0x2f8] sm:$0x3] %v14446_v1 }
  0x67   :  { %5398 = vst [vmem:[#allocation3 + $0x300] sm:$0xff] %v14446_v1  ;;  %5399 = vst [vmem:[#allocation3 + $0x308] sm:$0xff] %v14446_v1 }
  0x68   :  { %5400 = vst [vmem:[#allocation3 + $0x310] sm:$0x3] %v14446_v1  ;;  %5401 = vst [vmem:[#allocation3 + $0x318] sm:$0xff] %v14446_v1 }
  0x69   :  { %5402 = vst [vmem:[#allocation3 + $0x320] sm:$0xff] %v14446_v1  ;;  %5403 = vst [vmem:[#allocation3 + $0x328] sm:$0x3] %v14446_v1 }
  0x6a   :  { %5404 = vst [vmem:[#allocation3 + $0x330] sm:$0xff] %v14446_v1  ;;  %5405 = vst [vmem:[#allocation3 + $0x338] sm:$0xff] %v14446_v1 }
  0x6b   :  { %5406 = vst [vmem:[#allocation3 + $0x340] sm:$0x3] %v14446_v1  ;;  %5407 = vst [vmem:[#allocation3 + $0x348] sm:$0xff] %v14446_v1 }
  0x6c   :  { %5408 = vst [vmem:[#allocation3 + $0x350] sm:$0xff] %v14446_v1  ;;  %5409 = vst [vmem:[#allocation3 + $0x358] sm:$0x3] %v14446_v1  ;;  %v10993_v1 = vunpack.c.h.bf16 %v11063_v61  ;;  %v472_v61 = vld [vmem:[#allocation2 + $0x1b1] sm:$0xff] }
  0x6d   :  { %264 = vst [vmem:[#allocation2 + $0x19] sm:$0xff] %v10920_v9  ;;  %265 = vst [vmem:[#allocation2 + $0x21] sm:$0xff] %v10921_v10  ;;  %v11066_v9 = vld [vmem:[%s18854_s0 + $0xa8] sm:$0xff]  }
  0x6e   :  { %266 = vst [vmem:[#allocation2 + $0x31] sm:$0xff] %v10924_v12  ;;  %267 = vst [vmem:[#allocation2 + $0x39] sm:$0xff] %v10925_v13  ;;  %v11004_v10 = vunpack.c.l.bf16 %v11066_v9  ;;  %v11005_v11 = vunpack.c.h.bf16 %v11066_v9  ;;  %v11067_v12 = vld [vmem:[%s18854_s0 + $0xb0] sm:$0xff]   ;;  %v14270_v13 = vld [vmem:[%s18854_s0] sm:$0xff] }
  0x6f   :  { %268 = vst [vmem:[#allocation2 + $0x49] sm:$0xff] %v10928_v17  ;;  %269 = vst [vmem:[#allocation2 + $0x51] sm:$0xff] %v10929_v18  ;;  %v11008_v14 = vunpack.c.l.bf16 %v11067_v12  ;;  %v11009_v15 = vunpack.c.h.bf16 %v11067_v12  ;;  %v11069_v17 = vld [vmem:[%s18854_s0 + $0xc0] sm:$0xff]   ;;  %v14272_v18 = vld [vmem:[%s18854_s0 + $0x8] sm:$0xff]  ;;  %11814 = vmatmul.mubr.bf16.vlgmr.msra.gmra.mrb[0].mxu0 %v14270_v13 }
  0x70   :  { %270 = vst [vmem:[#allocation2 + $0x61] sm:$0xff] %v10932_v19  ;;  %271 = vst [vmem:[#allocation2 + $0x69] sm:$0xff] %v10933_v20  ;;  %v11012_v19 = vunpack.c.l.bf16 %v11068_v16  ;;  %v11013_v20 = vunpack.c.h.bf16 %v11068_v16  ;;  %v11016_v21 = vunpack.c.l.bf16 %v11069_v17  ;;  %11878 = vmatpush3.bf16.msra.mxu0 %v14271_v6  ;;  %11817 = vmatprep.mubr.bf16.mxu0 %v14272_v18  ;;  %v14296_v6 = vld [vmem:[%s18854_s0 + $0xa8] sm:$0xff]  ;;  %v14299_v9 = vld [vmem:[%s18854_s0 + $0xc0] sm:$0xff] }
  0x71   :  { %272 = vst [vmem:[#allocation2 + $0x79] sm:$0xff] %v10936_v22  ;;  %273 = vst [vmem:[#allocation2 + $0x81] sm:$0xff] %v10937_v23  ;;  %v11017_v22 = vunpack.c.h.bf16 %v11069_v17  ;;  %v14276_v23 = vld [vmem:[%s18853_s1 + $0x8] sm:$0xff]   ;;  %v14303_v12 = vld [vmem:[%s18854_s0 + $0xd8] sm:$0xff] }
  0x72   :  { %274 = vst [vmem:[#allocation2 + $0x91] sm:$0xff] %v10940_v26  ;;  %275 = vst [vmem:[#allocation2 + $0x99] sm:$0xff] %v10941_v27  ;;  %v11021_v26 = vunpack.c.h.bf16 %v11070_v24  ;;  %v11071_v27 = vld [vmem:[%s18854_s0 + $0xd0] sm:$0xff]   ;;  %11879 = vmatprep.subr.bf16.mxu0 %v14276_v23  ;;  %v14304_v13 = vld [vmem:[%s18854_s0 + $0xe0] sm:$0xff] }
  0x73   :  { %276 = vst [vmem:[#allocation2 + $0xa9] sm:$0xff] %v10944_v28  ;;  %277 = vst [vmem:[#allocation2 + $0xb1] sm:$0xff] %v10945_v29  ;;  %v11072_v28 = vld [vmem:[%s18854_s0 + $0xd8] sm:$0xff]   ;;  %v11024_v29 = vunpack.c.l.bf16 %v11071_v27  ;;  %v11025_v30 = vunpack.c.h.bf16 %v11071_v27  ;;  %v14442_v16 = vld [vmem:[#allocation2] sm:$0xff] }
  0x74   :  { %278 = vst [vmem:[#allocation2 + $0xc1] sm:$0xff] %v10948_v32  ;;  %279 = vst [vmem:[#allocation2 + $0xc9] sm:$0xff] %v10949_v33  ;;  %v11028_v31 = vunpack.c.l.bf16 %v11072_v28  ;;  %v11029_v32 = vunpack.c.h.bf16 %v11072_v28  ;;  %v11073_v33 = vld [vmem:[%s18854_s0 + $0xe0] sm:$0xff]   ;;  %11880 = vmatpush3.bf16.msra.mxu0 %v14276_v23  ;;  %v14938_v17 = vpack.c.bf16 %v14442_v16, %v14442_v16  ;;  %v330_v18 = vld [vmem:[#allocation2 + $0x18] sm:$0xff] }
  0x75   :  { %280 = vst [vmem:[#allocation2 + $0xd9] sm:$0xff] %v10952_v35  ;;  %281 = vst [vmem:[#allocation2 + $0xe1] sm:$0xff] %v10953_v36  ;;  %v11032_v34 = vunpack.c.l.bf16 %v11073_v33  ;;  %v11033_v35 = vunpack.c.h.bf16 %v11073_v33  ;;  %v14281_v36 = vld [vmem:[%s18853_s1 + $0x10] sm:$0xff]   ;;  %v14309_v24 = vld [vmem:[%s18853_s1 + $0x88] sm:$0xff]  }
  0x76   :  { %282 = vst [vmem:[#allocation2 + $0xf1] sm:$0xff] %v10956_v38  ;;  %283 = vst [vmem:[#allocation2 + $0xf9] sm:$0xff] %v10957_v39  ;;  %v11075_v38 = vld [vmem:[%s18854_s0 + $0xf0] sm:$0xff]   ;;  %v11036_v39 = vunpack.c.l.bf16 %v11074_v37  ;;  %11881 = vmatprep.subr.bf16.mxu0 %v14281_v36  ;;  %v14312_v37 = vld [vmem:[%s18853_s1 + $0xa0] sm:$0xff]  }
  0x77   :  { %284 = vst [vmem:[#allocation2 + $0x109] sm:$0xff] %v10960_v41  ;;  %285 = vst [vmem:[#allocation2 + $0x111] sm:$0xff] %v10961_v42  ;;  %v11040_v41 = vunpack.c.l.bf16 %v11075_v38  ;;  %v11041_v42 = vunpack.c.h.bf16 %v11075_v38  ;;  %11818 = vmatmul.mubr.bf16.gmra.mrb[4].mxu0 %v14273_v43  ;;  %v336_v27 = vld [vmem:[#allocation2 + $0x60] sm:$0xff]  ;;  %v337_v28 = vld [vmem:[#allocation2 + $0x68] sm:$0xff] }
  0x78   :  { %286 = vst [vmem:[#allocation2 + $0x121] sm:$0xff] %v10964_v46  ;;  %287 = vst [vmem:[#allocation2 + $0x129] sm:$0xff] %v10965_v47  ;;  %11821 = vmatprep.mubr.bf16.mxu0 %v14274_v44  ;;  %11882 = vmatpush3.bf16.msra.mxu0 %v14281_v36  ;;  %v14290_v46 = vld [vmem:[%s18853_s1 + $0x20] sm:$0xff]   ;;  %v338_v33 = vld [vmem:[#allocation2 + $0x78] sm:$0xff] }
  0x79   :  { %288 = vst [vmem:[#allocation2 + $0x139] sm:$0xff] %v10968_v48  ;;  %289 = vst [vmem:[#allocation2 + $0x141] sm:$0xff] %v10969_v49  ;;  %v14275_v47 = vld [vmem:[%s18854_s0 + $0x20] sm:$0xff]  ;;  %11883 = vmatprep.subr.bf16.mxu0 %v14286_v45  ;;  %v14277_v48 = vld [vmem:[%s18854_s0 + $0x28] sm:$0xff] }
  0x7a   :  { %290 = vst [vmem:[#allocation2 + $0x151] sm:$0xff] %v10972_v51  ;;  %291 = vst [vmem:[#allocation2 + $0x159] sm:$0xff] %v10973_v52  ;;  %v14295_v49 = vld [vmem:[%s18853_s1 + $0x28] sm:$0xff]   ;;  %v14278_v51 = vld [vmem:[%s18854_s0 + $0x30] sm:$0xff] }
  0x7b   :  { %292 = vst [vmem:[#allocation2 + $0x169] sm:$0xff] %v10976_v54  ;;  %293 = vst [vmem:[#allocation2 + $0x171] sm:$0xff] %v10977_v55  ;;  %v14279_v52 = vld [vmem:[%s18854_s0 + $0x38] sm:$0xff]  ;;  %v14308_v54 = vld [vmem:[%s18853_s1 + $0x80] sm:$0xff]  }
  0x7c   :  { %296 = vst [vmem:[#allocation2 + $0x1c9] sm:$0xff] %v10984_v58  ;;  %297 = vst [vmem:[#allocation2 + $0x1d1] sm:$0xff] %v10985_v59  ;;  %11884 = vmatpush3.bf16.msra.mxu0 %v14286_v45  ;;  %v14280_v55 = vld [vmem:[%s18854_s0 + $0x40] sm:$0xff]  ;;  %v14284_v58 = vld [vmem:[%s18854_s0 + $0x58] sm:$0xff] }
  0x7d   :  { %298 = vst [vmem:[#allocation2 + $0x1e1] sm:$0xff] %v10988_v62  ;;  %299 = vst [vmem:[#allocation2 + $0x1e9] sm:$0xff] %v10989_v63  ;;  %11885 = vmatprep.subr.bf16.mxu0 %v14290_v46  ;;  %v14285_v59 = vld [vmem:[%s18854_s0 + $0x60] sm:$0xff]  ;;  %v14288_v63 = vld [vmem:[%s18854_s0 + $0x70] sm:$0xff] }
  0x7e   :  { %300 = vst [vmem:[#allocation2 + $0x1f9] sm:$0xff] %v10992_v0  ;;  %301 = vst [vmem:[#allocation2 + $0x201] sm:$0xff] %v10993_v1  ;;  %v473_v62 = vld [vmem:[#allocation2 + $0x1b9] sm:$0xff]  ;;  %v345_v44 = vld [vmem:[#allocation2 + $0xc8] sm:$0xff] }
  0x7f   :  { %302 = vst [vmem:[#allocation2 + $0x211] sm:$0xff] %v10996_v3  ;;  %303 = vst [vmem:[#allocation2 + $0x219] sm:$0xff] %v10997_v4  ;;  %11822 = vmatmul.mubr.bf16.gmra.mrb[8].mxu0 %v14275_v47  ;;  %v520_v0 = vpack.c.bf16 %v473_v62, %v472_v61  ;;  %v14289_v1 = vld [vmem:[%s18854_s0 + $0x80] sm:$0xff]  ;;  %v14292_v3 = vld [vmem:[%s18854_s0 + $0x90] sm:$0xff] }
  0x80   :  { %304 = vst [vmem:[#allocation2 + $0x229] sm:$0xff] %v11000_v7  ;;  %305 = vst [vmem:[#allocation2 + $0x231] sm:$0xff] %v11001_v8  ;;  %11825 = vmatprep.mubr.bf16.mxu0 %v14277_v48  ;;  %11886 = vmatpush3.bf16.msra.mxu0 %v14290_v46  ;;  %v14293_v4 = vld [vmem:[%s18854_s0 + $0x98] sm:$0xff]  ;;  %v14297_v7 = vld [vmem:[%s18854_s0 + $0xb0] sm:$0xff] }
  0x81   :  { %306 = vst [vmem:[#allocation2 + $0x241] sm:$0xff] %v11004_v10  ;;  %307 = vst [vmem:[#allocation2 + $0x249] sm:$0xff] %v11005_v11  ;;  %11887 = vmatprep.subr.bf16.mxu0 %v14295_v49  ;;  %v14298_v8 = vld [vmem:[%s18854_s0 + $0xb8] sm:$0xff]  ;;  %v14301_v10 = vld [vmem:[%s18854_s0 + $0xc8] sm:$0xff] }
  0x82   :  { %308 = vst [vmem:[#allocation2 + $0x259] sm:$0xff] %v11008_v14  ;;  %309 = vst [vmem:[#allocation2 + $0x261] sm:$0xff] %v11009_v15  ;;  %v14302_v11 = vld [vmem:[%s18854_s0 + $0xd0] sm:$0xff]  ;;  %v14306_v14 = vld [vmem:[%s18854_s0 + $0xe8] sm:$0xff] }
  0x83   :  { %310 = vst [vmem:[#allocation2 + $0x271] sm:$0xff] %v11012_v19  ;;  %311 = vst [vmem:[#allocation2 + $0x279] sm:$0xff] %v11013_v20  ;;  %v14307_v15 = vld [vmem:[%s18854_s0 + $0xf0] sm:$0xff]  ;;  %v331_v19 = vld [vmem:[#allocation2 + $0x20] sm:$0xff] }
  0x84   :  { %312 = vst [vmem:[#allocation2 + $0x289] sm:$0xff] %v11016_v21  ;;  %313 = vst [vmem:[#allocation2 + $0x291] sm:$0xff] %v11017_v22  ;;  %11888 = vmatpush3.bf16.msra.mxu0 %v14295_v49  ;;  %v332_v20 = vld [vmem:[#allocation2 + $0x30] sm:$0xff]  ;;  %v333_v21 = vld [vmem:[#allocation2 + $0x38] sm:$0xff]  ;;  %v14941_v22 = vpack.c.bf16 %v331_v19, %v330_v18 }
  0x85   :  { %314 = vst [vmem:[#allocation2 + $0x2a1] sm:$0xff] %v11020_v25  ;;  %315 = vst [vmem:[#allocation2 + $0x2a9] sm:$0xff] %v11021_v26  ;;  %11889 = vmatprep.subr.bf16.mxu0 %v14300_v50  ;;  %v14943_v23 = vpack.c.bf16 %v333_v21, %v332_v20  ;;  %v334_v25 = vld [vmem:[#allocation2 + $0x48] sm:$0xff]  ;;  %v335_v26 = vld [vmem:[#allocation2 + $0x50] sm:$0xff] }
  0x86   :  { %316 = vst [vmem:[#allocation2 + $0x2b9] sm:$0xff] %v11024_v29  ;;  %317 = vst [vmem:[#allocation2 + $0x2c1] sm:$0xff] %v11025_v30  ;;  %v14310_v29 = vld [vmem:[%s18853_s1 + $0x90] sm:$0xff]   ;;  %v14953_v30 = vpack.c.bf16 %v335_v26, %v334_v25  ;;  %v341_v36 = vld [vmem:[#allocation2 + $0x98] sm:$0xff] }
  0x87   :  { %318 = vst [vmem:[#allocation2 + $0x2d1] sm:$0xff] %v11028_v31  ;;  %319 = vst [vmem:[#allocation2 + $0x2d9] sm:$0xff] %v11029_v32  ;;  %11826 = vmatmul.mubr.bf16.gmra.mrb[12].mxu0 %v14278_v51  ;;  %v14955_v31 = vpack.c.bf16 %v337_v28, %v336_v27  ;;  %v14311_v32 = vld [vmem:[%s18853_s1 + $0x98] sm:$0xff]   ;;  %v344_v43 = vld [vmem:[#allocation2 + $0xc0] sm:$0xff] }
  0x88   :  { %320 = vst [vmem:[#allocation2 + $0x2e9] sm:$0xff] %v11032_v34  ;;  %321 = vst [vmem:[#allocation2 + $0x2f1] sm:$0xff] %v11033_v35  ;;  %11829 = vmatprep.mubr.bf16.mxu0 %v14279_v52  ;;  %11890 = vmatpush3.bf16.msra.mxu0 %v14300_v50  ;;  %v339_v34 = vld [vmem:[#allocation2 + $0x80] sm:$0xff]  ;;  %v340_v35 = vld [vmem:[#allocation2 + $0x90] sm:$0xff]  ;;  %v14979_v47 = vpack.c.bf16 %v345_v44, %v344_v43 }
  0x89   :  { %322 = vst [vmem:[#allocation2 + $0x301] sm:$0xff] %v11036_v39  ;;  %323 = vst [vmem:[#allocation2 + $0x309] sm:$0xff] %v11037_v40  ;;  %11891 = vmatprep.subr.bf16.mxu0 %v14305_v53  ;;  %v14965_v38 = vpack.c.bf16 %v339_v34, %v338_v33  ;;  %v14967_v39 = vpack.c.bf16 %v341_v36, %v340_v35  ;;  %v14313_v40 = vld [vmem:[%s18853_s1 + $0xa8] sm:$0xff]   ;;  %v14314_v45 = vld [vmem:[%s18853_s1 + $0xb0] sm:$0xff]  }
  0x8a   :  { %324 = vst [vmem:[#allocation2 + $0x319] sm:$0xff] %v11040_v41  ;;  %325 = vst [vmem:[#allocation2 + $0x321] sm:$0xff] %v11041_v42  ;;  %v342_v41 = vld [vmem:[#allocation2 + $0xa8] sm:$0xff]  ;;  %v343_v42 = vld [vmem:[#allocation2 + $0xb0] sm:$0xff] }
  0x8b   :  { %v14977_v46 = vpack.c.bf16 %v343_v42, %v342_v41  ;;  %v14315_v48 = vld [vmem:[%s18853_s1 + $0xb8] sm:$0xff]   ;;  %v347_v50 = vld [vmem:[#allocation2 + $0xe0] sm:$0xff]  ;;  %v348_v51 = vld [vmem:[#allocation2 + $0xf0] sm:$0xff] }
  0x8c   :  { %11892 = vmatpush3.bf16.msra.mxu0 %v14305_v53  ;;  %v346_v49 = vld [vmem:[#allocation2 + $0xd8] sm:$0xff]  ;;  %v14989_v53 = vld [vmem:[%s18853_s1 + $0xc0] sm:$0xff]   ;;  %v371_v20 = vld [vmem:[#allocation2 + $0x230] sm:$0xff] }
  0x8d   :  { %11957 = vmatprep.subr.bf16.mxu0 %v14308_v54  ;;  %v349_v52 = vld [vmem:[#allocation2 + $0xf8] sm:$0xff]  ;;  %v372_v21 = vld [vmem:[#allocation2 + $0x240] sm:$0xff]  ;;  %v378_v35 = vld [vmem:[#allocation2 + $0x288] sm:$0xff] }
  0x8e   :  { %v354_v62 = vld [vmem:[#allocation2 + $0x138] sm:$0xff]  ;;  %v375_v28 = vld [vmem:[#allocation2 + $0x260] sm:$0xff]  ;;  %v379_v36 = vld [vmem:[#allocation2 + $0x290] sm:$0xff] }
  0x8f   :  { %11830 = vmatmul.mubr.bf16.gmra.mrb[16].mxu0 %v14280_v55  ;;  %v14993_v55 = vpack.c.bf16 %v349_v52, %v348_v51  ;;  %v369_v16 = vld [vmem:[#allocation2 + $0x218] sm:$0xff]  ;;  %v15038_v41 = vpack.c.bf16 %v379_v36, %v378_v35  ;;  %v383_v44 = vld [vmem:[#allocation2 + $0x2c0] sm:$0xff]  ;;  %v386_v51 = vld [vmem:[#allocation2 + $0x2e8] sm:$0xff] }
  0x90   :  { %11833 = vmatprep.mubr.bf16.mxu0 %v14282_v56  ;;  %v350_v56 = vld [vmem:[#allocation2 + $0x108] sm:$0xff]  ;;  %v374_v27 = vld [vmem:[#allocation2 + $0x258] sm:$0xff]  ;;  %v387_v52 = vld [vmem:[#allocation2 + $0x2f0] sm:$0xff] }
  0x91   :  { %v15032_v33 = vpack.c.bf16 %v375_v28, %v374_v27  ;;  %v382_v43 = vld [vmem:[#allocation2 + $0x2b8] sm:$0xff] }
  0x92   :  { %v1239_v35 = vld [vmem:[#allocation2 + $0x92] sm:$0xff]  ;;  %v1240_v36 = vld [vmem:[#allocation2 + $0x9a] sm:$0xff] }
  0x97   :  { %11834 = vmatmul.mubr.bf16.gmra.mrb[20].mxu0 %v14283_v57  ;;  %v351_v57 = vld [vmem:[#allocation2 + $0x110] sm:$0xff] }
  0x98   :  { %11837 = vmatprep.mubr.bf16.mxu0 %v14284_v58  ;;  %v352_v58 = vld [vmem:[#allocation2 + $0x120] sm:$0xff] }
  0x9f   :  { %11838 = vmatmul.mubr.bf16.gmra.mrb[24].mxu0 %v14285_v59  ;;  %v353_v59 = vld [vmem:[#allocation2 + $0x128] sm:$0xff] }
  0xa0   :  { %11841 = vmatprep.mubr.bf16.mxu0 %v14287_v60  ;;  %v14998_v60 = vpack.c.bf16 %v351_v57, %v350_v56  ;;  %v15000_v61 = vpack.c.bf16 %v353_v59, %v352_v58  ;;  %v388_v56 = vld [vmem:[#allocation2 + $0x300] sm:$0xff]  ;;  %v389_v57 = vld [vmem:[#allocation2 + $0x308] sm:$0xff]  ;;  %v15050_v58 = vpack.c.bf16 %v387_v52, %v386_v51 }
  0xa1   :  { %v15052_v59 = vpack.c.bf16 %v389_v57, %v388_v56  ;;  %v1243_v51 = vld [vmem:[#allocation2 + $0xc2] sm:$0xff]  ;;  %v1244_v52 = vld [vmem:[#allocation2 + $0xca] sm:$0xff] }
  0xa2   :  { %v14322_v56 = vld [vmem:[%s18853_s1 + $0xf0] sm:$0xff]  }
  0xa7   :  { %11842 = vmatmul.mubr.bf16.gmra.mrb[28].mxu0 %v14288_v63  ;;  %v355_v63 = vld [vmem:[#allocation2 + $0x140] sm:$0xff] }
  0xa8   :  { %11845 = vmatprep.mubr.bf16.mxu0 %v520_v0  ;;  %v356_v0 = vld [vmem:[#allocation2 + $0x150] sm:$0xff] }
  0xaf   :  { %11846 = vmatmul.mubr.bf16.gmra.mrb[32].mxu0 %v14289_v1  ;;  %v357_v1 = vld [vmem:[#allocation2 + $0x158] sm:$0xff] }
  0xb0   :  { %11849 = vmatprep.mubr.bf16.mxu0 %v14291_v2  ;;  %v15004_v2 = vpack.c.bf16 %v355_v63, %v354_v62  ;;  %v390_v62 = vld [vmem:[#allocation2 + $0x318] sm:$0xff]  ;;  %v391_v63 = vld [vmem:[#allocation2 + $0x320] sm:$0xff] }
  0xb7   :  { %11850 = vmatmul.mubr.bf16.gmra.mrb[36].mxu0 %v14292_v3  ;;  %v15006_v3 = vpack.c.bf16 %v357_v1, %v356_v0  ;;  %v1227_v0 = vld [vmem:[#allocation2 + $0x2] sm:$0xff]  ;;  %v1228_v1 = vld [vmem:[#allocation2 + $0xa] sm:$0xff] }
  0xb8   :  { %11853 = vmatprep.mubr.bf16.mxu0 %v14293_v4  ;;  %v358_v4 = vld [vmem:[#allocation2 + $0x168] sm:$0xff] }
  0xbf   :  { %11854 = vmatmul.mubr.bf16.gmra.mrb[40].mxu0 %v14294_v5  ;;  %v359_v5 = vld [vmem:[#allocation2 + $0x170] sm:$0xff] }
  0xc0   :  { %11857 = vmatprep.mubr.bf16.mxu0 %v14296_v6  ;;  %v15010_v6 = vpack.c.bf16 %v359_v5, %v358_v4  ;;  %v15056_v4 = vpack.c.bf16 %v391_v63, %v390_v62  ;;  %v1291_v5 = vpack.c.bf16 %v1228_v1, %v1227_v0  ;;  %v15098_v62 = vpack.c.bf16 %v1244_v52, %v1243_v51  ;;  %v14323_v63 = vld [vmem:[%s18853_s1 + $0xf8] sm:$0xff]   ;;  %v1246_v1 = vld [vmem:[#allocation2 + $0xe2] sm:$0xff]  ;;  %v1257_v51 = vld [vmem:[#allocation2 + $0x16a] sm:$0xff] }
  0xc1   :  { %v1245_v0 = vld [vmem:[#allocation2 + $0xda] sm:$0xff]  ;;  %v1258_v52 = vld [vmem:[#allocation2 + $0x172] sm:$0xff] }
  0xc7   :  { %11858 = vmatmul.mubr.bf16.gmra.mrb[44].mxu0 %v14297_v7  ;;  %v362_v7 = vld [vmem:[#allocation2 + $0x1c8] sm:$0xff] }
  0xc8   :  { %11861 = vmatprep.mubr.bf16.mxu0 %v14298_v8  ;;  %v363_v8 = vld [vmem:[#allocation2 + $0x1d0] sm:$0xff] }
  0xcf   :  { %11862 = vmatmul.mubr.bf16.gmra.mrb[48].mxu0 %v14299_v9  ;;  %v364_v9 = vld [vmem:[#allocation2 + $0x1e0] sm:$0xff] }
  0xd0   :  { %11865 = vmatprep.mubr.bf16.mxu0 %v14301_v10  ;;  %v365_v10 = vld [vmem:[#allocation2 + $0x1e8] sm:$0xff] }
  0xd7   :  { %11866 = vmatmul.mubr.bf16.gmra.mrb[52].mxu0 %v14302_v11  ;;  %v15014_v11 = vpack.c.bf16 %v363_v8, %v362_v7  ;;  %v1229_v7 = vld [vmem:[#allocation2 + $0x1a] sm:$0xff]  ;;  %v1230_v8 = vld [vmem:[#allocation2 + $0x22] sm:$0xff] }
  0xd8   :  { %11869 = vmatprep.mubr.bf16.mxu0 %v14303_v12  ;;  %v15016_v12 = vpack.c.bf16 %v365_v10, %v364_v9  ;;  %v1231_v9 = vld [vmem:[#allocation2 + $0x32] sm:$0xff]  ;;  %v1232_v10 = vld [vmem:[#allocation2 + $0x3a] sm:$0xff] }
  0xdf   :  { %11870 = vmatmul.mubr.bf16.gmra.mrb[56].mxu0 %v14304_v13  ;;  %v366_v13 = vld [vmem:[#allocation2 + $0x1f8] sm:$0xff] }
  0xe0   :  { %11873 = vmatprep.mubr.bf16.mxu0 %v14306_v14  ;;  %v367_v14 = vld [vmem:[#allocation2 + $0x200] sm:$0xff] }
  0xe1   :  { %v15020_v18 = vpack.c.bf16 %v367_v14, %v366_v13  ;;  %v15059_v13 = vpack.c.bf16 %v1230_v8, %v1229_v7  ;;  %v15061_v14 = vpack.c.bf16 %v1232_v10, %v1231_v9  ;;  %v1248_v7 = vld [vmem:[#allocation2 + $0xfa] sm:$0xff]  ;;  %v15110_v9 = vpack.c.bf16 %v1246_v1, %v1245_v0 }
  0xe2   :  { %v15108_v8 = vld [vmem:[%s18853_s1 + $0x100] sm:$0xff]   ;;  %v15132_v0 = vpack.c.bf16 %v1258_v52, %v1257_v51  ;;  %v1270_v51 = vld [vmem:[#allocation2 + $0x232] sm:$0xff] }
  0xe3   :  { %v1271_v52 = vld [vmem:[#allocation2 + $0x242] sm:$0xff] }
  0xe7   :  { %11874 = vmatmul.mubr.bf16.gmra.mrb[60].mxu0 %v14307_v15  ;;  %v368_v15 = vld [vmem:[#allocation2 + $0x210] sm:$0xff] }
  0xe8   :  { %11893 = vmatprep.mubr.bf16.mxu0 %v14938_v17  ;;  %v15022_v19 = vpack.c.bf16 %v369_v16, %v368_v15  ;;  %v14317_v15 = vld [vmem:[%s18853_s1 + $0xc8] sm:$0xff]  }
  0xe9   :  { %v1233_v16 = vld [vmem:[#allocation2 + $0x4a] sm:$0xff] }
  0xef   :  { %11894 = vmatmul.mubr.bf16.vlgmr.msra.gmra.mrb[0].mxu0 %v14941_v22 }
  0xf0   :  { %11958 = vmatpush3.bf16.msra.mxu0 %v14308_v54  ;;  %11897 = vmatprep.mubr.bf16.mxu0 %v14943_v23  ;;  %v14991_v54 = vpack.c.bf16 %v347_v50, %v346_v49  ;;  %v15044_v49 = vpack.c.bf16 %v383_v44, %v382_v43  ;;  %v15086_v43 = vpack.c.bf16 %v1240_v36, %v1239_v35  ;;  %v14321_v44 = vld [vmem:[%s18853_s1 + $0xe8] sm:$0xff]   ;;  %v1256_v35 = vld [vmem:[#allocation2 + $0x15a] sm:$0xff] }
  0xf1   :  { %11959 = vmatprep.subr.bf16.mxu0 %v14309_v24  ;;  %v11060_v36 = vld [vmem:[%s18854_s0 + $0x78] sm:$0xff]  }
  0xf4   :  { %11960 = vmatpush3.bf16.msra.mxu0 %v14309_v24  ;;  %v373_v24 = vld [vmem:[#allocation2 + $0x248] sm:$0xff] }
  0xf5   :  { %11961 = vmatprep.subr.bf16.mxu0 %v14310_v29  ;;  %v15028_v26 = vpack.c.bf16 %v373_v24, %v372_v21  ;;  %v1236_v21 = vld [vmem:[#allocation2 + $0x6a] sm:$0xff] }
  0xf6   :  { %v14318_v24 = vld [vmem:[%s18853_s1 + $0xd0] sm:$0xff]  }
  0xf7   :  { %11898 = vmatmul.mubr.bf16.gmra.mrb[4].mxu0 %v14953_v30 }
  0xf8   :  { %11901 = vmatprep.mubr.bf16.mxu0 %v14955_v31  ;;  %11962 = vmatpush3.bf16.msra.mxu0 %v14310_v29  ;;  %v376_v29 = vld [vmem:[#allocation2 + $0x270] sm:$0xff] }
  0xf9   :  { %11963 = vmatprep.subr.bf16.mxu0 %v14311_v32 }
  0xfc   :  { %11964 = vmatpush3.bf16.msra.mxu0 %v14311_v32  ;;  %v377_v32 = vld [vmem:[#allocation2 + $0x278] sm:$0xff] }
  0xfd   :  { %11965 = vmatprep.subr.bf16.mxu0 %v14312_v37  ;;  %v15034_v34 = vpack.c.bf16 %v377_v32, %v376_v29  ;;  %v1237_v29 = vld [vmem:[#allocation2 + $0x7a] sm:$0xff]  ;;  %v1238_v32 = vld [vmem:[#allocation2 + $0x82] sm:$0xff] }
  0xff   :  { %11902 = vmatmul.mubr.bf16.gmra.mrb[8].mxu0 %v14965_v38 }
 0x100   :  { %11905 = vmatprep.mubr.bf16.mxu0 %v14967_v39  ;;  %11966 = vmatpush3.bf16.msra.mxu0 %v14312_v37  ;;  %v380_v37 = vld [vmem:[#allocation2 + $0x2a0] sm:$0xff] }
 0x101   :  { %11967 = vmatprep.subr.bf16.mxu0 %v14313_v40 }
 0x104   :  { %11968 = vmatpush3.bf16.msra.mxu0 %v14313_v40  ;;  %v381_v40 = vld [vmem:[#allocation2 + $0x2a8] sm:$0xff] }
 0x105   :  { %11969 = vmatprep.subr.bf16.mxu0 %v14314_v45  ;;  %v15040_v42 = vpack.c.bf16 %v381_v40, %v380_v37  ;;  %v14320_v37 = vld [vmem:[%s18853_s1 + $0xe0] sm:$0xff]   ;;  %v15084_v40 = vpack.c.bf16 %v1238_v32, %v1237_v29  ;;  %v1255_v32 = vld [vmem:[#allocation2 + $0x152] sm:$0xff] }
 0x106   :  { %v1254_v29 = vld [vmem:[#allocation2 + $0x142] sm:$0xff] }
 0x107   :  { %11906 = vmatmul.mubr.bf16.gmra.mrb[12].mxu0 %v14977_v46 }
 0x108   :  { %11909 = vmatprep.mubr.bf16.mxu0 %v14979_v47  ;;  %11970 = vmatpush3.bf16.msra.mxu0 %v14314_v45  ;;  %v384_v45 = vld [vmem:[#allocation2 + $0x2d0] sm:$0xff] }
 0x109   :  { %11971 = vmatprep.subr.bf16.mxu0 %v14315_v48 }
 0x10c   :  { %11972 = vmatpush3.bf16.msra.mxu0 %v14315_v48  ;;  %v385_v48 = vld [vmem:[#allocation2 + $0x2d8] sm:$0xff] }
 0x10d   :  { %12037 = vmatprep.subr.bf16.mxu0 %v14989_v53  ;;  %v15046_v50 = vpack.c.bf16 %v385_v48, %v384_v45  ;;  %v1241_v45 = vld [vmem:[#allocation2 + $0xaa] sm:$0xff]  ;;  %v1242_v48 = vld [vmem:[#allocation2 + $0xb2] sm:$0xff] }
 0x10e   :  { %v15096_v57 = vpack.c.bf16 %v1242_v48, %v1241_v45  ;;  %v10981_v45 = vunpack.c.h.bf16 %v11060_v36  ;;  %v15128_v48 = vpack.c.bf16 %v1256_v35, %v1255_v32  ;;  %v1267_v32 = vld [vmem:[#allocation2 + $0x212] sm:$0xff]  ;;  %v1268_v35 = vld [vmem:[#allocation2 + $0x21a] sm:$0xff] }
 0x10f   :  { %11910 = vmatmul.mubr.bf16.gmra.mrb[16].mxu0 %v14991_v54 }
 0x110   :  { %11913 = vmatprep.mubr.bf16.mxu0 %v14993_v55  ;;  %295 = vst [vmem:[#allocation2 + $0x189] sm:$0xff] %v10981_v45  ;;  %v1269_v45 = vld [vmem:[#allocation2 + $0x22a] sm:$0xff] }
 0x117   :  { %11914 = vmatmul.mubr.bf16.gmra.mrb[20].mxu0 %v14998_v60 }
 0x118   :  { %11917 = vmatprep.mubr.bf16.mxu0 %v15000_v61 }
 0x11f   :  { %11918 = vmatmul.mubr.bf16.gmra.mrb[24].mxu0 %v15004_v2 }
 0x120   :  { %11921 = vmatprep.mubr.bf16.mxu0 %v15006_v3 }
 0x127   :  { %11922 = vmatmul.mubr.bf16.gmra.mrb[28].mxu0 %v15010_v6 }
 0x128   :  { %11925 = vmatprep.mubr.bf16.mxu0 %v14938_v17  ;;  %v370_v17 = vld [vmem:[#allocation2 + $0x228] sm:$0xff] }
 0x129   :  { %v15026_v25 = vpack.c.bf16 %v371_v20, %v370_v17  ;;  %v1234_v17 = vld [vmem:[#allocation2 + $0x52] sm:$0xff]  ;;  %v1235_v20 = vld [vmem:[#allocation2 + $0x62] sm:$0xff] }
 0x12a   :  { %v15072_v27 = vpack.c.bf16 %v1234_v17, %v1233_v16  ;;  %v15074_v28 = vpack.c.bf16 %v1236_v21, %v1235_v20  ;;  %v1250_v16 = vld [vmem:[#allocation2 + $0x112] sm:$0xff]  ;;  %v1251_v17 = vld [vmem:[#allocation2 + $0x122] sm:$0xff]  ;;  %v1252_v20 = vld [vmem:[#allocation2 + $0x12a] sm:$0xff] }
 0x12f   :  { %11926 = vmatmul.mubr.bf16.gmra.mrb[32].mxu0 %v15014_v11 }
 0x130   :  { %11929 = vmatprep.mubr.bf16.mxu0 %v15016_v12 }
 0x137   :  { %11930 = vmatmul.mubr.bf16.gmra.mrb[36].mxu0 %v15020_v18 }
 0x138   :  { %11933 = vmatprep.mubr.bf16.mxu0 %v15022_v19 }
 0x13f   :  { %11934 = vmatmul.mubr.bf16.gmra.mrb[40].mxu0 %v15026_v25 }
 0x140   :  { %11937 = vmatprep.mubr.bf16.mxu0 %v15028_v26 }
 0x147   :  { %11938 = vmatmul.mubr.bf16.gmra.mrb[44].mxu0 %v15032_v33 }
 0x148   :  { %11941 = vmatprep.mubr.bf16.mxu0 %v15034_v34 }
 0x14f   :  { %11942 = vmatmul.mubr.bf16.gmra.mrb[48].mxu0 %v15038_v41 }
 0x150   :  { %11945 = vmatprep.mubr.bf16.mxu0 %v15040_v42 }
 0x157   :  { %11946 = vmatmul.mubr.bf16.gmra.mrb[52].mxu0 %v15044_v49 }
 0x158   :  { %11949 = vmatprep.mubr.bf16.mxu0 %v15046_v50 }
 0x15f   :  { %11950 = vmatmul.mubr.bf16.gmra.mrb[56].mxu0 %v15050_v58 }
 0x160   :  { %11953 = vmatprep.mubr.bf16.mxu0 %v15052_v59 }
 0x167   :  { %11954 = vmatmul.mubr.bf16.gmra.mrb[60].mxu0 %v15056_v4 }
 0x168   :  { %11973 = vmatprep.mubr.bf16.mxu0 %v1291_v5  ;;  %v1247_v5 = vld [vmem:[#allocation2 + $0xf2] sm:$0xff] }
 0x169   :  { %v15112_v10 = vpack.c.bf16 %v1248_v7, %v1247_v5  ;;  %v1261_v5 = vld [vmem:[#allocation2 + $0x1ca] sm:$0xff]  ;;  %v1262_v7 = vld [vmem:[#allocation2 + $0x1d2] sm:$0xff] }
 0x16f   :  { %11974 = vmatmul.mubr.bf16.vlgmr.msra.gmra.mrb[0].mxu0 %v15059_v13 }
 0x170   :  { %12038 = vmatpush3.bf16.msra.mxu0 %v14989_v53  ;;  %11977 = vmatprep.mubr.bf16.mxu0 %v15061_v14  ;;  %v14319_v53 = vld [vmem:[%s18853_s1 + $0xd8] sm:$0xff]  }
 0x171   :  { %12039 = vmatprep.subr.bf16.mxu0 %v14317_v15 }
 0x174   :  { %12040 = vmatpush3.bf16.msra.mxu0 %v14317_v15  ;;  %v1249_v15 = vld [vmem:[#allocation2 + $0x10a] sm:$0xff] }
 0x175   :  { %12041 = vmatprep.subr.bf16.mxu0 %v14318_v24  ;;  %v15117_v21 = vpack.c.bf16 %v1250_v16, %v1249_v15  ;;  %v1263_v15 = vld [vmem:[#allocation2 + $0x1e2] sm:$0xff]  ;;  %v1264_v16 = vld [vmem:[#allocation2 + $0x1ea] sm:$0xff] }
 0x177   :  { %11978 = vmatmul.mubr.bf16.gmra.mrb[4].mxu0 %v15072_v27 }
 0x178   :  { %11981 = vmatprep.mubr.bf16.mxu0 %v15074_v28  ;;  %12042 = vmatpush3.bf16.msra.mxu0 %v14318_v24  ;;  %v15119_v24 = vpack.c.bf16 %v1252_v20, %v1251_v17  ;;  %v15135_v17 = vpack.c.bf16 %v1262_v7, %v1261_v5  ;;  %v15137_v20 = vpack.c.bf16 %v1264_v16, %v1263_v15  ;;  %v1273_v5 = vld [vmem:[#allocation2 + $0x25a] sm:$0xff]  ;;  %v1274_v7 = vld [vmem:[#allocation2 + $0x262] sm:$0xff]  ;;  %v1275_v15 = vld [vmem:[#allocation2 + $0x272] sm:$0xff] }
 0x179   :  { %12043 = vmatprep.subr.bf16.mxu0 %v14319_v53  ;;  %v1276_v16 = vld [vmem:[#allocation2 + $0x27a] sm:$0xff] }
 0x17c   :  { %12044 = vmatpush3.bf16.msra.mxu0 %v14319_v53  ;;  %v1253_v53 = vld [vmem:[#allocation2 + $0x13a] sm:$0xff] }
 0x17d   :  { %12045 = vmatprep.subr.bf16.mxu0 %v14320_v37 }
 0x17f   :  { %11982 = vmatmul.mubr.bf16.gmra.mrb[8].mxu0 %v15084_v40 }
 0x180   :  { %11985 = vmatprep.mubr.bf16.mxu0 %v15086_v43  ;;  %12046 = vmatpush3.bf16.msra.mxu0 %v14320_v37  ;;  %v15126_v37 = vpack.c.bf16 %v1254_v29, %v1253_v53  ;;  %v1265_v53 = vld [vmem:[#allocation2 + $0x1fa] sm:$0xff]  ;;  %v1266_v29 = vld [vmem:[#allocation2 + $0x202] sm:$0xff] }
 0x181   :  { %12047 = vmatprep.subr.bf16.mxu0 %v14321_v44 }
 0x184   :  { %12048 = vmatpush3.bf16.msra.mxu0 %v14321_v44  ;;  %v10980_v44 = vunpack.c.l.bf16 %v11060_v36  ;;  %v15141_v36 = vpack.c.bf16 %v1266_v29, %v1265_v53  ;;  %v15153_v53 = vpack.c.bf16 %v1274_v7, %v1273_v5  ;;  %v15155_v29 = vpack.c.bf16 %v1276_v16, %v1275_v15  ;;  %v1281_v5 = vld [vmem:[#allocation2 + $0x2ba] sm:$0xff]  ;;  %v1282_v7 = vld [vmem:[#allocation2 + $0x2c2] sm:$0xff]  ;;  %v1283_v15 = vld [vmem:[#allocation2 + $0x2d2] sm:$0xff] }
 0x185   :  { %12049 = vmatprep.subr.bf16.mxu0 %v14322_v56  ;;  %v1284_v16 = vld [vmem:[#allocation2 + $0x2da] sm:$0xff] }
 0x186   :  { %294 = vst [vmem:[#allocation2 + $0x181] sm:$0xff] %v10980_v44  ;;  %v15143_v44 = vpack.c.bf16 %v1268_v35, %v1267_v32  ;;  %18972 = vst [vmem:[#allocation6_spill] sm:$0xff] %v15153_v53  ;;  %v1277_v32 = vld [vmem:[#allocation2 + $0x28a] sm:$0xff]  ;;  %v1278_v35 = vld [vmem:[#allocation2 + $0x292] sm:$0xff] }
 0x187   :  { %11986 = vmatmul.mubr.bf16.gmra.mrb[12].mxu0 %v15096_v57  ;;  %18973 = vst [vmem:[#allocation7_spill] sm:$0xff] %v15155_v29 }
 0x188   :  { %11989 = vmatprep.mubr.bf16.mxu0 %v15098_v62  ;;  %12050 = vmatpush3.bf16.msra.mxu0 %v14322_v56  ;;  %v1259_v56 = vld [vmem:[#allocation2 + $0x1b2] sm:$0xff] }
 0x189   :  { %12051 = vmatprep.subr.bf16.mxu0 %v14323_v63 }
 0x18c   :  { %12052 = vmatpush3.bf16.msra.mxu0 %v14323_v63  ;;  %v1260_v63 = vld [vmem:[#allocation2 + $0x1ba] sm:$0xff] }
 0x18d   :  { %12117 = vmatprep.subr.bf16.mxu0 %v15108_v8  ;;  %v1307_v1 = vpack.c.bf16 %v1260_v63, %v1259_v56  ;;  %v1272_v56 = vld [vmem:[#allocation2 + $0x24a] sm:$0xff]  ;;  %v15147_v63 = vpack.c.bf16 %v1270_v51, %v1269_v45  ;;  %v1279_v45 = vld [vmem:[#allocation2 + $0x2a2] sm:$0xff] }
 0x18e   :  { %v1280_v51 = vld [vmem:[#allocation2 + $0x2aa] sm:$0xff] }
 0x18f   :  { %11990 = vmatmul.mubr.bf16.gmra.mrb[16].mxu0 %v15110_v9  ;;  %18970 = vst [vmem:[#allocation4_spill] sm:$0xff] %v15147_v63 }
 0x190   :  { %11993 = vmatprep.mubr.bf16.mxu0 %v15112_v10 }
 0x197   :  { %11994 = vmatmul.mubr.bf16.gmra.mrb[20].mxu0 %v15117_v21 }
 0x198   :  { %11997 = vmatprep.mubr.bf16.mxu0 %v15119_v24 }
 0x19f   :  { %11998 = vmatmul.mubr.bf16.gmra.mrb[24].mxu0 %v15126_v37 }
 0x1a0   :  { %12001 = vmatprep.mubr.bf16.mxu0 %v15128_v48 }
 0x1a7   :  { %12002 = vmatmul.mubr.bf16.gmra.mrb[28].mxu0 %v15132_v0 }
 0x1a8   :  { %12005 = vmatprep.mubr.bf16.mxu0 %v1307_v1  ;;  %v15149_v1 = vpack.c.bf16 %v1272_v56, %v1271_v52  ;;  %v15159_v52 = vpack.c.bf16 %v1278_v35, %v1277_v32  ;;  %v15161_v56 = vpack.c.bf16 %v1280_v51, %v1279_v45  ;;  %v1285_v32 = vld [vmem:[#allocation2 + $0x2ea] sm:$0xff]  ;;  %v1286_v35 = vld [vmem:[#allocation2 + $0x2f2] sm:$0xff]  ;;  %v1287_v45 = vld [vmem:[#allocation2 + $0x302] sm:$0xff] }
 0x1a9   :  { %v1288_v51 = vld [vmem:[#allocation2 + $0x30a] sm:$0xff] }
 0x1aa   :  { %18971 = vst [vmem:[#allocation5_spill] sm:$0xff] %v15149_v1  ;;  %18974 = vst [vmem:[#allocation8_spill] sm:$0xff] %v15159_v52 }
 0x1ab   :  { %18975 = vst [vmem:[#allocation9_spill] sm:$0xff] %v15161_v56 }
 0x1af   :  { %12006 = vmatmul.mubr.bf16.gmra.mrb[32].mxu0 %v15135_v17 }
 0x1b0   :  { %12009 = vmatprep.mubr.bf16.mxu0 %v15137_v20 }
 0x1b7   :  { %12010 = vmatmul.mubr.bf16.gmra.mrb[36].mxu0 %v15141_v36 }
 0x1b8   :  { %12013 = vmatprep.mubr.bf16.mxu0 %v15143_v44 }
 0x1bf   :  { %12014 = vmatmul.mubr.bf16.gmra.mrb[40].mxu0 %v15147_v63 }
 0x1c0   :  { %12017 = vmatprep.mubr.bf16.mxu0 %v15149_v1  ;;  %v15165_v1 = vpack.c.bf16 %v1282_v7, %v1281_v5  ;;  %v15176_v5 = vpack.c.bf16 %v1288_v51, %v1287_v45  ;;  %v1289_v7 = vld [vmem:[#allocation2 + $0x31a] sm:$0xff] }
 0x1c1   :  { %v14337_v45 = vld [vmem:[%s18853_s1 + $0x160] sm:$0xff]  }
 0x1c7   :  { %12018 = vmatmul.mubr.bf16.gmra.mrb[44].mxu0 %v15153_v53  ;;  %v15167_v53 = vpack.c.bf16 %v1284_v16, %v1283_v15  ;;  %v1290_v15 = vld [vmem:[#allocation2 + $0x322] sm:$0xff] }
 0x1c8   :  { %12021 = vmatprep.mubr.bf16.mxu0 %v15155_v29  ;;  %v15180_v16 = vpack.c.bf16 %v1290_v15, %v1289_v7  ;;  %v14338_v15 = vld [vmem:[%s18853_s1 + $0x168] sm:$0xff]  }
 0x1cf   :  { %12022 = vmatmul.mubr.bf16.gmra.mrb[48].mxu0 %v15159_v52  ;;  %v15174_v52 = vpack.c.bf16 %v1286_v35, %v1285_v32  ;;  %v2267_v32 = vld [vmem:[#allocation2 + $0xa9] sm:$0xff]  ;;  %v2268_v35 = vld [vmem:[#allocation2 + $0xb1] sm:$0xff] }
 0x1d0   :  { %12025 = vmatprep.mubr.bf16.mxu0 %v15161_v56  ;;  %v11076_v56 = vld [vmem:[%s18854_s0 + $0xf8] sm:$0xff]   ;;  %v15270_v7 = vpack.c.bf16 %v2268_v35, %v2267_v32 }
 0x1d1   :  { %v11044_v29 = vunpack.c.l.bf16 %v11076_v56  ;;  %v11045_v63 = vunpack.c.h.bf16 %v11076_v56  ;;  %v14325_v56 = vld [vmem:[%s18853_s1 + $0x108] sm:$0xff]   ;;  %v2288_v32 = vld [vmem:[#allocation2 + $0x1d1] sm:$0xff] }
 0x1d2   :  { %v14336_v35 = vld [vmem:[%s18854_s0 + $0x78] sm:$0xff] }
 0x1d3   :  { %326 = vst [vmem:[#allocation2 + $0x331] sm:$0xff] %v11044_v29  ;;  %327 = vst [vmem:[#allocation2 + $0x339] sm:$0xff] %v11045_v63  ;;  %v14326_v63 = vld [vmem:[%s18853_s1 + $0x110] sm:$0xff]   ;;  %v2266_v29 = vld [vmem:[#allocation2 + $0x99] sm:$0xff] }
 0x1d7   :  { %12026 = vmatmul.mubr.bf16.gmra.mrb[52].mxu0 %v15165_v1 }
 0x1d8   :  { %12029 = vmatprep.mubr.bf16.mxu0 %v15167_v53 }
 0x1df   :  { %12030 = vmatmul.mubr.bf16.gmra.mrb[56].mxu0 %v15174_v52 }
 0x1e0   :  { %12033 = vmatprep.mubr.bf16.mxu0 %v15176_v5 }
 0x1e7   :  { %12034 = vmatmul.mubr.bf16.gmra.mrb[60].mxu0 %v15180_v16 }
 0x1e8   :  { %12053 = vmatprep.mubr.bf16.mxu0 %v14941_v22  ;;  %v14327_v22 = vld [vmem:[%s18853_s1 + $0x118] sm:$0xff]  }
 0x1ef   :  { %12054 = vmatmul.mubr.bf16.vlgmr.msra.gmra.mrb[0].mxu0 %v14943_v23  ;;  %v14328_v23 = vld [vmem:[%s18853_s1 + $0x120] sm:$0xff]  }
 0x1f0   :  { %12118 = vmatpush3.bf16.msra.mxu0 %v15108_v8  ;;  %12057 = vmatprep.mubr.bf16.mxu0 %v14953_v30  ;;  %v14329_v30 = vld [vmem:[%s18853_s1 + $0x128] sm:$0xff]   ;;  %v2265_v8 = vld [vmem:[#allocation2 + $0x91] sm:$0xff] }
 0x1f1   :  { %12119 = vmatprep.subr.bf16.mxu0 %v14325_v56  ;;  %v15268_v51 = vpack.c.bf16 %v2266_v29, %v2265_v8  ;;  %v2287_v29 = vld [vmem:[#allocation2 + $0x1c9] sm:$0xff] }
 0x1f4   :  { %12120 = vmatpush3.bf16.msra.mxu0 %v14325_v56  ;;  %v2269_v56 = vld [vmem:[#allocation2 + $0xc1] sm:$0xff] }
 0x1f5   :  { %12121 = vmatprep.subr.bf16.mxu0 %v14326_v63 }
 0x1f7   :  { %12058 = vmatmul.mubr.bf16.gmra.mrb[4].mxu0 %v14955_v31  ;;  %v14330_v31 = vld [vmem:[%s18853_s1 + $0x130] sm:$0xff]  }
 0x1f8   :  { %12061 = vmatprep.mubr.bf16.mxu0 %v14965_v38  ;;  %12122 = vmatpush3.bf16.msra.mxu0 %v14326_v63  ;;  %v14331_v38 = vld [vmem:[%s18853_s1 + $0x138] sm:$0xff]   ;;  %v2270_v63 = vld [vmem:[#allocation2 + $0xc9] sm:$0xff] }
 0x1f9   :  { %12123 = vmatprep.subr.bf16.mxu0 %v14327_v22 }
 0x1fc   :  { %12124 = vmatpush3.bf16.msra.mxu0 %v14327_v22  ;;  %v2271_v22 = vld [vmem:[#allocation2 + $0xd9] sm:$0xff] }
 0x1fd   :  { %12125 = vmatprep.subr.bf16.mxu0 %v14328_v23 }
 0x1ff   :  { %12062 = vmatmul.mubr.bf16.gmra.mrb[8].mxu0 %v14967_v39  ;;  %v14332_v39 = vld [vmem:[%s18853_s1 + $0x140] sm:$0xff]  }
 0x200   :  { %12065 = vmatprep.mubr.bf16.mxu0 %v14977_v46  ;;  %12126 = vmatpush3.bf16.msra.mxu0 %v14328_v23  ;;  %v1771_v46 = vld [vmem:[#allocation2 + $0x180] sm:$0xff] }
 0x201   :  { %12127 = vmatprep.subr.bf16.mxu0 %v14329_v30  ;;  %v2272_v23 = vld [vmem:[#allocation2 + $0xe1] sm:$0xff] }
 0x204   :  { %12128 = vmatpush3.bf16.msra.mxu0 %v14329_v30  ;;  %v14339_v30 = vld [vmem:[%s18853_s1 + $0x170] sm:$0xff]  }
 0x205   :  { %12129 = vmatprep.subr.bf16.mxu0 %v14330_v31 }
 0x207   :  { %12066 = vmatmul.mubr.bf16.gmra.mrb[12].mxu0 %v14979_v47  ;;  %v1772_v47 = vld [vmem:[#allocation2 + $0x188] sm:$0xff] }
 0x208   :  { %12069 = vmatprep.mubr.bf16.mxu0 %v14991_v54  ;;  %12130 = vmatpush3.bf16.msra.mxu0 %v14330_v31  ;;  %v15223_v54 = vpack.c.bf16 %v1772_v47, %v1771_v46  ;;  %v15280_v31 = vpack.c.bf16 %v2270_v63, %v2269_v56  ;;  %v2273_v46 = vld [vmem:[#allocation2 + $0xf1] sm:$0xff]  ;;  %v2274_v47 = vld [vmem:[#allocation2 + $0xf9] sm:$0xff]  ;;  %v2290_v56 = vld [vmem:[#allocation2 + $0x1e9] sm:$0xff] }
 0x209   :  { %12131 = vmatprep.subr.bf16.mxu0 %v14331_v38  ;;  %v2291_v63 = vld [vmem:[#allocation2 + $0x1f9] sm:$0xff] }
 0x20c   :  { %12132 = vmatpush3.bf16.msra.mxu0 %v14331_v38  ;;  %v15282_v38 = vpack.c.bf16 %v2272_v23, %v2271_v22  ;;  %v2292_v22 = vld [vmem:[#allocation2 + $0x201] sm:$0xff] }
 0x20d   :  { %12197 = vmatprep.subr.bf16.mxu0 %v14332_v39 }
 0x20f   :  { %12070 = vmatmul.mubr.bf16.gmra.mrb[16].mxu0 %v14993_v55  ;;  %v1803_v55 = vld [vmem:[#allocation2 + $0x330] sm:$0xff] }
 0x210   :  { %12073 = vmatprep.mubr.bf16.mxu0 %v14998_v60  ;;  %v1804_v60 = vld [vmem:[#allocation2 + $0x338] sm:$0xff] }
 0x217   :  { %12074 = vmatmul.mubr.bf16.gmra.mrb[20].mxu0 %v15000_v61  ;;  %v2255_v61 = vld [vmem:[#allocation2 + $0x19] sm:$0xff] }
 0x218   :  { %12077 = vmatprep.mubr.bf16.mxu0 %v15004_v2  ;;  %v2256_v2 = vld [vmem:[#allocation2 + $0x21] sm:$0xff] }
 0x21f   :  { %12078 = vmatmul.mubr.bf16.gmra.mrb[24].mxu0 %v15006_v3  ;;  %v15241_v3 = vpack.c.bf16 %v1804_v60, %v1803_v55  ;;  %v2275_v55 = vld [vmem:[#allocation2 + $0x109] sm:$0xff]  ;;  %v2276_v60 = vld [vmem:[#allocation2 + $0x111] sm:$0xff] }
 0x220   :  { %12081 = vmatprep.mubr.bf16.mxu0 %v15010_v6  ;;  %v2319_v6 = vpack.c.bf16 %v2256_v2, %v2255_v61  ;;  %v15292_v61 = vld [vmem:[%s18853_s1 + $0x180] sm:$0xff]   ;;  %v15294_v2 = vpack.c.bf16 %v2274_v47, %v2273_v46  ;;  %v2295_v47 = vld [vmem:[#allocation2 + $0x229] sm:$0xff] }
 0x221   :  { %v2294_v46 = vld [vmem:[#allocation2 + $0x219] sm:$0xff] }
 0x227   :  { %12082 = vmatmul.mubr.bf16.gmra.mrb[28].mxu0 %v15223_v54 }
 0x228   :  { %12085 = vmatprep.mubr.bf16.mxu0 %v15014_v11  ;;  %v2257_v11 = vld [vmem:[#allocation2 + $0x31] sm:$0xff] }
 0x22f   :  { %12086 = vmatmul.mubr.bf16.gmra.mrb[32].mxu0 %v15016_v12  ;;  %v2258_v12 = vld [vmem:[#allocation2 + $0x39] sm:$0xff] }
 0x230   :  { %12089 = vmatprep.mubr.bf16.mxu0 %v15020_v18  ;;  %v2259_v18 = vld [vmem:[#allocation2 + $0x49] sm:$0xff] }
 0x237   :  { %12090 = vmatmul.mubr.bf16.gmra.mrb[36].mxu0 %v15022_v19  ;;  %v2260_v19 = vld [vmem:[#allocation2 + $0x51] sm:$0xff] }
 0x238   :  { %12093 = vmatprep.mubr.bf16.mxu0 %v15026_v25  ;;  %v15244_v25 = vpack.c.bf16 %v2258_v12, %v2257_v11  ;;  %v2277_v11 = vld [vmem:[#allocation2 + $0x121] sm:$0xff]  ;;  %v2278_v12 = vld [vmem:[#allocation2 + $0x129] sm:$0xff] }
 0x23f   :  { %12094 = vmatmul.mubr.bf16.gmra.mrb[40].mxu0 %v15028_v26  ;;  %v15246_v26 = vpack.c.bf16 %v2260_v19, %v2259_v18  ;;  %v2279_v18 = vld [vmem:[#allocation2 + $0x139] sm:$0xff]  ;;  %v2280_v19 = vld [vmem:[#allocation2 + $0x141] sm:$0xff] }
 0x240   :  { %12097 = vmatprep.mubr.bf16.mxu0 %v15032_v33  ;;  %v14333_v33 = vld [vmem:[%s18853_s1 + $0x148] sm:$0xff]  }
 0x247   :  { %12098 = vmatmul.mubr.bf16.gmra.mrb[44].mxu0 %v15034_v34  ;;  %v2261_v34 = vld [vmem:[#allocation2 + $0x61] sm:$0xff] }
 0x248   :  { %12101 = vmatprep.mubr.bf16.mxu0 %v15038_v41  ;;  %v2262_v41 = vld [vmem:[#allocation2 + $0x69] sm:$0xff] }
 0x24f   :  { %12102 = vmatmul.mubr.bf16.gmra.mrb[48].mxu0 %v15040_v42  ;;  %v2263_v42 = vld [vmem:[#allocation2 + $0x79] sm:$0xff] }
 0x250   :  { %12105 = vmatprep.mubr.bf16.mxu0 %v15044_v49  ;;  %v2264_v49 = vld [vmem:[#allocation2 + $0x81] sm:$0xff] }
 0x257   :  { %12106 = vmatmul.mubr.bf16.gmra.mrb[52].mxu0 %v15046_v50  ;;  %v14334_v50 = vld [vmem:[%s18853_s1 + $0x150] sm:$0xff]  }
 0x258   :  { %12109 = vmatprep.mubr.bf16.mxu0 %v15050_v58  ;;  %v15256_v58 = vpack.c.bf16 %v2262_v41, %v2261_v34  ;;  %v15303_v34 = vpack.c.bf16 %v2280_v19, %v2279_v18  ;;  %v2281_v41 = vld [vmem:[#allocation2 + $0x151] sm:$0xff]  ;;  %v2298_v18 = vld [vmem:[#allocation2 + $0x249] sm:$0xff]  ;;  %v2299_v19 = vld [vmem:[#allocation2 + $0x259] sm:$0xff] }
 0x25f   :  { %12110 = vmatmul.mubr.bf16.gmra.mrb[56].mxu0 %v15052_v59  ;;  %v15258_v59 = vpack.c.bf16 %v2264_v49, %v2263_v42  ;;  %v2282_v42 = vld [vmem:[#allocation2 + $0x159] sm:$0xff]  ;;  %v2283_v49 = vld [vmem:[#allocation2 + $0x169] sm:$0xff] }
 0x260   :  { %12113 = vmatprep.mubr.bf16.mxu0 %v15056_v4  ;;  %v14335_v4 = vld [vmem:[%s18853_s1 + $0x158] sm:$0xff]  }
 0x267   :  { %12114 = vmatmul.mubr.bf16.gmra.mrb[60].mxu0 %v15241_v3 }
 0x268   :  { %12133 = vmatprep.mubr.bf16.mxu0 %v2319_v6  ;;  %v15296_v6 = vpack.c.bf16 %v2276_v60, %v2275_v55  ;;  %v2296_v55 = vld [vmem:[#allocation2 + $0x231] sm:$0xff] }
 0x26f   :  { %12134 = vmatmul.mubr.bf16.vlgmr.msra.gmra.mrb[0].mxu0 %v15244_v25 }
 0x270   :  { %12198 = vmatpush3.bf16.msra.mxu0 %v14332_v39  ;;  %12137 = vmatprep.mubr.bf16.mxu0 %v15246_v26  ;;  %v14340_v39 = vld [vmem:[%s18853_s1 + $0x178] sm:$0xff]  }
 0x271   :  { %12199 = vmatprep.subr.bf16.mxu0 %v14333_v33 }
 0x274   :  { %12200 = vmatpush3.bf16.msra.mxu0 %v14333_v33  ;;  %v15301_v33 = vpack.c.bf16 %v2278_v12, %v2277_v11  ;;  %v15324_v11 = vpack.c.bf16 %v2296_v55, %v2295_v47  ;;  %v2297_v12 = vld [vmem:[#allocation2 + $0x241] sm:$0xff]  ;;  %v2309_v55 = vld [vmem:[#allocation2 + $0x2d1] sm:$0xff] }
 0x275   :  { %12201 = vmatprep.subr.bf16.mxu0 %v14334_v50 }
 0x277   :  { %12138 = vmatmul.mubr.bf16.gmra.mrb[4].mxu0 %v15256_v58 }
 0x278   :  { %12141 = vmatprep.mubr.bf16.mxu0 %v15258_v59  ;;  %12202 = vmatpush3.bf16.msra.mxu0 %v14334_v50  ;;  %v2284_v50 = vld [vmem:[#allocation2 + $0x171] sm:$0xff] }
 0x279   :  { %12203 = vmatprep.subr.bf16.mxu0 %v14335_v4  ;;  %v15309_v8 = vpack.c.bf16 %v2284_v50, %v2283_v49  ;;  %v2301_v50 = vld [vmem:[#allocation2 + $0x271] sm:$0xff] }
 0x27c   :  { %12204 = vmatpush3.bf16.msra.mxu0 %v14335_v4  ;;  %v15307_v4 = vpack.c.bf16 %v2282_v42, %v2281_v41  ;;  %v2300_v41 = vld [vmem:[#allocation2 + $0x261] sm:$0xff]  ;;  %v15328_v42 = vpack.c.bf16 %v2298_v18, %v2297_v12  ;;  %v2310_v12 = vld [vmem:[#allocation2 + $0x2d9] sm:$0xff]  ;;  %v2311_v18 = vld [vmem:[#allocation2 + $0x2e9] sm:$0xff] }
 0x27d   :  { %12205 = vmatprep.subr.bf16.mxu0 %v14337_v45  ;;  %v15330_v49 = vpack.c.bf16 %v2300_v41, %v2299_v19  ;;  %v2312_v19 = vld [vmem:[#allocation2 + $0x2f1] sm:$0xff]  ;;  %v15346_v41 = vpack.c.bf16 %v2310_v12, %v2309_v55  ;;  %v14343_v55 = vld [vmem:[%s18853_s1 + $0x188] sm:$0xff]  }
 0x27e   :  { %v14344_v12 = vld [vmem:[%s18853_s1 + $0x190] sm:$0xff]  }
 0x27f   :  { %12142 = vmatmul.mubr.bf16.gmra.mrb[8].mxu0 %v15268_v51 }
 0x280   :  { %12145 = vmatprep.mubr.bf16.mxu0 %v15270_v7  ;;  %12206 = vmatpush3.bf16.msra.mxu0 %v14337_v45  ;;  %v2335_v45 = vpack.c.bf16 %v2288_v32, %v2287_v29  ;;  %v2302_v29 = vld [vmem:[#allocation2 + $0x279] sm:$0xff]  ;;  %v2303_v32 = vld [vmem:[#allocation2 + $0x289] sm:$0xff] }
 0x281   :  { %12207 = vmatprep.subr.bf16.mxu0 %v14338_v15 }
 0x284   :  { %12208 = vmatpush3.bf16.msra.mxu0 %v14338_v15  ;;  %v2289_v15 = vld [vmem:[#allocation2 + $0x1e1] sm:$0xff] }
 0x285   :  { %12209 = vmatprep.subr.bf16.mxu0 %v14339_v30  ;;  %v15316_v23 = vpack.c.bf16 %v2290_v56, %v2289_v15  ;;  %v2305_v56 = vld [vmem:[#allocation2 + $0x2a1] sm:$0xff] }
 0x287   :  { %12146 = vmatmul.mubr.bf16.gmra.mrb[12].mxu0 %v15280_v31 }
 0x288   :  { %12149 = vmatprep.mubr.bf16.mxu0 %v15282_v38  ;;  %12210 = vmatpush3.bf16.msra.mxu0 %v14339_v30  ;;  %v15318_v30 = vpack.c.bf16 %v2292_v22, %v2291_v63  ;;  %v2306_v63 = vld [vmem:[#allocation2 + $0x2a9] sm:$0xff]  ;;  %v2307_v22 = vld [vmem:[#allocation2 + $0x2b9] sm:$0xff] }
 0x289   :  { %12211 = vmatprep.subr.bf16.mxu0 %v14340_v39 }
 0x28c   :  { %12212 = vmatpush3.bf16.msra.mxu0 %v14340_v39  ;;  %v2293_v39 = vld [vmem:[#allocation2 + $0x211] sm:$0xff] }
 0x28d   :  { %12277 = vmatprep.subr.bf16.mxu0 %v15292_v61  ;;  %v15322_v60 = vpack.c.bf16 %v2294_v46, %v2293_v39  ;;  %v2308_v39 = vld [vmem:[#allocation2 + $0x2c1] sm:$0xff]  ;;  %v15340_v46 = vpack.c.bf16 %v2306_v63, %v2305_v56 }
 0x28e   :  { %v15342_v47 = vpack.c.bf16 %v2308_v39, %v2307_v22  ;;  %v2316_v56 = vld [vmem:[#allocation2 + $0x321] sm:$0xff]  ;;  %v14341_v39 = vld [vmem:[%s18854_s0 + $0xf8] sm:$0xff] }
 0x28f   :  { %12150 = vmatmul.mubr.bf16.gmra.mrb[16].mxu0 %v15294_v2 }
 0x290   :  { %12153 = vmatprep.mubr.bf16.mxu0 %v15296_v6 }
 0x297   :  { %12154 = vmatmul.mubr.bf16.gmra.mrb[20].mxu0 %v15301_v33 }
 0x298   :  { %12157 = vmatprep.mubr.bf16.mxu0 %v15303_v34 }
 0x29f   :  { %12158 = vmatmul.mubr.bf16.gmra.mrb[24].mxu0 %v15307_v4 }
 0x2a0   :  { %12161 = vmatprep.mubr.bf16.mxu0 %v15309_v8 }
 0x2a7   :  { %12162 = vmatmul.mubr.bf16.gmra.mrb[28].mxu0 %v14336_v35  ;;  %v2304_v35 = vld [vmem:[#allocation2 + $0x291] sm:$0xff] }
 0x2a8   :  { %12165 = vmatprep.mubr.bf16.mxu0 %v2335_v45  ;;  %v15334_v45 = vpack.c.bf16 %v2302_v29, %v2301_v50  ;;  %v15336_v15 = vpack.c.bf16 %v2304_v35, %v2303_v32  ;;  %v15348_v50 = vpack.c.bf16 %v2312_v19, %v2311_v18  ;;  %v2313_v29 = vld [vmem:[#allocation2 + $0x301] sm:$0xff]  ;;  %v2314_v32 = vld [vmem:[#allocation2 + $0x309] sm:$0xff]  ;;  %v2315_v35 = vld [vmem:[#allocation2 + $0x319] sm:$0xff] }
 0x2a9   :  { %v15352_v63 = vpack.c.bf16 %v2314_v32, %v2313_v29  ;;  %v15354_v22 = vpack.c.bf16 %v2316_v56, %v2315_v35  ;;  %v3286_v19 = vld [vmem:[#allocation2 + $0x48] sm:$0xff]  ;;  %v3288_v29 = vld [vmem:[#allocation2 + $0x60] sm:$0xff]  ;;  %v3292_v56 = vld [vmem:[#allocation2 + $0x90] sm:$0xff] }
 0x2aa   :  { %v3291_v35 = vld [vmem:[#allocation2 + $0x80] sm:$0xff] }
 0x2af   :  { %12166 = vmatmul.mubr.bf16.gmra.mrb[32].mxu0 %v15316_v23 }
 0x2b0   :  { %12169 = vmatprep.mubr.bf16.mxu0 %v15318_v30 }
 0x2b7   :  { %12170 = vmatmul.mubr.bf16.gmra.mrb[36].mxu0 %v15322_v60 }
 0x2b8   :  { %12173 = vmatprep.mubr.bf16.mxu0 %v15324_v11 }
 0x2bf   :  { %12174 = vmatmul.mubr.bf16.gmra.mrb[40].mxu0 %v15328_v42 }
 0x2c0   :  { %12177 = vmatprep.mubr.bf16.mxu0 %v15330_v49 }
 0x2c7   :  { %12178 = vmatmul.mubr.bf16.gmra.mrb[44].mxu0 %v15334_v45 }
 0x2c8   :  { %12181 = vmatprep.mubr.bf16.mxu0 %v15336_v15 }
 0x2cf   :  { %12182 = vmatmul.mubr.bf16.gmra.mrb[48].mxu0 %v15340_v46 }
 0x2d0   :  { %12185 = vmatprep.mubr.bf16.mxu0 %v15342_v47 }
 0x2d7   :  { %12186 = vmatmul.mubr.bf16.gmra.mrb[52].mxu0 %v15346_v41 }
 0x2d8   :  { %12189 = vmatprep.mubr.bf16.mxu0 %v15348_v50 }
 0x2df   :  { %12190 = vmatmul.mubr.bf16.gmra.mrb[56].mxu0 %v15352_v63 }
 0x2e0   :  { %12193 = vmatprep.mubr.bf16.mxu0 %v15354_v22 }
 0x2e7   :  { %12194 = vmatmul.mubr.bf16.gmra.mrb[60].mxu0 %v14341_v39  ;;  %v3293_v39 = vld [vmem:[#allocation2 + $0x98] sm:$0xff] }
 0x2e8   :  { %12213 = vmatprep.mubr.bf16.mxu0 %v15059_v13  ;;  %v14345_v13 = vld [vmem:[%s18853_s1 + $0x198] sm:$0xff]  }
 0x2ef   :  { %12214 = vmatmul.mubr.bf16.vlgmr.msra.gmra.mrb[0].mxu0 %v15061_v14  ;;  %v14346_v14 = vld [vmem:[%s18853_s1 + $0x1a0] sm:$0xff]  }
 0x2f0   :  { %12278 = vmatpush3.bf16.msra.mxu0 %v15292_v61  ;;  %12217 = vmatprep.mubr.bf16.mxu0 %v15072_v27  ;;  %v14347_v27 = vld [vmem:[%s18853_s1 + $0x1a8] sm:$0xff]  }
 0x2f1   :  { %12279 = vmatprep.subr.bf16.mxu0 %v14343_v55 }
 0x2f4   :  { %12280 = vmatpush3.bf16.msra.mxu0 %v14343_v55  ;;  %v14352_v55 = vld [vmem:[%s18853_s1 + $0x1d0] sm:$0xff]  }
 0x2f5   :  { %12281 = vmatprep.subr.bf16.mxu0 %v14344_v12 }
 0x2f7   :  { %12218 = vmatmul.mubr.bf16.gmra.mrb[4].mxu0 %v15074_v28  ;;  %v14348_v28 = vld [vmem:[%s18853_s1 + $0x1b0] sm:$0xff]  }
 0x2f8   :  { %12221 = vmatprep.mubr.bf16.mxu0 %v15084_v40  ;;  %12282 = vmatpush3.bf16.msra.mxu0 %v14344_v12  ;;  %v14349_v40 = vld [vmem:[%s18853_s1 + $0x1b8] sm:$0xff]  }
 0x2f9   :  { %12283 = vmatprep.subr.bf16.mxu0 %v14345_v13 }
 0x2fc   :  { %12284 = vmatpush3.bf16.msra.mxu0 %v14345_v13  ;;  %v3352_v13 = vpack.c.bf16 %v3293_v39, %v3292_v56  ;;  %v3309_v56 = vld [vmem:[#allocation2 + $0x158] sm:$0xff] }
 0x2fd   :  { %12285 = vmatprep.subr.bf16.mxu0 %v14346_v14 }
 0x2ff   :  { %12222 = vmatmul.mubr.bf16.gmra.mrb[8].mxu0 %v15086_v43  ;;  %v14350_v43 = vld [vmem:[%s18853_s1 + $0x1c0] sm:$0xff]  }
 0x300   :  { %12225 = vmatprep.mubr.bf16.mxu0 %v15096_v57  ;;  %12286 = vmatpush3.bf16.msra.mxu0 %v14346_v14  ;;  %v2799_v57 = vld [vmem:[#allocation2 + $0x182] sm:$0xff]  ;;  %v14353_v14 = vld [vmem:[%s18853_s1 + $0x1d8] sm:$0xff]  }
 0x301   :  { %12287 = vmatprep.subr.bf16.mxu0 %v14347_v27 }
 0x304   :  { %12288 = vmatpush3.bf16.msra.mxu0 %v14347_v27  ;;  %v3294_v27 = vld [vmem:[#allocation2 + $0xa8] sm:$0xff] }
 0x305   :  { %12289 = vmatprep.subr.bf16.mxu0 %v14348_v28 }
 0x307   :  { %12226 = vmatmul.mubr.bf16.gmra.mrb[12].mxu0 %v15098_v62  ;;  %v2800_v62 = vld [vmem:[#allocation2 + $0x18a] sm:$0xff] }
 0x308   :  { %12229 = vmatprep.mubr.bf16.mxu0 %v15110_v9  ;;  %12290 = vmatpush3.bf16.msra.mxu0 %v14348_v28  ;;  %v15401_v9 = vpack.c.bf16 %v2800_v62, %v2799_v57  ;;  %v3295_v28 = vld [vmem:[#allocation2 + $0xb0] sm:$0xff]  ;;  %v14354_v57 = vld [vmem:[%s18853_s1 + $0x1e0] sm:$0xff]  }
 0x309   :  { %12291 = vmatprep.subr.bf16.mxu0 %v14349_v40  ;;  %v3353_v62 = vpack.c.bf16 %v3295_v28, %v3294_v27  ;;  %v3316_v27 = vld [vmem:[#allocation2 + $0x1e0] sm:$0xff]  ;;  %v3317_v28 = vld [vmem:[#allocation2 + $0x1e8] sm:$0xff] }
 0x30c   :  { %12292 = vmatpush3.bf16.msra.mxu0 %v14349_v40  ;;  %v3296_v40 = vld [vmem:[#allocation2 + $0xc0] sm:$0xff] }
 0x30d   :  { %12357 = vmatprep.subr.bf16.mxu0 %v14350_v43 }
 0x30f   :  { %12230 = vmatmul.mubr.bf16.gmra.mrb[16].mxu0 %v15112_v10  ;;  %v18976_v10 = vld [vmem:[#allocation4_spill] sm:$0xff] }
 0x310   :  { %12233 = vmatprep.mubr.bf16.mxu0 %v15117_v21  ;;  %v18977_v21 = vld [vmem:[#allocation5_spill] sm:$0xff] }
 0x317   :  { %12234 = vmatmul.mubr.bf16.gmra.mrb[20].mxu0 %v15119_v24  ;;  %v18978_v24 = vld [vmem:[#allocation6_spill] sm:$0xff] }
 0x318   :  { %12237 = vmatprep.mubr.bf16.mxu0 %v15126_v37  ;;  %v18979_v37 = vld [vmem:[#allocation7_spill] sm:$0xff] }
 0x31f   :  { %12238 = vmatmul.mubr.bf16.gmra.mrb[24].mxu0 %v15128_v48  ;;  %v18980_v48 = vld [vmem:[#allocation8_spill] sm:$0xff] }
 0x320   :  { %12241 = vmatprep.mubr.bf16.mxu0 %v15132_v0  ;;  %v18981_v0 = vld [vmem:[#allocation9_spill] sm:$0xff] }
 0x327   :  { %12242 = vmatmul.mubr.bf16.gmra.mrb[28].mxu0 %v15401_v9 }
 0x328   :  { %12245 = vmatprep.mubr.bf16.mxu0 %v15135_v17  ;;  %v2831_v17 = vld [vmem:[#allocation2 + $0x332] sm:$0xff] }
 0x32f   :  { %12246 = vmatmul.mubr.bf16.gmra.mrb[32].mxu0 %v15137_v20  ;;  %v2832_v20 = vld [vmem:[#allocation2 + $0x33a] sm:$0xff] }
 0x330   :  { %12249 = vmatprep.mubr.bf16.mxu0 %v15141_v36  ;;  %v3284_v36 = vld [vmem:[#allocation2 + $0x30] sm:$0xff]  ;;  %v15419_v61 = vpack.c.bf16 %v2832_v20, %v2831_v17 }
 0x331   :  { %v14356_v17 = vld [vmem:[%s18853_s1 + $0x1f0] sm:$0xff]  }
 0x337   :  { %12250 = vmatmul.mubr.bf16.gmra.mrb[36].mxu0 %v15143_v44  ;;  %v3285_v44 = vld [vmem:[#allocation2 + $0x38] sm:$0xff] }
 0x338   :  { %12253 = vmatprep.mubr.bf16.mxu0 %v18976_v10  ;;  %v3348_v18 = vpack.c.bf16 %v3285_v44, %v3284_v36  ;;  %v14357_v44 = vld [vmem:[%s18853_s1 + $0x1f8] sm:$0xff]  }
 0x33f   :  { %12254 = vmatmul.mubr.bf16.gmra.mrb[40].mxu0 %v18977_v21  ;;  %v14355_v21 = vld [vmem:[%s18853_s1 + $0x1e8] sm:$0xff]  }
 0x340   :  { %12257 = vmatprep.mubr.bf16.mxu0 %v18978_v24  ;;  %v3298_v24 = vld [vmem:[#allocation2 + $0xd8] sm:$0xff] }
 0x347   :  { %12258 = vmatmul.mubr.bf16.gmra.mrb[44].mxu0 %v18979_v37  ;;  %v3299_v37 = vld [vmem:[#allocation2 + $0xe0] sm:$0xff] }
 0x348   :  { %12261 = vmatprep.mubr.bf16.mxu0 %v18980_v48  ;;  %v3300_v48 = vld [vmem:[#allocation2 + $0xf0] sm:$0xff]  ;;  %v3355_v20 = vpack.c.bf16 %v3299_v37, %v3298_v24  ;;  %v3321_v24 = vld [vmem:[#allocation2 + $0x218] sm:$0xff] }
 0x34f   :  { %12262 = vmatmul.mubr.bf16.gmra.mrb[48].mxu0 %v18981_v0  ;;  %v3301_v0 = vld [vmem:[#allocation2 + $0xf8] sm:$0xff] }
 0x350   :  { %12265 = vmatprep.mubr.bf16.mxu0 %v15165_v1  ;;  %v3287_v1 = vld [vmem:[#allocation2 + $0x50] sm:$0xff]  ;;  %v3356_v36 = vpack.c.bf16 %v3301_v0, %v3300_v48  ;;  %v3322_v0 = vld [vmem:[#allocation2 + $0x228] sm:$0xff] }
 0x351   :  { %v3349_v32 = vpack.c.bf16 %v3287_v1, %v3286_v19  ;;  %v3303_v19 = vld [vmem:[#allocation2 + $0x110] sm:$0xff]  ;;  %v3304_v1 = vld [vmem:[#allocation2 + $0x120] sm:$0xff] }
 0x357   :  { %12266 = vmatmul.mubr.bf16.gmra.mrb[52].mxu0 %v15167_v53  ;;  %v3289_v53 = vld [vmem:[#allocation2 + $0x68] sm:$0xff] }
 0x358   :  { %12269 = vmatprep.mubr.bf16.mxu0 %v15174_v52  ;;  %v3350_v52 = vpack.c.bf16 %v3289_v53, %v3288_v29  ;;  %v3305_v29 = vld [vmem:[#allocation2 + $0x128] sm:$0xff]  ;;  %v15446_v53 = vld [vmem:[%s18853_s1 + $0x200] sm:$0xff]  }
 0x35f   :  { %12270 = vmatmul.mubr.bf16.gmra.mrb[56].mxu0 %v15176_v5  ;;  %v14351_v5 = vld [vmem:[%s18853_s1 + $0x1c8] sm:$0xff]  }
 0x360   :  { %12273 = vmatprep.mubr.bf16.mxu0 %v15180_v16  ;;  %v3290_v16 = vld [vmem:[#allocation2 + $0x78] sm:$0xff] }
 0x361   :  { %v3351_v12 = vpack.c.bf16 %v3291_v35, %v3290_v16  ;;  %v3307_v16 = vld [vmem:[#allocation2 + $0x140] sm:$0xff]  ;;  %v3308_v35 = vld [vmem:[#allocation2 + $0x150] sm:$0xff] }
 0x367   :  { %12274 = vmatmul.mubr.bf16.gmra.mrb[60].mxu0 %v15419_v61 }
 0x368   :  { %12293 = vmatprep.mubr.bf16.mxu0 %v3348_v18  ;;  %v3302_v18 = vld [vmem:[#allocation2 + $0x108] sm:$0xff] }
 0x36f   :  { %12294 = vmatmul.mubr.bf16.vlgmr.msra.gmra.mrb[0].mxu0 %v3349_v32  ;;  %v3357_v32 = vpack.c.bf16 %v3303_v19, %v3302_v18  ;;  %v3326_v18 = vld [vmem:[#allocation2 + $0x258] sm:$0xff]  ;;  %v3327_v19 = vld [vmem:[#allocation2 + $0x260] sm:$0xff] }
 0x370   :  { %12358 = vmatpush3.bf16.msra.mxu0 %v14350_v43  ;;  %12297 = vmatprep.mubr.bf16.mxu0 %v3350_v52  ;;  %v3297_v43 = vld [vmem:[#allocation2 + $0xc8] sm:$0xff]  ;;  %v3358_v52 = vpack.c.bf16 %v3305_v29, %v3304_v1  ;;  %v3328_v1 = vld [vmem:[#allocation2 + $0x270] sm:$0xff]  ;;  %v3329_v29 = vld [vmem:[#allocation2 + $0x278] sm:$0xff] }
 0x371   :  { %12359 = vmatprep.subr.bf16.mxu0 %v14351_v5  ;;  %v3354_v10 = vpack.c.bf16 %v3297_v43, %v3296_v40  ;;  %v14443_v40 = vld [vmem:[#allocation2] sm:$0xff] }
 0x372   :  { %v3363_v43 = vpack.c.bf16 %v14443_v40, %v14443_v40 }
 0x374   :  { %12360 = vmatpush3.bf16.msra.mxu0 %v14351_v5  ;;  %v3306_v5 = vld [vmem:[#allocation2 + $0x138] sm:$0xff] }
 0x375   :  { %12361 = vmatprep.subr.bf16.mxu0 %v14352_v55  ;;  %v3359_v39 = vpack.c.bf16 %v3307_v16, %v3306_v5  ;;  %v3330_v5 = vld [vmem:[#allocation2 + $0x288] sm:$0xff]  ;;  %v3331_v16 = vld [vmem:[#allocation2 + $0x290] sm:$0xff] }
 0x377   :  { %12298 = vmatmul.mubr.bf16.gmra.mrb[4].mxu0 %v3351_v12  ;;  %v3310_v12 = vld [vmem:[#allocation2 + $0x168] sm:$0xff] }
 0x378   :  { %12301 = vmatprep.mubr.bf16.mxu0 %v3352_v13  ;;  %12362 = vmatpush3.bf16.msra.mxu0 %v14352_v55  ;;  %v3360_v55 = vpack.c.bf16 %v3309_v56, %v3308_v35  ;;  %v3311_v13 = vld [vmem:[#allocation2 + $0x170] sm:$0xff]  ;;  %v3332_v35 = vld [vmem:[#allocation2 + $0x2a0] sm:$0xff]  ;;  %v3333_v56 = vld [vmem:[#allocation2 + $0x2a8] sm:$0xff] }
 0x379   :  { %12363 = vmatprep.subr.bf16.mxu0 %v14353_v14 }
 0x37c   :  { %12364 = vmatpush3.bf16.msra.mxu0 %v14353_v14  ;;  %v3361_v14 = vpack.c.bf16 %v3311_v13, %v3310_v12  ;;  %v3334_v12 = vld [vmem:[#allocation2 + $0x2b8] sm:$0xff]  ;;  %v3335_v13 = vld [vmem:[#allocation2 + $0x2c0] sm:$0xff] }
 0x37d   :  { %12365 = vmatprep.subr.bf16.mxu0 %v14354_v57 }
 0x37f   :  { %12302 = vmatmul.mubr.bf16.gmra.mrb[8].mxu0 %v3353_v62  ;;  %v3318_v62 = vld [vmem:[#allocation2 + $0x1f8] sm:$0xff] }
 0x380   :  { %12305 = vmatprep.mubr.bf16.mxu0 %v3354_v10  ;;  %12366 = vmatpush3.bf16.msra.mxu0 %v14354_v57  ;;  %v3364_v57 = vpack.c.bf16 %v3317_v28, %v3316_v27  ;;  %v3319_v10 = vld [vmem:[#allocation2 + $0x200] sm:$0xff]  ;;  %v3337_v27 = vld [vmem:[#allocation2 + $0x2d8] sm:$0xff]  ;;  %v3373_v28 = vpack.c.bf16 %v3335_v13, %v3334_v12 }
 0x381   :  { %12367 = vmatprep.subr.bf16.mxu0 %v14355_v21  ;;  %v3365_v37 = vpack.c.bf16 %v3319_v10, %v3318_v62  ;;  %v3339_v62 = vld [vmem:[#allocation2 + $0x2f0] sm:$0xff]  ;;  %v3340_v10 = vld [vmem:[#allocation2 + $0x300] sm:$0xff] }
 0x382   :  { %v4331_v12 = vld [vmem:[#allocation2 + $0x112] sm:$0xff]  ;;  %v4332_v13 = vld [vmem:[#allocation2 + $0x122] sm:$0xff] }
 0x384   :  { %12368 = vmatpush3.bf16.msra.mxu0 %v14355_v21  ;;  %v3320_v21 = vld [vmem:[#allocation2 + $0x210] sm:$0xff] }
 0x385   :  { %12369 = vmatprep.subr.bf16.mxu0 %v14356_v17  ;;  %v3366_v48 = vpack.c.bf16 %v3321_v24, %v3320_v21  ;;  %v3341_v21 = vld [vmem:[#allocation2 + $0x308] sm:$0xff] }
 0x387   :  { %12306 = vmatmul.mubr.bf16.gmra.mrb[12].mxu0 %v3355_v20  ;;  %v3324_v20 = vld [vmem:[#allocation2 + $0x240] sm:$0xff] }
 0x388   :  { %12309 = vmatprep.mubr.bf16.mxu0 %v3356_v36  ;;  %12370 = vmatpush3.bf16.msra.mxu0 %v14356_v17  ;;  %v3323_v17 = vld [vmem:[#allocation2 + $0x230] sm:$0xff]  ;;  %v3325_v36 = vld [vmem:[#allocation2 + $0x248] sm:$0xff] }
 0x389   :  { %12371 = vmatprep.subr.bf16.mxu0 %v14357_v44 }
 0x38c   :  { %12372 = vmatpush3.bf16.msra.mxu0 %v14357_v44  ;;  %v3368_v44 = vpack.c.bf16 %v3325_v36, %v3324_v20  ;;  %v14359_v20 = vld [vmem:[%s18853_s1 + $0x208] sm:$0xff]   ;;  %v14360_v36 = vld [vmem:[%s18853_s1 + $0x210] sm:$0xff]  }
 0x38d   :  { %12437 = vmatprep.subr.bf16.mxu0 %v15446_v53 }
 0x38f   :  { %12310 = vmatmul.mubr.bf16.gmra.mrb[16].mxu0 %v3357_v32  ;;  %v3369_v32 = vpack.c.bf16 %v3327_v19, %v3326_v18  ;;  %v4323_v18 = vld [vmem:[#allocation2 + $0xb2] sm:$0xff]  ;;  %v4324_v19 = vld [vmem:[#allocation2 + $0xc2] sm:$0xff] }
 0x390   :  { %12313 = vmatprep.mubr.bf16.mxu0 %v3358_v52  ;;  %v3370_v52 = vpack.c.bf16 %v3329_v29, %v3328_v1  ;;  %v4325_v1 = vld [vmem:[#allocation2 + $0xca] sm:$0xff] }
 0x397   :  { %12314 = vmatmul.mubr.bf16.gmra.mrb[20].mxu0 %v3359_v39  ;;  %v3371_v39 = vpack.c.bf16 %v3331_v16, %v3330_v5  ;;  %v4327_v5 = vld [vmem:[#allocation2 + $0xe2] sm:$0xff]  ;;  %v4328_v16 = vld [vmem:[#allocation2 + $0xf2] sm:$0xff] }
 0x398   :  { %12317 = vmatprep.mubr.bf16.mxu0 %v3360_v55  ;;  %v3372_v55 = vpack.c.bf16 %v3333_v56, %v3332_v35  ;;  %v4329_v35 = vld [vmem:[#allocation2 + $0xfa] sm:$0xff] }
 0x39f   :  { %12318 = vmatmul.mubr.bf16.gmra.mrb[24].mxu0 %v3361_v14  ;;  %v3336_v14 = vld [vmem:[#allocation2 + $0x2d0] sm:$0xff] }
 0x3a0   :  { %12321 = vmatprep.mubr.bf16.mxu0 %v15223_v54  ;;  %v3367_v54 = vpack.c.bf16 %v3323_v17, %v3322_v0  ;;  %v3374_v40 = vpack.c.bf16 %v3337_v27, %v3336_v14  ;;  %v3343_v0 = vld [vmem:[#allocation2 + $0x320] sm:$0xff]  ;;  %v4333_v14 = vld [vmem:[#allocation2 + $0x12a] sm:$0xff] }
 0x3a7   :  { %12322 = vmatmul.mubr.bf16.gmra.mrb[28].mxu0 %v3363_v43 }
 0x3a8   :  { %12325 = vmatprep.mubr.bf16.mxu0 %v3364_v57  ;;  %v3338_v57 = vld [vmem:[#allocation2 + $0x2e8] sm:$0xff] }
 0x3a9   :  { %v3375_v24 = vpack.c.bf16 %v3339_v62, %v3338_v57  ;;  %v4335_v57 = vld [vmem:[#allocation2 + $0x142] sm:$0xff]  ;;  %v4336_v62 = vld [vmem:[#allocation2 + $0x152] sm:$0xff] }
 0x3af   :  { %12326 = vmatmul.mubr.bf16.gmra.mrb[32].mxu0 %v3365_v37  ;;  %v3376_v37 = vpack.c.bf16 %v3341_v21, %v3340_v10  ;;  %v4337_v10 = vld [vmem:[#allocation2 + $0x15a] sm:$0xff] }
 0x3b0   :  { %12329 = vmatprep.mubr.bf16.mxu0 %v3366_v48  ;;  %v3342_v48 = vld [vmem:[#allocation2 + $0x318] sm:$0xff] }
 0x3b1   :  { %v3377_v17 = vpack.c.bf16 %v3343_v0, %v3342_v48  ;;  %v4339_v48 = vld [vmem:[#allocation2 + $0x172] sm:$0xff] }
 0x3b7   :  { %12330 = vmatmul.mubr.bf16.gmra.mrb[36].mxu0 %v3367_v54 }
 0x3b8   :  { %12333 = vmatprep.mubr.bf16.mxu0 %v3368_v44  ;;  %v4322_v44 = vld [vmem:[#allocation2 + $0xaa] sm:$0xff] }
 0x3b9   :  { %v4381_v29 = vpack.c.bf16 %v4323_v18, %v4322_v44  ;;  %v4366_v44 = vld [vmem:[#allocation2 + $0x2ea] sm:$0xff]  ;;  %v4367_v18 = vld [vmem:[#allocation2 + $0x2f2] sm:$0xff] }
 0x3bf   :  { %12334 = vmatmul.mubr.bf16.gmra.mrb[40].mxu0 %v3369_v32  ;;  %v4382_v32 = vpack.c.bf16 %v4325_v1, %v4324_v19  ;;  %v4368_v19 = vld [vmem:[#allocation2 + $0x302] sm:$0xff]  ;;  %v4369_v1 = vld [vmem:[#allocation2 + $0x30a] sm:$0xff] }
 0x3c0   :  { %12337 = vmatprep.mubr.bf16.mxu0 %v3370_v52  ;;  %v4326_v52 = vld [vmem:[#allocation2 + $0xda] sm:$0xff] }
 0x3c1   :  { %v4383_v56 = vpack.c.bf16 %v4327_v5, %v4326_v52  ;;  %v4370_v52 = vld [vmem:[#allocation2 + $0x31a] sm:$0xff]  ;;  %v4371_v5 = vld [vmem:[#allocation2 + $0x322] sm:$0xff] }
 0x3c7   :  { %12338 = vmatmul.mubr.bf16.gmra.mrb[44].mxu0 %v3371_v39  ;;  %v4384_v39 = vpack.c.bf16 %v4329_v35, %v4328_v16  ;;  %v4405_v16 = vpack.c.bf16 %v4371_v5, %v4370_v52  ;;  %v4374_v35 = vld [vmem:[#allocation2 + $0x34a] sm:$0xff] }
 0x3c8   :  { %12341 = vmatprep.mubr.bf16.mxu0 %v3372_v55  ;;  %v4330_v55 = vld [vmem:[#allocation2 + $0x10a] sm:$0xff] }
 0x3c9   :  { %v4385_v27 = vpack.c.bf16 %v4331_v12, %v4330_v55 }
 0x3cf   :  { %12342 = vmatmul.mubr.bf16.gmra.mrb[48].mxu0 %v3373_v28  ;;  %v4386_v28 = vpack.c.bf16 %v4333_v14, %v4332_v13 }
 0x3d0   :  { %12345 = vmatprep.mubr.bf16.mxu0 %v3374_v40  ;;  %v4334_v40 = vld [vmem:[#allocation2 + $0x13a] sm:$0xff] }
 0x3d1   :  { %v4387_v21 = vpack.c.bf16 %v4335_v57, %v4334_v40 }
 0x3d7   :  { %12346 = vmatmul.mubr.bf16.gmra.mrb[52].mxu0 %v3375_v24  ;;  %v4388_v24 = vpack.c.bf16 %v4337_v10, %v4336_v62 }
 0x3d8   :  { %12349 = vmatprep.mubr.bf16.mxu0 %v3376_v37  ;;  %v4338_v37 = vld [vmem:[#allocation2 + $0x16a] sm:$0xff] }
 0x3d9   :  { %v4389_v0 = vpack.c.bf16 %v4339_v48, %v4338_v37 }
 0x3df   :  { %12350 = vmatmul.mubr.bf16.gmra.mrb[56].mxu0 %v3377_v17  ;;  %v4342_v17 = vld [vmem:[#allocation2 + $0x19a] sm:$0xff] }
 0x3e0   :  { %12353 = vmatprep.mubr.bf16.mxu0 %v15241_v3  ;;  %v14361_v3 = vld [vmem:[%s18853_s1 + $0x218] sm:$0xff]  }
 0x3e7   :  { %12354 = vmatmul.mubr.bf16.gmra.mrb[60].mxu0 %v3363_v43 }
 0x3e8   :  { %12373 = vmatprep.mubr.bf16.mxu0 %v15244_v25  ;;  %v14362_v25 = vld [vmem:[%s18853_s1 + $0x220] sm:$0xff]  }
 0x3ef   :  { %12374 = vmatmul.mubr.bf16.vlgmr.msra.gmra.mrb[0].mxu0 %v15246_v26  ;;  %v14363_v26 = vld [vmem:[%s18853_s1 + $0x228] sm:$0xff]  }
 0x3f0   :  { %12438 = vmatpush3.bf16.msra.mxu0 %v15446_v53  ;;  %12377 = vmatprep.mubr.bf16.mxu0 %v15256_v58  ;;  %v14364_v58 = vld [vmem:[%s18853_s1 + $0x230] sm:$0xff]   ;;  %v3829_v53 = vld [vmem:[#allocation2 + $0x1a1] sm:$0xff] }
 0x3f1   :  { %12439 = vmatprep.subr.bf16.mxu0 %v14359_v20 }
 0x3f4   :  { %12440 = vmatpush3.bf16.msra.mxu0 %v14359_v20  ;;  %v4343_v20 = vld [vmem:[#allocation2 + $0x1a2] sm:$0xff] }
 0x3f5   :  { %12441 = vmatprep.subr.bf16.mxu0 %v14360_v36 }
 0x3f7   :  { %12378 = vmatmul.mubr.bf16.gmra.mrb[4].mxu0 %v15258_v59  ;;  %v14365_v59 = vld [vmem:[%s18853_s1 + $0x238] sm:$0xff]  }
 0x3f8   :  { %12381 = vmatprep.mubr.bf16.mxu0 %v15268_v51  ;;  %12442 = vmatpush3.bf16.msra.mxu0 %v14360_v36  ;;  %v3826_v51 = vld [vmem:[#allocation2 + $0x181] sm:$0xff] }
 0x3f9   :  { %12443 = vmatprep.subr.bf16.mxu0 %v14361_v3  ;;  %v4344_v36 = vld [vmem:[#allocation2 + $0x1e2] sm:$0xff] }
 0x3fc   :  { %12444 = vmatpush3.bf16.msra.mxu0 %v14361_v3  ;;  %v4345_v3 = vld [vmem:[#allocation2 + $0x1ea] sm:$0xff] }
 0x3fd   :  { %12445 = vmatprep.subr.bf16.mxu0 %v14362_v25 }
 0x3ff   :  { %12382 = vmatmul.mubr.bf16.gmra.mrb[8].mxu0 %v15270_v7  ;;  %v3827_v7 = vld [vmem:[#allocation2 + $0x189] sm:$0xff] }
 0x400   :  { %12385 = vmatprep.mubr.bf16.mxu0 %v15280_v31  ;;  %12446 = vmatpush3.bf16.msra.mxu0 %v14362_v25  ;;  %v3876_v31 = vpack.c.bf16 %v3827_v7, %v3826_v51  ;;  %v4391_v25 = vpack.c.bf16 %v4343_v20, %v4342_v17  ;;  %v4348_v51 = vld [vmem:[#allocation2 + $0x212] sm:$0xff]  ;;  %v4349_v7 = vld [vmem:[#allocation2 + $0x21a] sm:$0xff] }
 0x401   :  { %12447 = vmatprep.subr.bf16.mxu0 %v14363_v26 }
 0x404   :  { %12448 = vmatpush3.bf16.msra.mxu0 %v14363_v26  ;;  %v4392_v26 = vpack.c.bf16 %v4345_v3, %v4344_v36 }
 0x405   :  { %12449 = vmatprep.subr.bf16.mxu0 %v14364_v58 }
 0x407   :  { %12386 = vmatmul.mubr.bf16.gmra.mrb[12].mxu0 %v15282_v38  ;;  %v3828_v38 = vld [vmem:[#allocation2 + $0x199] sm:$0xff] }
 0x408   :  { %12389 = vmatprep.mubr.bf16.mxu0 %v15294_v2  ;;  %12450 = vmatpush3.bf16.msra.mxu0 %v14364_v58  ;;  %v3877_v2 = vpack.c.bf16 %v3829_v53, %v3828_v38  ;;  %v4346_v58 = vld [vmem:[#allocation2 + $0x1fa] sm:$0xff]  ;;  %v4394_v38 = vpack.c.bf16 %v4349_v7, %v4348_v51  ;;  %v4350_v53 = vld [vmem:[#allocation2 + $0x22a] sm:$0xff] }
 0x409   :  { %12451 = vmatprep.subr.bf16.mxu0 %v14365_v59 }
 0x40c   :  { %12452 = vmatpush3.bf16.msra.mxu0 %v14365_v59  ;;  %v4347_v59 = vld [vmem:[#allocation2 + $0x202] sm:$0xff] }
 0x40f   :  { %12390 = vmatmul.mubr.bf16.gmra.mrb[16].mxu0 %v15296_v6  ;;  %v3858_v6 = vld [vmem:[#allocation2 + $0x331] sm:$0xff] }
 0x410   :  { %12393 = vmatprep.mubr.bf16.mxu0 %v15301_v33  ;;  %v3859_v33 = vld [vmem:[#allocation2 + $0x339] sm:$0xff] }
 0x417   :  { %12394 = vmatmul.mubr.bf16.gmra.mrb[20].mxu0 %v15303_v34  ;;  %v3892_v34 = vpack.c.bf16 %v3859_v33, %v3858_v6  ;;  %v4352_v6 = vld [vmem:[#allocation2 + $0x242] sm:$0xff] }
 0x418   :  { %12397 = vmatprep.mubr.bf16.mxu0 %v15307_v4  ;;  %v3860_v4 = vld [vmem:[#allocation2 + $0x349] sm:$0xff] }
 0x41f   :  { %12398 = vmatmul.mubr.bf16.gmra.mrb[24].mxu0 %v15309_v8  ;;  %v3861_v8 = vld [vmem:[#allocation2 + $0x351] sm:$0xff] }
 0x420   :  { %12401 = vmatprep.mubr.bf16.mxu0 %v3876_v31  ;;  %v4393_v31 = vpack.c.bf16 %v4347_v59, %v4346_v58 }
 0x427   :  { %12402 = vmatmul.mubr.bf16.gmra.mrb[28].mxu0 %v3877_v2  ;;  %v4351_v2 = vld [vmem:[#allocation2 + $0x232] sm:$0xff] }
 0x428   :  { %12405 = vmatprep.mubr.bf16.mxu0 %v15316_v23  ;;  %v4312_v23 = vld [vmem:[#allocation2 + $0x32] sm:$0xff]  ;;  %v4395_v33 = vpack.c.bf16 %v4351_v2, %v4350_v53 }
 0x42f   :  { %12406 = vmatmul.mubr.bf16.gmra.mrb[32].mxu0 %v15318_v30  ;;  %v4313_v30 = vld [vmem:[#allocation2 + $0x3a] sm:$0xff] }
 0x430   :  { %12409 = vmatprep.mubr.bf16.mxu0 %v15322_v60  ;;  %v3893_v60 = vpack.c.bf16 %v3861_v8, %v3860_v4  ;;  %v4354_v4 = vld [vmem:[#allocation2 + $0x25a] sm:$0xff]  ;;  %v4355_v8 = vld [vmem:[#allocation2 + $0x262] sm:$0xff] }
 0x437   :  { %12410 = vmatmul.mubr.bf16.gmra.mrb[36].mxu0 %v15324_v11  ;;  %v4376_v11 = vpack.c.bf16 %v4313_v30, %v4312_v23  ;;  %v4356_v23 = vld [vmem:[#allocation2 + $0x272] sm:$0xff]  ;;  %v4357_v30 = vld [vmem:[#allocation2 + $0x27a] sm:$0xff] }
 0x438   :  { %12413 = vmatprep.mubr.bf16.mxu0 %v15328_v42  ;;  %v4314_v42 = vld [vmem:[#allocation2 + $0x4a] sm:$0xff] }
 0x43f   :  { %12414 = vmatmul.mubr.bf16.gmra.mrb[40].mxu0 %v15330_v49  ;;  %v4315_v49 = vld [vmem:[#allocation2 + $0x52] sm:$0xff] }
 0x440   :  { %12417 = vmatprep.mubr.bf16.mxu0 %v15334_v45  ;;  %v4316_v45 = vld [vmem:[#allocation2 + $0x62] sm:$0xff] }
 0x447   :  { %12418 = vmatmul.mubr.bf16.gmra.mrb[44].mxu0 %v15336_v15  ;;  %v4317_v15 = vld [vmem:[#allocation2 + $0x6a] sm:$0xff] }
 0x448   :  { %12421 = vmatprep.mubr.bf16.mxu0 %v15340_v46  ;;  %v4377_v46 = vpack.c.bf16 %v4315_v49, %v4314_v42  ;;  %v4358_v42 = vld [vmem:[#allocation2 + $0x28a] sm:$0xff]  ;;  %v4359_v49 = vld [vmem:[#allocation2 + $0x292] sm:$0xff] }
 0x44f   :  { %12422 = vmatmul.mubr.bf16.gmra.mrb[48].mxu0 %v15342_v47  ;;  %v4378_v47 = vpack.c.bf16 %v4317_v15, %v4316_v45  ;;  %v4360_v45 = vld [vmem:[#allocation2 + $0x2a2] sm:$0xff]  ;;  %v4361_v15 = vld [vmem:[#allocation2 + $0x2aa] sm:$0xff] }
 0x450   :  { %12425 = vmatprep.mubr.bf16.mxu0 %v15346_v41  ;;  %v4318_v41 = vld [vmem:[#allocation2 + $0x7a] sm:$0xff] }
 0x457   :  { %12426 = vmatmul.mubr.bf16.gmra.mrb[52].mxu0 %v15348_v50  ;;  %v4319_v50 = vld [vmem:[#allocation2 + $0x82] sm:$0xff] }
 0x458   :  { %12429 = vmatprep.mubr.bf16.mxu0 %v15352_v63  ;;  %v4320_v63 = vld [vmem:[#allocation2 + $0x92] sm:$0xff]  ;;  %v4379_v43 = vpack.c.bf16 %v4319_v50, %v4318_v41  ;;  %v4362_v41 = vld [vmem:[#allocation2 + $0x2ba] sm:$0xff]  ;;  %v4363_v50 = vld [vmem:[#allocation2 + $0x2c2] sm:$0xff] }
 0x45f   :  { %12430 = vmatmul.mubr.bf16.gmra.mrb[56].mxu0 %v15354_v22  ;;  %v4321_v22 = vld [vmem:[#allocation2 + $0x9a] sm:$0xff] }
 0x460   :  { %12433 = vmatprep.mubr.bf16.mxu0 %v3892_v34  ;;  %v4380_v54 = vpack.c.bf16 %v4321_v22, %v4320_v63  ;;  %v4364_v63 = vld [vmem:[#allocation2 + $0x2d2] sm:$0xff]  ;;  %v4365_v22 = vld [vmem:[#allocation2 + $0x2da] sm:$0xff] }
 0x467   :  { %12434 = vmatmul.mubr.bf16.gmra.mrb[60].mxu0 %v3893_v60  ;;  %v4397_v60 = vpack.c.bf16 %v4355_v8, %v4354_v4 }
 0x468   :  { %12453 = vmatprep.mubr.bf16.mxu0 %v4376_v11  ;;  %v4398_v11 = vpack.c.bf16 %v4357_v30, %v4356_v23 }
 0x46f   :  { %12454 = vmatmul.mubr.bf16.vlgmr.msra.gmra.mrb[0].mxu0 %v4377_v46  ;;  %v4399_v46 = vpack.c.bf16 %v4359_v49, %v4358_v42 }
 0x470   :  { %12457 = vmatprep.mubr.bf16.mxu0 %v4378_v47  ;;  %v4400_v47 = vpack.c.bf16 %v4361_v15, %v4360_v45 }
 0x477   :  { %12458 = vmatmul.mubr.bf16.gmra.mrb[4].mxu0 %v4379_v43  ;;  %v4401_v43 = vpack.c.bf16 %v4363_v50, %v4362_v41 }
 0x478   :  { %12461 = vmatprep.mubr.bf16.mxu0 %v4380_v54  ;;  %v4402_v54 = vpack.c.bf16 %v4365_v22, %v4364_v63 }
 0x47f   :  { %12462 = vmatmul.mubr.bf16.gmra.mrb[8].mxu0 %v4381_v29  ;;  %v4403_v29 = vpack.c.bf16 %v4367_v18, %v4366_v44 }
 0x480   :  { %12465 = vmatprep.mubr.bf16.mxu0 %v4382_v32  ;;  %v4404_v32 = vpack.c.bf16 %v4369_v1, %v4368_v19 }
 0x487   :  { %12466 = vmatmul.mubr.bf16.gmra.mrb[12].mxu0 %v4383_v56  ;;  %v4375_v56 = vld [vmem:[#allocation2 + $0x352] sm:$0xff] }
 0x488   :  { %12469 = vmatprep.mubr.bf16.mxu0 %v4384_v39  ;;  %v4407_v39 = vpack.c.bf16 %v4375_v56, %v4374_v35 }
 0x48f   :  { %12470 = vmatmul.mubr.bf16.gmra.mrb[16].mxu0 %v4385_v27 }
 0x490   :  { %12473 = vmatprep.mubr.bf16.mxu0 %v4386_v28 }
 0x497   :  { %12474 = vmatmul.mubr.bf16.gmra.mrb[20].mxu0 %v4387_v21 }
 0x498   :  { %12477 = vmatprep.mubr.bf16.mxu0 %v4388_v24 }
 0x49f   :  { %12478 = vmatmul.mubr.bf16.gmra.mrb[24].mxu0 %v4389_v0 }
 0x4a0   :  { %12481 = vmatprep.mubr.bf16.mxu0 %v15401_v9  ;;  %v4353_v9 = vld [vmem:[#allocation2 + $0x24a] sm:$0xff] }
 0x4a1   :  { %v4396_v34 = vpack.c.bf16 %v4353_v9, %v4352_v6 }
 0x4a7   :  { %12482 = vmatmul.mubr.bf16.gmra.mrb[28].mxu0 %v4391_v25 }
 0x4a8   :  { %12485 = vmatprep.mubr.bf16.mxu0 %v4392_v26 }
 0x4af   :  { %12486 = vmatmul.mubr.bf16.gmra.mrb[32].mxu0 %v4393_v31 }
 0x4b0   :  { %12489 = vmatprep.mubr.bf16.mxu0 %v4394_v38 }
 0x4b7   :  { %12490 = vmatmul.mubr.bf16.gmra.mrb[36].mxu0 %v4395_v33 }
 0x4b8   :  { %12493 = vmatprep.mubr.bf16.mxu0 %v4396_v34 }
 0x4bf   :  { %12494 = vmatmul.mubr.bf16.gmra.mrb[40].mxu0 %v4397_v60 }
 0x4c0   :  { %12497 = vmatprep.mubr.bf16.mxu0 %v4398_v11 }
 0x4c7   :  { %12498 = vmatmul.mubr.bf16.gmra.mrb[44].mxu0 %v4399_v46 }
 0x4c8   :  { %12501 = vmatprep.mubr.bf16.mxu0 %v4400_v47 }
 0x4cf   :  { %12502 = vmatmul.mubr.bf16.gmra.mrb[48].mxu0 %v4401_v43 }
 0x4d0   :  { %12505 = vmatprep.mubr.bf16.mxu0 %v4402_v54 }
 0x4d7   :  { %12506 = vmatmul.mubr.bf16.gmra.mrb[52].mxu0 %v4403_v29 }
 0x4d8   :  { %12509 = vmatprep.mubr.bf16.mxu0 %v4404_v32 }
 0x4df   :  { %12510 = vmatmul.mubr.bf16.gmra.mrb[56].mxu0 %v4405_v16 }
 0x4e0   :  { %12513 = vmatprep.mubr.bf16.mxu0 %v15419_v61 }
 0x4e7   :  { %12514 = vmatmul.mubr.bf16.gmra.mrb[60].mxu0 %v4407_v39 }
 0x542   :  { %v15503_v55 = vpop.f32.mrb[0].mxu0 }
 0x543   :  { %v15505_v12 = vpop.f32.mrb[1].mxu0 }
 0x544   :  { %v15507_v13 = vpop.f32.mrb[2].mxu0 }
 0x545   :  { %v15509_v14 = vpop.f32.mrb[3].mxu0 }
 0x546   :  { %v4826_v27 = vadd.f32 %v15509_v14, %v15505_v12 }
 0x548   :  { %v4827_v28 = vadd.f32 %v15503_v55, %v4826_v27 }
 0x54a   :  { %v15514_v40 = vpop.f32.mrb[4].mxu0  ;;  %v4828_v61 = vadd.f32 %v15507_v13, %v4827_v28 }
 0x54b   :  { %v15517_v57 = vpop.f32.mrb[5].mxu0 }
 0x54c   :  { %v4829_v62 = vadd.f32 %v4828_v61, %v15517_v57  ;;  %v15520_v10 = vpop.f32.mrb[6].mxu0 }
 0x54d   :  { %v15522_v21 = vpop.f32.mrb[7].mxu0 }
 0x54e   :  { %v4830_v24 = vadd.f32 %v4829_v62, %v15522_v21 }
 0x550   :  { %v4831_v37 = vadd.f32 %v15514_v40, %v4830_v24 }
 0x552   :  { %v15526_v48 = vpop.f32.mrb[8].mxu0  ;;  %v4832_v0 = vadd.f32 %v15520_v10, %v4831_v37 }
 0x553   :  { %v15529_v17 = vpop.f32.mrb[9].mxu0 }
 0x554   :  { %v4833_v20 = vadd.f32 %v4832_v0, %v15529_v17  ;;  %v15532_v36 = vpop.f32.mrb[10].mxu0 }
 0x555   :  { %v15534_v3 = vpop.f32.mrb[11].mxu0 }
 0x556   :  { %v4834_v25 = vadd.f32 %v4833_v20, %v15534_v3 }
 0x558   :  { %v4835_v26 = vadd.f32 %v15526_v48, %v4834_v25 }
 0x55a   :  { %v15538_v58 = vpop.f32.mrb[12].mxu0  ;;  %v4836_v59 = vadd.f32 %v15532_v36, %v4835_v26 }
 0x55b   :  { %v15541_v51 = vpop.f32.mrb[13].mxu0 }
 0x55c   :  { %v4837_v7 = vadd.f32 %v4836_v59, %v15541_v51  ;;  %v15544_v31 = vpop.f32.mrb[14].mxu0 }
 0x55d   :  { %v15546_v38 = vpop.f32.mrb[15].mxu0 }
 0x55e   :  { %v4838_v53 = vadd.f32 %v4837_v7, %v15546_v38 }
 0x560   :  { %v4839_v2 = vadd.f32 %v15538_v58, %v4838_v53 }
 0x562   :  { %v15550_v6 = vpop.f32.mrb[16].mxu0  ;;  %v4840_v9 = vadd.f32 %v15544_v31, %v4839_v2 }
 0x563   :  { %v15553_v33 = vpop.f32.mrb[17].mxu0 }
 0x564   :  { %v4841_v34 = vadd.f32 %v4840_v9, %v15553_v33  ;;  %v15556_v4 = vpop.f32.mrb[18].mxu0 }
 0x565   :  { %v15558_v8 = vpop.f32.mrb[19].mxu0 }
 0x566   :  { %v4842_v23 = vadd.f32 %v4841_v34, %v15558_v8 }
 0x568   :  { %v4843_v30 = vadd.f32 %v15550_v6, %v4842_v23 }
 0x56a   :  { %v15562_v60 = vpop.f32.mrb[20].mxu0  ;;  %v4844_v11 = vadd.f32 %v15556_v4, %v4843_v30 }
 0x56b   :  { %v15565_v42 = vpop.f32.mrb[21].mxu0 }
 0x56c   :  { %v4845_v49 = vadd.f32 %v4844_v11, %v15565_v42  ;;  %v15568_v45 = vpop.f32.mrb[22].mxu0 }
 0x56d   :  { %v15570_v15 = vpop.f32.mrb[23].mxu0 }
 0x56e   :  { %v4846_v46 = vadd.f32 %v4845_v49, %v15570_v15 }
 0x570   :  { %v4847_v47 = vadd.f32 %v15562_v60, %v4846_v46 }
 0x572   :  { %v15574_v41 = vpop.f32.mrb[24].mxu0  ;;  %v4848_v50 = vadd.f32 %v15568_v45, %v4847_v47 }
 0x573   :  { %v15577_v63 = vpop.f32.mrb[25].mxu0 }
 0x574   :  { %v4849_v22 = vadd.f32 %v4848_v50, %v15577_v63  ;;  %v15580_v43 = vpop.f32.mrb[26].mxu0 }
 0x575   :  { %v15582_v54 = vpop.f32.mrb[27].mxu0 }
 0x576   :  { %v4850_v44 = vadd.f32 %v4849_v22, %v15582_v54 }
 0x578   :  { %v4851_v18 = vadd.f32 %v15574_v41, %v4850_v44 }
 0x57a   :  { %v15586_v19 = vpop.f32.mrb[28].mxu0  ;;  %v4852_v1 = vadd.f32 %v15580_v43, %v4851_v18 }
 0x57b   :  { %v15589_v29 = vpop.f32.mrb[29].mxu0 }
 0x57c   :  { %v4853_v32 = vadd.f32 %v4852_v1, %v15589_v29  ;;  %v15592_v52 = vpop.f32.mrb[30].mxu0 }
 0x57d   :  { %v15594_v5 = vpop.f32.mrb[31].mxu0 }
 0x57e   :  { %v4854_v16 = vadd.f32 %v4853_v32, %v15594_v5 }
 0x580   :  { %v4855_v35 = vadd.f32 %v15586_v19, %v4854_v16 }
 0x582   :  { %v15598_v56 = vpop.f32.mrb[32].mxu0  ;;  %v4856_v39 = vadd.f32 %v15592_v52, %v4855_v35 }
 0x583   :  { %v15601_v27 = vpop.f32.mrb[33].mxu0 }
 0x584   :  { %v4857_v28 = vadd.f32 %v4856_v39, %v15601_v27  ;;  %v15604_v61 = vpop.f32.mrb[34].mxu0 }
 0x585   :  { %v15606_v62 = vpop.f32.mrb[35].mxu0 }
 0x586   :  { %v4858_v24 = vadd.f32 %v4857_v28, %v15606_v62 }
 0x588   :  { %v4859_v37 = vadd.f32 %v15598_v56, %v4858_v24 }
 0x58a   :  { %v15610_v0 = vpop.f32.mrb[36].mxu0  ;;  %v4860_v20 = vadd.f32 %v15604_v61, %v4859_v37 }
 0x58b   :  { %v15613_v25 = vpop.f32.mrb[37].mxu0 }
 0x58c   :  { %v4861_v26 = vadd.f32 %v4860_v20, %v15613_v25  ;;  %v15616_v59 = vpop.f32.mrb[38].mxu0 }
 0x58d   :  { %v15618_v7 = vpop.f32.mrb[39].mxu0 }
 0x58e   :  { %v4862_v53 = vadd.f32 %v4861_v26, %v15618_v7 }
 0x590   :  { %v4863_v2 = vadd.f32 %v15610_v0, %v4862_v53 }
 0x592   :  { %v15622_v9 = vpop.f32.mrb[40].mxu0  ;;  %v4864_v34 = vadd.f32 %v15616_v59, %v4863_v2 }
 0x593   :  { %v15625_v23 = vpop.f32.mrb[41].mxu0 }
 0x594   :  { %v4865_v30 = vadd.f32 %v4864_v34, %v15625_v23  ;;  %v15628_v11 = vpop.f32.mrb[42].mxu0 }
 0x595   :  { %v15630_v49 = vpop.f32.mrb[43].mxu0 }
 0x596   :  { %v4866_v46 = vadd.f32 %v4865_v30, %v15630_v49 }
 0x598   :  { %v4867_v47 = vadd.f32 %v15622_v9, %v4866_v46 }
 0x59a   :  { %v15634_v50 = vpop.f32.mrb[44].mxu0  ;;  %v4868_v22 = vadd.f32 %v15628_v11, %v4867_v47 }
 0x59b   :  { %v15637_v44 = vpop.f32.mrb[45].mxu0 }
 0x59c   :  { %v4869_v18 = vadd.f32 %v4868_v22, %v15637_v44  ;;  %v15640_v1 = vpop.f32.mrb[46].mxu0 }
 0x59d   :  { %v15642_v32 = vpop.f32.mrb[47].mxu0 }
 0x59e   :  { %v4870_v16 = vadd.f32 %v4869_v18, %v15642_v32 }
 0x5a0   :  { %v4871_v35 = vadd.f32 %v15634_v50, %v4870_v16 }
 0x5a2   :  { %v15646_v39 = vpop.f32.mrb[48].mxu0  ;;  %v4872_v28 = vadd.f32 %v15640_v1, %v4871_v35 }
 0x5a3   :  { %18982 = vst [vmem:[#allocation4_spill] sm:$0xff] %v15646_v39  ;;  %v15649_v24 = vpop.f32.mrb[49].mxu0 }
 0x5a4   :  { %18983 = vst [vmem:[#allocation5_spill] sm:$0xff] %v15649_v24  ;;  %v4873_v37 = vadd.f32 %v4872_v28, %v15649_v24  ;;  %v15652_v20 = vpop.f32.mrb[50].mxu0 }
 0x5a5   :  { %18984 = vst [vmem:[#allocation6_spill] sm:$0xff] %v15652_v20  ;;  %v15654_v26 = vpop.f32.mrb[51].mxu0 }
 0x5a6   :  { %18985 = vst [vmem:[#allocation7_spill] sm:$0xff] %v15654_v26  ;;  %v4874_v53 = vadd.f32 %v4873_v37, %v15654_v26 }
 0x5a8   :  { %v4875_v2 = vadd.f32 %v15646_v39, %v4874_v53 }
 0x5aa   :  { %v15658_v34 = vpop.f32.mrb[52].mxu0  ;;  %v4876_v30 = vadd.f32 %v15652_v20, %v4875_v2 }
 0x5ab   :  { %18986 = vst [vmem:[#allocation8_spill] sm:$0xff] %v15658_v34  ;;  %v15661_v46 = vpop.f32.mrb[53].mxu0 }
 0x5ac   :  { %18987 = vst [vmem:[#allocation9_spill] sm:$0xff] %v15661_v46  ;;  %v4877_v47 = vadd.f32 %v4876_v30, %v15661_v46  ;;  %v15664_v22 = vpop.f32.mrb[54].mxu0 }
 0x5ad   :  { %18988 = vst [vmem:[#allocation10_spill] sm:$0xff] %v15664_v22  ;;  %v15666_v18 = vpop.f32.mrb[55].mxu0 }
 0x5ae   :  { %18989 = vst [vmem:[#allocation11_spill] sm:$0xff] %v15666_v18  ;;  %v4878_v16 = vadd.f32 %v4877_v47, %v15666_v18 }
 0x5b0   :  { %v4879_v35 = vadd.f32 %v15658_v34, %v4878_v16 }
 0x5b2   :  { %v15670_v28 = vpop.f32.mrb[56].mxu0  ;;  %v4880_v37 = vadd.f32 %v15664_v22, %v4879_v35 }
 0x5b3   :  { %18990 = vst [vmem:[#allocation12_spill] sm:$0xff] %v15670_v28  ;;  %v15673_v53 = vpop.f32.mrb[57].mxu0 }
 0x5b4   :  { %18991 = vst [vmem:[#allocation13_spill] sm:$0xff] %v15673_v53  ;;  %v4881_v2 = vadd.f32 %v4880_v37, %v15673_v53  ;;  %v15676_v20 = vpop.f32.mrb[58].mxu0 }
 0x5b5   :  { %18992 = vst [vmem:[#allocation14_spill] sm:$0xff] %v15676_v20  ;;  %v15678_v39 = vpop.f32.mrb[59].mxu0 }
 0x5b6   :  { %18993 = vst [vmem:[#allocation15_spill] sm:$0xff] %v15678_v39  ;;  %v4882_v30 = vadd.f32 %v4881_v2, %v15678_v39 }
 0x5b8   :  { %v4883_v46 = vadd.f32 %v15670_v28, %v4882_v30 }
 0x5ba   :  { %v15682_v26 = vpop.f32.mrb[60].mxu0  ;;  %v4884_v47 = vadd.f32 %v15676_v20, %v4883_v46 }
 0x5bb   :  { %v15685_v16 = vpop.f32.mrb[61].mxu0 }
 0x5bc   :  { %18994 = vst [vmem:[#allocation16_spill] sm:$0xff] %v15685_v16  ;;  %v4885_v35 = vadd.f32 %v4884_v47, %v15685_v16  ;;  %v15688_v22 = vpop.f32.mrb[62].mxu0 }
 0x5bd   :  { %v15690_v34 = vpop.f32.mrb[63].mxu0 }
 0x5be   :  { %v4886_v37 = vadd.f32 %v4885_v35, %v15690_v34 }
 0x5c0   :  { %v4887_v53 = vadd.f32 %v15682_v26, %v4886_v37  ;;  %v19008_v37 = vld [vmem:[#allocation6_spill] sm:$0xff] }
 0x5c2   :  { %v4888_v2 = vadd.f32 %v15688_v22, %v4887_v53  ;;  %v19006_v53 = vld [vmem:[#allocation4_spill] sm:$0xff] }
 0x5c4   :  { %v4889_v39 = vrot.slane %v4888_v2, 4 }
 0x5c6   :  { %v4890_v30 = vadd.f32 %v4889_v39, %v4888_v2  ;;  %v19010_v2 = vld [vmem:[#allocation9_spill] sm:$0xff] }
 0x5c8   :  { %v4891_v28 = vrot.slane %v4890_v30, 2 }
 0x5ca   :  { %v4892_v18 = vadd.f32 %v4891_v28, %v4890_v30  ;;  %v19004_v28 = vld [vmem:[#allocation7_spill] sm:$0xff] }
 0x5cb   :  { %v19012_v30 = vld [vmem:[#allocation11_spill] sm:$0xff] }
 0x5cc   :  { %v4893_v24 = vrot.slane %v4892_v18, 1 }
 0x5ce   :  { %v4894_v46 = vadd.f32 %v4893_v24, %v4892_v18  ;;  %v19002_v18 = vld [vmem:[#allocation5_spill] sm:$0xff] }
 0x5d0   :  { %v15695_v20 = vmul.f32 0.001953125, %v4894_v46 }
 0x5d2   :  { %v15699_v47 = vsub.f32 %v15505_v12, %v15695_v20  ;;  %v15703_v16 = vsub.f32 %v15509_v14, %v15695_v20  ;;  %v15707_v35 = vsub.f32 %v15503_v55, %v15695_v20  ;;  %v15711_v39 = vsub.f32 %v15507_v13, %v15695_v20 }
 0x5d3   :  { %v15715_v24 = vsub.f32 %v15517_v57, %v15695_v20  ;;  %v15719_v12 = vsub.f32 %v15522_v21, %v15695_v20  ;;  %v15723_v14 = vsub.f32 %v15514_v40, %v15695_v20  ;;  %v15727_v55 = vsub.f32 %v15520_v10, %v15695_v20 }
 0x5d4   :  { %18995 = vst [vmem:[#allocation17_spill] sm:$0xff] %v15699_v47  ;;  %18996 = vst [vmem:[#allocation18_spill] sm:$0xff] %v15703_v16  ;;  %v15731_v13 = vsub.f32 %v15529_v17, %v15695_v20  ;;  %v15735_v57 = vsub.f32 %v15534_v3, %v15695_v20  ;;  %v15739_v21 = vsub.f32 %v15526_v48, %v15695_v20 }
 0x5d5   :  { %18997 = vst [vmem:[#allocation19_spill] sm:$0xff] %v15707_v35  ;;  %v15743_v40 = vsub.f32 %v15532_v36, %v15695_v20  ;;  %v15747_v10 = vsub.f32 %v15541_v51, %v15695_v20  ;;  %v15751_v17 = vsub.f32 %v15546_v38, %v15695_v20  ;;  %v15755_v3 = vsub.f32 %v15538_v58, %v15695_v20 }
 0x5d6   :  { %v15759_v48 = vsub.f32 %v15544_v31, %v15695_v20  ;;  %v15763_v36 = vsub.f32 %v15553_v33, %v15695_v20  ;;  %v15767_v51 = vsub.f32 %v15558_v8, %v15695_v20  ;;  %v15771_v38 = vsub.f32 %v15550_v6, %v15695_v20 }
 0x5d7   :  { %v15775_v58 = vsub.f32 %v15556_v4, %v15695_v20  ;;  %v15779_v31 = vsub.f32 %v15565_v42, %v15695_v20  ;;  %v15783_v33 = vsub.f32 %v15570_v15, %v15695_v20  ;;  %v15787_v8 = vsub.f32 %v15562_v60, %v15695_v20 }
 0x5d8   :  { %v15791_v6 = vsub.f32 %v15568_v45, %v15695_v20  ;;  %v15795_v4 = vsub.f32 %v15577_v63, %v15695_v20  ;;  %v15799_v42 = vsub.f32 %v15582_v54, %v15695_v20  ;;  %v15803_v15 = vsub.f32 %v15574_v41, %v15695_v20 }
 0x5d9   :  { %v15807_v60 = vsub.f32 %v15580_v43, %v15695_v20  ;;  %v15811_v45 = vsub.f32 %v15589_v29, %v15695_v20  ;;  %v15815_v63 = vsub.f32 %v15594_v5, %v15695_v20  ;;  %v15819_v54 = vsub.f32 %v15586_v19, %v15695_v20 }
 0x5da   :  { %v15823_v41 = vsub.f32 %v15592_v52, %v15695_v20  ;;  %v15827_v43 = vsub.f32 %v15601_v27, %v15695_v20  ;;  %v15831_v29 = vsub.f32 %v15606_v62, %v15695_v20  ;;  %v15835_v5 = vsub.f32 %v15598_v56, %v15695_v20 }
 0x5db   :  { %v15839_v19 = vsub.f32 %v15604_v61, %v15695_v20  ;;  %v15843_v52 = vsub.f32 %v15613_v25, %v15695_v20  ;;  %v15847_v27 = vsub.f32 %v15618_v7, %v15695_v20  ;;  %v15851_v62 = vsub.f32 %v15610_v0, %v15695_v20 }
 0x5dc   :  { %v15855_v56 = vsub.f32 %v15616_v59, %v15695_v20  ;;  %v15859_v61 = vsub.f32 %v15625_v23, %v15695_v20  ;;  %v15863_v25 = vsub.f32 %v15630_v49, %v15695_v20  ;;  %v15867_v7 = vsub.f32 %v15622_v9, %v15695_v20 }
 0x5dd   :  { %v15871_v0 = vsub.f32 %v15628_v11, %v15695_v20  ;;  %v15875_v59 = vsub.f32 %v15637_v44, %v15695_v20  ;;  %v15879_v23 = vsub.f32 %v15642_v32, %v15695_v20  ;;  %v15883_v49 = vsub.f32 %v15634_v50, %v15695_v20 }
 0x5de   :  { %v15887_v9 = vsub.f32 %v15640_v1, %v15695_v20  ;;  %v15891_v11 = vsub.f32 %v19002_v18, %v15695_v20  ;;  %v15895_v44 = vsub.f32 %v19004_v28, %v15695_v20  ;;  %v15899_v32 = vsub.f32 %v19006_v53, %v15695_v20  ;;  %v19014_v18 = vld [vmem:[#allocation8_spill] sm:$0xff] }
 0x5df   :  { %18998 = vst [vmem:[#allocation20_spill] sm:$0xff] %v15875_v59  ;;  %18999 = vst [vmem:[#allocation21_spill] sm:$0xff] %v15879_v23  ;;  %v15903_v50 = vsub.f32 %v19008_v37, %v15695_v20  ;;  %v15907_v1 = vsub.f32 %v19010_v2, %v15695_v20  ;;  %v15911_v46 = vsub.f32 %v19012_v30, %v15695_v20 }
 0x5e0   :  { %19000 = vst [vmem:[#allocation22_spill] sm:$0xff] %v15883_v49  ;;  %19001 = vst [vmem:[#allocation23_spill] sm:$0xff] %v15887_v9  ;;  %v15915_v28 = vsub.f32 %v19014_v18, %v15695_v20 }
 0x5e1   :  { %19003 = vst [vmem:[#allocation5_spill] sm:$0xff] %v15891_v11  ;;  %19005 = vst [vmem:[#allocation7_spill] sm:$0xff] %v15895_v44  ;;  %v19016_v44 = vld [vmem:[#allocation10_spill] sm:$0xff] }
 0x5e2   :  { %19007 = vst [vmem:[#allocation4_spill] sm:$0xff] %v15899_v32  ;;  %19009 = vst [vmem:[#allocation6_spill] sm:$0xff] %v15903_v50  ;;  %v15919_v53 = vsub.f32 %v19016_v44, %v15695_v20  ;;  %v19018_v32 = vld [vmem:[#allocation13_spill] sm:$0xff]  ;;  %v19020_v50 = vld [vmem:[#allocation15_spill] sm:$0xff] }
 0x5e3   :  { %19011 = vst [vmem:[#allocation9_spill] sm:$0xff] %v15907_v1  ;;  %19013 = vst [vmem:[#allocation11_spill] sm:$0xff] %v15911_v46  ;;  %v15923_v37 = vsub.f32 %v19018_v32, %v15695_v20  ;;  %v15927_v2 = vsub.f32 %v19020_v50, %v15695_v20  ;;  %v19022_v1 = vld [vmem:[#allocation12_spill] sm:$0xff]  ;;  %v19024_v46 = vld [vmem:[#allocation14_spill] sm:$0xff]  ;;  %v15943_v32 = vsub.f32 %v15690_v34, %v15695_v20 }
 0x5e4   :  { %19015 = vst [vmem:[#allocation8_spill] sm:$0xff] %v15915_v28  ;;  %19017 = vst [vmem:[#allocation10_spill] sm:$0xff] %v15919_v53  ;;  %v15931_v30 = vsub.f32 %v19022_v1, %v15695_v20  ;;  %v15935_v18 = vsub.f32 %v19024_v46, %v15695_v20  ;;  %v19026_v28 = vld [vmem:[#allocation16_spill] sm:$0xff]  ;;  %v15947_v50 = vsub.f32 %v15682_v26, %v15695_v20 }
 0x5e5   :  { %19019 = vst [vmem:[#allocation13_spill] sm:$0xff] %v15923_v37  ;;  %19021 = vst [vmem:[#allocation15_spill] sm:$0xff] %v15927_v2  ;;  %v15939_v44 = vsub.f32 %v19026_v28, %v15695_v20  ;;  %v15951_v1 = vsub.f32 %v15688_v22, %v15695_v20  ;;  %v4961_v46 = vmul.f32 %v15699_v47, %v15699_v47 }
 0x5e6   :  { %19023 = vst [vmem:[#allocation12_spill] sm:$0xff] %v15931_v30  ;;  %19025 = vst [vmem:[#allocation14_spill] sm:$0xff] %v15935_v18  ;;  %v4962_v18 = vmul.f32 %v15703_v16, %v15703_v16  ;;  %v4963_v28 = vmul.f32 %v15707_v35, %v15707_v35  ;;  %v4964_v34 = vmul.f32 %v15711_v39, %v15711_v39 }
 0x5e7   :  { %19027 = vst [vmem:[#allocation16_spill] sm:$0xff] %v15939_v44  ;;  %19028 = vst [vmem:[#allocation24_spill] sm:$0xff] %v15943_v32  ;;  %v4965_v26 = vmul.f32 %v15715_v24, %v15715_v24  ;;  %v4966_v20 = vmul.f32 %v15719_v12, %v15719_v12  ;;  %v4967_v47 = vmul.f32 %v15723_v14, %v15723_v14 }
 0x5e8   :  { %19029 = vst [vmem:[#allocation25_spill] sm:$0xff] %v15947_v50  ;;  %v5025_v44 = vadd.f32 %v4962_v18, %v4961_v46  ;;  %v4968_v35 = vmul.f32 %v15727_v55, %v15727_v55  ;;  %v4969_v46 = vmul.f32 %v15731_v13, %v15731_v13 }
 0x5ea   :  { %v5026_v32 = vadd.f32 %v5025_v44, %v4963_v28  ;;  %v4970_v28 = vmul.f32 %v15735_v57, %v15735_v57 }
 0x5ec   :  { %v5027_v50 = vadd.f32 %v5026_v32, %v4964_v34  ;;  %v4971_v34 = vmul.f32 %v15739_v21, %v15739_v21 }
 0x5ee   :  { %v5028_v22 = vadd.f32 %v5027_v50, %v4965_v26  ;;  %v4972_v26 = vmul.f32 %v15743_v40, %v15743_v40 }
 0x5f0   :  { %v5029_v16 = vadd.f32 %v5028_v22, %v4966_v20  ;;  %v4973_v22 = vmul.f32 %v15747_v10, %v15747_v10 }
 0x5f2   :  { %v5030_v18 = vadd.f32 %v5029_v16, %v4967_v47  ;;  %v4974_v47 = vmul.f32 %v15751_v17, %v15751_v17 }
 0x5f4   :  { %v5031_v44 = vadd.f32 %v5030_v18, %v4968_v35  ;;  %v4975_v18 = vmul.f32 %v15755_v3, %v15755_v3 }
 0x5f6   :  { %v5032_v32 = vadd.f32 %v5031_v44, %v4969_v46  ;;  %v4976_v44 = vmul.f32 %v15759_v48, %v15759_v48 }
 0x5f8   :  { %v5033_v50 = vadd.f32 %v5032_v32, %v4970_v28  ;;  %v4977_v32 = vmul.f32 %v15763_v36, %v15763_v36 }
 0x5fa   :  { %v5034_v20 = vadd.f32 %v5033_v50, %v4971_v34  ;;  %v4978_v50 = vmul.f32 %v15767_v51, %v15767_v51 }
 0x5fc   :  { %v5035_v16 = vadd.f32 %v5034_v20, %v4972_v26  ;;  %v4979_v20 = vmul.f32 %v15771_v38, %v15771_v38 }
 0x5fe   :  { %v5036_v35 = vadd.f32 %v5035_v16, %v4973_v22  ;;  %v4980_v16 = vmul.f32 %v15775_v58, %v15775_v58 }
 0x600   :  { %v5037_v46 = vadd.f32 %v5036_v35, %v4974_v47  ;;  %v4981_v35 = vmul.f32 %v15779_v31, %v15779_v31 }
 0x602   :  { %v5038_v28 = vadd.f32 %v5037_v46, %v4975_v18  ;;  %v4982_v46 = vmul.f32 %v15783_v33, %v15783_v33 }
 0x604   :  { %v5039_v34 = vadd.f32 %v5038_v28, %v4976_v44  ;;  %v4983_v28 = vmul.f32 %v15787_v8, %v15787_v8 }
 0x606   :  { %v5040_v26 = vadd.f32 %v5039_v34, %v4977_v32  ;;  %v4984_v34 = vmul.f32 %v15791_v6, %v15791_v6 }
 0x608   :  { %v5041_v22 = vadd.f32 %v5040_v26, %v4978_v50  ;;  %v4985_v26 = vmul.f32 %v15795_v4, %v15795_v4 }
 0x60a   :  { %v5042_v47 = vadd.f32 %v5041_v22, %v4979_v20  ;;  %v4986_v22 = vmul.f32 %v15799_v42, %v15799_v42 }
 0x60c   :  { %v5043_v18 = vadd.f32 %v5042_v47, %v4980_v16  ;;  %v14366_v47 = vld [vmem:[%s18855_s4 + $0x40] sm:$0xff]  }
 0x60d   :  { %12517 = vmatprep.subr.bf16.mxu1 %v14366_v47 }
 0x60e   :  { %v5044_v44 = vadd.f32 %v5043_v18, %v4981_v35  ;;  %v4987_v35 = vmul.f32 %v15803_v15, %v15803_v15  ;;  %12518 = vmatpush3.bf16.msra.mxu1 %v14366_v47  ;;  %v4992_v47 = vmul.f32 %v15823_v41, %v15823_v41 }
 0x610   :  { %v5045_v32 = vadd.f32 %v5044_v44, %v4982_v46  ;;  %v4988_v46 = vmul.f32 %v15807_v60, %v15807_v60 }
 0x612   :  { %v5046_v50 = vadd.f32 %v5045_v32, %v4983_v28  ;;  %v14367_v28 = vld [vmem:[%s18855_s4 + $0x48] sm:$0xff]   ;;  %v4989_v32 = vmul.f32 %v15811_v45, %v15811_v45 }
 0x613   :  { %12519 = vmatprep.subr.bf16.mxu1 %v14367_v28 }
 0x614   :  { %v5047_v20 = vadd.f32 %v5046_v50, %v4984_v34  ;;  %12520 = vmatpush3.bf16.msra.mxu1 %v14367_v28  ;;  %v4990_v50 = vmul.f32 %v15815_v63, %v15815_v63  ;;  %v4994_v28 = vmul.f32 %v15831_v29, %v15831_v29 }
 0x616   :  { %v5048_v16 = vadd.f32 %v5047_v20, %v4985_v26  ;;  %v14368_v20 = vld [vmem:[%s18855_s4 + $0x50] sm:$0xff]  }
 0x617   :  { %12521 = vmatprep.subr.bf16.mxu1 %v14368_v20 }
 0x618   :  { %v5049_v18 = vadd.f32 %v5048_v16, %v4986_v22  ;;  %v4991_v22 = vmul.f32 %v15819_v54, %v15819_v54  ;;  %12522 = vmatpush3.bf16.msra.mxu1 %v14368_v20  ;;  %v4996_v20 = vmul.f32 %v15839_v19, %v15839_v19 }
 0x61a   :  { %v5050_v44 = vadd.f32 %v5049_v18, %v4987_v35  ;;  %v14369_v18 = vld [vmem:[%s18855_s4 + $0x58] sm:$0xff]  }
 0x61b   :  { %12523 = vmatprep.subr.bf16.mxu1 %v14369_v18 }
 0x61c   :  { %v5051_v34 = vadd.f32 %v5050_v44, %v4988_v46  ;;  %v4993_v46 = vmul.f32 %v15827_v43, %v15827_v43  ;;  %12524 = vmatpush3.bf16.msra.mxu1 %v14369_v18  ;;  %v4998_v18 = vmul.f32 %v15847_v27, %v15847_v27 }
 0x61e   :  { %v5052_v26 = vadd.f32 %v5051_v34, %v4989_v32  ;;  %v14370_v34 = vld [vmem:[%s18855_s4 + $0x60] sm:$0xff]  }
 0x61f   :  { %12525 = vmatprep.subr.bf16.mxu1 %v14370_v34 }
 0x620   :  { %v5053_v16 = vadd.f32 %v5052_v26, %v4990_v50  ;;  %v4995_v50 = vmul.f32 %v15835_v5, %v15835_v5  ;;  %12526 = vmatpush3.bf16.msra.mxu1 %v14370_v34  ;;  %v5000_v34 = vmul.f32 %v15855_v56, %v15855_v56 }
 0x622   :  { %v5054_v35 = vadd.f32 %v5053_v16, %v4991_v22  ;;  %v14371_v16 = vld [vmem:[%s18855_s4 + $0x68] sm:$0xff]  }
 0x623   :  { %12527 = vmatprep.subr.bf16.mxu1 %v14371_v16 }
 0x624   :  { %v5055_v44 = vadd.f32 %v5054_v35, %v4992_v47  ;;  %v4997_v47 = vmul.f32 %v15843_v52, %v15843_v52  ;;  %12528 = vmatpush3.bf16.msra.mxu1 %v14371_v16  ;;  %v5587_v16 = vld [vmem:[#allocation3 + $0x1] sm:$0xff] }
 0x626   :  { %v5056_v32 = vadd.f32 %v5055_v44, %v4993_v46  ;;  %v14372_v44 = vld [vmem:[%s18855_s4 + $0x70] sm:$0xff]  }
 0x627   :  { %12529 = vmatprep.subr.bf16.mxu1 %v14372_v44 }
 0x628   :  { %v5057_v26 = vadd.f32 %v5056_v32, %v4994_v28  ;;  %v4999_v28 = vmul.f32 %v15851_v62, %v15851_v62  ;;  %12530 = vmatpush3.bf16.msra.mxu1 %v14372_v44  ;;  %v16064_v44 = vld [vmem:[%s18855_s4] sm:$0xff]  }
 0x629   :  { %19030 = vst [vmem:[#allocation26_spill] sm:$0xff] %v16064_v44 }
 0x62a   :  { %v5058_v22 = vadd.f32 %v5057_v26, %v4995_v50  ;;  %v14373_v26 = vld [vmem:[%s18855_s4 + $0x78] sm:$0xff]  }
 0x62b   :  { %12531 = vmatprep.subr.bf16.mxu1 %v14373_v26 }
 0x62c   :  { %v5059_v35 = vadd.f32 %v5058_v22, %v4996_v20  ;;  %v5001_v20 = vmul.f32 %v15859_v61, %v15859_v61  ;;  %12532 = vmatpush3.bf16.msra.mxu1 %v14373_v26  ;;  %v5005_v26 = vmul.f32 %v15875_v59, %v15875_v59 }
 0x62d   :  { %12597 = vmatprep.subr.bf16.mxu1 %v16064_v44  ;;  %v5009_v44 = vmul.f32 %v15891_v11, %v15891_v11 }
 0x62e   :  { %v5060_v46 = vadd.f32 %v5059_v35, %v4997_v47  ;;  %v5588_v47 = vld [vmem:[#allocation3 + $0x9] sm:$0xff] }
 0x62f   :  { %v5651_v35 = vpack.c.bf16 %v5588_v47, %v5587_v16  ;;  %v5007_v47 = vmul.f32 %v15883_v49, %v15883_v49 }
 0x630   :  { %v5061_v32 = vadd.f32 %v5060_v46, %v4998_v18  ;;  %v5002_v18 = vmul.f32 %v15863_v25, %v15863_v25 }
 0x631   :  { %12533 = vmatprep.mubr.bf16.mxu1 %v5651_v35 }
 0x632   :  { %v5062_v50 = vadd.f32 %v5061_v32, %v4999_v28  ;;  %v5003_v28 = vmul.f32 %v15867_v7, %v15867_v7 }
 0x634   :  { %v5063_v22 = vadd.f32 %v5062_v50, %v5000_v34  ;;  %v5004_v34 = vmul.f32 %v15871_v0, %v15871_v0 }
 0x636   :  { %v5064_v46 = vadd.f32 %v5063_v22, %v5001_v20  ;;  %v5006_v22 = vmul.f32 %v15879_v23, %v15879_v23 }
 0x638   :  { %v5065_v32 = vadd.f32 %v5064_v46, %v5002_v18  ;;  %v5008_v18 = vmul.f32 %v15887_v9, %v15887_v9 }
 0x63a   :  { %v5066_v50 = vadd.f32 %v5065_v32, %v5003_v28  ;;  %v19031_v32 = vld [vmem:[#allocation7_spill] sm:$0xff] }
 0x63b   :  { %v5010_v59 = vmul.f32 %v19031_v32, %v19031_v32 }
 0x63c   :  { %v5067_v20 = vadd.f32 %v5066_v50, %v5004_v34  ;;  %v19032_v50 = vld [vmem:[#allocation4_spill] sm:$0xff] }
 0x63d   :  { %v5011_v23 = vmul.f32 %v19032_v50, %v19032_v50 }
 0x63e   :  { %v5068_v16 = vadd.f32 %v5067_v20, %v5005_v26  ;;  %v19033_v20 = vld [vmem:[#allocation6_spill] sm:$0xff] }
 0x63f   :  { %v5012_v49 = vmul.f32 %v19033_v20, %v19033_v20 }
 0x640   :  { %v5069_v35 = vadd.f32 %v5068_v16, %v5006_v22  ;;  %v19034_v16 = vld [vmem:[#allocation9_spill] sm:$0xff] }
 0x641   :  { %v5013_v9 = vmul.f32 %v19034_v16, %v19034_v16  ;;  %v5099_v16 = vlaneseq }
 0x642   :  { %v5070_v46 = vadd.f32 %v5069_v35, %v5007_v47  ;;  %v19035_v35 = vld [vmem:[#allocation11_spill] sm:$0xff] }
 0x643   :  { %v5014_v11 = vmul.f32 %v19035_v35, %v19035_v35 }
 0x644   :  { %v5071_v28 = vadd.f32 %v5070_v46, %v5008_v18  ;;  %v19036_v46 = vld [vmem:[#allocation8_spill] sm:$0xff] }
 0x645   :  { %v5015_v32 = vmul.f32 %v19036_v46, %v19036_v46 }
 0x646   :  { %v5072_v34 = vadd.f32 %v5071_v28, %v5009_v44  ;;  %v5016_v28 = vmul.f32 %v15919_v53, %v15919_v53 }
 0x648   :  { %v5073_v26 = vadd.f32 %v5072_v34, %v5010_v59  ;;  %v5017_v34 = vmul.f32 %v15923_v37, %v15923_v37 }
 0x64a   :  { %v5074_v22 = vadd.f32 %v5073_v26, %v5011_v23  ;;  %v5018_v26 = vmul.f32 %v15927_v2, %v15927_v2 }
 0x64c   :  { %v5075_v47 = vadd.f32 %v5074_v22, %v5012_v49  ;;  %v5019_v22 = vmul.f32 %v15931_v30, %v15931_v30 }
 0x64e   :  { %v5076_v18 = vadd.f32 %v5075_v47, %v5013_v9  ;;  %v19037_v47 = vld [vmem:[#allocation14_spill] sm:$0xff] }
 0x64f   :  { %v5020_v46 = vmul.f32 %v19037_v47, %v19037_v47 }
 0x650   :  { %v5077_v44 = vadd.f32 %v5076_v18, %v5014_v11  ;;  %v19038_v18 = vld [vmem:[#allocation16_spill] sm:$0xff] }
 0x651   :  { %v5021_v53 = vmul.f32 %v19038_v18, %v19038_v18 }
 0x652   :  { %v5078_v59 = vadd.f32 %v5077_v44, %v5015_v32  ;;  %v19039_v44 = vld [vmem:[#allocation24_spill] sm:$0xff] }
 0x653   :  { %v5022_v37 = vmul.f32 %v19039_v44, %v19039_v44 }
 0x654   :  { %v5079_v23 = vadd.f32 %v5078_v59, %v5016_v28  ;;  %v19040_v59 = vld [vmem:[#allocation25_spill] sm:$0xff] }
 0x655   :  { %v5023_v2 = vmul.f32 %v19040_v59, %v19040_v59 }
 0x656   :  { %v5080_v49 = vadd.f32 %v5079_v23, %v5017_v34  ;;  %v5024_v23 = vmul.f32 %v15951_v1, %v15951_v1 }
 0x658   :  { %v5081_v9 = vadd.f32 %v5080_v49, %v5018_v26 }
 0x65a   :  { %v5082_v11 = vadd.f32 %v5081_v9, %v5019_v22 }
 0x65c   :  { %v5083_v32 = vadd.f32 %v5082_v11, %v5020_v46 }
 0x65e   :  { %v5084_v28 = vadd.f32 %v5083_v32, %v5021_v53  ;;  %v16111_v53 = vshrl.u32 %v5099_v16, 7 }
 0x660   :  { %v5085_v34 = vadd.f32 %v5084_v28, %v5022_v37  ;;  %19041 = vst [vmem:[#allocation4_spill] sm:$0xff] %v16111_v53  ;;  %v5097_v37 = vld [vmem:[%s18856_s2] sm:$0x1]  ;;  %v18903_v32 = vsub.s32 0, %v16111_v53  ;;  %v19057_v53 = vld [vmem:[#allocation11_spill] sm:$0xff] }
 0x662   :  { %v5086_v26 = vadd.f32 %v5085_v34, %v5023_v2  ;;  %v19043_v34 = vld [vmem:[#allocation18_spill] sm:$0xff] }
 0x664   :  { %v5087_v49 = vadd.f32 %v5086_v26, %v5024_v23  ;;  %v19044_v26 = vld [vmem:[#allocation19_spill] sm:$0xff] }
 0x666   :  { %v5088_v30 = vrot.slane %v5087_v49, 4 }
 0x668   :  { %v5089_v47 = vadd.f32 %v5088_v30, %v5087_v49 }
 0x66a   :  { %v5090_v22 = vrot.slane %v5089_v47, 2 }
 0x66c   :  { %v5091_v9 = vadd.f32 %v5090_v22, %v5089_v47  ;;  %v19042_v47 = vld [vmem:[#allocation17_spill] sm:$0xff] }
 0x66e   :  { %v5092_v35 = vrot.slane %v5091_v9, 1 }
 0x670   :  { %v5093_v18 = vadd.f32 %v5092_v35, %v5091_v9  ;;  %v16124_v35 = vld [vmem:[%s18857_s3] ss:$0 sm:$0xff] }
 0x672   :  { %v5094_v46 = vmul.f32 0.001953125, %v5093_v18 }
 0x674   :  { %v5095_v11 = vadd.f32 1e-05, %v5094_v46 }
 0x676   :  { %14438 = vrsqrt.f32 %v5095_v11 }
 0x680   :  { %v14439_v2 = vpop.eup %14438 }
 0x681   :  { %v5098_v28 = vmul.f32 %v14439_v2, %v5097_v37 }
 0x683   :  { %v16119_v30 = vrot.slane %v5098_v28, %v18903_v32  ;;  %v19046_v28 = vld [vmem:[#allocation20_spill] sm:$0xff]  ;;  %v19051_v32 = vld [vmem:[#allocation7_spill] sm:$0xff] }
 0x685   :  { %v5164_v16 = vmul.f32 %v16119_v30, %v19039_v44  ;;  %v16130_v18 = vmul.f32 %v16119_v30, %v19042_v47  ;;  %v16134_v23 = vmul.f32 %v16119_v30, %v19043_v34  ;;  %v16138_v49 = vmul.f32 %v16119_v30, %v19044_v26  ;;  %v19048_v47 = vld [vmem:[#allocation22_spill] sm:$0xff]  ;;  %v19049_v34 = vld [vmem:[#allocation23_spill] sm:$0xff]  ;;  %v19050_v26 = vld [vmem:[#allocation5_spill] sm:$0xff] }
 0x686   :  { %v16142_v22 = vmul.f32 %v16119_v30, %v15711_v39  ;;  %v16146_v9 = vmul.f32 %v16119_v30, %v15715_v24  ;;  %v16150_v44 = vmul.f32 %v16119_v30, %v15719_v12  ;;  %v16154_v46 = vmul.f32 %v16119_v30, %v15723_v14 }
 0x687   :  { %v16157_v11 = vadd.f32 %v16124_v35, %v5164_v16  ;;  %v16161_v37 = vmul.f32 %v16119_v30, %v15727_v55  ;;  %v16165_v39 = vmul.f32 %v16119_v30, %v15731_v13  ;;  %v16169_v24 = vmul.f32 %v16119_v30, %v15735_v57  ;;  %v19047_v16 = vld [vmem:[#allocation21_spill] sm:$0xff] }
 0x688   :  { %v16173_v12 = vmul.f32 %v16119_v30, %v15739_v21  ;;  %v16177_v14 = vmul.f32 %v16119_v30, %v15743_v40  ;;  %v16181_v55 = vmul.f32 %v16119_v30, %v15747_v10  ;;  %v16185_v13 = vmul.f32 %v16119_v30, %v15751_v17 }
 0x689   :  { %19045 = vst [vmem:[#allocation6_spill] sm:$0xff] %v16157_v11  ;;  %v18904_v2 = vmax.f32 %v16157_v11, 0.0  ;;  %v16190_v57 = vmul.f32 %v16119_v30, %v15755_v3  ;;  %v16194_v21 = vmul.f32 %v16119_v30, %v15759_v48  ;;  %v16198_v40 = vmul.f32 %v16119_v30, %v15763_v36  ;;  %v19059_v11 = vld [vmem:[#allocation8_spill] sm:$0xff] }
 0x68a   :  { %v16202_v10 = vmul.f32 %v16119_v30, %v15767_v51  ;;  %v16206_v17 = vmul.f32 %v16119_v30, %v15771_v38  ;;  %v16210_v3 = vmul.f32 %v16119_v30, %v15775_v58  ;;  %v16214_v48 = vmul.f32 %v16119_v30, %v15779_v31 }
 0x68b   :  { %5472 = vst [vmem:[#allocation3 + $0x321] sm:$0xff] %v18904_v2  ;;  %v16220_v36 = vmul.f32 %v16119_v30, %v15783_v33  ;;  %v16224_v51 = vmul.f32 %v16119_v30, %v15787_v8  ;;  %v16228_v38 = vmul.f32 %v16119_v30, %v15791_v6  ;;  %v16232_v58 = vmul.f32 %v16119_v30, %v15795_v4  ;;  %v19055_v2 = vld [vmem:[#allocation9_spill] sm:$0xff] }
 0x68c   :  { %v16236_v31 = vmul.f32 %v16119_v30, %v15799_v42  ;;  %v16240_v33 = vmul.f32 %v16119_v30, %v15803_v15  ;;  %v16244_v8 = vmul.f32 %v16119_v30, %v15807_v60  ;;  %v16248_v6 = vmul.f32 %v16119_v30, %v15811_v45 }
 0x68d   :  { %v16252_v4 = vmul.f32 %v16119_v30, %v15815_v63  ;;  %v16256_v42 = vmul.f32 %v16119_v30, %v15819_v54  ;;  %v16260_v15 = vmul.f32 %v16119_v30, %v15823_v41  ;;  %v16264_v60 = vmul.f32 %v16119_v30, %v15827_v43 }
 0x68e   :  { %v16268_v45 = vmul.f32 %v16119_v30, %v15831_v29  ;;  %v16272_v63 = vmul.f32 %v16119_v30, %v15835_v5  ;;  %v16276_v54 = vmul.f32 %v16119_v30, %v15839_v19  ;;  %v16280_v41 = vmul.f32 %v16119_v30, %v15843_v52 }
 0x68f   :  { %v16284_v43 = vmul.f32 %v16119_v30, %v15847_v27  ;;  %v16288_v29 = vmul.f32 %v16119_v30, %v15851_v62  ;;  %v16292_v5 = vmul.f32 %v16119_v30, %v15855_v56  ;;  %v16296_v19 = vmul.f32 %v16119_v30, %v15859_v61 }
 0x690   :  { %v16300_v52 = vmul.f32 %v16119_v30, %v15863_v25  ;;  %v16304_v27 = vmul.f32 %v16119_v30, %v15867_v7  ;;  %v16308_v62 = vmul.f32 %v16119_v30, %v15871_v0  ;;  %v16312_v56 = vmul.f32 %v16119_v30, %v19046_v28 }
 0x691   :  { %v16316_v61 = vmul.f32 %v16119_v30, %v19047_v16  ;;  %v16320_v25 = vmul.f32 %v16119_v30, %v19048_v47  ;;  %v16324_v7 = vmul.f32 %v16119_v30, %v19049_v34  ;;  %v16328_v0 = vmul.f32 %v16119_v30, %v19050_v26 }
 0x692   :  { %v16332_v28 = vmul.f32 %v16119_v30, %v19051_v32  ;;  %v16336_v16 = vmul.f32 %v16119_v30, %v19032_v50  ;;  %v16340_v47 = vmul.f32 %v16119_v30, %v19033_v20  ;;  %v16344_v34 = vmul.f32 %v16119_v30, %v19055_v2 }
 0x693   :  { %v16348_v26 = vmul.f32 %v16119_v30, %v19057_v53  ;;  %v16352_v32 = vmul.f32 %v16119_v30, %v19059_v11 }
 0x694   :  { %19052 = vst [vmem:[#allocation24_spill] sm:$0xff] %v16332_v28  ;;  %19053 = vst [vmem:[#allocation25_spill] sm:$0xff] %v16336_v16  ;;  %v19061_v28 = vld [vmem:[#allocation10_spill] sm:$0xff]  ;;  %v19062_v16 = vld [vmem:[#allocation13_spill] sm:$0xff] }
 0x695   :  { %19054 = vst [vmem:[#allocation17_spill] sm:$0xff] %v16340_v47  ;;  %19056 = vst [vmem:[#allocation18_spill] sm:$0xff] %v16344_v34  ;;  %v16356_v50 = vmul.f32 %v16119_v30, %v19061_v28  ;;  %v16360_v20 = vmul.f32 %v16119_v30, %v19062_v16  ;;  %v19063_v47 = vld [vmem:[#allocation15_spill] sm:$0xff]  ;;  %v19064_v34 = vld [vmem:[#allocation12_spill] sm:$0xff]  ;;  %v16380_v16 = vmul.f32 %v16119_v30, %v19040_v59 }
 0x696   :  { %19058 = vst [vmem:[#allocation19_spill] sm:$0xff] %v16348_v26  ;;  %19060 = vst [vmem:[#allocation20_spill] sm:$0xff] %v16352_v32  ;;  %v16364_v2 = vmul.f32 %v16119_v30, %v19063_v47  ;;  %v16368_v53 = vmul.f32 %v16119_v30, %v19064_v34  ;;  %v19065_v26 = vld [vmem:[#allocation14_spill] sm:$0xff]  ;;  %v19066_v32 = vld [vmem:[#allocation16_spill] sm:$0xff]  ;;  %v16384_v47 = vmul.f32 %v16119_v30, %v15951_v1 }
 0x697   :  { %v16372_v11 = vmul.f32 %v16119_v30, %v19065_v26  ;;  %v16376_v28 = vmul.f32 %v16119_v30, %v19066_v32  ;;  %v16388_v34 = vadd.f32 %v16124_v35, %v16130_v18  ;;  %v16392_v26 = vadd.f32 %v16124_v35, %v16134_v23 }
 0x698   :  { %v16396_v32 = vadd.f32 %v16124_v35, %v16138_v49  ;;  %v16400_v59 = vadd.f32 %v16124_v35, %v16142_v22  ;;  %v16404_v1 = vadd.f32 %v16124_v35, %v16146_v9  ;;  %v16408_v30 = vadd.f32 %v16124_v35, %v16150_v44 }
 0x699   :  { %v16412_v18 = vadd.f32 %v16124_v35, %v16154_v46  ;;  %v16416_v23 = vadd.f32 %v16124_v35, %v16161_v37  ;;  %v16420_v49 = vadd.f32 %v16124_v35, %v16165_v39  ;;  %v16424_v22 = vadd.f32 %v16124_v35, %v16169_v24 }
 0x69a   :  { %v16428_v9 = vadd.f32 %v16124_v35, %v16173_v12  ;;  %v16432_v44 = vadd.f32 %v16124_v35, %v16177_v14  ;;  %v16436_v46 = vadd.f32 %v16124_v35, %v16181_v55  ;;  %v16440_v37 = vadd.f32 %v16124_v35, %v16185_v13 }
 0x69b   :  { %v16444_v39 = vadd.f32 %v16124_v35, %v16190_v57  ;;  %v16448_v24 = vadd.f32 %v16124_v35, %v16194_v21  ;;  %v16452_v12 = vadd.f32 %v16124_v35, %v16198_v40  ;;  %v16456_v14 = vadd.f32 %v16124_v35, %v16202_v10 }
 0x69c   :  { %v16460_v55 = vadd.f32 %v16124_v35, %v16206_v17  ;;  %v16464_v13 = vadd.f32 %v16124_v35, %v16210_v3  ;;  %v16468_v57 = vadd.f32 %v16124_v35, %v16214_v48  ;;  %v16472_v21 = vadd.f32 %v16124_v35, %v16220_v36 }
 0x69d   :  { %v16476_v40 = vadd.f32 %v16124_v35, %v16224_v51  ;;  %v16480_v10 = vadd.f32 %v16124_v35, %v16228_v38  ;;  %v16484_v17 = vadd.f32 %v16124_v35, %v16232_v58  ;;  %v16488_v3 = vadd.f32 %v16124_v35, %v16236_v31 }
 0x69e   :  { %v16492_v48 = vadd.f32 %v16124_v35, %v16240_v33  ;;  %v16496_v36 = vadd.f32 %v16124_v35, %v16244_v8  ;;  %v16500_v51 = vadd.f32 %v16124_v35, %v16248_v6  ;;  %v16504_v38 = vadd.f32 %v16124_v35, %v16252_v4 }
 0x69f   :  { %19067 = vst [vmem:[#allocation21_spill] sm:$0xff] %v16480_v10  ;;  %19068 = vst [vmem:[#allocation22_spill] sm:$0xff] %v16484_v17  ;;  %v16508_v58 = vadd.f32 %v16124_v35, %v16256_v42  ;;  %v16512_v31 = vadd.f32 %v16124_v35, %v16260_v15  ;;  %v16516_v33 = vadd.f32 %v16124_v35, %v16264_v60 }
 0x6a0   :  { %19069 = vst [vmem:[#allocation23_spill] sm:$0xff] %v16488_v3  ;;  %19070 = vst [vmem:[#allocation5_spill] sm:$0xff] %v16492_v48  ;;  %v16520_v8 = vadd.f32 %v16124_v35, %v16268_v45  ;;  %v16524_v6 = vadd.f32 %v16124_v35, %v16272_v63  ;;  %v16528_v4 = vadd.f32 %v16124_v35, %v16276_v54 }
 0x6a1   :  { %19071 = vst [vmem:[#allocation7_spill] sm:$0xff] %v16496_v36  ;;  %v16532_v42 = vadd.f32 %v16124_v35, %v16280_v41  ;;  %v16536_v15 = vadd.f32 %v16124_v35, %v16284_v43  ;;  %v16540_v60 = vadd.f32 %v16124_v35, %v16288_v29  ;;  %v16544_v45 = vadd.f32 %v16124_v35, %v16292_v5 }
 0x6a2   :  { %v16548_v63 = vadd.f32 %v16124_v35, %v16296_v19  ;;  %v16552_v54 = vadd.f32 %v16124_v35, %v16300_v52  ;;  %v16556_v41 = vadd.f32 %v16124_v35, %v16304_v27  ;;  %v16560_v43 = vadd.f32 %v16124_v35, %v16308_v62  ;;  %v19077_v62 = vld [vmem:[#allocation24_spill] sm:$0xff] }
 0x6a3   :  { %v16564_v29 = vadd.f32 %v16124_v35, %v16312_v56  ;;  %v16568_v5 = vadd.f32 %v16124_v35, %v16316_v61  ;;  %v16572_v19 = vadd.f32 %v16124_v35, %v16320_v25  ;;  %v16576_v52 = vadd.f32 %v16124_v35, %v16324_v7 }
 0x6a4   :  { %v16580_v27 = vadd.f32 %v16124_v35, %v16328_v0  ;;  %v16584_v56 = vadd.f32 %v16124_v35, %v19077_v62 }
 0x6a5   :  { %19072 = vst [vmem:[#allocation9_spill] sm:$0xff] %v16564_v29  ;;  %19073 = vst [vmem:[#allocation11_spill] sm:$0xff] %v16568_v5  ;;  %v19078_v29 = vld [vmem:[#allocation25_spill] sm:$0xff] }
 0x6a6   :  { %19074 = vst [vmem:[#allocation8_spill] sm:$0xff] %v16572_v19  ;;  %19075 = vst [vmem:[#allocation10_spill] sm:$0xff] %v16576_v52  ;;  %v16588_v61 = vadd.f32 %v16124_v35, %v19078_v29  ;;  %v19079_v5 = vld [vmem:[#allocation17_spill] sm:$0xff]  ;;  %v19080_v19 = vld [vmem:[#allocation18_spill] sm:$0xff]  ;;  %v16608_v29 = vadd.f32 %v16124_v35, %v16356_v50  ;;  %v16628_v50 = vadd.f32 %v16124_v35, %v16376_v28  ;;  %v19090_v28 = vmax.f32 %v16416_v23, 0.0 }
 0x6a7   :  { %19076 = vst [vmem:[#allocation13_spill] sm:$0xff] %v16580_v27  ;;  %v16592_v25 = vadd.f32 %v16124_v35, %v19079_v5  ;;  %v16596_v7 = vadd.f32 %v16124_v35, %v19080_v19  ;;  %v19081_v52 = vld [vmem:[#allocation19_spill] sm:$0xff]  ;;  %v19082_v27 = vld [vmem:[#allocation20_spill] sm:$0xff]  ;;  %v16612_v5 = vadd.f32 %v16124_v35, %v16360_v20  ;;  %v16616_v19 = vadd.f32 %v16124_v35, %v16364_v2 }
 0x6a8   :  { %v16600_v0 = vadd.f32 %v16124_v35, %v19081_v52  ;;  %v16604_v62 = vadd.f32 %v16124_v35, %v19082_v27  ;;  %v16620_v52 = vadd.f32 %v16124_v35, %v16368_v53  ;;  %v16624_v27 = vadd.f32 %v16124_v35, %v16372_v11  ;;  %19086 = vst [vmem:[#allocation16_spill] sm:$0xff] %v16628_v50 }
 0x6a9   :  { %19083 = vst [vmem:[#allocation15_spill] sm:$0xff] %v16616_v19  ;;  %v16632_v20 = vadd.f32 %v16124_v35, %v16380_v16  ;;  %v16636_v2 = vadd.f32 %v16124_v35, %v16384_v47  ;;  %v18907_v19 = vmax.f32 %v16388_v34, 0.0  ;;  %v18908_v53 = vmax.f32 %v16392_v26, 0.0  ;;  %5418 = vst [vmem:[#allocation3 + $0x69] sm:$0xff] %v19090_v28 }
 0x6aa   :  { %19084 = vst [vmem:[#allocation12_spill] sm:$0xff] %v16620_v52  ;;  %19085 = vst [vmem:[#allocation14_spill] sm:$0xff] %v16624_v27  ;;  %v18909_v52 = vmax.f32 %v16396_v32, 0.0  ;;  %v18910_v11 = vmax.f32 %v16400_v59, 0.0  ;;  %v18911_v27 = vmax.f32 %v16404_v1, 0.0  ;;  %v18912_v35 = vmax.f32 %v16424_v22, 0.0 }
 0x6ab   :  { %19087 = vst [vmem:[#allocation24_spill] sm:$0xff] %v16632_v20  ;;  %v18913_v47 = vmax.f32 %v16428_v9, 0.0  ;;  %5411 = vst [vmem:[#allocation3 + $0x19] sm:$0xff] %v18907_v19  ;;  %v19088_v19 = vmax.f32 %v16408_v30, 0.0  ;;  %v18915_v50 = vmax.f32 %v16452_v12, 0.0  ;;  %v19092_v16 = vmax.f32 %v16432_v44, 0.0 }
 0x6ac   :  { %5412 = vst [vmem:[#allocation3 + $0x21] sm:$0xff] %v18908_v53  ;;  %5413 = vst [vmem:[#allocation3 + $0x31] sm:$0xff] %v18909_v52  ;;  %v19089_v53 = vmax.f32 %v16412_v18, 0.0  ;;  %v18914_v52 = vmax.f32 %v16448_v24, 0.0  ;;  %v19093_v28 = vmax.f32 %v16436_v46, 0.0  ;;  %v5268_v20 = vmax.f32 %v16508_v58, 0.0 }
 0x6ad   :  { %5414 = vst [vmem:[#allocation3 + $0x39] sm:$0xff] %v18910_v11  ;;  %5415 = vst [vmem:[#allocation3 + $0x49] sm:$0xff] %v18911_v27  ;;  %v19091_v11 = vmax.f32 %v16420_v49, 0.0  ;;  %v18921_v27 = vmax.f32 %v16520_v8, 0.0  ;;  %v19108_v58 = vld [vmem:[#allocation8_spill] sm:$0xff] }
 0x6ae   :  { %5416 = vst [vmem:[#allocation3 + $0x51] sm:$0xff] %v19088_v19  ;;  %5417 = vst [vmem:[#allocation3 + $0x61] sm:$0xff] %v19089_v53  ;;  %v18916_v19 = vmax.f32 %v16464_v13, 0.0  ;;  %v18918_v53 = vmax.f32 %v16484_v17, 0.0 }
 0x6af   :  { %5419 = vst [vmem:[#allocation3 + $0x79] sm:$0xff] %v19091_v11  ;;  %5420 = vst [vmem:[#allocation3 + $0x81] sm:$0xff] %v18912_v35  ;;  %v19094_v11 = vmax.f32 %v16440_v37, 0.0  ;;  %v19095_v35 = vmax.f32 %v16444_v39, 0.0 }
 0x6b0   :  { %5421 = vst [vmem:[#allocation3 + $0x91] sm:$0xff] %v18913_v47  ;;  %5422 = vst [vmem:[#allocation3 + $0x99] sm:$0xff] %v19092_v16  ;;  %v18917_v47 = vmax.f32 %v16480_v10, 0.0  ;;  %v19096_v16 = vmax.f32 %v16456_v14, 0.0  ;;  %v5301_v10 = vmax.f32 %v16636_v2, 0.0  ;;  %v14375_v2 = vld [vmem:[%s18855_s4 + $0x8] sm:$0xff]  }
 0x6b1   :  { %5423 = vst [vmem:[#allocation3 + $0xa9] sm:$0xff] %v19093_v28  ;;  %5424 = vst [vmem:[#allocation3 + $0xb1] sm:$0xff] %v19094_v11  ;;  %v19097_v28 = vmax.f32 %v16460_v55, 0.0  ;;  %v18920_v11 = vmax.f32 %v16516_v33, 0.0 }
 0x6b2   :  { %5425 = vst [vmem:[#allocation3 + $0xc1] sm:$0xff] %v19095_v35  ;;  %5426 = vst [vmem:[#allocation3 + $0xc9] sm:$0xff] %v18914_v52  ;;  %v18919_v35 = vmax.f32 %v16496_v36, 0.0  ;;  %v19098_v52 = vmax.f32 %v16468_v57, 0.0  ;;  %v19114_v36 = vmax.f32 %v16544_v45, 0.0 }
 0x6b3   :  { %5427 = vst [vmem:[#allocation3 + $0xd9] sm:$0xff] %v18915_v50  ;;  %5428 = vst [vmem:[#allocation3 + $0xe1] sm:$0xff] %v19096_v16  ;;  %v19099_v50 = vmax.f32 %v16472_v21, 0.0  ;;  %v19100_v16 = vmax.f32 %v16476_v40, 0.0 }
 0x6b4   :  { %5429 = vst [vmem:[#allocation3 + $0xf1] sm:$0xff] %v19097_v28  ;;  %5430 = vst [vmem:[#allocation3 + $0xf9] sm:$0xff] %v18916_v19  ;;  %v5269_v28 = vmax.f32 %v16512_v31, 0.0  ;;  %v18923_v31 = vmax.f32 %v16528_v4, 0.0  ;;  %v19113_v19 = vld [vmem:[#allocation13_spill] sm:$0xff] }
 0x6b5   :  { %5431 = vst [vmem:[#allocation3 + $0x109] sm:$0xff] %v19098_v52  ;;  %5432 = vst [vmem:[#allocation3 + $0x111] sm:$0xff] %v19099_v50  ;;  %v19101_v52 = vmax.f32 %v16488_v3, 0.0  ;;  %v19102_v50 = vmax.f32 %v16492_v48, 0.0  ;;  %v19119_v48 = vld [vmem:[#allocation12_spill] sm:$0xff] }
 0x6b6   :  { %5433 = vst [vmem:[#allocation3 + $0x121] sm:$0xff] %v19100_v16  ;;  %5434 = vst [vmem:[#allocation3 + $0x129] sm:$0xff] %v18917_v47  ;;  %v19103_v47 = vmax.f32 %v16500_v51, 0.0  ;;  %v5284_v16 = vmax.f32 %v19108_v58, 0.0  ;;  %v5288_v58 = vmax.f32 %v16588_v61, 0.0  ;;  %v5292_v61 = vmax.f32 %v16604_v62, 0.0 }
 0x6b7   :  { %5435 = vst [vmem:[#allocation3 + $0x139] sm:$0xff] %v18918_v53  ;;  %5436 = vst [vmem:[#allocation3 + $0x141] sm:$0xff] %v19101_v52  ;;  %v19104_v53 = vmax.f32 %v16504_v38, 0.0  ;;  %v19107_v52 = vld [vmem:[#allocation11_spill] sm:$0xff]  ;;  %v19122_v3 = vld [vmem:[#allocation24_spill] sm:$0xff] }
 0x6b8   :  { %5437 = vst [vmem:[#allocation3 + $0x151] sm:$0xff] %v19102_v50  ;;  %5438 = vst [vmem:[#allocation3 + $0x159] sm:$0xff] %v18919_v35  ;;  %v5283_v50 = vmax.f32 %v19107_v52, 0.0  ;;  %v5287_v52 = vmax.f32 %v16584_v56, 0.0  ;;  %v5291_v56 = vmax.f32 %v16600_v0, 0.0  ;;  %v19121_v0 = vld [vmem:[#allocation16_spill] sm:$0xff] }
 0x6b9   :  { %5439 = vst [vmem:[#allocation3 + $0x169] sm:$0xff] %v19103_v47  ;;  %5440 = vst [vmem:[#allocation3 + $0x171] sm:$0xff] %v19104_v53  ;;  %v19105_v47 = vmax.f32 %v16524_v6, 0.0  ;;  %v19106_v53 = vld [vmem:[#allocation9_spill] sm:$0xff]  ;;  %v5298_v62 = vmax.f32 %v19121_v0, 0.0  ;;  %v5300_v17 = vmax.f32 %v19122_v3, 0.0 }
 0x6ba   :  { %5441 = vst [vmem:[#allocation3 + $0x181] sm:$0xff] %v5268_v20  ;;  %5442 = vst [vmem:[#allocation3 + $0x189] sm:$0xff] %v5269_v28  ;;  %v5281_v20 = vmax.f32 %v16560_v43, 0.0  ;;  %v5282_v35 = vmax.f32 %v19106_v53, 0.0  ;;  %v19109_v28 = vmax.f32 %v16532_v42, 0.0  ;;  %v5286_v53 = vmax.f32 %v19113_v19, 0.0 }
 0x6bb   :  { %5443 = vst [vmem:[#allocation3 + $0x1c9] sm:$0xff] %v18920_v11  ;;  %5444 = vst [vmem:[#allocation3 + $0x1d1] sm:$0xff] %v18921_v27  ;;  %v19110_v11 = vmax.f32 %v16536_v15, 0.0  ;;  %v19111_v27 = vmax.f32 %v16540_v60, 0.0  ;;  %v5290_v19 = vmax.f32 %v16596_v7, 0.0  ;;  %v19127_v0 = vld [vmem:[#allocation26_spill] sm:$0xff] }
 0x6bc   :  { %5445 = vst [vmem:[#allocation3 + $0x1e1] sm:$0xff] %v19105_v47  ;;  %5446 = vst [vmem:[#allocation3 + $0x1e9] sm:$0xff] %v18923_v31  ;;  %v19112_v47 = vld [vmem:[#allocation10_spill] sm:$0xff]  ;;  %v19115_v31 = vmax.f32 %v16548_v63, 0.0 }
 0x6bd   :  { %5447 = vst [vmem:[#allocation3 + $0x1f9] sm:$0xff] %v19109_v28  ;;  %5448 = vst [vmem:[#allocation3 + $0x201] sm:$0xff] %v19110_v11  ;;  %v5285_v43 = vmax.f32 %v19112_v47, 0.0  ;;  %v19116_v28 = vmax.f32 %v16552_v54, 0.0  ;;  %v19117_v11 = vmax.f32 %v16556_v41, 0.0  ;;  %v19118_v47 = vld [vmem:[#allocation15_spill] sm:$0xff] }
 0x6be   :  { %5449 = vst [vmem:[#allocation3 + $0x211] sm:$0xff] %v19111_v27  ;;  %5450 = vst [vmem:[#allocation3 + $0x219] sm:$0xff] %v19114_v36  ;;  %v5289_v27 = vmax.f32 %v16592_v25, 0.0  ;;  %v5293_v36 = vmax.f32 %v16608_v29, 0.0  ;;  %v19120_v25 = vld [vmem:[#allocation14_spill] sm:$0xff]  ;;  %v19124_v29 = vmax.f32 %v16392_v26, 0.0 }
 0x6bf   :  { %5451 = vst [vmem:[#allocation3 + $0x229] sm:$0xff] %v19115_v31  ;;  %5452 = vst [vmem:[#allocation3 + $0x231] sm:$0xff] %v19116_v28  ;;  %v5294_v31 = vmax.f32 %v16612_v5, 0.0  ;;  %v5295_v28 = vmax.f32 %v19118_v47, 0.0  ;;  %v5297_v7 = vmax.f32 %v19120_v25, 0.0  ;;  %v19125_v47 = vmax.f32 %v16396_v32, 0.0 }
 0x6c0   :  { %5453 = vst [vmem:[#allocation3 + $0x241] sm:$0xff] %v19117_v11  ;;  %5454 = vst [vmem:[#allocation3 + $0x249] sm:$0xff] %v5281_v20  ;;  %v5296_v11 = vmax.f32 %v19119_v48, 0.0  ;;  %v19123_v48 = vmax.f32 %v16388_v34, 0.0  ;;  %v19126_v25 = vmax.f32 %v16400_v59, 0.0  ;;  %v19128_v34 = vmax.f32 %v16500_v51, 0.0 }
 0x6c1   :  { %5455 = vst [vmem:[#allocation3 + $0x259] sm:$0xff] %v5282_v35  ;;  %5456 = vst [vmem:[#allocation3 + $0x261] sm:$0xff] %v5283_v50  ;;  %v19129_v26 = vmax.f32 %v16504_v38, 0.0  ;;  %v14376_v59 = vld [vmem:[%s18855_s4 + $0x10] sm:$0xff]   ;;  %v19134_v38 = vmax.f32 %v16532_v42, 0.0  ;;  %v16838_v42 = vpack.c.bf16 %v5283_v50, %v5282_v35  ;;  %v19143_v35 = vmax.f32 %v16404_v1, 0.0 }
 0x6c2   :  { %5457 = vst [vmem:[#allocation3 + $0x271] sm:$0xff] %v5284_v16  ;;  %5458 = vst [vmem:[#allocation3 + $0x279] sm:$0xff] %v5285_v43  ;;  %v5652_v5 = vpack.c.bf16 %v19124_v29, %v19123_v48  ;;  %v5653_v3 = vpack.c.bf16 %v19126_v25, %v19125_v47  ;;  %v19130_v48 = vmax.f32 %v16516_v33, 0.0  ;;  %v19132_v29 = vmax.f32 %v16524_v6, 0.0  ;;  %v14378_v1 = vld [vmem:[%s18855_s4 + $0x20] sm:$0xff]  }
 0x6c3   :  { %5459 = vst [vmem:[#allocation3 + $0x289] sm:$0xff] %v5286_v53  ;;  %5460 = vst [vmem:[#allocation3 + $0x291] sm:$0xff] %v5287_v52  ;;  %v16799_v32 = vpack.c.bf16 %v19129_v26, %v19128_v34  ;;  %v19135_v47 = vmax.f32 %v16536_v15, 0.0  ;;  %v19137_v33 = vmax.f32 %v16544_v45, 0.0  ;;  %v19139_v6 = vmax.f32 %v16552_v54, 0.0 }
 0x6c4   :  { %5461 = vst [vmem:[#allocation3 + $0x2a1] sm:$0xff] %v5288_v58  ;;  %5462 = vst [vmem:[#allocation3 + $0x2a9] sm:$0xff] %v5289_v27  ;;  %12534 = vmatmul.mubr.bf16.vlgmr.msra.gmra.mrb[0].mxu1 %v5652_v5  ;;  %v19133_v5 = vmax.f32 %v16528_v4, 0.0  ;;  %v19140_v4 = vmax.f32 %v16556_v41, 0.0  ;;  %v16840_v15 = vpack.c.bf16 %v5285_v43, %v5284_v16  ;;  %v16846_v45 = vpack.c.bf16 %v5291_v56, %v5290_v19 }
 0x6c5   :  { %5463 = vst [vmem:[#allocation3 + $0x2b9] sm:$0xff] %v5290_v19  ;;  %5464 = vst [vmem:[#allocation3 + $0x2c1] sm:$0xff] %v5291_v56  ;;  %12537 = vmatprep.mubr.bf16.mxu1 %v5653_v3  ;;  %12598 = vmatpush3.bf16.msra.mxu1 %v19127_v0  ;;  %v16820_v25 = vpack.c.bf16 %v19135_v47, %v19134_v38  ;;  %v19136_v3 = vmax.f32 %v16540_v60, 0.0  ;;  %v16844_v60 = vpack.c.bf16 %v5289_v27, %v5288_v58 }
 0x6c6   :  { %5465 = vst [vmem:[#allocation3 + $0x2d1] sm:$0xff] %v5292_v61  ;;  %5466 = vst [vmem:[#allocation3 + $0x2d9] sm:$0xff] %v5293_v36  ;;  %12599 = vmatprep.subr.bf16.mxu1 %v14375_v2  ;;  %v16814_v51 = vpack.c.bf16 %v19133_v5, %v19132_v29  ;;  %v16836_v26 = vpack.c.bf16 %v5281_v20, %v19140_v4  ;;  %v5681_v54 = vpack.c.bf16 %v5297_v7, %v5296_v11  ;;  %v19141_v29 = vld [vmem:[#allocation6_spill] sm:$0xff]  ;;  %v14377_v20 = vld [vmem:[%s18855_s4 + $0x18] sm:$0xff]  }
 0x6c7   :  { %5467 = vst [vmem:[#allocation3 + $0x2e9] sm:$0xff] %v5294_v31  ;;  %5468 = vst [vmem:[#allocation3 + $0x2f1] sm:$0xff] %v5295_v28  ;;  %v16826_v0 = vpack.c.bf16 %v19137_v33, %v19136_v3  ;;  %v19142_v5 = vmax.f32 %v19141_v29, 0.0  ;;  %v19144_v16 = vmax.f32 %v16408_v30, 0.0  ;;  %v19145_v43 = vmax.f32 %v16412_v18, 0.0  ;;  %v14379_v18 = vld [vmem:[%s18855_s4 + $0x28] sm:$0xff]  }
 0x6c8   :  { %5469 = vst [vmem:[#allocation3 + $0x301] sm:$0xff] %v5296_v11  ;;  %5470 = vst [vmem:[#allocation3 + $0x309] sm:$0xff] %v5297_v7  ;;  %v19147_v30 = vmax.f32 %v16420_v49, 0.0  ;;  %v19148_v58 = vmax.f32 %v16424_v22, 0.0  ;;  %v19150_v19 = vmax.f32 %v16432_v44, 0.0  ;;  %v14380_v49 = vld [vmem:[%s18855_s4 + $0x30] sm:$0xff]  }
 0x6c9   :  { %5471 = vst [vmem:[#allocation3 + $0x319] sm:$0xff] %v5298_v62  ;;  %5473 = vst [vmem:[#allocation3 + $0x331] sm:$0xff] %v5300_v17  ;;  %v19131_v17 = vmax.f32 %v16520_v8, 0.0  ;;  %v19138_v8 = vmax.f32 %v16548_v63, 0.0  ;;  %12600 = vmatpush3.bf16.msra.mxu1 %v14375_v2  ;;  %v5680_v63 = vpack.c.bf16 %v5295_v28, %v5294_v31  ;;  %v16852_v41 = vpack.c.bf16 %v19142_v5, %v5298_v62  ;;  %v19162_v3 = vld [vmem:[#allocation21_spill] sm:$0xff]  ;;  %v19170_v5 = vld [vmem:[#allocation7_spill] sm:$0xff] }
 0x6ca   :  { %5474 = vst [vmem:[#allocation3 + $0x339] sm:$0xff] %v5301_v10  ;;  %v5654_v50 = vpack.c.bf16 %v19144_v16, %v19143_v35  ;;  %12601 = vmatprep.subr.bf16.mxu1 %v14376_v59  ;;  %v5656_v27 = vpack.c.bf16 %v19148_v58, %v19147_v30  ;;  %v19151_v22 = vmax.f32 %v16436_v46, 0.0  ;;  %v19153_v44 = vmax.f32 %v16444_v39, 0.0  ;;  %v14382_v46 = vld [vmem:[%s18855_s4 + $0x80] sm:$0xff]   ;;  %v19168_v4 = vld [vmem:[#allocation5_spill] sm:$0xff] }
 0x6cb   :  { %v16808_v10 = vpack.c.bf16 %v19131_v17, %v19130_v48  ;;  %v16832_v34 = vpack.c.bf16 %v19139_v6, %v19138_v8  ;;  %v16842_v48 = vpack.c.bf16 %v5287_v52, %v5286_v53  ;;  %v16848_v17 = vpack.c.bf16 %v5293_v36, %v5292_v61  ;;  %v5620_v16 = vld [vmem:[#allocation3 + $0x1b9] sm:$0xff]  ;;  %v14387_v58 = vld [vmem:[%s18855_s4 + $0xa8] sm:$0xff]  }
 0x6cc   :  { %v19146_v53 = vmax.f32 %v16416_v23, 0.0  ;;  %12538 = vmatmul.mubr.bf16.gmra.mrb[4].mxu1 %v5654_v50  ;;  %v19149_v23 = vmax.f32 %v16428_v9, 0.0  ;;  %v19152_v61 = vmax.f32 %v16440_v37, 0.0  ;;  %v14381_v9 = vld [vmem:[%s18855_s4 + $0x38] sm:$0xff]   ;;  %v19154_v31 = vmax.f32 %v16448_v24, 0.0 }
 0x6cd   :  { %12602 = vmatpush3.bf16.msra.mxu1 %v14376_v59  ;;  %v19155_v37 = vmax.f32 %v16452_v12, 0.0  ;;  %v19156_v11 = vmax.f32 %v16456_v14, 0.0  ;;  %v19157_v39 = vmax.f32 %v16460_v55, 0.0  ;;  %v19158_v24 = vmax.f32 %v16464_v13, 0.0  ;;  %v19164_v14 = vld [vmem:[#allocation22_spill] sm:$0xff]  ;;  %v19166_v55 = vld [vmem:[#allocation23_spill] sm:$0xff] }
 0x6ce   :  { %v5655_v52 = vpack.c.bf16 %v19146_v53, %v19145_v43  ;;  %12603 = vmatprep.subr.bf16.mxu1 %v14377_v20  ;;  %v5657_v56 = vpack.c.bf16 %v19150_v19, %v19149_v23  ;;  %v5658_v36 = vpack.c.bf16 %v19152_v61, %v19151_v22  ;;  %v5659_v28 = vpack.c.bf16 %v19154_v31, %v19153_v44  ;;  %v5485_v43 = vld [vmem:[#allocation3 + $0x78] sm:$0xff]  ;;  %v5486_v53 = vld [vmem:[#allocation3 + $0x80] sm:$0xff]  ;;  %v5489_v23 = vld [vmem:[#allocation3 + $0xa8] sm:$0xff] }
 0x6cf   :  { %v5660_v7 = vpack.c.bf16 %v19156_v11, %v19155_v37  ;;  %v5661_v62 = vpack.c.bf16 %v19158_v24, %v19157_v39  ;;  %v19159_v2 = vmax.f32 %v16468_v57, 0.0  ;;  %v19160_v59 = vmax.f32 %v16472_v21, 0.0  ;;  %v5619_v21 = vld [vmem:[#allocation3 + $0x1b1] sm:$0xff]  ;;  %v5494_v31 = vld [vmem:[#allocation3 + $0xe0] sm:$0xff] }
 0x6d0   :  { %12541 = vmatprep.mubr.bf16.mxu1 %v5655_v52  ;;  %v19161_v47 = vmax.f32 %v16476_v40, 0.0  ;;  %v19163_v12 = vmax.f32 %v19162_v3, 0.0  ;;  %v19165_v8 = vmax.f32 %v19164_v14, 0.0  ;;  %v19167_v6 = vmax.f32 %v19166_v55, 0.0  ;;  %v5487_v52 = vld [vmem:[#allocation3 + $0x90] sm:$0xff]  ;;  %v14389_v61 = vld [vmem:[%s18855_s4 + $0xb8] sm:$0xff]  }
 0x6d1   :  { %12604 = vmatpush3.bf16.msra.mxu1 %v14377_v20  ;;  %v5662_v38 = vpack.c.bf16 %v19160_v59, %v19159_v2  ;;  %v19169_v29 = vmax.f32 %v19168_v4, 0.0  ;;  %v19171_v35 = vmax.f32 %v19170_v5, 0.0  ;;  %v5667_v40 = vpack.c.bf16 %v5620_v16, %v5619_v21  ;;  %v14386_v20 = vld [vmem:[%s18855_s4 + $0xa0] sm:$0xff]   ;;  %v5490_v19 = vld [vmem:[#allocation3 + $0xb0] sm:$0xff]  ;;  %v5493_v44 = vld [vmem:[#allocation3 + $0xd8] sm:$0xff] }
 0x6d2   :  { %12605 = vmatprep.subr.bf16.mxu1 %v14378_v1  ;;  %v5663_v33 = vpack.c.bf16 %v19163_v12, %v19161_v47  ;;  %v5664_v13 = vpack.c.bf16 %v19167_v6, %v19165_v8  ;;  %v16961_v30 = vpack.c.bf16 %v5486_v53, %v5485_v43  ;;  %v16973_v22 = vpack.c.bf16 %v5490_v19, %v5489_v23  ;;  %v5498_v39 = vld [vmem:[#allocation3 + $0x110] sm:$0xff]  ;;  %v5499_v24 = vld [vmem:[#allocation3 + $0x120] sm:$0xff]  ;;  %v5504_v12 = vld [vmem:[#allocation3 + $0x158] sm:$0xff] }
 0x6d3   :  { %v5665_v57 = vpack.c.bf16 %v19171_v35, %v19169_v29  ;;  %v16987_v37 = vpack.c.bf16 %v5494_v31, %v5493_v44  ;;  %v5502_v47 = vld [vmem:[#allocation3 + $0x140] sm:$0xff]  ;;  %v5503_v3 = vld [vmem:[#allocation3 + $0x150] sm:$0xff]  ;;  %v5505_v8 = vld [vmem:[#allocation3 + $0x168] sm:$0xff] }
 0x6d4   :  { %12542 = vmatmul.mubr.bf16.gmra.mrb[8].mxu1 %v5656_v27  ;;  %v17002_v14 = vpack.c.bf16 %v5504_v12, %v5503_v3  ;;  %v5506_v55 = vld [vmem:[#allocation3 + $0x170] sm:$0xff]  ;;  %v5511_v29 = vld [vmem:[#allocation3 + $0x1e0] sm:$0xff]  ;;  %v5512_v5 = vld [vmem:[#allocation3 + $0x1e8] sm:$0xff] }
 0x6d5   :  { %12545 = vmatprep.mubr.bf16.mxu1 %v5657_v56  ;;  %12606 = vmatpush3.bf16.msra.mxu1 %v14378_v1  ;;  %v5488_v1 = vld [vmem:[#allocation3 + $0x98] sm:$0xff]  ;;  %v5491_v56 = vld [vmem:[#allocation3 + $0xc0] sm:$0xff]  ;;  %v17006_v6 = vpack.c.bf16 %v5506_v55, %v5505_v8  ;;  %v5510_v4 = vld [vmem:[#allocation3 + $0x1d0] sm:$0xff] }
 0x6d6   :  { %12607 = vmatprep.subr.bf16.mxu1 %v14379_v18  ;;  %v16966_v27 = vpack.c.bf16 %v5488_v1, %v5487_v52  ;;  %v5513_v21 = vld [vmem:[#allocation3 + $0x1f8] sm:$0xff]  ;;  %v5514_v16 = vld [vmem:[#allocation3 + $0x200] sm:$0xff]  ;;  %v5525_v53 = vld [vmem:[#allocation3 + $0x288] sm:$0xff] }
 0x6d7   :  { %v5526_v52 = vld [vmem:[#allocation3 + $0x290] sm:$0xff]  ;;  %v5527_v1 = vld [vmem:[#allocation3 + $0x2a0] sm:$0xff]  ;;  %v5529_v19 = vld [vmem:[#allocation3 + $0x2b8] sm:$0xff] }
 0x6d8   :  { %v5537_v3 = vld [vmem:[#allocation3 + $0x318] sm:$0xff]  ;;  %v5538_v12 = vld [vmem:[#allocation3 + $0x320] sm:$0xff] }
 0x6d9   :  { %12608 = vmatpush3.bf16.msra.mxu1 %v14379_v18  ;;  %v14388_v18 = vld [vmem:[%s18855_s4 + $0xb0] sm:$0xff]   ;;  %v17052_v55 = vpack.c.bf16 %v5538_v12, %v5537_v3  ;;  %v17104_v3 = vld [vmem:[%s18855_s4 + $0x100] sm:$0xff]  }
 0x6da   :  { %12609 = vmatprep.subr.bf16.mxu1 %v14380_v49  ;;  %v6392_v12 = vld [vmem:[#allocation3 + $0xda] sm:$0xff] }
 0x6dc   :  { %12546 = vmatmul.mubr.bf16.gmra.mrb[12].mxu1 %v5658_v36 }
 0x6dd   :  { %12549 = vmatprep.mubr.bf16.mxu1 %v5659_v28  ;;  %12610 = vmatpush3.bf16.msra.mxu1 %v14380_v49  ;;  %v5492_v49 = vld [vmem:[#allocation3 + $0xc8] sm:$0xff]  ;;  %v5495_v28 = vld [vmem:[#allocation3 + $0xf0] sm:$0xff] }
 0x6de   :  { %12611 = vmatprep.subr.bf16.mxu1 %v14381_v9  ;;  %v16978_v36 = vpack.c.bf16 %v5492_v49, %v5491_v56  ;;  %v5530_v56 = vld [vmem:[#allocation3 + $0x2c0] sm:$0xff]  ;;  %v5531_v49 = vld [vmem:[#allocation3 + $0x2d0] sm:$0xff] }
 0x6df   :  { %v17040_v44 = vpack.c.bf16 %v5530_v56, %v5529_v19  ;;  %v14395_v19 = vld [vmem:[%s18855_s4 + $0xe8] sm:$0xff]  }
 0x6e1   :  { %12612 = vmatpush3.bf16.msra.mxu1 %v14381_v9  ;;  %v16985_v9 = vld [vmem:[%s18855_s4 + $0xc0] sm:$0xff]  }
 0x6e2   :  { %12677 = vmatprep.subr.bf16.mxu1 %v14382_v46 }
 0x6e4   :  { %12550 = vmatmul.mubr.bf16.gmra.mrb[16].mxu1 %v5660_v7  ;;  %v5497_v7 = vld [vmem:[#allocation3 + $0x108] sm:$0xff] }
 0x6e5   :  { %12553 = vmatprep.mubr.bf16.mxu1 %v5661_v62  ;;  %v5500_v62 = vld [vmem:[#allocation3 + $0x128] sm:$0xff]  ;;  %v16994_v2 = vpack.c.bf16 %v5498_v39, %v5497_v7  ;;  %v5535_v7 = vld [vmem:[#allocation3 + $0x300] sm:$0xff] }
 0x6e6   :  { %v16996_v59 = vpack.c.bf16 %v5500_v62, %v5499_v24  ;;  %v5536_v39 = vld [vmem:[#allocation3 + $0x308] sm:$0xff] }
 0x6e7   :  { %v17048_v62 = vpack.c.bf16 %v5536_v39, %v5535_v7  ;;  %v6391_v7 = vld [vmem:[#allocation3 + $0xca] sm:$0xff] }
 0x6ec   :  { %12554 = vmatmul.mubr.bf16.gmra.mrb[20].mxu1 %v5662_v38  ;;  %v5501_v38 = vld [vmem:[#allocation3 + $0x138] sm:$0xff] }
 0x6ed   :  { %12557 = vmatprep.mubr.bf16.mxu1 %v5663_v33  ;;  %v17000_v33 = vpack.c.bf16 %v5502_v47, %v5501_v38  ;;  %v6374_v38 = vld [vmem:[#allocation3 + $0x2] sm:$0xff]  ;;  %v6375_v47 = vld [vmem:[#allocation3 + $0xa] sm:$0xff] }
 0x6ee   :  { %v6438_v8 = vpack.c.bf16 %v6375_v47, %v6374_v38  ;;  %v14397_v38 = vld [vmem:[%s18855_s4 + $0xf8] sm:$0xff]  }
 0x6f4   :  { %12558 = vmatmul.mubr.bf16.gmra.mrb[24].mxu1 %v5664_v13  ;;  %v5509_v13 = vld [vmem:[#allocation3 + $0x1c8] sm:$0xff] }
 0x6f5   :  { %12561 = vmatprep.mubr.bf16.mxu1 %v5665_v57  ;;  %v17010_v35 = vpack.c.bf16 %v5510_v4, %v5509_v13  ;;  %v17012_v57 = vpack.c.bf16 %v5512_v5, %v5511_v29  ;;  %v6376_v13 = vld [vmem:[#allocation3 + $0x1a] sm:$0xff]  ;;  %v6377_v4 = vld [vmem:[#allocation3 + $0x22] sm:$0xff]  ;;  %v6378_v29 = vld [vmem:[#allocation3 + $0x32] sm:$0xff] }
 0x6f6   :  { %v6379_v5 = vld [vmem:[#allocation3 + $0x3a] sm:$0xff] }
 0x6fc   :  { %12562 = vmatmul.mubr.bf16.gmra.mrb[28].mxu1 %v16799_v32  ;;  %v14444_v32 = vld [vmem:[#allocation2] sm:$0xff] }
 0x6fd   :  { %12565 = vmatprep.mubr.bf16.mxu1 %v5667_v40  ;;  %v5515_v40 = vld [vmem:[#allocation3 + $0x210] sm:$0xff] }
 0x704   :  { %12566 = vmatmul.mubr.bf16.gmra.mrb[32].mxu1 %v16808_v10  ;;  %v16933_v10 = vpack.c.bf16 %v14444_v32, %v14444_v32  ;;  %v5516_v32 = vld [vmem:[#allocation3 + $0x218] sm:$0xff] }
 0x705   :  { %12569 = vmatprep.mubr.bf16.mxu1 %v16814_v51  ;;  %v5477_v51 = vld [vmem:[#allocation3 + $0x18] sm:$0xff] }
 0x70c   :  { %12570 = vmatmul.mubr.bf16.gmra.mrb[36].mxu1 %v16820_v25  ;;  %v5478_v25 = vld [vmem:[#allocation3 + $0x20] sm:$0xff] }
 0x70d   :  { %12573 = vmatprep.mubr.bf16.mxu1 %v16826_v0  ;;  %v5479_v0 = vld [vmem:[#allocation3 + $0x30] sm:$0xff] }
 0x714   :  { %12574 = vmatmul.mubr.bf16.gmra.mrb[40].mxu1 %v16832_v34  ;;  %v5480_v34 = vld [vmem:[#allocation3 + $0x38] sm:$0xff] }
 0x715   :  { %12577 = vmatprep.mubr.bf16.mxu1 %v16836_v26  ;;  %v16937_v26 = vpack.c.bf16 %v5478_v25, %v5477_v51  ;;  %v17016_v51 = vpack.c.bf16 %v5514_v16, %v5513_v21  ;;  %v17018_v25 = vpack.c.bf16 %v5516_v32, %v5515_v40  ;;  %v17055_v21 = vpack.c.bf16 %v6377_v4, %v6376_v13  ;;  %v14391_v16 = vld [vmem:[%s18855_s4 + $0xc8] sm:$0xff]   ;;  %v14392_v32 = vld [vmem:[%s18855_s4 + $0xd0] sm:$0xff]   ;;  %v6395_v4 = vld [vmem:[#allocation3 + $0xfa] sm:$0xff] }
 0x716   :  { %v17060_v40 = vpack.c.bf16 %v6379_v5, %v6378_v29  ;;  %v6394_v13 = vld [vmem:[#allocation3 + $0xf2] sm:$0xff] }
 0x717   :  { %v17109_v5 = vpack.c.bf16 %v6395_v4, %v6394_v13  ;;  %v6411_v13 = vld [vmem:[#allocation3 + $0x1ea] sm:$0xff] }
 0x71c   :  { %12578 = vmatmul.mubr.bf16.gmra.mrb[44].mxu1 %v16838_v42  ;;  %v14383_v42 = vld [vmem:[%s18855_s4 + $0x88] sm:$0xff]  }
 0x71d   :  { %12581 = vmatprep.mubr.bf16.mxu1 %v16840_v15  ;;  %v16942_v15 = vpack.c.bf16 %v5480_v34, %v5479_v0  ;;  %v5518_v0 = vld [vmem:[#allocation3 + $0x230] sm:$0xff]  ;;  %v5519_v34 = vld [vmem:[#allocation3 + $0x240] sm:$0xff] }
 0x724   :  { %12582 = vmatmul.mubr.bf16.gmra.mrb[48].mxu1 %v16842_v48  ;;  %v14384_v48 = vld [vmem:[%s18855_s4 + $0x90] sm:$0xff]  }
 0x725   :  { %12585 = vmatprep.mubr.bf16.mxu1 %v16844_v60  ;;  %v5481_v60 = vld [vmem:[#allocation3 + $0x48] sm:$0xff] }
 0x72c   :  { %12586 = vmatmul.mubr.bf16.gmra.mrb[52].mxu1 %v16846_v45  ;;  %v5482_v45 = vld [vmem:[#allocation3 + $0x50] sm:$0xff] }
 0x72d   :  { %12589 = vmatprep.mubr.bf16.mxu1 %v16848_v17  ;;  %v5483_v17 = vld [vmem:[#allocation3 + $0x60] sm:$0xff] }
 0x734   :  { %12590 = vmatmul.mubr.bf16.gmra.mrb[56].mxu1 %v5680_v63  ;;  %v5484_v63 = vld [vmem:[#allocation3 + $0x68] sm:$0xff] }
 0x735   :  { %12593 = vmatprep.mubr.bf16.mxu1 %v5681_v54  ;;  %v16949_v54 = vpack.c.bf16 %v5482_v45, %v5481_v60  ;;  %v16954_v50 = vpack.c.bf16 %v5484_v63, %v5483_v17  ;;  %v5521_v45 = vld [vmem:[#allocation3 + $0x258] sm:$0xff]  ;;  %v5522_v17 = vld [vmem:[#allocation3 + $0x260] sm:$0xff]  ;;  %v5523_v63 = vld [vmem:[#allocation3 + $0x270] sm:$0xff] }
 0x73c   :  { %12594 = vmatmul.mubr.bf16.gmra.mrb[60].mxu1 %v16852_v41  ;;  %v14385_v41 = vld [vmem:[%s18855_s4 + $0x98] sm:$0xff]  }
 0x73d   :  { %12613 = vmatprep.mubr.bf16.mxu1 %v16933_v10 }
 0x744   :  { %12614 = vmatmul.mubr.bf16.vlgmr.msra.gmra.mrb[0].mxu1 %v16937_v26 }
 0x745   :  { %12617 = vmatprep.mubr.bf16.mxu1 %v16942_v15  ;;  %12678 = vmatpush3.bf16.msra.mxu1 %v14382_v46  ;;  %v5496_v46 = vld [vmem:[#allocation3 + $0xf8] sm:$0xff] }
 0x746   :  { %12679 = vmatprep.subr.bf16.mxu1 %v14383_v42  ;;  %v16990_v11 = vpack.c.bf16 %v5496_v46, %v5495_v28  ;;  %v5533_v28 = vld [vmem:[#allocation3 + $0x2e8] sm:$0xff]  ;;  %v5534_v46 = vld [vmem:[#allocation3 + $0x2f0] sm:$0xff] }
 0x747   :  { %v17046_v24 = vpack.c.bf16 %v5534_v46, %v5533_v28  ;;  %v6389_v28 = vld [vmem:[#allocation3 + $0xb2] sm:$0xff]  ;;  %v6390_v46 = vld [vmem:[#allocation3 + $0xc2] sm:$0xff] }
 0x748   :  { %v17097_v47 = vpack.c.bf16 %v6391_v7, %v6390_v46 }
 0x749   :  { %12680 = vmatpush3.bf16.msra.mxu1 %v14383_v42  ;;  %v5520_v42 = vld [vmem:[#allocation3 + $0x248] sm:$0xff] }
 0x74a   :  { %12681 = vmatprep.subr.bf16.mxu1 %v14384_v48  ;;  %v17024_v60 = vpack.c.bf16 %v5520_v42, %v5519_v34  ;;  %v6382_v34 = vld [vmem:[#allocation3 + $0x62] sm:$0xff]  ;;  %v6383_v42 = vld [vmem:[#allocation3 + $0x6a] sm:$0xff] }
 0x74c   :  { %12618 = vmatmul.mubr.bf16.gmra.mrb[4].mxu1 %v16949_v54 }
 0x74d   :  { %12621 = vmatprep.mubr.bf16.mxu1 %v16954_v50  ;;  %12682 = vmatpush3.bf16.msra.mxu1 %v14384_v48 }
 0x74e   :  { %12683 = vmatprep.subr.bf16.mxu1 %v14385_v41 }
 0x751   :  { %12684 = vmatpush3.bf16.msra.mxu1 %v14385_v41  ;;  %v5524_v41 = vld [vmem:[#allocation3 + $0x278] sm:$0xff] }
 0x752   :  { %12685 = vmatprep.subr.bf16.mxu1 %v14386_v20  ;;  %v17030_v43 = vpack.c.bf16 %v5524_v41, %v5523_v63  ;;  %v17073_v63 = vpack.c.bf16 %v6383_v42, %v6382_v34  ;;  %v6384_v41 = vld [vmem:[#allocation3 + $0x7a] sm:$0xff] }
 0x754   :  { %12622 = vmatmul.mubr.bf16.gmra.mrb[8].mxu1 %v16961_v30 }
 0x755   :  { %12625 = vmatprep.mubr.bf16.mxu1 %v16966_v27  ;;  %12686 = vmatpush3.bf16.msra.mxu1 %v14386_v20  ;;  %v17028_v20 = vpack.c.bf16 %v5522_v17, %v5521_v45  ;;  %v14393_v17 = vld [vmem:[%s18855_s4 + $0xd8] sm:$0xff]  }
 0x756   :  { %12687 = vmatprep.subr.bf16.mxu1 %v14387_v58 }
 0x759   :  { %12688 = vmatpush3.bf16.msra.mxu1 %v14387_v58  ;;  %v5528_v58 = vld [vmem:[#allocation3 + $0x2a8] sm:$0xff] }
 0x75a   :  { %12689 = vmatprep.subr.bf16.mxu1 %v14388_v18  ;;  %v17036_v23 = vpack.c.bf16 %v5528_v58, %v5527_v1  ;;  %v6387_v1 = vld [vmem:[#allocation3 + $0x9a] sm:$0xff] }
 0x75c   :  { %12626 = vmatmul.mubr.bf16.gmra.mrb[12].mxu1 %v16973_v22 }
 0x75d   :  { %12629 = vmatprep.mubr.bf16.mxu1 %v16978_v36  ;;  %12690 = vmatpush3.bf16.msra.mxu1 %v14388_v18  ;;  %v17034_v18 = vpack.c.bf16 %v5526_v52, %v5525_v53  ;;  %v6385_v53 = vld [vmem:[#allocation3 + $0x82] sm:$0xff]  ;;  %v6386_v52 = vld [vmem:[#allocation3 + $0x92] sm:$0xff] }
 0x75e   :  { %12691 = vmatprep.subr.bf16.mxu1 %v14389_v61  ;;  %v17080_v58 = vpack.c.bf16 %v6385_v53, %v6384_v41  ;;  %v17085_v56 = vpack.c.bf16 %v6387_v1, %v6386_v52  ;;  %v6402_v41 = vld [vmem:[#allocation3 + $0x152] sm:$0xff]  ;;  %v6403_v53 = vld [vmem:[#allocation3 + $0x15a] sm:$0xff] }
 0x75f   :  { %v17121_v1 = vpack.c.bf16 %v6403_v53, %v6402_v41  ;;  %v6416_v53 = vld [vmem:[#allocation3 + $0x22a] sm:$0xff] }
 0x761   :  { %12692 = vmatpush3.bf16.msra.mxu1 %v14389_v61  ;;  %v5532_v61 = vld [vmem:[#allocation3 + $0x2d8] sm:$0xff] }
 0x762   :  { %12757 = vmatprep.subr.bf16.mxu1 %v16985_v9  ;;  %v17042_v31 = vpack.c.bf16 %v5532_v61, %v5531_v49  ;;  %v14396_v49 = vld [vmem:[%s18855_s4 + $0xf0] sm:$0xff]  }
 0x763   :  { %v6388_v61 = vld [vmem:[#allocation3 + $0xaa] sm:$0xff] }
 0x764   :  { %12630 = vmatmul.mubr.bf16.gmra.mrb[16].mxu1 %v16987_v37  ;;  %v17092_v39 = vpack.c.bf16 %v6389_v28, %v6388_v61  ;;  %v6404_v61 = vld [vmem:[#allocation3 + $0x16a] sm:$0xff]  ;;  %v6405_v28 = vld [vmem:[#allocation3 + $0x172] sm:$0xff] }
 0x765   :  { %12633 = vmatprep.mubr.bf16.mxu1 %v16990_v11  ;;  %v17125_v7 = vpack.c.bf16 %v6405_v28, %v6404_v61  ;;  %v6419_v61 = vld [vmem:[#allocation3 + $0x24a] sm:$0xff] }
 0x76c   :  { %12634 = vmatmul.mubr.bf16.gmra.mrb[20].mxu1 %v16994_v2 }
 0x76d   :  { %12637 = vmatprep.mubr.bf16.mxu1 %v16996_v59 }
 0x774   :  { %12638 = vmatmul.mubr.bf16.gmra.mrb[24].mxu1 %v17000_v33 }
 0x775   :  { %12641 = vmatprep.mubr.bf16.mxu1 %v17002_v14 }
 0x77c   :  { %12642 = vmatmul.mubr.bf16.gmra.mrb[28].mxu1 %v17006_v6 }
 0x77d   :  { %12645 = vmatprep.mubr.bf16.mxu1 %v16933_v10  ;;  %v5517_v10 = vld [vmem:[#allocation3 + $0x228] sm:$0xff] }
 0x77e   :  { %v17022_v48 = vpack.c.bf16 %v5518_v0, %v5517_v10  ;;  %v6380_v10 = vld [vmem:[#allocation3 + $0x4a] sm:$0xff]  ;;  %v6381_v0 = vld [vmem:[#allocation3 + $0x52] sm:$0xff] }
 0x77f   :  { %v17068_v45 = vpack.c.bf16 %v6381_v0, %v6380_v10  ;;  %v6398_v10 = vld [vmem:[#allocation3 + $0x122] sm:$0xff]  ;;  %v6399_v0 = vld [vmem:[#allocation3 + $0x12a] sm:$0xff] }
 0x780   :  { %v17115_v42 = vpack.c.bf16 %v6399_v0, %v6398_v10  ;;  %v6413_v10 = vld [vmem:[#allocation3 + $0x202] sm:$0xff]  ;;  %v6414_v0 = vld [vmem:[#allocation3 + $0x212] sm:$0xff] }
 0x784   :  { %12646 = vmatmul.mubr.bf16.gmra.mrb[32].mxu1 %v17010_v35 }
 0x785   :  { %12649 = vmatprep.mubr.bf16.mxu1 %v17012_v57 }
 0x78c   :  { %12650 = vmatmul.mubr.bf16.gmra.mrb[36].mxu1 %v17016_v51 }
 0x78d   :  { %12653 = vmatprep.mubr.bf16.mxu1 %v17018_v25 }
 0x794   :  { %12654 = vmatmul.mubr.bf16.gmra.mrb[40].mxu1 %v17022_v48 }
 0x795   :  { %12657 = vmatprep.mubr.bf16.mxu1 %v17024_v60 }
 0x79c   :  { %12658 = vmatmul.mubr.bf16.gmra.mrb[44].mxu1 %v17028_v20 }
 0x79d   :  { %12661 = vmatprep.mubr.bf16.mxu1 %v17030_v43 }
 0x7a4   :  { %12662 = vmatmul.mubr.bf16.gmra.mrb[48].mxu1 %v17034_v18 }
 0x7a5   :  { %12665 = vmatprep.mubr.bf16.mxu1 %v17036_v23 }
 0x7ac   :  { %12666 = vmatmul.mubr.bf16.gmra.mrb[52].mxu1 %v17040_v44 }
 0x7ad   :  { %12669 = vmatprep.mubr.bf16.mxu1 %v17042_v31 }
 0x7b4   :  { %12670 = vmatmul.mubr.bf16.gmra.mrb[56].mxu1 %v17046_v24 }
 0x7b5   :  { %12673 = vmatprep.mubr.bf16.mxu1 %v17048_v62 }
 0x7bc   :  { %12674 = vmatmul.mubr.bf16.gmra.mrb[60].mxu1 %v17052_v55 }
 0x7bd   :  { %12693 = vmatprep.mubr.bf16.mxu1 %v6438_v8  ;;  %v6393_v8 = vld [vmem:[#allocation3 + $0xe2] sm:$0xff] }
 0x7be   :  { %v17106_v29 = vpack.c.bf16 %v6393_v8, %v6392_v12  ;;  %v6409_v12 = vld [vmem:[#allocation3 + $0x1d2] sm:$0xff]  ;;  %v6410_v8 = vld [vmem:[#allocation3 + $0x1e2] sm:$0xff] }
 0x7c4   :  { %12694 = vmatmul.mubr.bf16.vlgmr.msra.gmra.mrb[0].mxu1 %v17055_v21 }
 0x7c5   :  { %12697 = vmatprep.mubr.bf16.mxu1 %v17060_v40  ;;  %12758 = vmatpush3.bf16.msra.mxu1 %v16985_v9  ;;  %v14394_v9 = vld [vmem:[%s18855_s4 + $0xe0] sm:$0xff]  }
 0x7c6   :  { %12759 = vmatprep.subr.bf16.mxu1 %v14391_v16 }
 0x7c9   :  { %12760 = vmatpush3.bf16.msra.mxu1 %v14391_v16  ;;  %v6396_v16 = vld [vmem:[#allocation3 + $0x10a] sm:$0xff] }
 0x7ca   :  { %12761 = vmatprep.subr.bf16.mxu1 %v14392_v32 }
 0x7cc   :  { %12698 = vmatmul.mubr.bf16.gmra.mrb[4].mxu1 %v17068_v45 }
 0x7cd   :  { %12701 = vmatprep.mubr.bf16.mxu1 %v17073_v63  ;;  %12762 = vmatpush3.bf16.msra.mxu1 %v14392_v32  ;;  %v6397_v32 = vld [vmem:[#allocation3 + $0x112] sm:$0xff] }
 0x7ce   :  { %12763 = vmatprep.subr.bf16.mxu1 %v14393_v17  ;;  %v17113_v34 = vpack.c.bf16 %v6397_v32, %v6396_v16  ;;  %v17130_v16 = vpack.c.bf16 %v6411_v13, %v6410_v8  ;;  %v6412_v32 = vld [vmem:[#allocation3 + $0x1fa] sm:$0xff]  ;;  %v6422_v8 = vld [vmem:[#allocation3 + $0x272] sm:$0xff] }
 0x7cf   :  { %v6423_v13 = vld [vmem:[#allocation3 + $0x27a] sm:$0xff] }
 0x7d1   :  { %12764 = vmatpush3.bf16.msra.mxu1 %v14393_v17  ;;  %v6400_v17 = vld [vmem:[#allocation3 + $0x13a] sm:$0xff] }
 0x7d2   :  { %12765 = vmatprep.subr.bf16.mxu1 %v14394_v9 }
 0x7d4   :  { %12702 = vmatmul.mubr.bf16.gmra.mrb[8].mxu1 %v17080_v58 }
 0x7d5   :  { %12705 = vmatprep.mubr.bf16.mxu1 %v17085_v56  ;;  %12766 = vmatpush3.bf16.msra.mxu1 %v14394_v9  ;;  %v6401_v9 = vld [vmem:[#allocation3 + $0x142] sm:$0xff] }
 0x7d6   :  { %12767 = vmatprep.subr.bf16.mxu1 %v14395_v19  ;;  %v17119_v52 = vpack.c.bf16 %v6401_v9, %v6400_v17  ;;  %v6415_v17 = vld [vmem:[#allocation3 + $0x21a] sm:$0xff]  ;;  %v17134_v9 = vpack.c.bf16 %v6413_v10, %v6412_v32  ;;  %v17148_v10 = vpack.c.bf16 %v6423_v13, %v6422_v8  ;;  %v6430_v8 = vld [vmem:[#allocation3 + $0x2d2] sm:$0xff] }
 0x7d7   :  { %v17136_v41 = vpack.c.bf16 %v6415_v17, %v6414_v0  ;;  %v6424_v0 = vld [vmem:[#allocation3 + $0x28a] sm:$0xff]  ;;  %v6425_v17 = vld [vmem:[#allocation3 + $0x292] sm:$0xff]  ;;  %v6431_v13 = vld [vmem:[#allocation3 + $0x2da] sm:$0xff] }
 0x7d8   :  { %19174 = vst [vmem:[#allocation18_spill] sm:$0xff] %v17148_v10 }
 0x7d9   :  { %12768 = vmatpush3.bf16.msra.mxu1 %v14395_v19  ;;  %v6406_v19 = vld [vmem:[#allocation3 + $0x1b2] sm:$0xff] }
 0x7da   :  { %12769 = vmatprep.subr.bf16.mxu1 %v14396_v49 }
 0x7dc   :  { %12706 = vmatmul.mubr.bf16.gmra.mrb[12].mxu1 %v17092_v39 }
 0x7dd   :  { %12709 = vmatprep.mubr.bf16.mxu1 %v17097_v47  ;;  %12770 = vmatpush3.bf16.msra.mxu1 %v14396_v49  ;;  %v6407_v49 = vld [vmem:[#allocation3 + $0x1ba] sm:$0xff] }
 0x7de   :  { %12771 = vmatprep.subr.bf16.mxu1 %v14397_v38  ;;  %v6454_v46 = vpack.c.bf16 %v6407_v49, %v6406_v19  ;;  %v6417_v19 = vld [vmem:[#allocation3 + $0x232] sm:$0xff]  ;;  %v6418_v49 = vld [vmem:[#allocation3 + $0x242] sm:$0xff] }
 0x7df   :  { %v17140_v28 = vpack.c.bf16 %v6417_v19, %v6416_v53  ;;  %v6426_v53 = vld [vmem:[#allocation3 + $0x2a2] sm:$0xff]  ;;  %v6427_v19 = vld [vmem:[#allocation3 + $0x2aa] sm:$0xff] }
 0x7e1   :  { %12772 = vmatpush3.bf16.msra.mxu1 %v14397_v38  ;;  %v6408_v38 = vld [vmem:[#allocation3 + $0x1ca] sm:$0xff] }
 0x7e2   :  { %12837 = vmatprep.subr.bf16.mxu1 %v17104_v3  ;;  %v17128_v4 = vpack.c.bf16 %v6409_v12, %v6408_v38  ;;  %v6420_v38 = vld [vmem:[#allocation3 + $0x25a] sm:$0xff]  ;;  %v6421_v12 = vld [vmem:[#allocation3 + $0x262] sm:$0xff] }
 0x7e3   :  { %v17146_v32 = vpack.c.bf16 %v6421_v12, %v6420_v38  ;;  %v6428_v38 = vld [vmem:[#allocation3 + $0x2ba] sm:$0xff]  ;;  %v6429_v12 = vld [vmem:[#allocation3 + $0x2c2] sm:$0xff] }
 0x7e4   :  { %12710 = vmatmul.mubr.bf16.gmra.mrb[16].mxu1 %v17106_v29 }
 0x7e5   :  { %12713 = vmatprep.mubr.bf16.mxu1 %v17109_v5  ;;  %19173 = vst [vmem:[#allocation17_spill] sm:$0xff] %v17146_v32 }
 0x7ec   :  { %12714 = vmatmul.mubr.bf16.gmra.mrb[20].mxu1 %v17113_v34 }
 0x7ed   :  { %12717 = vmatprep.mubr.bf16.mxu1 %v17115_v42 }
 0x7f4   :  { %12718 = vmatmul.mubr.bf16.gmra.mrb[24].mxu1 %v17119_v52 }
 0x7f5   :  { %12721 = vmatprep.mubr.bf16.mxu1 %v17121_v1 }
 0x7fc   :  { %12722 = vmatmul.mubr.bf16.gmra.mrb[28].mxu1 %v17125_v7 }
 0x7fd   :  { %12725 = vmatprep.mubr.bf16.mxu1 %v6454_v46  ;;  %v17142_v46 = vpack.c.bf16 %v6419_v61, %v6418_v49  ;;  %v17152_v49 = vpack.c.bf16 %v6425_v17, %v6424_v0  ;;  %v17154_v61 = vpack.c.bf16 %v6427_v19, %v6426_v53  ;;  %v6432_v0 = vld [vmem:[#allocation3 + $0x2ea] sm:$0xff]  ;;  %v6433_v17 = vld [vmem:[#allocation3 + $0x2f2] sm:$0xff]  ;;  %v6434_v53 = vld [vmem:[#allocation3 + $0x302] sm:$0xff] }
 0x7fe   :  { %v6435_v19 = vld [vmem:[#allocation3 + $0x30a] sm:$0xff] }
 0x7ff   :  { %19172 = vst [vmem:[#allocation25_spill] sm:$0xff] %v17142_v46  ;;  %19175 = vst [vmem:[#allocation19_spill] sm:$0xff] %v17152_v49 }
 0x804   :  { %12726 = vmatmul.mubr.bf16.gmra.mrb[32].mxu1 %v17128_v4 }
 0x805   :  { %12729 = vmatprep.mubr.bf16.mxu1 %v17130_v16 }
 0x80c   :  { %12730 = vmatmul.mubr.bf16.gmra.mrb[36].mxu1 %v17134_v9 }
 0x80d   :  { %12733 = vmatprep.mubr.bf16.mxu1 %v17136_v41 }
 0x814   :  { %12734 = vmatmul.mubr.bf16.gmra.mrb[40].mxu1 %v17140_v28 }
 0x815   :  { %12737 = vmatprep.mubr.bf16.mxu1 %v17142_v46  ;;  %v17158_v46 = vpack.c.bf16 %v6429_v12, %v6428_v38  ;;  %v6436_v38 = vld [vmem:[#allocation3 + $0x31a] sm:$0xff]  ;;  %v6437_v12 = vld [vmem:[#allocation3 + $0x322] sm:$0xff] }
 0x81c   :  { %12738 = vmatmul.mubr.bf16.gmra.mrb[44].mxu1 %v17146_v32  ;;  %v17160_v32 = vpack.c.bf16 %v6431_v13, %v6430_v8  ;;  %v17170_v8 = vpack.c.bf16 %v6437_v12, %v6436_v38  ;;  %v14399_v13 = vld [vmem:[%s18855_s4 + $0x108] sm:$0xff]   ;;  %v7415_v38 = vld [vmem:[#allocation3 + $0xb1] sm:$0xff] }
 0x81d   :  { %12741 = vmatprep.mubr.bf16.mxu1 %v17148_v10  ;;  %v17164_v10 = vpack.c.bf16 %v6433_v17, %v6432_v0  ;;  %v14400_v0 = vld [vmem:[%s18855_s4 + $0x110] sm:$0xff]  }
 0x81e   :  { %v7412_v17 = vld [vmem:[#allocation3 + $0x91] sm:$0xff] }
 0x824   :  { %12742 = vmatmul.mubr.bf16.gmra.mrb[48].mxu1 %v17152_v49  ;;  %v17166_v49 = vpack.c.bf16 %v6435_v19, %v6434_v53  ;;  %v7413_v53 = vld [vmem:[#allocation3 + $0x99] sm:$0xff]  ;;  %v7414_v19 = vld [vmem:[#allocation3 + $0xa9] sm:$0xff] }
 0x825   :  { %12745 = vmatprep.mubr.bf16.mxu1 %v17154_v61  ;;  %v17258_v12 = vpack.c.bf16 %v7413_v53, %v7412_v17 }
 0x82c   :  { %12746 = vmatmul.mubr.bf16.gmra.mrb[52].mxu1 %v17158_v46 }
 0x82d   :  { %12749 = vmatprep.mubr.bf16.mxu1 %v17160_v32 }
 0x834   :  { %12750 = vmatmul.mubr.bf16.gmra.mrb[56].mxu1 %v17164_v10 }
 0x835   :  { %12753 = vmatprep.mubr.bf16.mxu1 %v17166_v49 }
 0x83c   :  { %12754 = vmatmul.mubr.bf16.gmra.mrb[60].mxu1 %v17170_v8 }
 0x83d   :  { %12773 = vmatprep.mubr.bf16.mxu1 %v16937_v26  ;;  %v14401_v26 = vld [vmem:[%s18855_s4 + $0x118] sm:$0xff]  }
 0x844   :  { %12774 = vmatmul.mubr.bf16.vlgmr.msra.gmra.mrb[0].mxu1 %v16942_v15  ;;  %v14402_v15 = vld [vmem:[%s18855_s4 + $0x120] sm:$0xff]  }
 0x845   :  { %12777 = vmatprep.mubr.bf16.mxu1 %v16949_v54  ;;  %12838 = vmatpush3.bf16.msra.mxu1 %v17104_v3  ;;  %v14403_v54 = vld [vmem:[%s18855_s4 + $0x128] sm:$0xff]   ;;  %v14410_v3 = vld [vmem:[%s18855_s4 + $0x160] sm:$0xff]  }
 0x846   :  { %12839 = vmatprep.subr.bf16.mxu1 %v14399_v13 }
 0x849   :  { %12840 = vmatpush3.bf16.msra.mxu1 %v14399_v13  ;;  %v14411_v13 = vld [vmem:[%s18855_s4 + $0x168] sm:$0xff]  }
 0x84a   :  { %12841 = vmatprep.subr.bf16.mxu1 %v14400_v0 }
 0x84c   :  { %12778 = vmatmul.mubr.bf16.gmra.mrb[4].mxu1 %v16954_v50  ;;  %v14404_v50 = vld [vmem:[%s18855_s4 + $0x130] sm:$0xff]  }
 0x84d   :  { %12781 = vmatprep.mubr.bf16.mxu1 %v16961_v30  ;;  %12842 = vmatpush3.bf16.msra.mxu1 %v14400_v0  ;;  %v14405_v30 = vld [vmem:[%s18855_s4 + $0x138] sm:$0xff]   ;;  %v17263_v0 = vpack.c.bf16 %v7415_v38, %v7414_v19  ;;  %v7432_v19 = vld [vmem:[#allocation3 + $0x181] sm:$0xff]  ;;  %v7433_v38 = vld [vmem:[#allocation3 + $0x189] sm:$0xff] }
 0x84e   :  { %12843 = vmatprep.subr.bf16.mxu1 %v14401_v26 }
 0x851   :  { %12844 = vmatpush3.bf16.msra.mxu1 %v14401_v26  ;;  %v14412_v26 = vld [vmem:[%s18855_s4 + $0x170] sm:$0xff]  }
 0x852   :  { %12845 = vmatprep.subr.bf16.mxu1 %v14402_v15 }
 0x854   :  { %12782 = vmatmul.mubr.bf16.gmra.mrb[8].mxu1 %v16966_v27  ;;  %v14406_v27 = vld [vmem:[%s18855_s4 + $0x140] sm:$0xff]  }
 0x855   :  { %12785 = vmatprep.mubr.bf16.mxu1 %v16973_v22  ;;  %12846 = vmatpush3.bf16.msra.mxu1 %v14402_v15  ;;  %v6918_v22 = vld [vmem:[#allocation3 + $0x180] sm:$0xff] }
 0x856   :  { %12847 = vmatprep.subr.bf16.mxu1 %v14403_v54  ;;  %v7416_v15 = vld [vmem:[#allocation3 + $0xc1] sm:$0xff] }
 0x859   :  { %12848 = vmatpush3.bf16.msra.mxu1 %v14403_v54  ;;  %v7417_v54 = vld [vmem:[#allocation3 + $0xc9] sm:$0xff] }
 0x85a   :  { %12849 = vmatprep.subr.bf16.mxu1 %v14404_v50 }
 0x85c   :  { %12786 = vmatmul.mubr.bf16.gmra.mrb[12].mxu1 %v16978_v36  ;;  %v6919_v36 = vld [vmem:[#allocation3 + $0x188] sm:$0xff] }
 0x85d   :  { %12789 = vmatprep.mubr.bf16.mxu1 %v16987_v37  ;;  %12850 = vmatpush3.bf16.msra.mxu1 %v14404_v50  ;;  %v17213_v37 = vpack.c.bf16 %v6919_v36, %v6918_v22  ;;  %v7418_v50 = vld [vmem:[#allocation3 + $0xd9] sm:$0xff] }
 0x85e   :  { %12851 = vmatprep.subr.bf16.mxu1 %v14405_v30  ;;  %v14413_v22 = vld [vmem:[%s18855_s4 + $0x178] sm:$0xff]  }
 0x861   :  { %12852 = vmatpush3.bf16.msra.mxu1 %v14405_v30  ;;  %v7419_v30 = vld [vmem:[#allocation3 + $0xe1] sm:$0xff] }
 0x862   :  { %12917 = vmatprep.subr.bf16.mxu1 %v14406_v27  ;;  %v17275_v36 = vpack.c.bf16 %v7419_v30, %v7418_v50  ;;  %v7436_v50 = vld [vmem:[#allocation3 + $0x1e1] sm:$0xff]  ;;  %v7437_v30 = vld [vmem:[#allocation3 + $0x1e9] sm:$0xff] }
 0x864   :  { %12790 = vmatmul.mubr.bf16.gmra.mrb[16].mxu1 %v16990_v11  ;;  %v6950_v11 = vld [vmem:[#allocation3 + $0x330] sm:$0xff] }
 0x865   :  { %12793 = vmatprep.mubr.bf16.mxu1 %v16994_v2  ;;  %v6951_v2 = vld [vmem:[#allocation3 + $0x338] sm:$0xff] }
 0x86c   :  { %12794 = vmatmul.mubr.bf16.gmra.mrb[20].mxu1 %v16996_v59  ;;  %v7402_v59 = vld [vmem:[#allocation3 + $0x19] sm:$0xff] }
 0x86d   :  { %12797 = vmatprep.mubr.bf16.mxu1 %v17000_v33  ;;  %v7403_v33 = vld [vmem:[#allocation3 + $0x21] sm:$0xff] }
 0x874   :  { %12798 = vmatmul.mubr.bf16.gmra.mrb[24].mxu1 %v17002_v14  ;;  %v17231_v14 = vpack.c.bf16 %v6951_v2, %v6950_v11  ;;  %v17282_v11 = vld [vmem:[%s18855_s4 + $0x180] sm:$0xff]   ;;  %v7420_v2 = vld [vmem:[#allocation3 + $0xf1] sm:$0xff] }
 0x875   :  { %12801 = vmatprep.mubr.bf16.mxu1 %v17006_v6  ;;  %v7466_v6 = vpack.c.bf16 %v7403_v33, %v7402_v59  ;;  %v7421_v59 = vld [vmem:[#allocation3 + $0xf9] sm:$0xff]  ;;  %v7422_v33 = vld [vmem:[#allocation3 + $0x109] sm:$0xff] }
 0x87c   :  { %12802 = vmatmul.mubr.bf16.gmra.mrb[28].mxu1 %v17213_v37 }
 0x87d   :  { %12805 = vmatprep.mubr.bf16.mxu1 %v17010_v35  ;;  %v7404_v35 = vld [vmem:[#allocation3 + $0x31] sm:$0xff] }
 0x884   :  { %12806 = vmatmul.mubr.bf16.gmra.mrb[32].mxu1 %v17012_v57  ;;  %v7405_v57 = vld [vmem:[#allocation3 + $0x39] sm:$0xff] }
 0x885   :  { %12809 = vmatprep.mubr.bf16.mxu1 %v17016_v51  ;;  %v7406_v51 = vld [vmem:[#allocation3 + $0x49] sm:$0xff] }
 0x88c   :  { %12810 = vmatmul.mubr.bf16.gmra.mrb[36].mxu1 %v17018_v25  ;;  %v7407_v25 = vld [vmem:[#allocation3 + $0x51] sm:$0xff] }
 0x88d   :  { %12813 = vmatprep.mubr.bf16.mxu1 %v17022_v48  ;;  %v17234_v48 = vpack.c.bf16 %v7405_v57, %v7404_v35  ;;  %v17284_v35 = vpack.c.bf16 %v7421_v59, %v7420_v2  ;;  %v7439_v2 = vld [vmem:[#allocation3 + $0x201] sm:$0xff]  ;;  %v17306_v59 = vpack.c.bf16 %v7437_v30, %v7436_v50  ;;  %v7450_v50 = vld [vmem:[#allocation3 + $0x289] sm:$0xff]  ;;  %v7451_v30 = vld [vmem:[#allocation3 + $0x291] sm:$0xff] }
 0x894   :  { %12814 = vmatmul.mubr.bf16.gmra.mrb[40].mxu1 %v17024_v60  ;;  %v14407_v60 = vld [vmem:[%s18855_s4 + $0x148] sm:$0xff]  }
 0x895   :  { %12817 = vmatprep.mubr.bf16.mxu1 %v17028_v20  ;;  %v17239_v20 = vpack.c.bf16 %v7407_v25, %v7406_v51  ;;  %v7424_v51 = vld [vmem:[#allocation3 + $0x121] sm:$0xff]  ;;  %v7425_v25 = vld [vmem:[#allocation3 + $0x129] sm:$0xff] }
 0x89c   :  { %12818 = vmatmul.mubr.bf16.gmra.mrb[44].mxu1 %v17030_v43  ;;  %v14408_v43 = vld [vmem:[%s18855_s4 + $0x150] sm:$0xff]  }
 0x89d   :  { %12821 = vmatprep.mubr.bf16.mxu1 %v17034_v18  ;;  %v7408_v18 = vld [vmem:[#allocation3 + $0x61] sm:$0xff] }
 0x8a4   :  { %12822 = vmatmul.mubr.bf16.gmra.mrb[48].mxu1 %v17036_v23  ;;  %v7409_v23 = vld [vmem:[#allocation3 + $0x69] sm:$0xff] }
 0x8a5   :  { %12825 = vmatprep.mubr.bf16.mxu1 %v17040_v44  ;;  %v7410_v44 = vld [vmem:[#allocation3 + $0x79] sm:$0xff] }
 0x8ac   :  { %12826 = vmatmul.mubr.bf16.gmra.mrb[52].mxu1 %v17042_v31  ;;  %v7411_v31 = vld [vmem:[#allocation3 + $0x81] sm:$0xff] }
 0x8ad   :  { %12829 = vmatprep.mubr.bf16.mxu1 %v17046_v24  ;;  %v17246_v24 = vpack.c.bf16 %v7409_v23, %v7408_v18  ;;  %v17291_v18 = vpack.c.bf16 %v7425_v25, %v7424_v51  ;;  %v7441_v51 = vld [vmem:[#allocation3 + $0x219] sm:$0xff]  ;;  %v7442_v25 = vld [vmem:[#allocation3 + $0x229] sm:$0xff] }
 0x8b4   :  { %12830 = vmatmul.mubr.bf16.gmra.mrb[56].mxu1 %v17048_v62  ;;  %v14409_v62 = vld [vmem:[%s18855_s4 + $0x158] sm:$0xff]  }
 0x8b5   :  { %12833 = vmatprep.mubr.bf16.mxu1 %v17052_v55  ;;  %v17251_v55 = vpack.c.bf16 %v7411_v31, %v7410_v44  ;;  %v7428_v44 = vld [vmem:[#allocation3 + $0x151] sm:$0xff]  ;;  %v7429_v31 = vld [vmem:[#allocation3 + $0x159] sm:$0xff] }
 0x8b6   :  { %v17297_v17 = vpack.c.bf16 %v7429_v31, %v7428_v44  ;;  %v7444_v31 = vld [vmem:[#allocation3 + $0x241] sm:$0xff] }
 0x8bc   :  { %12834 = vmatmul.mubr.bf16.gmra.mrb[60].mxu1 %v17231_v14 }
 0x8bd   :  { %12853 = vmatprep.mubr.bf16.mxu1 %v7466_v6  ;;  %v7423_v6 = vld [vmem:[#allocation3 + $0x111] sm:$0xff] }
 0x8be   :  { %v17287_v57 = vpack.c.bf16 %v7423_v6, %v7422_v33  ;;  %v7440_v6 = vld [vmem:[#allocation3 + $0x211] sm:$0xff] }
 0x8c4   :  { %12854 = vmatmul.mubr.bf16.vlgmr.msra.gmra.mrb[0].mxu1 %v17234_v48 }
 0x8c5   :  { %12857 = vmatprep.mubr.bf16.mxu1 %v17239_v20  ;;  %12918 = vmatpush3.bf16.msra.mxu1 %v14406_v27  ;;  %v17270_v27 = vpack.c.bf16 %v7417_v54, %v7416_v15  ;;  %v17303_v15 = vpack.c.bf16 %v7433_v38, %v7432_v19  ;;  %v7447_v19 = vld [vmem:[#allocation3 + $0x261] sm:$0xff] }
 0x8c6   :  { %12919 = vmatprep.subr.bf16.mxu1 %v14407_v60 }
 0x8c9   :  { %12920 = vmatpush3.bf16.msra.mxu1 %v14407_v60  ;;  %v7426_v60 = vld [vmem:[#allocation3 + $0x139] sm:$0xff] }
 0x8ca   :  { %12921 = vmatprep.subr.bf16.mxu1 %v14408_v43 }
 0x8cc   :  { %12858 = vmatmul.mubr.bf16.gmra.mrb[4].mxu1 %v17246_v24 }
 0x8cd   :  { %12861 = vmatprep.mubr.bf16.mxu1 %v17251_v55  ;;  %12922 = vmatpush3.bf16.msra.mxu1 %v14408_v43  ;;  %v7427_v43 = vld [vmem:[#allocation3 + $0x141] sm:$0xff] }
 0x8ce   :  { %12923 = vmatprep.subr.bf16.mxu1 %v14409_v62  ;;  %v17293_v23 = vpack.c.bf16 %v7427_v43, %v7426_v60  ;;  %v7443_v60 = vld [vmem:[#allocation3 + $0x231] sm:$0xff]  ;;  %v17312_v43 = vpack.c.bf16 %v7441_v51, %v7440_v6  ;;  %v7452_v6 = vld [vmem:[#allocation3 + $0x2a1] sm:$0xff]  ;;  %v7453_v51 = vld [vmem:[#allocation3 + $0x2a9] sm:$0xff] }
 0x8cf   :  { %v17314_v44 = vpack.c.bf16 %v7443_v60, %v7442_v25  ;;  %v7454_v25 = vld [vmem:[#allocation3 + $0x2b9] sm:$0xff]  ;;  %v7455_v60 = vld [vmem:[#allocation3 + $0x2c1] sm:$0xff] }
 0x8d1   :  { %12924 = vmatpush3.bf16.msra.mxu1 %v14409_v62  ;;  %v7430_v62 = vld [vmem:[#allocation3 + $0x169] sm:$0xff] }
 0x8d2   :  { %12925 = vmatprep.subr.bf16.mxu1 %v14410_v3 }
 0x8d4   :  { %12862 = vmatmul.mubr.bf16.gmra.mrb[8].mxu1 %v17258_v12 }
 0x8d5   :  { %12865 = vmatprep.mubr.bf16.mxu1 %v17263_v0  ;;  %12926 = vmatpush3.bf16.msra.mxu1 %v14410_v3  ;;  %v7431_v3 = vld [vmem:[#allocation3 + $0x171] sm:$0xff] }
 0x8d6   :  { %12927 = vmatprep.subr.bf16.mxu1 %v14411_v13  ;;  %v17299_v53 = vpack.c.bf16 %v7431_v3, %v7430_v62  ;;  %v7445_v62 = vld [vmem:[#allocation3 + $0x249] sm:$0xff]  ;;  %v7446_v3 = vld [vmem:[#allocation3 + $0x259] sm:$0xff] }
 0x8d7   :  { %v17318_v38 = vpack.c.bf16 %v7445_v62, %v7444_v31  ;;  %v17330_v31 = vpack.c.bf16 %v7453_v51, %v7452_v6  ;;  %v17332_v62 = vpack.c.bf16 %v7455_v60, %v7454_v25  ;;  %v7460_v6 = vld [vmem:[#allocation3 + $0x301] sm:$0xff]  ;;  %v7461_v51 = vld [vmem:[#allocation3 + $0x309] sm:$0xff]  ;;  %v7462_v25 = vld [vmem:[#allocation3 + $0x319] sm:$0xff] }
 0x8d8   :  { %v7463_v60 = vld [vmem:[#allocation3 + $0x321] sm:$0xff] }
 0x8d9   :  { %12928 = vmatpush3.bf16.msra.mxu1 %v14411_v13  ;;  %v7434_v13 = vld [vmem:[#allocation3 + $0x1c9] sm:$0xff]  ;;  %19177 = vst [vmem:[#allocation9_spill] sm:$0xff] %v17330_v31 }
 0x8da   :  { %12929 = vmatprep.subr.bf16.mxu1 %v14412_v26 }
 0x8dc   :  { %12866 = vmatmul.mubr.bf16.gmra.mrb[12].mxu1 %v17270_v27 }
 0x8dd   :  { %12869 = vmatprep.mubr.bf16.mxu1 %v17275_v36  ;;  %12930 = vmatpush3.bf16.msra.mxu1 %v14412_v26  ;;  %v7435_v26 = vld [vmem:[#allocation3 + $0x1d1] sm:$0xff] }
 0x8de   :  { %12931 = vmatprep.subr.bf16.mxu1 %v14413_v22  ;;  %v7482_v54 = vpack.c.bf16 %v7435_v26, %v7434_v13  ;;  %v17320_v13 = vpack.c.bf16 %v7447_v19, %v7446_v3  ;;  %v7448_v26 = vld [vmem:[#allocation3 + $0x271] sm:$0xff]  ;;  %v7457_v19 = vld [vmem:[#allocation3 + $0x2d9] sm:$0xff] }
 0x8df   :  { %v7456_v3 = vld [vmem:[#allocation3 + $0x2d1] sm:$0xff] }
 0x8e1   :  { %12932 = vmatpush3.bf16.msra.mxu1 %v14413_v22  ;;  %v7438_v22 = vld [vmem:[#allocation3 + $0x1f9] sm:$0xff] }
 0x8e2   :  { %12997 = vmatprep.subr.bf16.mxu1 %v17282_v11  ;;  %v17308_v33 = vpack.c.bf16 %v7439_v2, %v7438_v22  ;;  %v17326_v2 = vpack.c.bf16 %v7451_v30, %v7450_v50  ;;  %v17336_v50 = vpack.c.bf16 %v7457_v19, %v7456_v3  ;;  %v7464_v3 = vld [vmem:[#allocation3 + $0x331] sm:$0xff]  ;;  %v7465_v19 = vld [vmem:[#allocation3 + $0x339] sm:$0xff] }
 0x8e4   :  { %12870 = vmatmul.mubr.bf16.gmra.mrb[16].mxu1 %v17284_v35  ;;  %19176 = vst [vmem:[#allocation20_spill] sm:$0xff] %v17326_v2 }
 0x8e5   :  { %12873 = vmatprep.mubr.bf16.mxu1 %v17287_v57 }
 0x8ec   :  { %12874 = vmatmul.mubr.bf16.gmra.mrb[20].mxu1 %v17291_v18 }
 0x8ed   :  { %12877 = vmatprep.mubr.bf16.mxu1 %v17293_v23 }
 0x8f4   :  { %12878 = vmatmul.mubr.bf16.gmra.mrb[24].mxu1 %v17297_v17 }
 0x8f5   :  { %12881 = vmatprep.mubr.bf16.mxu1 %v17299_v53 }
 0x8fc   :  { %12882 = vmatmul.mubr.bf16.gmra.mrb[28].mxu1 %v17303_v15 }
 0x8fd   :  { %12885 = vmatprep.mubr.bf16.mxu1 %v7482_v54  ;;  %v7449_v54 = vld [vmem:[#allocation3 + $0x279] sm:$0xff] }
 0x8fe   :  { %v17324_v22 = vpack.c.bf16 %v7449_v54, %v7448_v26  ;;  %v7458_v26 = vld [vmem:[#allocation3 + $0x2e9] sm:$0xff]  ;;  %v7459_v54 = vld [vmem:[#allocation3 + $0x2f1] sm:$0xff] }
 0x8ff   :  { %v17338_v30 = vpack.c.bf16 %v7459_v54, %v7458_v26  ;;  %v17348_v26 = vpack.c.bf16 %v7465_v19, %v7464_v3  ;;  %v14415_v54 = vld [vmem:[%s18855_s4 + $0x188] sm:$0xff]   ;;  %v8440_v3 = vld [vmem:[#allocation3 + $0x98] sm:$0xff] }
 0x904   :  { %12886 = vmatmul.mubr.bf16.gmra.mrb[32].mxu1 %v17306_v59 }
 0x905   :  { %12889 = vmatprep.mubr.bf16.mxu1 %v17308_v33 }
 0x90c   :  { %12890 = vmatmul.mubr.bf16.gmra.mrb[36].mxu1 %v17312_v43 }
 0x90d   :  { %12893 = vmatprep.mubr.bf16.mxu1 %v17314_v44 }
 0x914   :  { %12894 = vmatmul.mubr.bf16.gmra.mrb[40].mxu1 %v17318_v38 }
 0x915   :  { %12897 = vmatprep.mubr.bf16.mxu1 %v17320_v13 }
 0x91c   :  { %12898 = vmatmul.mubr.bf16.gmra.mrb[44].mxu1 %v17324_v22 }
 0x91d   :  { %12901 = vmatprep.mubr.bf16.mxu1 %v17326_v2  ;;  %v17342_v2 = vpack.c.bf16 %v7461_v51, %v7460_v6  ;;  %v14416_v6 = vld [vmem:[%s18855_s4 + $0x190] sm:$0xff]   ;;  %v8437_v51 = vld [vmem:[#allocation3 + $0x78] sm:$0xff] }
 0x924   :  { %12902 = vmatmul.mubr.bf16.gmra.mrb[48].mxu1 %v17330_v31  ;;  %v17344_v31 = vpack.c.bf16 %v7463_v60, %v7462_v25  ;;  %v8438_v25 = vld [vmem:[#allocation3 + $0x80] sm:$0xff]  ;;  %v8439_v60 = vld [vmem:[#allocation3 + $0x90] sm:$0xff] }
 0x925   :  { %12905 = vmatprep.mubr.bf16.mxu1 %v17332_v62  ;;  %v8498_v19 = vpack.c.bf16 %v8438_v25, %v8437_v51  ;;  %v8455_v51 = vld [vmem:[#allocation3 + $0x150] sm:$0xff]  ;;  %v8456_v25 = vld [vmem:[#allocation3 + $0x158] sm:$0xff] }
 0x92c   :  { %12906 = vmatmul.mubr.bf16.gmra.mrb[52].mxu1 %v17336_v50 }
 0x92d   :  { %12909 = vmatprep.mubr.bf16.mxu1 %v17338_v30 }
 0x934   :  { %12910 = vmatmul.mubr.bf16.gmra.mrb[56].mxu1 %v17342_v2 }
 0x935   :  { %12913 = vmatprep.mubr.bf16.mxu1 %v17344_v31 }
 0x93c   :  { %12914 = vmatmul.mubr.bf16.gmra.mrb[60].mxu1 %v17348_v26 }
 0x93d   :  { %12933 = vmatprep.mubr.bf16.mxu1 %v17055_v21  ;;  %v14417_v21 = vld [vmem:[%s18855_s4 + $0x198] sm:$0xff]  }
 0x944   :  { %12934 = vmatmul.mubr.bf16.vlgmr.msra.gmra.mrb[0].mxu1 %v17060_v40  ;;  %v14418_v40 = vld [vmem:[%s18855_s4 + $0x1a0] sm:$0xff]  }
 0x945   :  { %12937 = vmatprep.mubr.bf16.mxu1 %v17068_v45  ;;  %12998 = vmatpush3.bf16.msra.mxu1 %v17282_v11  ;;  %v14419_v45 = vld [vmem:[%s18855_s4 + $0x1a8] sm:$0xff]  }
 0x946   :  { %12999 = vmatprep.subr.bf16.mxu1 %v14415_v54 }
 0x949   :  { %13000 = vmatpush3.bf16.msra.mxu1 %v14415_v54  ;;  %v14425_v54 = vld [vmem:[%s18855_s4 + $0x1d8] sm:$0xff]  }
 0x94a   :  { %13001 = vmatprep.subr.bf16.mxu1 %v14416_v6 }
 0x94c   :  { %12938 = vmatmul.mubr.bf16.gmra.mrb[4].mxu1 %v17073_v63  ;;  %v14420_v63 = vld [vmem:[%s18855_s4 + $0x1b0] sm:$0xff]  }
 0x94d   :  { %12941 = vmatprep.mubr.bf16.mxu1 %v17080_v58  ;;  %13002 = vmatpush3.bf16.msra.mxu1 %v14416_v6  ;;  %v14421_v58 = vld [vmem:[%s18855_s4 + $0x1b8] sm:$0xff]   ;;  %v8499_v6 = vpack.c.bf16 %v8440_v3, %v8439_v60  ;;  %v8507_v3 = vpack.c.bf16 %v8456_v25, %v8455_v51  ;;  %v8479_v51 = vld [vmem:[#allocation3 + $0x2a0] sm:$0xff]  ;;  %v8480_v25 = vld [vmem:[#allocation3 + $0x2a8] sm:$0xff] }
 0x94e   :  { %13003 = vmatprep.subr.bf16.mxu1 %v14417_v21 }
 0x951   :  { %13004 = vmatpush3.bf16.msra.mxu1 %v14417_v21  ;;  %v14426_v21 = vld [vmem:[%s18855_s4 + $0x1e0] sm:$0xff]  }
 0x952   :  { %13005 = vmatprep.subr.bf16.mxu1 %v14418_v40 }
 0x954   :  { %12942 = vmatmul.mubr.bf16.gmra.mrb[8].mxu1 %v17085_v56  ;;  %v14422_v56 = vld [vmem:[%s18855_s4 + $0x1c0] sm:$0xff]  }
 0x955   :  { %12945 = vmatprep.mubr.bf16.mxu1 %v17092_v39  ;;  %13006 = vmatpush3.bf16.msra.mxu1 %v14418_v40  ;;  %v7946_v39 = vld [vmem:[#allocation3 + $0x182] sm:$0xff] }
 0x956   :  { %13007 = vmatprep.subr.bf16.mxu1 %v14419_v45  ;;  %v8441_v40 = vld [vmem:[#allocation3 + $0xa8] sm:$0xff] }
 0x959   :  { %13008 = vmatpush3.bf16.msra.mxu1 %v14419_v45  ;;  %v8442_v45 = vld [vmem:[#allocation3 + $0xb0] sm:$0xff] }
 0x95a   :  { %13009 = vmatprep.subr.bf16.mxu1 %v14420_v63 }
 0x95c   :  { %12946 = vmatmul.mubr.bf16.gmra.mrb[12].mxu1 %v17097_v47  ;;  %v7947_v47 = vld [vmem:[#allocation3 + $0x18a] sm:$0xff] }
 0x95d   :  { %12949 = vmatprep.mubr.bf16.mxu1 %v17106_v29  ;;  %13010 = vmatpush3.bf16.msra.mxu1 %v14420_v63  ;;  %v17391_v29 = vpack.c.bf16 %v7947_v47, %v7946_v39  ;;  %v8443_v63 = vld [vmem:[#allocation3 + $0xc0] sm:$0xff]  ;;  %v14427_v39 = vld [vmem:[%s18855_s4 + $0x1e8] sm:$0xff]  }
 0x95e   :  { %13011 = vmatprep.subr.bf16.mxu1 %v14421_v58 }
 0x961   :  { %13012 = vmatpush3.bf16.msra.mxu1 %v14421_v58  ;;  %v8444_v58 = vld [vmem:[#allocation3 + $0xc8] sm:$0xff] }
 0x962   :  { %13077 = vmatprep.subr.bf16.mxu1 %v14422_v56  ;;  %v8501_v47 = vpack.c.bf16 %v8444_v58, %v8443_v63  ;;  %v8464_v63 = vld [vmem:[#allocation3 + $0x1e8] sm:$0xff] }
 0x964   :  { %12950 = vmatmul.mubr.bf16.gmra.mrb[16].mxu1 %v17109_v5  ;;  %v19178_v5 = vld [vmem:[#allocation25_spill] sm:$0xff] }
 0x965   :  { %12953 = vmatprep.mubr.bf16.mxu1 %v17113_v34  ;;  %v19179_v34 = vld [vmem:[#allocation17_spill] sm:$0xff] }
 0x96c   :  { %12954 = vmatmul.mubr.bf16.gmra.mrb[20].mxu1 %v17115_v42  ;;  %v19180_v42 = vld [vmem:[#allocation18_spill] sm:$0xff] }
 0x96d   :  { %12957 = vmatprep.mubr.bf16.mxu1 %v17119_v52  ;;  %v19181_v52 = vld [vmem:[#allocation19_spill] sm:$0xff] }
 0x974   :  { %12958 = vmatmul.mubr.bf16.gmra.mrb[24].mxu1 %v17121_v1  ;;  %v7978_v1 = vld [vmem:[#allocation3 + $0x332] sm:$0xff] }
 0x975   :  { %12961 = vmatprep.mubr.bf16.mxu1 %v17125_v7  ;;  %v7979_v7 = vld [vmem:[#allocation3 + $0x33a] sm:$0xff] }
 0x97c   :  { %12962 = vmatmul.mubr.bf16.gmra.mrb[28].mxu1 %v17391_v29 }
 0x97d   :  { %12965 = vmatprep.mubr.bf16.mxu1 %v17128_v4  ;;  %v8431_v4 = vld [vmem:[#allocation3 + $0x30] sm:$0xff] }
 0x984   :  { %12966 = vmatmul.mubr.bf16.gmra.mrb[32].mxu1 %v17130_v16  ;;  %v8432_v16 = vld [vmem:[#allocation3 + $0x38] sm:$0xff] }
 0x985   :  { %12969 = vmatprep.mubr.bf16.mxu1 %v17134_v9  ;;  %v17409_v9 = vpack.c.bf16 %v7979_v7, %v7978_v1  ;;  %v8448_v1 = vld [vmem:[#allocation3 + $0xf8] sm:$0xff] }
 0x98c   :  { %12970 = vmatmul.mubr.bf16.gmra.mrb[36].mxu1 %v17136_v41  ;;  %v8495_v41 = vpack.c.bf16 %v8432_v16, %v8431_v4  ;;  %v14429_v4 = vld [vmem:[%s18855_s4 + $0x1f8] sm:$0xff]  }
 0x98d   :  { %12973 = vmatprep.mubr.bf16.mxu1 %v17140_v28  ;;  %v8433_v28 = vld [vmem:[#allocation3 + $0x48] sm:$0xff] }
 0x994   :  { %12974 = vmatmul.mubr.bf16.gmra.mrb[40].mxu1 %v19178_v5  ;;  %v14428_v5 = vld [vmem:[%s18855_s4 + $0x1f0] sm:$0xff]  }
 0x995   :  { %12977 = vmatprep.mubr.bf16.mxu1 %v19179_v34  ;;  %v8445_v34 = vld [vmem:[#allocation3 + $0xd8] sm:$0xff] }
 0x99c   :  { %12978 = vmatmul.mubr.bf16.gmra.mrb[44].mxu1 %v19180_v42  ;;  %v8446_v42 = vld [vmem:[#allocation3 + $0xe0] sm:$0xff] }
 0x99d   :  { %12981 = vmatprep.mubr.bf16.mxu1 %v19181_v52  ;;  %v8447_v52 = vld [vmem:[#allocation3 + $0xf0] sm:$0xff]  ;;  %v8502_v7 = vpack.c.bf16 %v8446_v42, %v8445_v34 }
 0x99e   :  { %v8503_v16 = vpack.c.bf16 %v8448_v1, %v8447_v52  ;;  %v8469_v52 = vld [vmem:[#allocation3 + $0x228] sm:$0xff]  ;;  %v8470_v1 = vld [vmem:[#allocation3 + $0x230] sm:$0xff] }
 0x9a4   :  { %12982 = vmatmul.mubr.bf16.gmra.mrb[48].mxu1 %v17154_v61  ;;  %v8435_v61 = vld [vmem:[#allocation3 + $0x60] sm:$0xff] }
 0x9a5   :  { %12985 = vmatprep.mubr.bf16.mxu1 %v17158_v46  ;;  %v8434_v46 = vld [vmem:[#allocation3 + $0x50] sm:$0xff] }
 0x9a6   :  { %v8496_v11 = vpack.c.bf16 %v8434_v46, %v8433_v28  ;;  %v8449_v28 = vld [vmem:[#allocation3 + $0x108] sm:$0xff]  ;;  %v8450_v46 = vld [vmem:[#allocation3 + $0x110] sm:$0xff] }
 0x9ac   :  { %12986 = vmatmul.mubr.bf16.gmra.mrb[52].mxu1 %v17160_v32  ;;  %v8436_v32 = vld [vmem:[#allocation3 + $0x68] sm:$0xff] }
 0x9ad   :  { %12989 = vmatprep.mubr.bf16.mxu1 %v17164_v10  ;;  %v14423_v10 = vld [vmem:[%s18855_s4 + $0x1c8] sm:$0xff]  }
 0x9b4   :  { %12990 = vmatmul.mubr.bf16.gmra.mrb[56].mxu1 %v17166_v49  ;;  %v8497_v49 = vpack.c.bf16 %v8436_v32, %v8435_v61  ;;  %v8451_v61 = vld [vmem:[#allocation3 + $0x120] sm:$0xff]  ;;  %v8452_v32 = vld [vmem:[#allocation3 + $0x128] sm:$0xff] }
 0x9b5   :  { %12993 = vmatprep.mubr.bf16.mxu1 %v17170_v8  ;;  %v14424_v8 = vld [vmem:[%s18855_s4 + $0x1d0] sm:$0xff]  }
 0x9bc   :  { %12994 = vmatmul.mubr.bf16.gmra.mrb[60].mxu1 %v17409_v9 }
 0x9bd   :  { %13013 = vmatprep.mubr.bf16.mxu1 %v8495_v41  ;;  %v17436_v41 = vld [vmem:[%s18855_s4 + $0x200] sm:$0xff]  }
 0x9c4   :  { %13014 = vmatmul.mubr.bf16.vlgmr.msra.gmra.mrb[0].mxu1 %v8496_v11  ;;  %v8504_v11 = vpack.c.bf16 %v8450_v46, %v8449_v28  ;;  %v8473_v28 = vld [vmem:[#allocation3 + $0x258] sm:$0xff]  ;;  %v8474_v46 = vld [vmem:[#allocation3 + $0x260] sm:$0xff] }
 0x9c5   :  { %13017 = vmatprep.mubr.bf16.mxu1 %v8497_v49  ;;  %13078 = vmatpush3.bf16.msra.mxu1 %v14422_v56  ;;  %v8500_v56 = vpack.c.bf16 %v8442_v45, %v8441_v40  ;;  %v8453_v49 = vld [vmem:[#allocation3 + $0x138] sm:$0xff]  ;;  %v8463_v45 = vld [vmem:[#allocation3 + $0x1e0] sm:$0xff] }
 0x9c6   :  { %13079 = vmatprep.subr.bf16.mxu1 %v14423_v10  ;;  %v8511_v58 = vpack.c.bf16 %v8464_v63, %v8463_v45 }
 0x9c9   :  { %13080 = vmatpush3.bf16.msra.mxu1 %v14423_v10  ;;  %v8505_v10 = vpack.c.bf16 %v8452_v32, %v8451_v61  ;;  %v8475_v61 = vld [vmem:[#allocation3 + $0x270] sm:$0xff]  ;;  %v8476_v32 = vld [vmem:[#allocation3 + $0x278] sm:$0xff] }
 0x9ca   :  { %13081 = vmatprep.subr.bf16.mxu1 %v14424_v8 }
 0x9cc   :  { %13018 = vmatmul.mubr.bf16.gmra.mrb[4].mxu1 %v8498_v19  ;;  %v8457_v19 = vld [vmem:[#allocation3 + $0x168] sm:$0xff] }
 0x9cd   :  { %13021 = vmatprep.mubr.bf16.mxu1 %v8499_v6  ;;  %13082 = vmatpush3.bf16.msra.mxu1 %v14424_v8  ;;  %v8454_v8 = vld [vmem:[#allocation3 + $0x140] sm:$0xff] }
 0x9ce   :  { %13083 = vmatprep.subr.bf16.mxu1 %v14425_v54  ;;  %v8506_v60 = vpack.c.bf16 %v8454_v8, %v8453_v49  ;;  %v8477_v49 = vld [vmem:[#allocation3 + $0x288] sm:$0xff]  ;;  %v8478_v8 = vld [vmem:[#allocation3 + $0x290] sm:$0xff] }
 0x9d1   :  { %13084 = vmatpush3.bf16.msra.mxu1 %v14425_v54  ;;  %v8458_v54 = vld [vmem:[#allocation3 + $0x170] sm:$0xff] }
 0x9d2   :  { %13085 = vmatprep.subr.bf16.mxu1 %v14426_v21  ;;  %v8508_v6 = vpack.c.bf16 %v8458_v54, %v8457_v19  ;;  %v8481_v19 = vld [vmem:[#allocation3 + $0x2b8] sm:$0xff]  ;;  %v8482_v54 = vld [vmem:[#allocation3 + $0x2c0] sm:$0xff] }
 0x9d3   :  { %v8520_v45 = vpack.c.bf16 %v8482_v54, %v8481_v19  ;;  %v9481_v54 = vld [vmem:[#allocation3 + $0x13a] sm:$0xff] }
 0x9d4   :  { %13022 = vmatmul.mubr.bf16.gmra.mrb[8].mxu1 %v8500_v56  ;;  %v8465_v56 = vld [vmem:[#allocation3 + $0x1f8] sm:$0xff] }
 0x9d5   :  { %13025 = vmatprep.mubr.bf16.mxu1 %v8501_v47  ;;  %13086 = vmatpush3.bf16.msra.mxu1 %v14426_v21  ;;  %v14445_v21 = vld [vmem:[#allocation2] sm:$0xff]  ;;  %v8467_v47 = vld [vmem:[#allocation3 + $0x210] sm:$0xff] }
 0x9d6   :  { %13087 = vmatprep.subr.bf16.mxu1 %v14427_v39  ;;  %v8510_v40 = vpack.c.bf16 %v14445_v21, %v14445_v21  ;;  %v8484_v21 = vld [vmem:[#allocation3 + $0x2d8] sm:$0xff] }
 0x9d9   :  { %13088 = vmatpush3.bf16.msra.mxu1 %v14427_v39  ;;  %v8466_v39 = vld [vmem:[#allocation3 + $0x200] sm:$0xff] }
 0x9da   :  { %13089 = vmatprep.subr.bf16.mxu1 %v14428_v5  ;;  %v8512_v34 = vpack.c.bf16 %v8466_v39, %v8465_v56  ;;  %v8486_v56 = vld [vmem:[#allocation3 + $0x2f0] sm:$0xff]  ;;  %v8487_v39 = vld [vmem:[#allocation3 + $0x300] sm:$0xff] }
 0x9dc   :  { %13026 = vmatmul.mubr.bf16.gmra.mrb[12].mxu1 %v8502_v7  ;;  %v8471_v7 = vld [vmem:[#allocation3 + $0x240] sm:$0xff] }
 0x9dd   :  { %13029 = vmatprep.mubr.bf16.mxu1 %v8503_v16  ;;  %13090 = vmatpush3.bf16.msra.mxu1 %v14428_v5  ;;  %v8468_v5 = vld [vmem:[#allocation3 + $0x218] sm:$0xff] }
 0x9de   :  { %13091 = vmatprep.subr.bf16.mxu1 %v14429_v4  ;;  %v8513_v42 = vpack.c.bf16 %v8468_v5, %v8467_v47  ;;  %v8488_v47 = vld [vmem:[#allocation3 + $0x308] sm:$0xff] }
 0x9e1   :  { %13092 = vmatpush3.bf16.msra.mxu1 %v14429_v4  ;;  %v8472_v4 = vld [vmem:[#allocation3 + $0x248] sm:$0xff] }
 0x9e2   :  { %13157 = vmatprep.subr.bf16.mxu1 %v17436_v41  ;;  %v8515_v16 = vpack.c.bf16 %v8472_v4, %v8471_v7  ;;  %v14431_v7 = vld [vmem:[%s18855_s4 + $0x208] sm:$0xff]   ;;  %v14432_v4 = vld [vmem:[%s18855_s4 + $0x210] sm:$0xff]  }
 0x9e4   :  { %13030 = vmatmul.mubr.bf16.gmra.mrb[16].mxu1 %v8504_v11  ;;  %v8516_v11 = vpack.c.bf16 %v8474_v46, %v8473_v28  ;;  %v9473_v46 = vld [vmem:[#allocation3 + $0xda] sm:$0xff] }
 0x9e5   :  { %13033 = vmatprep.mubr.bf16.mxu1 %v8505_v10  ;;  %v8517_v10 = vpack.c.bf16 %v8476_v32, %v8475_v61  ;;  %v9474_v61 = vld [vmem:[#allocation3 + $0xe2] sm:$0xff]  ;;  %v9475_v32 = vld [vmem:[#allocation3 + $0xf2] sm:$0xff] }
 0x9ec   :  { %13034 = vmatmul.mubr.bf16.gmra.mrb[20].mxu1 %v8506_v60  ;;  %v8518_v60 = vpack.c.bf16 %v8478_v8, %v8477_v49  ;;  %v9477_v8 = vld [vmem:[#allocation3 + $0x10a] sm:$0xff] }
 0x9ed   :  { %13037 = vmatprep.mubr.bf16.mxu1 %v8507_v3  ;;  %v8519_v3 = vpack.c.bf16 %v8480_v25, %v8479_v51  ;;  %v9478_v51 = vld [vmem:[#allocation3 + $0x112] sm:$0xff]  ;;  %v9479_v25 = vld [vmem:[#allocation3 + $0x122] sm:$0xff] }
 0x9f4   :  { %13038 = vmatmul.mubr.bf16.gmra.mrb[24].mxu1 %v8508_v6  ;;  %v8483_v6 = vld [vmem:[#allocation3 + $0x2d0] sm:$0xff] }
 0x9f5   :  { %13041 = vmatprep.mubr.bf16.mxu1 %v17213_v37  ;;  %v8514_v37 = vpack.c.bf16 %v8470_v1, %v8469_v52  ;;  %v8521_v63 = vpack.c.bf16 %v8484_v21, %v8483_v6  ;;  %v8490_v52 = vld [vmem:[#allocation3 + $0x320] sm:$0xff]  ;;  %v9483_v21 = vld [vmem:[#allocation3 + $0x152] sm:$0xff] }
 0x9f6   :  { %v9482_v6 = vld [vmem:[#allocation3 + $0x142] sm:$0xff] }
 0x9fc   :  { %13042 = vmatmul.mubr.bf16.gmra.mrb[28].mxu1 %v8510_v40 }
 0x9fd   :  { %13045 = vmatprep.mubr.bf16.mxu1 %v8511_v58  ;;  %v8485_v58 = vld [vmem:[#allocation3 + $0x2e8] sm:$0xff] }
 0x9fe   :  { %v8522_v5 = vpack.c.bf16 %v8486_v56, %v8485_v58  ;;  %v9485_v56 = vld [vmem:[#allocation3 + $0x16a] sm:$0xff] }
 0xa04   :  { %13046 = vmatmul.mubr.bf16.gmra.mrb[32].mxu1 %v8512_v34  ;;  %v8523_v34 = vpack.c.bf16 %v8488_v47, %v8487_v39  ;;  %v9486_v39 = vld [vmem:[#allocation3 + $0x172] sm:$0xff] }
 0xa05   :  { %13049 = vmatprep.mubr.bf16.mxu1 %v8513_v42  ;;  %v8489_v42 = vld [vmem:[#allocation3 + $0x318] sm:$0xff]  ;;  %v9536_v47 = vpack.c.bf16 %v9486_v39, %v9485_v56 }
 0xa06   :  { %v8524_v1 = vpack.c.bf16 %v8490_v52, %v8489_v42  ;;  %v9491_v52 = vld [vmem:[#allocation3 + $0x1e2] sm:$0xff] }
 0xa0c   :  { %13050 = vmatmul.mubr.bf16.gmra.mrb[36].mxu1 %v8514_v37  ;;  %v9472_v37 = vld [vmem:[#allocation3 + $0xca] sm:$0xff] }
 0xa0d   :  { %13053 = vmatprep.mubr.bf16.mxu1 %v8515_v16 }
 0xa14   :  { %13054 = vmatmul.mubr.bf16.gmra.mrb[40].mxu1 %v8516_v11  ;;  %v9476_v11 = vld [vmem:[#allocation3 + $0xfa] sm:$0xff] }
 0xa15   :  { %13057 = vmatprep.mubr.bf16.mxu1 %v8517_v10  ;;  %v9530_v10 = vpack.c.bf16 %v9474_v61, %v9473_v46  ;;  %v9531_v49 = vpack.c.bf16 %v9476_v11, %v9475_v32  ;;  %v9517_v46 = vld [vmem:[#allocation3 + $0x31a] sm:$0xff]  ;;  %v9518_v61 = vld [vmem:[#allocation3 + $0x322] sm:$0xff]  ;;  %v9521_v11 = vld [vmem:[#allocation3 + $0x34a] sm:$0xff] }
 0xa16   :  { %v9552_v32 = vpack.c.bf16 %v9518_v61, %v9517_v46 }
 0xa1c   :  { %13058 = vmatmul.mubr.bf16.gmra.mrb[44].mxu1 %v8518_v60  ;;  %v9480_v60 = vld [vmem:[#allocation3 + $0x12a] sm:$0xff] }
 0xa1d   :  { %13061 = vmatprep.mubr.bf16.mxu1 %v8519_v3  ;;  %v9532_v3 = vpack.c.bf16 %v9478_v51, %v9477_v8  ;;  %v9533_v19 = vpack.c.bf16 %v9480_v60, %v9479_v25 }
 0xa24   :  { %13062 = vmatmul.mubr.bf16.gmra.mrb[48].mxu1 %v8520_v45  ;;  %v9484_v45 = vld [vmem:[#allocation3 + $0x15a] sm:$0xff] }
 0xa25   :  { %13065 = vmatprep.mubr.bf16.mxu1 %v8521_v63  ;;  %v9534_v63 = vpack.c.bf16 %v9482_v6, %v9481_v54  ;;  %v9535_v58 = vpack.c.bf16 %v9484_v45, %v9483_v21 }
 0xa2c   :  { %13066 = vmatmul.mubr.bf16.gmra.mrb[52].mxu1 %v8522_v5  ;;  %v9489_v5 = vld [vmem:[#allocation3 + $0x19a] sm:$0xff] }
 0xa2d   :  { %13069 = vmatprep.mubr.bf16.mxu1 %v8523_v34  ;;  %v9490_v34 = vld [vmem:[#allocation3 + $0x1a2] sm:$0xff] }
 0xa2e   :  { %v9538_v42 = vpack.c.bf16 %v9490_v34, %v9489_v5 }
 0xa34   :  { %13070 = vmatmul.mubr.bf16.gmra.mrb[56].mxu1 %v8524_v1  ;;  %v9492_v1 = vld [vmem:[#allocation3 + $0x1ea] sm:$0xff] }
 0xa35   :  { %13073 = vmatprep.mubr.bf16.mxu1 %v17231_v14  ;;  %v14433_v14 = vld [vmem:[%s18855_s4 + $0x218] sm:$0xff]  }
 0xa3c   :  { %13074 = vmatmul.mubr.bf16.gmra.mrb[60].mxu1 %v8510_v40  ;;  %v9471_v40 = vld [vmem:[#allocation3 + $0xc2] sm:$0xff] }
 0xa3d   :  { %13093 = vmatprep.mubr.bf16.mxu1 %v17234_v48  ;;  %v14434_v48 = vld [vmem:[%s18855_s4 + $0x220] sm:$0xff]   ;;  %v9529_v28 = vpack.c.bf16 %v9472_v37, %v9471_v40  ;;  %v9516_v37 = vld [vmem:[#allocation3 + $0x30a] sm:$0xff] }
 0xa3e   :  { %v9515_v40 = vld [vmem:[#allocation3 + $0x302] sm:$0xff] }
 0xa44   :  { %13094 = vmatmul.mubr.bf16.vlgmr.msra.gmra.mrb[0].mxu1 %v17239_v20  ;;  %v14435_v20 = vld [vmem:[%s18855_s4 + $0x228] sm:$0xff]  }
 0xa45   :  { %13097 = vmatprep.mubr.bf16.mxu1 %v17246_v24  ;;  %13158 = vmatpush3.bf16.msra.mxu1 %v17436_v41  ;;  %v14436_v24 = vld [vmem:[%s18855_s4 + $0x230] sm:$0xff]  }
 0xa46   :  { %13159 = vmatprep.subr.bf16.mxu1 %v14431_v7  ;;  %v9470_v41 = vld [vmem:[#allocation3 + $0xb2] sm:$0xff] }
 0xa49   :  { %13160 = vmatpush3.bf16.msra.mxu1 %v14431_v7  ;;  %v9539_v7 = vpack.c.bf16 %v9492_v1, %v9491_v52 }
 0xa4a   :  { %13161 = vmatprep.subr.bf16.mxu1 %v14432_v4 }
 0xa4c   :  { %13098 = vmatmul.mubr.bf16.gmra.mrb[4].mxu1 %v17251_v55  ;;  %v14437_v55 = vld [vmem:[%s18855_s4 + $0x238] sm:$0xff]  }
 0xa4d   :  { %13101 = vmatprep.mubr.bf16.mxu1 %v17258_v12  ;;  %13162 = vmatpush3.bf16.msra.mxu1 %v14432_v4  ;;  %v8975_v12 = vld [vmem:[#allocation3 + $0x199] sm:$0xff] }
 0xa4e   :  { %13163 = vmatprep.subr.bf16.mxu1 %v14433_v14  ;;  %v9493_v4 = vld [vmem:[#allocation3 + $0x1fa] sm:$0xff] }
 0xa51   :  { %13164 = vmatpush3.bf16.msra.mxu1 %v14433_v14  ;;  %v9494_v14 = vld [vmem:[#allocation3 + $0x202] sm:$0xff] }
 0xa52   :  { %13165 = vmatprep.subr.bf16.mxu1 %v14434_v48 }
 0xa54   :  { %13102 = vmatmul.mubr.bf16.gmra.mrb[8].mxu1 %v17263_v0  ;;  %v8976_v0 = vld [vmem:[#allocation3 + $0x1a1] sm:$0xff] }
 0xa55   :  { %13105 = vmatprep.mubr.bf16.mxu1 %v17270_v27  ;;  %13166 = vmatpush3.bf16.msra.mxu1 %v14434_v48  ;;  %v9024_v27 = vpack.c.bf16 %v8976_v0, %v8975_v12  ;;  %v9495_v48 = vld [vmem:[#allocation3 + $0x212] sm:$0xff]  ;;  %v9497_v12 = vld [vmem:[#allocation3 + $0x22a] sm:$0xff] }
 0xa56   :  { %13167 = vmatprep.subr.bf16.mxu1 %v14435_v20  ;;  %v9498_v0 = vld [vmem:[#allocation3 + $0x232] sm:$0xff] }
 0xa59   :  { %13168 = vmatpush3.bf16.msra.mxu1 %v14435_v20  ;;  %v9496_v20 = vld [vmem:[#allocation3 + $0x21a] sm:$0xff] }
 0xa5a   :  { %13169 = vmatprep.subr.bf16.mxu1 %v14436_v24 }
 0xa5c   :  { %13106 = vmatmul.mubr.bf16.gmra.mrb[12].mxu1 %v17275_v36  ;;  %v19182_v36 = vld [vmem:[#allocation20_spill] sm:$0xff] }
 0xa5d   :  { %13109 = vmatprep.mubr.bf16.mxu1 %v17284_v35  ;;  %13170 = vmatpush3.bf16.msra.mxu1 %v14436_v24  ;;  %v19183_v35 = vld [vmem:[#allocation9_spill] sm:$0xff]  ;;  %v9540_v24 = vpack.c.bf16 %v9494_v14, %v9493_v4 }
 0xa5e   :  { %13171 = vmatprep.subr.bf16.mxu1 %v14437_v55 }
 0xa61   :  { %13172 = vmatpush3.bf16.msra.mxu1 %v14437_v55  ;;  %v9541_v55 = vpack.c.bf16 %v9496_v20, %v9495_v48 }
 0xa64   :  { %13110 = vmatmul.mubr.bf16.gmra.mrb[16].mxu1 %v17287_v57  ;;  %v9007_v57 = vld [vmem:[#allocation3 + $0x349] sm:$0xff] }
 0xa65   :  { %13113 = vmatprep.mubr.bf16.mxu1 %v17291_v18  ;;  %v9008_v18 = vld [vmem:[#allocation3 + $0x351] sm:$0xff] }
 0xa6c   :  { %13114 = vmatmul.mubr.bf16.gmra.mrb[20].mxu1 %v17293_v23  ;;  %v9040_v23 = vpack.c.bf16 %v9008_v18, %v9007_v57  ;;  %v9501_v57 = vld [vmem:[#allocation3 + $0x25a] sm:$0xff]  ;;  %v9502_v18 = vld [vmem:[#allocation3 + $0x262] sm:$0xff] }
 0xa6d   :  { %13117 = vmatprep.mubr.bf16.mxu1 %v17297_v17  ;;  %v9459_v17 = vld [vmem:[#allocation3 + $0x32] sm:$0xff] }
 0xa74   :  { %13118 = vmatmul.mubr.bf16.gmra.mrb[24].mxu1 %v17299_v53  ;;  %v9460_v53 = vld [vmem:[#allocation3 + $0x3a] sm:$0xff] }
 0xa75   :  { %13121 = vmatprep.mubr.bf16.mxu1 %v17303_v15  ;;  %v9523_v15 = vpack.c.bf16 %v9460_v53, %v9459_v17  ;;  %v9504_v17 = vld [vmem:[#allocation3 + $0x27a] sm:$0xff]  ;;  %v9544_v53 = vpack.c.bf16 %v9502_v18, %v9501_v57 }
 0xa7c   :  { %13122 = vmatmul.mubr.bf16.gmra.mrb[28].mxu1 %v9024_v27  ;;  %v9499_v27 = vld [vmem:[#allocation3 + $0x242] sm:$0xff] }
 0xa7d   :  { %13125 = vmatprep.mubr.bf16.mxu1 %v17306_v59  ;;  %v9461_v59 = vld [vmem:[#allocation3 + $0x4a] sm:$0xff] }
 0xa84   :  { %13126 = vmatmul.mubr.bf16.gmra.mrb[32].mxu1 %v17308_v33  ;;  %v9462_v33 = vld [vmem:[#allocation3 + $0x52] sm:$0xff] }
 0xa85   :  { %13129 = vmatprep.mubr.bf16.mxu1 %v17312_v43  ;;  %v9463_v43 = vld [vmem:[#allocation3 + $0x62] sm:$0xff] }
 0xa8c   :  { %13130 = vmatmul.mubr.bf16.gmra.mrb[36].mxu1 %v17314_v44  ;;  %v9464_v44 = vld [vmem:[#allocation3 + $0x6a] sm:$0xff] }
 0xa8d   :  { %13133 = vmatprep.mubr.bf16.mxu1 %v17318_v38  ;;  %v9524_v38 = vpack.c.bf16 %v9462_v33, %v9461_v59  ;;  %v9505_v59 = vld [vmem:[#allocation3 + $0x28a] sm:$0xff]  ;;  %v9506_v33 = vld [vmem:[#allocation3 + $0x292] sm:$0xff] }
 0xa94   :  { %13134 = vmatmul.mubr.bf16.gmra.mrb[40].mxu1 %v17320_v13  ;;  %v9525_v13 = vpack.c.bf16 %v9464_v44, %v9463_v43  ;;  %v9507_v43 = vld [vmem:[#allocation3 + $0x2a2] sm:$0xff]  ;;  %v9508_v44 = vld [vmem:[#allocation3 + $0x2aa] sm:$0xff] }
 0xa95   :  { %13137 = vmatprep.mubr.bf16.mxu1 %v17324_v22  ;;  %v9465_v22 = vld [vmem:[#allocation3 + $0x7a] sm:$0xff] }
 0xa9c   :  { %13138 = vmatmul.mubr.bf16.gmra.mrb[44].mxu1 %v19182_v36  ;;  %v9542_v36 = vpack.c.bf16 %v9498_v0, %v9497_v12 }
 0xa9d   :  { %13141 = vmatprep.mubr.bf16.mxu1 %v19183_v35 }
 0xaa4   :  { %13142 = vmatmul.mubr.bf16.gmra.mrb[48].mxu1 %v17332_v62  ;;  %v9468_v62 = vld [vmem:[#allocation3 + $0x9a] sm:$0xff] }
 0xaa5   :  { %13145 = vmatprep.mubr.bf16.mxu1 %v17336_v50 }
 0xaac   :  { %13146 = vmatmul.mubr.bf16.gmra.mrb[52].mxu1 %v17338_v30 }
 0xaad   :  { %13149 = vmatprep.mubr.bf16.mxu1 %v17342_v2  ;;  %v9466_v2 = vld [vmem:[#allocation3 + $0x82] sm:$0xff] }
 0xaae   :  { %v9526_v50 = vpack.c.bf16 %v9466_v2, %v9465_v22  ;;  %v9509_v22 = vld [vmem:[#allocation3 + $0x2ba] sm:$0xff]  ;;  %v9510_v2 = vld [vmem:[#allocation3 + $0x2c2] sm:$0xff] }
 0xab4   :  { %13150 = vmatmul.mubr.bf16.gmra.mrb[56].mxu1 %v17344_v31  ;;  %v9467_v31 = vld [vmem:[#allocation3 + $0x92] sm:$0xff] }
 0xab5   :  { %13153 = vmatprep.mubr.bf16.mxu1 %v17348_v26  ;;  %v9527_v30 = vpack.c.bf16 %v9468_v62, %v9467_v31  ;;  %v9469_v26 = vld [vmem:[#allocation3 + $0xaa] sm:$0xff]  ;;  %v9511_v31 = vld [vmem:[#allocation3 + $0x2d2] sm:$0xff]  ;;  %v9512_v62 = vld [vmem:[#allocation3 + $0x2da] sm:$0xff] }
 0xab6   :  { %v9528_v16 = vpack.c.bf16 %v9470_v41, %v9469_v26  ;;  %v9513_v26 = vld [vmem:[#allocation3 + $0x2ea] sm:$0xff]  ;;  %v9514_v41 = vld [vmem:[#allocation3 + $0x2f2] sm:$0xff] }
 0xabc   :  { %13154 = vmatmul.mubr.bf16.gmra.mrb[60].mxu1 %v9040_v23  ;;  %v9503_v23 = vld [vmem:[#allocation3 + $0x272] sm:$0xff] }
 0xabd   :  { %13173 = vmatprep.mubr.bf16.mxu1 %v9523_v15  ;;  %v9545_v15 = vpack.c.bf16 %v9504_v17, %v9503_v23 }
 0xac4   :  { %13174 = vmatmul.mubr.bf16.vlgmr.msra.gmra.mrb[0].mxu1 %v9524_v38  ;;  %v9546_v38 = vpack.c.bf16 %v9506_v33, %v9505_v59 }
 0xac5   :  { %13177 = vmatprep.mubr.bf16.mxu1 %v9525_v13  ;;  %v9547_v13 = vpack.c.bf16 %v9508_v44, %v9507_v43 }
 0xacc   :  { %13178 = vmatmul.mubr.bf16.gmra.mrb[4].mxu1 %v9526_v50  ;;  %v9548_v50 = vpack.c.bf16 %v9510_v2, %v9509_v22 }
 0xacd   :  { %13181 = vmatprep.mubr.bf16.mxu1 %v9527_v30  ;;  %v9549_v30 = vpack.c.bf16 %v9512_v62, %v9511_v31 }
 0xad4   :  { %13182 = vmatmul.mubr.bf16.gmra.mrb[8].mxu1 %v9528_v16  ;;  %v9550_v16 = vpack.c.bf16 %v9514_v41, %v9513_v26 }
 0xad5   :  { %13185 = vmatprep.mubr.bf16.mxu1 %v9529_v28  ;;  %v9551_v28 = vpack.c.bf16 %v9516_v37, %v9515_v40 }
 0xadc   :  { %13186 = vmatmul.mubr.bf16.gmra.mrb[12].mxu1 %v9530_v10  ;;  %v9522_v10 = vld [vmem:[#allocation3 + $0x352] sm:$0xff] }
 0xadd   :  { %13189 = vmatprep.mubr.bf16.mxu1 %v9531_v49  ;;  %v9554_v49 = vpack.c.bf16 %v9522_v10, %v9521_v11 }
 0xae4   :  { %13190 = vmatmul.mubr.bf16.gmra.mrb[16].mxu1 %v9532_v3 }
 0xae5   :  { %13193 = vmatprep.mubr.bf16.mxu1 %v9533_v19 }
 0xaec   :  { %13194 = vmatmul.mubr.bf16.gmra.mrb[20].mxu1 %v9534_v63 }
 0xaed   :  { %13197 = vmatprep.mubr.bf16.mxu1 %v9535_v58 }
 0xaf4   :  { %13198 = vmatmul.mubr.bf16.gmra.mrb[24].mxu1 %v9536_v47 }
 0xaf5   :  { %13201 = vmatprep.mubr.bf16.mxu1 %v17391_v29  ;;  %v9500_v29 = vld [vmem:[#allocation3 + $0x24a] sm:$0xff] }
 0xaf6   :  { %v9543_v35 = vpack.c.bf16 %v9500_v29, %v9499_v27 }
 0xafc   :  { %13202 = vmatmul.mubr.bf16.gmra.mrb[28].mxu1 %v9538_v42 }
 0xafd   :  { %13205 = vmatprep.mubr.bf16.mxu1 %v9539_v7 }
 0xb04   :  { %13206 = vmatmul.mubr.bf16.gmra.mrb[32].mxu1 %v9540_v24 }
 0xb05   :  { %13209 = vmatprep.mubr.bf16.mxu1 %v9541_v55 }
 0xb0c   :  { %13210 = vmatmul.mubr.bf16.gmra.mrb[36].mxu1 %v9542_v36 }
 0xb0d   :  { %13213 = vmatprep.mubr.bf16.mxu1 %v9543_v35 }
 0xb14   :  { %13214 = vmatmul.mubr.bf16.gmra.mrb[40].mxu1 %v9544_v53 }
 0xb15   :  { %13217 = vmatprep.mubr.bf16.mxu1 %v9545_v15 }
 0xb1c   :  { %13218 = vmatmul.mubr.bf16.gmra.mrb[44].mxu1 %v9546_v38 }
 0xb1d   :  { %13221 = vmatprep.mubr.bf16.mxu1 %v9547_v13 }
 0xb24   :  { %13222 = vmatmul.mubr.bf16.gmra.mrb[48].mxu1 %v9548_v50 }
 0xb25   :  { %13225 = vmatprep.mubr.bf16.mxu1 %v9549_v30 }
 0xb2c   :  { %13226 = vmatmul.mubr.bf16.gmra.mrb[52].mxu1 %v9550_v16 }
 0xb2d   :  { %13229 = vmatprep.mubr.bf16.mxu1 %v9551_v28 }
 0xb34   :  { %13230 = vmatmul.mubr.bf16.gmra.mrb[56].mxu1 %v9552_v32 }
 0xb35   :  { %13233 = vmatprep.mubr.bf16.mxu1 %v17409_v9 }
 0xb3c   :  { %13234 = vmatmul.mubr.bf16.gmra.mrb[60].mxu1 %v9554_v49 }
 0xb97   :  { %v17495_v8 = vpop.f32.mrb[0].mxu1 }
 0xb98   :  { %v17497_v51 = vpop.f32.mrb[1].mxu1 }
 0xb99   :  { %v17499_v25 = vpop.f32.mrb[2].mxu1 }
 0xb9a   :  { %v17501_v60 = vpop.f32.mrb[3].mxu1 }
 0xb9b   :  { %v9973_v3 = vadd.f32 %v17501_v60, %v17497_v51 }
 0xb9d   :  { %v9974_v19 = vadd.f32 %v17495_v8, %v9973_v3 }
 0xb9f   :  { %v17506_v54 = vpop.f32.mrb[4].mxu1  ;;  %v9975_v9 = vadd.f32 %v17499_v25, %v9974_v19 }
 0xba0   :  { %v17509_v6 = vpop.f32.mrb[5].mxu1 }
 0xba1   :  { %v9976_v21 = vadd.f32 %v9975_v9, %v17509_v6  ;;  %v17512_v45 = vpop.f32.mrb[6].mxu1 }
 0xba2   :  { %v17514_v63 = vpop.f32.mrb[7].mxu1 }
 0xba3   :  { %v9977_v58 = vadd.f32 %v9976_v21, %v17514_v63 }
 0xba5   :  { %v9978_v56 = vadd.f32 %v17506_v54, %v9977_v58 }
 0xba7   :  { %v17518_v39 = vpop.f32.mrb[8].mxu1  ;;  %v9979_v47 = vadd.f32 %v17512_v45, %v9978_v56 }
 0xba8   :  { %v17521_v5 = vpop.f32.mrb[9].mxu1 }
 0xba9   :  { %v9980_v34 = vadd.f32 %v9979_v47, %v17521_v5  ;;  %v17524_v42 = vpop.f32.mrb[10].mxu1 }
 0xbaa   :  { %v17526_v52 = vpop.f32.mrb[11].mxu1 }
 0xbab   :  { %v9981_v1 = vadd.f32 %v9980_v34, %v17526_v52 }
 0xbad   :  { %v9982_v7 = vadd.f32 %v17518_v39, %v9981_v1 }
 0xbaf   :  { %v17530_v4 = vpop.f32.mrb[12].mxu1  ;;  %v9983_v14 = vadd.f32 %v17524_v42, %v9982_v7 }
 0xbb0   :  { %v17533_v48 = vpop.f32.mrb[13].mxu1 }
 0xbb1   :  { %v9984_v20 = vadd.f32 %v9983_v14, %v17533_v48  ;;  %v17536_v24 = vpop.f32.mrb[14].mxu1 }
 0xbb2   :  { %v17538_v55 = vpop.f32.mrb[15].mxu1 }
 0xbb3   :  { %v9985_v12 = vadd.f32 %v9984_v20, %v17538_v55 }
 0xbb5   :  { %v9986_v0 = vadd.f32 %v17530_v4, %v9985_v12 }
 0xbb7   :  { %v17542_v27 = vpop.f32.mrb[16].mxu1  ;;  %v9987_v29 = vadd.f32 %v17536_v24, %v9986_v0 }
 0xbb8   :  { %v17545_v36 = vpop.f32.mrb[17].mxu1 }
 0xbb9   :  { %v9988_v35 = vadd.f32 %v9987_v29, %v17545_v36  ;;  %v17548_v57 = vpop.f32.mrb[18].mxu1 }
 0xbba   :  { %v17550_v18 = vpop.f32.mrb[19].mxu1 }
 0xbbb   :  { %v9989_v23 = vadd.f32 %v9988_v35, %v17550_v18 }
 0xbbd   :  { %v9990_v17 = vadd.f32 %v17542_v27, %v9989_v23 }
 0xbbf   :  { %v17554_v53 = vpop.f32.mrb[20].mxu1  ;;  %v9991_v15 = vadd.f32 %v17548_v57, %v9990_v17 }
 0xbc0   :  { %v17557_v59 = vpop.f32.mrb[21].mxu1 }
 0xbc1   :  { %v9992_v33 = vadd.f32 %v9991_v15, %v17557_v59  ;;  %v17560_v43 = vpop.f32.mrb[22].mxu1 }
 0xbc2   :  { %v17562_v44 = vpop.f32.mrb[23].mxu1 }
 0xbc3   :  { %v9993_v38 = vadd.f32 %v9992_v33, %v17562_v44 }
 0xbc5   :  { %v9994_v13 = vadd.f32 %v17554_v53, %v9993_v38 }
 0xbc7   :  { %v17566_v22 = vpop.f32.mrb[24].mxu1  ;;  %v9995_v2 = vadd.f32 %v17560_v43, %v9994_v13 }
 0xbc8   :  { %v17569_v31 = vpop.f32.mrb[25].mxu1 }
 0xbc9   :  { %v9996_v62 = vadd.f32 %v9995_v2, %v17569_v31  ;;  %v17572_v50 = vpop.f32.mrb[26].mxu1 }
 0xbca   :  { %v17574_v30 = vpop.f32.mrb[27].mxu1 }
 0xbcb   :  { %v9997_v26 = vadd.f32 %v9996_v62, %v17574_v30 }
 0xbcd   :  { %v9998_v41 = vadd.f32 %v17566_v22, %v9997_v26 }
 0xbcf   :  { %v17578_v40 = vpop.f32.mrb[28].mxu1  ;;  %v9999_v37 = vadd.f32 %v17572_v50, %v9998_v41 }
 0xbd0   :  { %v17581_v16 = vpop.f32.mrb[29].mxu1 }
 0xbd1   :  { %v10000_v28 = vadd.f32 %v9999_v37, %v17581_v16  ;;  %v17584_v46 = vpop.f32.mrb[30].mxu1 }
 0xbd2   :  { %v17586_v61 = vpop.f32.mrb[31].mxu1 }
 0xbd3   :  { %v10001_v32 = vadd.f32 %v10000_v28, %v17586_v61 }
 0xbd5   :  { %v10002_v11 = vadd.f32 %v17578_v40, %v10001_v32 }
 0xbd7   :  { %v17590_v10 = vpop.f32.mrb[32].mxu1  ;;  %v10003_v49 = vadd.f32 %v17584_v46, %v10002_v11 }
 0xbd8   :  { %v17593_v3 = vpop.f32.mrb[33].mxu1 }
 0xbd9   :  { %v10004_v19 = vadd.f32 %v10003_v49, %v17593_v3  ;;  %v17596_v9 = vpop.f32.mrb[34].mxu1 }
 0xbda   :  { %v17598_v21 = vpop.f32.mrb[35].mxu1 }
 0xbdb   :  { %v10005_v58 = vadd.f32 %v10004_v19, %v17598_v21 }
 0xbdd   :  { %v10006_v56 = vadd.f32 %v17590_v10, %v10005_v58 }
 0xbdf   :  { %v17602_v47 = vpop.f32.mrb[36].mxu1  ;;  %v10007_v34 = vadd.f32 %v17596_v9, %v10006_v56 }
 0xbe0   :  { %v17605_v1 = vpop.f32.mrb[37].mxu1 }
 0xbe1   :  { %v10008_v7 = vadd.f32 %v10007_v34, %v17605_v1  ;;  %v17608_v14 = vpop.f32.mrb[38].mxu1 }
 0xbe2   :  { %v17610_v20 = vpop.f32.mrb[39].mxu1 }
 0xbe3   :  { %v10009_v12 = vadd.f32 %v10008_v7, %v17610_v20 }
 0xbe5   :  { %v10010_v0 = vadd.f32 %v17602_v47, %v10009_v12 }
 0xbe7   :  { %v17614_v29 = vpop.f32.mrb[40].mxu1  ;;  %v10011_v35 = vadd.f32 %v17608_v14, %v10010_v0 }
 0xbe8   :  { %v17617_v23 = vpop.f32.mrb[41].mxu1 }
 0xbe9   :  { %v10012_v17 = vadd.f32 %v10011_v35, %v17617_v23  ;;  %v17620_v15 = vpop.f32.mrb[42].mxu1 }
 0xbea   :  { %v17622_v33 = vpop.f32.mrb[43].mxu1 }
 0xbeb   :  { %v10013_v38 = vadd.f32 %v10012_v17, %v17622_v33 }
 0xbed   :  { %v10014_v13 = vadd.f32 %v17614_v29, %v10013_v38 }
 0xbef   :  { %v17626_v2 = vpop.f32.mrb[44].mxu1  ;;  %v10015_v62 = vadd.f32 %v17620_v15, %v10014_v13 }
 0xbf0   :  { %v17629_v26 = vpop.f32.mrb[45].mxu1 }
 0xbf1   :  { %v10016_v41 = vadd.f32 %v10015_v62, %v17629_v26  ;;  %v17632_v37 = vpop.f32.mrb[46].mxu1 }
 0xbf2   :  { %v17634_v28 = vpop.f32.mrb[47].mxu1 }
 0xbf3   :  { %v10017_v32 = vadd.f32 %v10016_v41, %v17634_v28 }
 0xbf5   :  { %v10018_v11 = vadd.f32 %v17626_v2, %v10017_v32 }
 0xbf7   :  { %v17638_v49 = vpop.f32.mrb[48].mxu1  ;;  %v10019_v19 = vadd.f32 %v17632_v37, %v10018_v11 }
 0xbf8   :  { %19184 = vst [vmem:[#allocation11_spill] sm:$0xff] %v17638_v49  ;;  %v17641_v58 = vpop.f32.mrb[49].mxu1 }
 0xbf9   :  { %19185 = vst [vmem:[#allocation8_spill] sm:$0xff] %v17641_v58  ;;  %v10020_v56 = vadd.f32 %v10019_v19, %v17641_v58  ;;  %v17644_v34 = vpop.f32.mrb[50].mxu1 }
 0xbfa   :  { %19186 = vst [vmem:[#allocation10_spill] sm:$0xff] %v17644_v34  ;;  %v17646_v7 = vpop.f32.mrb[51].mxu1 }
 0xbfb   :  { %19187 = vst [vmem:[#allocation13_spill] sm:$0xff] %v17646_v7  ;;  %v10021_v12 = vadd.f32 %v10020_v56, %v17646_v7 }
 0xbfd   :  { %v10022_v0 = vadd.f32 %v17638_v49, %v10021_v12 }
 0xbff   :  { %v17650_v35 = vpop.f32.mrb[52].mxu1  ;;  %v10023_v17 = vadd.f32 %v17644_v34, %v10022_v0 }
 0xc00   :  { %19188 = vst [vmem:[#allocation15_spill] sm:$0xff] %v17650_v35  ;;  %v17653_v38 = vpop.f32.mrb[53].mxu1 }
 0xc01   :  { %19189 = vst [vmem:[#allocation12_spill] sm:$0xff] %v17653_v38  ;;  %v10024_v13 = vadd.f32 %v10023_v17, %v17653_v38  ;;  %v17656_v62 = vpop.f32.mrb[54].mxu1 }
 0xc02   :  { %19190 = vst [vmem:[#allocation14_spill] sm:$0xff] %v17656_v62  ;;  %v17658_v41 = vpop.f32.mrb[55].mxu1 }
 0xc03   :  { %19191 = vst [vmem:[#allocation16_spill] sm:$0xff] %v17658_v41  ;;  %v10025_v32 = vadd.f32 %v10024_v13, %v17658_v41 }
 0xc05   :  { %v10026_v11 = vadd.f32 %v17650_v35, %v10025_v32 }
 0xc07   :  { %v17662_v19 = vpop.f32.mrb[56].mxu1  ;;  %v10027_v56 = vadd.f32 %v17656_v62, %v10026_v11 }
 0xc08   :  { %19192 = vst [vmem:[#allocation24_spill] sm:$0xff] %v17662_v19  ;;  %v17665_v12 = vpop.f32.mrb[57].mxu1 }
 0xc09   :  { %19193 = vst [vmem:[#allocation26_spill] sm:$0xff] %v17665_v12  ;;  %v10028_v0 = vadd.f32 %v10027_v56, %v17665_v12  ;;  %v17668_v34 = vpop.f32.mrb[58].mxu1 }
 0xc0a   :  { %19194 = vst [vmem:[#allocation6_spill] sm:$0xff] %v17668_v34  ;;  %v17670_v49 = vpop.f32.mrb[59].mxu1 }
 0xc0b   :  { %19195 = vst [vmem:[#allocation21_spill] sm:$0xff] %v17670_v49  ;;  %v10029_v17 = vadd.f32 %v10028_v0, %v17670_v49 }
 0xc0d   :  { %v10030_v38 = vadd.f32 %v17662_v19, %v10029_v17 }
 0xc0f   :  { %v17674_v7 = vpop.f32.mrb[60].mxu1  ;;  %v10031_v13 = vadd.f32 %v17668_v34, %v10030_v38 }
 0xc10   :  { %v17677_v32 = vpop.f32.mrb[61].mxu1 }
 0xc11   :  { %19196 = vst [vmem:[#allocation22_spill] sm:$0xff] %v17677_v32  ;;  %v10032_v11 = vadd.f32 %v10031_v13, %v17677_v32  ;;  %v17680_v62 = vpop.f32.mrb[62].mxu1 }
 0xc12   :  { %v17682_v35 = vpop.f32.mrb[63].mxu1 }
 0xc13   :  { %v10033_v56 = vadd.f32 %v10032_v11, %v17682_v35 }
 0xc15   :  { %v10034_v12 = vadd.f32 %v17674_v7, %v10033_v56  ;;  %v19210_v56 = vld [vmem:[#allocation10_spill] sm:$0xff] }
 0xc17   :  { %v10035_v0 = vadd.f32 %v17680_v62, %v10034_v12  ;;  %v19208_v12 = vld [vmem:[#allocation11_spill] sm:$0xff] }
 0xc19   :  { %v10036_v49 = vrot.slane %v10035_v0, 4 }
 0xc1b   :  { %v10037_v17 = vadd.f32 %v10036_v49, %v10035_v0  ;;  %v19212_v0 = vld [vmem:[#allocation12_spill] sm:$0xff] }
 0xc1d   :  { %v10038_v19 = vrot.slane %v10037_v17, 2 }
 0xc1f   :  { %v10039_v41 = vadd.f32 %v10038_v19, %v10037_v17  ;;  %v19206_v19 = vld [vmem:[#allocation13_spill] sm:$0xff]  ;;  %v19214_v17 = vld [vmem:[#allocation16_spill] sm:$0xff] }
 0xc21   :  { %v10040_v58 = vrot.slane %v10039_v41, 1 }
 0xc23   :  { %v10041_v38 = vadd.f32 %v10040_v58, %v10039_v41  ;;  %v19204_v41 = vld [vmem:[#allocation8_spill] sm:$0xff] }
 0xc25   :  { %v17687_v34 = vmul.f32 0.001953125, %v10041_v38 }
 0xc27   :  { %v17691_v13 = vsub.f32 %v17497_v51, %v17687_v34  ;;  %v17695_v32 = vsub.f32 %v17501_v60, %v17687_v34  ;;  %v17699_v11 = vsub.f32 %v17495_v8, %v17687_v34  ;;  %v17703_v49 = vsub.f32 %v17499_v25, %v17687_v34 }
 0xc28   :  { %v17707_v58 = vsub.f32 %v17509_v6, %v17687_v34  ;;  %v17711_v51 = vsub.f32 %v17514_v63, %v17687_v34  ;;  %v17715_v60 = vsub.f32 %v17506_v54, %v17687_v34  ;;  %v17719_v8 = vsub.f32 %v17512_v45, %v17687_v34 }
 0xc29   :  { %19197 = vst [vmem:[#allocation23_spill] sm:$0xff] %v17691_v13  ;;  %19198 = vst [vmem:[#allocation5_spill] sm:$0xff] %v17695_v32  ;;  %v17723_v25 = vsub.f32 %v17521_v5, %v17687_v34  ;;  %v17727_v6 = vsub.f32 %v17526_v52, %v17687_v34  ;;  %v17731_v63 = vsub.f32 %v17518_v39, %v17687_v34 }
 0xc2a   :  { %19199 = vst [vmem:[#allocation7_spill] sm:$0xff] %v17699_v11  ;;  %v17735_v54 = vsub.f32 %v17524_v42, %v17687_v34  ;;  %v17739_v45 = vsub.f32 %v17533_v48, %v17687_v34  ;;  %v17743_v5 = vsub.f32 %v17538_v55, %v17687_v34  ;;  %v17747_v52 = vsub.f32 %v17530_v4, %v17687_v34 }
 0xc2b   :  { %v17751_v39 = vsub.f32 %v17536_v24, %v17687_v34  ;;  %v17755_v42 = vsub.f32 %v17545_v36, %v17687_v34  ;;  %v17759_v48 = vsub.f32 %v17550_v18, %v17687_v34  ;;  %v17763_v55 = vsub.f32 %v17542_v27, %v17687_v34 }
 0xc2c   :  { %v17767_v4 = vsub.f32 %v17548_v57, %v17687_v34  ;;  %v17771_v24 = vsub.f32 %v17557_v59, %v17687_v34  ;;  %v17775_v36 = vsub.f32 %v17562_v44, %v17687_v34  ;;  %v17779_v18 = vsub.f32 %v17554_v53, %v17687_v34 }
 0xc2d   :  { %v17783_v27 = vsub.f32 %v17560_v43, %v17687_v34  ;;  %v17787_v57 = vsub.f32 %v17569_v31, %v17687_v34  ;;  %v17791_v59 = vsub.f32 %v17574_v30, %v17687_v34  ;;  %v17795_v44 = vsub.f32 %v17566_v22, %v17687_v34 }
 0xc2e   :  { %v17799_v53 = vsub.f32 %v17572_v50, %v17687_v34  ;;  %v17803_v43 = vsub.f32 %v17581_v16, %v17687_v34  ;;  %v17807_v31 = vsub.f32 %v17586_v61, %v17687_v34  ;;  %v17811_v30 = vsub.f32 %v17578_v40, %v17687_v34 }
 0xc2f   :  { %v17815_v22 = vsub.f32 %v17584_v46, %v17687_v34  ;;  %v17819_v50 = vsub.f32 %v17593_v3, %v17687_v34  ;;  %v17823_v16 = vsub.f32 %v17598_v21, %v17687_v34  ;;  %v17827_v61 = vsub.f32 %v17590_v10, %v17687_v34 }
 0xc30   :  { %v17831_v40 = vsub.f32 %v17596_v9, %v17687_v34  ;;  %v17835_v46 = vsub.f32 %v17605_v1, %v17687_v34  ;;  %v17839_v3 = vsub.f32 %v17610_v20, %v17687_v34  ;;  %v17843_v21 = vsub.f32 %v17602_v47, %v17687_v34 }
 0xc31   :  { %v17847_v10 = vsub.f32 %v17608_v14, %v17687_v34  ;;  %v17851_v9 = vsub.f32 %v17617_v23, %v17687_v34  ;;  %v17855_v1 = vsub.f32 %v17622_v33, %v17687_v34  ;;  %v17859_v20 = vsub.f32 %v17614_v29, %v17687_v34 }
 0xc32   :  { %v17863_v47 = vsub.f32 %v17620_v15, %v17687_v34  ;;  %v17867_v14 = vsub.f32 %v17629_v26, %v17687_v34  ;;  %v17871_v23 = vsub.f32 %v17634_v28, %v17687_v34  ;;  %v17875_v33 = vsub.f32 %v17626_v2, %v17687_v34 }
 0xc33   :  { %v17879_v29 = vsub.f32 %v17632_v37, %v17687_v34  ;;  %v17883_v15 = vsub.f32 %v19204_v41, %v17687_v34  ;;  %v17887_v26 = vsub.f32 %v19206_v19, %v17687_v34  ;;  %v17891_v28 = vsub.f32 %v19208_v12, %v17687_v34  ;;  %v19216_v41 = vld [vmem:[#allocation15_spill] sm:$0xff] }
 0xc34   :  { %19200 = vst [vmem:[#allocation25_spill] sm:$0xff] %v17867_v14  ;;  %19201 = vst [vmem:[#allocation17_spill] sm:$0xff] %v17871_v23  ;;  %v17895_v2 = vsub.f32 %v19210_v56, %v17687_v34  ;;  %v17899_v37 = vsub.f32 %v19212_v0, %v17687_v34  ;;  %v17903_v38 = vsub.f32 %v19214_v17, %v17687_v34 }
 0xc35   :  { %19202 = vst [vmem:[#allocation18_spill] sm:$0xff] %v17875_v33  ;;  %19203 = vst [vmem:[#allocation19_spill] sm:$0xff] %v17879_v29  ;;  %v17907_v19 = vsub.f32 %v19216_v41, %v17687_v34 }
 0xc36   :  { %19205 = vst [vmem:[#allocation20_spill] sm:$0xff] %v17883_v15  ;;  %19207 = vst [vmem:[#allocation9_spill] sm:$0xff] %v17887_v26  ;;  %v19218_v26 = vld [vmem:[#allocation14_spill] sm:$0xff] }
 0xc37   :  { %19209 = vst [vmem:[#allocation8_spill] sm:$0xff] %v17891_v28  ;;  %19211 = vst [vmem:[#allocation13_spill] sm:$0xff] %v17895_v2  ;;  %v17911_v12 = vsub.f32 %v19218_v26, %v17687_v34  ;;  %v19220_v28 = vld [vmem:[#allocation26_spill] sm:$0xff]  ;;  %v19222_v2 = vld [vmem:[#allocation21_spill] sm:$0xff] }
 0xc38   :  { %19213 = vst [vmem:[#allocation11_spill] sm:$0xff] %v17899_v37  ;;  %19215 = vst [vmem:[#allocation10_spill] sm:$0xff] %v17903_v38  ;;  %v17915_v56 = vsub.f32 %v19220_v28, %v17687_v34  ;;  %v17919_v0 = vsub.f32 %v19222_v2, %v17687_v34  ;;  %v19224_v37 = vld [vmem:[#allocation24_spill] sm:$0xff]  ;;  %v19226_v38 = vld [vmem:[#allocation6_spill] sm:$0xff]  ;;  %v17935_v28 = vsub.f32 %v17682_v35, %v17687_v34 }
 0xc39   :  { %19217 = vst [vmem:[#allocation12_spill] sm:$0xff] %v17907_v19  ;;  %19219 = vst [vmem:[#allocation16_spill] sm:$0xff] %v17911_v12  ;;  %v17923_v17 = vsub.f32 %v19224_v37, %v17687_v34  ;;  %v17927_v41 = vsub.f32 %v19226_v38, %v17687_v34  ;;  %v19228_v19 = vld [vmem:[#allocation22_spill] sm:$0xff]  ;;  %v17939_v2 = vsub.f32 %v17674_v7, %v17687_v34 }
 0xc3a   :  { %19221 = vst [vmem:[#allocation15_spill] sm:$0xff] %v17915_v56  ;;  %19223 = vst [vmem:[#allocation14_spill] sm:$0xff] %v17919_v0  ;;  %v17931_v26 = vsub.f32 %v19228_v19, %v17687_v34  ;;  %v17943_v37 = vsub.f32 %v17680_v62, %v17687_v34  ;;  %v10107_v38 = vmul.f32 %v17691_v13, %v17691_v13 }
 0xc3b   :  { %19225 = vst [vmem:[#allocation26_spill] sm:$0xff] %v17923_v17  ;;  %19227 = vst [vmem:[#allocation21_spill] sm:$0xff] %v17927_v41  ;;  %v10108_v41 = vmul.f32 %v17695_v32, %v17695_v32  ;;  %v10109_v19 = vmul.f32 %v17699_v11, %v17699_v11  ;;  %v10110_v35 = vmul.f32 %v17703_v49, %v17703_v49 }
 0xc3c   :  { %19229 = vst [vmem:[#allocation24_spill] sm:$0xff] %v17931_v26  ;;  %19230 = vst [vmem:[#allocation6_spill] sm:$0xff] %v17935_v28  ;;  %v10111_v7 = vmul.f32 %v17707_v58, %v17707_v58  ;;  %v10112_v34 = vmul.f32 %v17711_v51, %v17711_v51  ;;  %v10113_v13 = vmul.f32 %v17715_v60, %v17715_v60 }
 0xc3d   :  { %19231 = vst [vmem:[#allocation22_spill] sm:$0xff] %v17939_v2  ;;  %19232 = vst [vmem:[#allocation27_spill] sm:$0xff] %v17943_v37  ;;  %v10171_v26 = vadd.f32 %v10108_v41, %v10107_v38  ;;  %v10114_v11 = vmul.f32 %v17719_v8, %v17719_v8  ;;  %v10115_v38 = vmul.f32 %v17723_v25, %v17723_v25 }
 0xc3f   :  { %v10172_v28 = vadd.f32 %v10171_v26, %v10109_v19  ;;  %v10116_v19 = vmul.f32 %v17727_v6, %v17727_v6 }
 0xc41   :  { %v10173_v2 = vadd.f32 %v10172_v28, %v10110_v35  ;;  %v10117_v35 = vmul.f32 %v17731_v63, %v17731_v63 }
 0xc43   :  { %v10174_v62 = vadd.f32 %v10173_v2, %v10111_v7  ;;  %v10118_v7 = vmul.f32 %v17735_v54, %v17735_v54 }
 0xc45   :  { %v10175_v32 = vadd.f32 %v10174_v62, %v10112_v34  ;;  %v10119_v62 = vmul.f32 %v17739_v45, %v17739_v45 }
 0xc47   :  { %v10176_v41 = vadd.f32 %v10175_v32, %v10113_v13  ;;  %v10120_v13 = vmul.f32 %v17743_v5, %v17743_v5 }
 0xc49   :  { %v10177_v26 = vadd.f32 %v10176_v41, %v10114_v11  ;;  %v10121_v41 = vmul.f32 %v17747_v52, %v17747_v52 }
 0xc4b   :  { %v10178_v28 = vadd.f32 %v10177_v26, %v10115_v38  ;;  %v10122_v26 = vmul.f32 %v17751_v39, %v17751_v39 }
 0xc4d   :  { %v10179_v2 = vadd.f32 %v10178_v28, %v10116_v19  ;;  %v10123_v28 = vmul.f32 %v17755_v42, %v17755_v42 }
 0xc4f   :  { %v10180_v34 = vadd.f32 %v10179_v2, %v10117_v35  ;;  %v10124_v2 = vmul.f32 %v17759_v48, %v17759_v48 }
 0xc51   :  { %v10181_v32 = vadd.f32 %v10180_v34, %v10118_v7  ;;  %v10125_v34 = vmul.f32 %v17763_v55, %v17763_v55 }
 0xc53   :  { %v10182_v11 = vadd.f32 %v10181_v32, %v10119_v62  ;;  %v10126_v32 = vmul.f32 %v17767_v4, %v17767_v4 }
 0xc55   :  { %v10183_v38 = vadd.f32 %v10182_v11, %v10120_v13  ;;  %v10127_v11 = vmul.f32 %v17771_v24, %v17771_v24 }
 0xc57   :  { %v10184_v19 = vadd.f32 %v10183_v38, %v10121_v41  ;;  %v10128_v38 = vmul.f32 %v17775_v36, %v17775_v36 }
 0xc59   :  { %v10185_v35 = vadd.f32 %v10184_v19, %v10122_v26  ;;  %v10129_v19 = vmul.f32 %v17779_v18, %v17779_v18 }
 0xc5b   :  { %v10186_v7 = vadd.f32 %v10185_v35, %v10123_v28  ;;  %v10130_v35 = vmul.f32 %v17783_v27, %v17783_v27 }
 0xc5d   :  { %v10187_v62 = vadd.f32 %v10186_v7, %v10124_v2  ;;  %v10131_v7 = vmul.f32 %v17787_v57, %v17787_v57 }
 0xc5f   :  { %v10188_v13 = vadd.f32 %v10187_v62, %v10125_v34  ;;  %v10132_v62 = vmul.f32 %v17791_v59, %v17791_v59 }
 0xc61   :  { %v10189_v41 = vadd.f32 %v10188_v13, %v10126_v32  ;;  %v10133_v13 = vmul.f32 %v17795_v44, %v17795_v44 }
 0xc63   :  { %v10190_v26 = vadd.f32 %v10189_v41, %v10127_v11  ;;  %v10134_v41 = vmul.f32 %v17799_v53, %v17799_v53 }
 0xc65   :  { %v10191_v28 = vadd.f32 %v10190_v26, %v10128_v38  ;;  %v10135_v26 = vmul.f32 %v17803_v43, %v17803_v43 }
 0xc67   :  { %v10192_v2 = vadd.f32 %v10191_v28, %v10129_v19  ;;  %v10136_v28 = vmul.f32 %v17807_v31, %v17807_v31 }
 0xc69   :  { %v10193_v34 = vadd.f32 %v10192_v2, %v10130_v35  ;;  %v10137_v2 = vmul.f32 %v17811_v30, %v17811_v30 }
 0xc6b   :  { %v10194_v32 = vadd.f32 %v10193_v34, %v10131_v7  ;;  %v10138_v34 = vmul.f32 %v17815_v22, %v17815_v22 }
 0xc6d   :  { %v10195_v11 = vadd.f32 %v10194_v32, %v10132_v62  ;;  %v10139_v32 = vmul.f32 %v17819_v50, %v17819_v50 }
 0xc6f   :  { %v10196_v38 = vadd.f32 %v10195_v11, %v10133_v13  ;;  %v10140_v11 = vmul.f32 %v17823_v16, %v17823_v16 }
 0xc71   :  { %v10197_v19 = vadd.f32 %v10196_v38, %v10134_v41  ;;  %v10141_v38 = vmul.f32 %v17827_v61, %v17827_v61 }
 0xc73   :  { %v10198_v35 = vadd.f32 %v10197_v19, %v10135_v26  ;;  %v10142_v19 = vmul.f32 %v17831_v40, %v17831_v40 }
 0xc75   :  { %v10199_v7 = vadd.f32 %v10198_v35, %v10136_v28  ;;  %v10143_v35 = vmul.f32 %v17835_v46, %v17835_v46 }
 0xc77   :  { %v10200_v62 = vadd.f32 %v10199_v7, %v10137_v2  ;;  %v10144_v7 = vmul.f32 %v17839_v3, %v17839_v3 }
 0xc79   :  { %v10201_v13 = vadd.f32 %v10200_v62, %v10138_v34  ;;  %v10145_v62 = vmul.f32 %v17843_v21, %v17843_v21 }
 0xc7b   :  { %v10202_v41 = vadd.f32 %v10201_v13, %v10139_v32  ;;  %v10146_v13 = vmul.f32 %v17847_v10, %v17847_v10 }
 0xc7d   :  { %v10203_v26 = vadd.f32 %v10202_v41, %v10140_v11  ;;  %v10147_v41 = vmul.f32 %v17851_v9, %v17851_v9 }
 0xc7f   :  { %v10204_v28 = vadd.f32 %v10203_v26, %v10141_v38  ;;  %v10148_v26 = vmul.f32 %v17855_v1, %v17855_v1 }
 0xc81   :  { %v10205_v2 = vadd.f32 %v10204_v28, %v10142_v19  ;;  %v10149_v28 = vmul.f32 %v17859_v20, %v17859_v20 }
 0xc83   :  { %v10206_v34 = vadd.f32 %v10205_v2, %v10143_v35  ;;  %v10150_v2 = vmul.f32 %v17863_v47, %v17863_v47 }
 0xc85   :  { %v10207_v32 = vadd.f32 %v10206_v34, %v10144_v7  ;;  %v10151_v34 = vmul.f32 %v17867_v14, %v17867_v14 }
 0xc87   :  { %v10208_v11 = vadd.f32 %v10207_v32, %v10145_v62  ;;  %v10152_v32 = vmul.f32 %v17871_v23, %v17871_v23 }
 0xc89   :  { %v10209_v38 = vadd.f32 %v10208_v11, %v10146_v13  ;;  %v10153_v11 = vmul.f32 %v17875_v33, %v17875_v33 }
 0xc8b   :  { %v10210_v19 = vadd.f32 %v10209_v38, %v10147_v41  ;;  %v10154_v38 = vmul.f32 %v17879_v29, %v17879_v29 }
 0xc8d   :  { %v10211_v35 = vadd.f32 %v10210_v19, %v10148_v26  ;;  %v10155_v19 = vmul.f32 %v17883_v15, %v17883_v15 }
 0xc8f   :  { %v10212_v7 = vadd.f32 %v10211_v35, %v10149_v28  ;;  %v19233_v35 = vld [vmem:[#allocation9_spill] sm:$0xff] }
 0xc90   :  { %v10156_v14 = vmul.f32 %v19233_v35, %v19233_v35 }
 0xc91   :  { %v10213_v62 = vadd.f32 %v10212_v7, %v10150_v2  ;;  %v19234_v7 = vld [vmem:[#allocation8_spill] sm:$0xff] }
 0xc92   :  { %v10157_v23 = vmul.f32 %v19234_v7, %v19234_v7 }
 0xc93   :  { %v10214_v13 = vadd.f32 %v10213_v62, %v10151_v34  ;;  %v19235_v62 = vld [vmem:[#allocation13_spill] sm:$0xff] }
 0xc94   :  { %v10158_v33 = vmul.f32 %v19235_v62, %v19235_v62 }
 0xc95   :  { %v10215_v41 = vadd.f32 %v10214_v13, %v10152_v32  ;;  %v19236_v13 = vld [vmem:[#allocation11_spill] sm:$0xff] }
 0xc96   :  { %v10159_v29 = vmul.f32 %v19236_v13, %v19236_v13 }
 0xc97   :  { %v10216_v26 = vadd.f32 %v10215_v41, %v10153_v11  ;;  %v19237_v41 = vld [vmem:[#allocation10_spill] sm:$0xff] }
 0xc98   :  { %v10160_v15 = vmul.f32 %v19237_v41, %v19237_v41 }
 0xc99   :  { %v10217_v28 = vadd.f32 %v10216_v26, %v10154_v38  ;;  %v19238_v26 = vld [vmem:[#allocation12_spill] sm:$0xff] }
 0xc9a   :  { %v10161_v35 = vmul.f32 %v19238_v26, %v19238_v26 }
 0xc9b   :  { %v10218_v2 = vadd.f32 %v10217_v28, %v10155_v19  ;;  %v10162_v28 = vmul.f32 %v17911_v12, %v17911_v12 }
 0xc9d   :  { %v10219_v34 = vadd.f32 %v10218_v2, %v10156_v14  ;;  %v10163_v2 = vmul.f32 %v17915_v56, %v17915_v56 }
 0xc9f   :  { %v10220_v32 = vadd.f32 %v10219_v34, %v10157_v23  ;;  %v10164_v34 = vmul.f32 %v17919_v0, %v17919_v0 }
 0xca1   :  { %v10221_v11 = vadd.f32 %v10220_v32, %v10158_v33  ;;  %v10165_v32 = vmul.f32 %v17923_v17, %v17923_v17 }
 0xca3   :  { %v10222_v38 = vadd.f32 %v10221_v11, %v10159_v29  ;;  %v19239_v11 = vld [vmem:[#allocation21_spill] sm:$0xff] }
 0xca4   :  { %v10166_v26 = vmul.f32 %v19239_v11, %v19239_v11 }
 0xca5   :  { %v10223_v19 = vadd.f32 %v10222_v38, %v10160_v15  ;;  %v19240_v38 = vld [vmem:[#allocation24_spill] sm:$0xff] }
 0xca6   :  { %v10167_v12 = vmul.f32 %v19240_v38, %v19240_v38 }
 0xca7   :  { %v10224_v14 = vadd.f32 %v10223_v19, %v10161_v35  ;;  %v19241_v19 = vld [vmem:[#allocation6_spill] sm:$0xff] }
 0xca8   :  { %v10168_v56 = vmul.f32 %v19241_v19, %v19241_v19 }
 0xca9   :  { %v10225_v23 = vadd.f32 %v10224_v14, %v10162_v28  ;;  %v19242_v14 = vld [vmem:[#allocation22_spill] sm:$0xff] }
 0xcaa   :  { %v10169_v0 = vmul.f32 %v19242_v14, %v19242_v14 }
 0xcab   :  { %v10226_v33 = vadd.f32 %v10225_v23, %v10163_v2  ;;  %v10170_v23 = vmul.f32 %v17943_v37, %v17943_v37 }
 0xcad   :  { %v10227_v29 = vadd.f32 %v10226_v33, %v10164_v34 }
 0xcaf   :  { %v10228_v15 = vadd.f32 %v10227_v29, %v10165_v32 }
 0xcb1   :  { %v10229_v35 = vadd.f32 %v10228_v15, %v10166_v26 }
 0xcb3   :  { %v10230_v28 = vadd.f32 %v10229_v35, %v10167_v12  ;;  %v10243_v12 = vld [vmem:[%s18858_s5] sm:$0x1] }
 0xcb5   :  { %v10231_v2 = vadd.f32 %v10230_v28, %v10168_v56  ;;  %v19243_v28 = vld [vmem:[#allocation4_spill] sm:$0xff] }
 0xcb6   :  { %v19244_v14 = vsub.s32 0, %v19243_v28 }
 0xcb7   :  { %v10232_v34 = vadd.f32 %v10231_v2, %v10169_v0  ;;  %v19245_v0 = vld [vmem:[#allocation23_spill] sm:$0xff] }
 0xcb9   :  { %v10233_v33 = vadd.f32 %v10232_v34, %v10170_v23 }
 0xcbb   :  { %v10234_v17 = vrot.slane %v10233_v33, 4 }
 0xcbd   :  { %v10235_v11 = vadd.f32 %v10234_v17, %v10233_v33 }
 0xcbf   :  { %v10236_v32 = vrot.slane %v10235_v11, 2 }
 0xcc1   :  { %v10237_v29 = vadd.f32 %v10236_v32, %v10235_v11  ;;  %v19246_v11 = vld [vmem:[#allocation5_spill] sm:$0xff] }
 0xcc3   :  { %v10238_v41 = vrot.slane %v10237_v29, 1 }
 0xcc5   :  { %v10239_v38 = vadd.f32 %v10238_v41, %v10237_v29  ;;  %v19248_v29 = vld [vmem:[#allocation25_spill] sm:$0xff] }
 0xcc7   :  { %v10240_v26 = vmul.f32 0.001953125, %v10239_v38  ;;  %v19247_v38 = vld [vmem:[#allocation7_spill] sm:$0xff] }
 0xcc9   :  { %v10241_v15 = vadd.f32 1e-05, %v10240_v26  ;;  %v19249_v26 = vld [vmem:[#allocation17_spill] sm:$0xff] }
 0xccb   :  { %14440 = vrsqrt.f32 %v10241_v15  ;;  %v19250_v15 = vld [vmem:[#allocation18_spill] sm:$0xff] }
 0xcd5   :  { %v14441_v35 = vpop.eup %14440 }
 0xcd6   :  { %v10244_v56 = vmul.f32 %v14441_v35, %v10243_v12  ;;  %v19251_v12 = vld [vmem:[#allocation19_spill] sm:$0xff]  ;;  %v19252_v35 = vld [vmem:[#allocation20_spill] sm:$0xff] }
 0xcd8   :  { %v18078_v37 = vrot.slane %v10244_v56, %v19244_v14  ;;  %v19253_v56 = vld [vmem:[#allocation9_spill] sm:$0xff] }
 0xcda   :  { %v18082_v17 = vmul.f32 %v18078_v37, %v19245_v0  ;;  %v18086_v41 = vmul.f32 %v18078_v37, %v19246_v11  ;;  %v18090_v2 = vmul.f32 %v18078_v37, %v19247_v38  ;;  %v18094_v23 = vmul.f32 %v18078_v37, %v17703_v49 }
 0xcdb   :  { %v18098_v14 = vmul.f32 %v18078_v37, %v17707_v58  ;;  %v18102_v34 = vmul.f32 %v18078_v37, %v17711_v51  ;;  %v18106_v33 = vmul.f32 %v18078_v37, %v17715_v60  ;;  %v18110_v32 = vmul.f32 %v18078_v37, %v17719_v8 }
 0xcdc   :  { %v18114_v49 = vmul.f32 %v18078_v37, %v17723_v25  ;;  %v18118_v58 = vmul.f32 %v18078_v37, %v17727_v6  ;;  %v18122_v51 = vmul.f32 %v18078_v37, %v17731_v63  ;;  %v18126_v60 = vmul.f32 %v18078_v37, %v17735_v54 }
 0xcdd   :  { %v18130_v8 = vmul.f32 %v18078_v37, %v17739_v45  ;;  %v18134_v25 = vmul.f32 %v18078_v37, %v17743_v5  ;;  %v18138_v6 = vmul.f32 %v18078_v37, %v17747_v52  ;;  %v18142_v63 = vmul.f32 %v18078_v37, %v17751_v39 }
 0xcde   :  { %v18146_v54 = vmul.f32 %v18078_v37, %v17755_v42  ;;  %v18150_v45 = vmul.f32 %v18078_v37, %v17759_v48  ;;  %v18154_v5 = vmul.f32 %v18078_v37, %v17763_v55  ;;  %v18158_v52 = vmul.f32 %v18078_v37, %v17767_v4 }
 0xcdf   :  { %v18162_v39 = vmul.f32 %v18078_v37, %v17771_v24  ;;  %v18166_v42 = vmul.f32 %v18078_v37, %v17775_v36  ;;  %v18170_v48 = vmul.f32 %v18078_v37, %v17779_v18  ;;  %v18174_v55 = vmul.f32 %v18078_v37, %v17783_v27 }
 0xce0   :  { %v18178_v4 = vmul.f32 %v18078_v37, %v17787_v57  ;;  %v18182_v24 = vmul.f32 %v18078_v37, %v17791_v59  ;;  %v18186_v36 = vmul.f32 %v18078_v37, %v17795_v44  ;;  %v18190_v18 = vmul.f32 %v18078_v37, %v17799_v53 }
 0xce1   :  { %v18194_v27 = vmul.f32 %v18078_v37, %v17803_v43  ;;  %v18198_v57 = vmul.f32 %v18078_v37, %v17807_v31  ;;  %v18202_v59 = vmul.f32 %v18078_v37, %v17811_v30  ;;  %v18206_v44 = vmul.f32 %v18078_v37, %v17815_v22 }
 0xce2   :  { %v18210_v53 = vmul.f32 %v18078_v37, %v17819_v50  ;;  %v18214_v43 = vmul.f32 %v18078_v37, %v17823_v16  ;;  %v18218_v31 = vmul.f32 %v18078_v37, %v17827_v61  ;;  %v18222_v30 = vmul.f32 %v18078_v37, %v17831_v40 }
 0xce3   :  { %v18226_v22 = vmul.f32 %v18078_v37, %v17835_v46  ;;  %v18230_v50 = vmul.f32 %v18078_v37, %v17839_v3  ;;  %v18234_v16 = vmul.f32 %v18078_v37, %v17843_v21  ;;  %v18238_v61 = vmul.f32 %v18078_v37, %v17847_v10 }
 0xce4   :  { %v18242_v40 = vmul.f32 %v18078_v37, %v17851_v9  ;;  %v18246_v46 = vmul.f32 %v18078_v37, %v17855_v1  ;;  %v18250_v3 = vmul.f32 %v18078_v37, %v17859_v20  ;;  %v18254_v21 = vmul.f32 %v18078_v37, %v17863_v47 }
 0xce5   :  { %v18258_v10 = vmul.f32 %v18078_v37, %v19248_v29  ;;  %v18262_v9 = vmul.f32 %v18078_v37, %v19249_v26  ;;  %v18266_v1 = vmul.f32 %v18078_v37, %v19250_v15  ;;  %v18270_v20 = vmul.f32 %v18078_v37, %v19251_v12  ;;  %v19256_v29 = vld [vmem:[#allocation10_spill] sm:$0xff]  ;;  %v19258_v15 = vld [vmem:[#allocation12_spill] sm:$0xff] }
 0xce6   :  { %v18274_v47 = vmul.f32 %v18078_v37, %v19252_v35  ;;  %v18278_v28 = vmul.f32 %v18078_v37, %v19253_v56  ;;  %v18282_v0 = vmul.f32 %v18078_v37, %v19234_v7  ;;  %v18286_v11 = vmul.f32 %v18078_v37, %v19235_v62  ;;  %v19260_v35 = vld [vmem:[#allocation16_spill] sm:$0xff]  ;;  %v19262_v56 = vld [vmem:[#allocation15_spill] sm:$0xff] }
 0xce7   :  { %v18290_v38 = vmul.f32 %v18078_v37, %v19236_v13  ;;  %v18294_v26 = vmul.f32 %v18078_v37, %v19256_v29  ;;  %v18298_v12 = vmul.f32 %v18078_v37, %v19258_v15  ;;  %v18302_v7 = vmul.f32 %v18078_v37, %v19260_v35  ;;  %v18307_v62 = vld [vmem:[%s18859_s6] ss:$0 sm:$0xff] }
 0xce8   :  { %19254 = vst [vmem:[#allocation8_spill] sm:$0xff] %v18286_v11  ;;  %v18311_v13 = vmul.f32 %v18078_v37, %v19262_v56  ;;  %v18331_v56 = vmul.f32 %v18078_v37, %v19241_v19  ;;  %v18351_v19 = vadd.f32 %v18307_v62, %v18090_v2  ;;  %v18371_v2 = vadd.f32 %v18307_v62, %v18110_v32 }
 0xce9   :  { %19255 = vst [vmem:[#allocation13_spill] sm:$0xff] %v18290_v38  ;;  %19257 = vst [vmem:[#allocation11_spill] sm:$0xff] %v18294_v26  ;;  %v19264_v38 = vld [vmem:[#allocation14_spill] sm:$0xff]  ;;  %v18391_v32 = vadd.f32 %v18307_v62, %v18130_v8  ;;  %v18411_v8 = vadd.f32 %v18307_v62, %v18150_v45  ;;  %v18431_v45 = vadd.f32 %v18307_v62, %v18170_v48 }
 0xcea   :  { %19259 = vst [vmem:[#allocation6_spill] sm:$0xff] %v18298_v12  ;;  %19261 = vst [vmem:[#allocation4_spill] sm:$0xff] %v18302_v7  ;;  %v18315_v29 = vmul.f32 %v18078_v37, %v19264_v38  ;;  %v19266_v26 = vld [vmem:[#allocation26_spill] sm:$0xff]  ;;  %v19267_v12 = vld [vmem:[#allocation21_spill] sm:$0xff]  ;;  %v18451_v48 = vadd.f32 %v18307_v62, %v18190_v18  ;;  %v18471_v18 = vadd.f32 %v18307_v62, %v18210_v53 }
 0xceb   :  { %19263 = vst [vmem:[#allocation23_spill] sm:$0xff] %v18311_v13  ;;  %v18319_v15 = vmul.f32 %v18078_v37, %v19266_v26  ;;  %v18323_v35 = vmul.f32 %v18078_v37, %v19267_v12  ;;  %v19268_v7 = vld [vmem:[#allocation24_spill] sm:$0xff]  ;;  %v19269_v13 = vld [vmem:[#allocation22_spill] sm:$0xff]  ;;  %v18343_v12 = vadd.f32 %v18307_v62, %v18082_v17  ;;  %v18363_v17 = vadd.f32 %v18307_v62, %v18102_v34 }
 0xcec   :  { %19265 = vst [vmem:[#allocation5_spill] sm:$0xff] %v18315_v29  ;;  %v18327_v11 = vmul.f32 %v18078_v37, %v19268_v7  ;;  %v18335_v38 = vmul.f32 %v18078_v37, %v19269_v13  ;;  %v19270_v29 = vld [vmem:[#allocation27_spill] sm:$0xff]  ;;  %v18347_v7 = vadd.f32 %v18307_v62, %v18086_v41  ;;  %v18355_v13 = vadd.f32 %v18307_v62, %v18094_v23 }
 0xced   :  { %v18339_v26 = vmul.f32 %v18078_v37, %v19270_v29  ;;  %v18359_v37 = vadd.f32 %v18307_v62, %v18098_v14  ;;  %v18367_v41 = vadd.f32 %v18307_v62, %v18106_v33  ;;  %v18375_v23 = vadd.f32 %v18307_v62, %v18114_v49 }
 0xcee   :  { %v18379_v14 = vadd.f32 %v18307_v62, %v18118_v58  ;;  %v18383_v34 = vadd.f32 %v18307_v62, %v18122_v51  ;;  %v18387_v33 = vadd.f32 %v18307_v62, %v18126_v60  ;;  %v18395_v49 = vadd.f32 %v18307_v62, %v18134_v25 }
 0xcef   :  { %v18399_v58 = vadd.f32 %v18307_v62, %v18138_v6  ;;  %v18403_v51 = vadd.f32 %v18307_v62, %v18142_v63  ;;  %v18407_v60 = vadd.f32 %v18307_v62, %v18146_v54  ;;  %v18415_v25 = vadd.f32 %v18307_v62, %v18154_v5  ;;  %v19276_v29 = vld [vmem:[#allocation8_spill] sm:$0xff] }
 0xcf0   :  { %v18419_v6 = vadd.f32 %v18307_v62, %v18158_v52  ;;  %v18423_v63 = vadd.f32 %v18307_v62, %v18162_v39  ;;  %v18427_v54 = vadd.f32 %v18307_v62, %v18166_v42  ;;  %v18435_v5 = vadd.f32 %v18307_v62, %v18174_v55 }
 0xcf1   :  { %v18439_v52 = vadd.f32 %v18307_v62, %v18178_v4  ;;  %v18443_v39 = vadd.f32 %v18307_v62, %v18182_v24  ;;  %v18447_v42 = vadd.f32 %v18307_v62, %v18186_v36  ;;  %v18455_v55 = vadd.f32 %v18307_v62, %v18194_v27 }
 0xcf2   :  { %v18459_v4 = vadd.f32 %v18307_v62, %v18198_v57  ;;  %v18463_v24 = vadd.f32 %v18307_v62, %v18202_v59  ;;  %v18467_v36 = vadd.f32 %v18307_v62, %v18206_v44  ;;  %v18475_v27 = vadd.f32 %v18307_v62, %v18214_v43 }
 0xcf3   :  { %v18479_v57 = vadd.f32 %v18307_v62, %v18218_v31  ;;  %v18483_v59 = vadd.f32 %v18307_v62, %v18222_v30  ;;  %v18487_v44 = vadd.f32 %v18307_v62, %v18226_v22  ;;  %v18491_v53 = vadd.f32 %v18307_v62, %v18230_v50 }
 0xcf4   :  { %v18495_v43 = vadd.f32 %v18307_v62, %v18234_v16  ;;  %v18499_v31 = vadd.f32 %v18307_v62, %v18238_v61  ;;  %v18503_v30 = vadd.f32 %v18307_v62, %v18242_v40  ;;  %v18507_v22 = vadd.f32 %v18307_v62, %v18246_v46 }
 0xcf5   :  { %v18511_v50 = vadd.f32 %v18307_v62, %v18250_v3  ;;  %v18515_v16 = vadd.f32 %v18307_v62, %v18254_v21  ;;  %v18519_v61 = vadd.f32 %v18307_v62, %v18258_v10  ;;  %v18523_v40 = vadd.f32 %v18307_v62, %v18262_v9 }
 0xcf6   :  { %v18527_v46 = vadd.f32 %v18307_v62, %v18266_v1  ;;  %v18531_v3 = vadd.f32 %v18307_v62, %v18270_v20  ;;  %v18535_v21 = vadd.f32 %v18307_v62, %v18274_v47  ;;  %v18539_v10 = vadd.f32 %v18307_v62, %v18278_v28 }
 0xcf7   :  { %v18543_v9 = vadd.f32 %v18307_v62, %v18282_v0  ;;  %v18547_v1 = vadd.f32 %v18307_v62, %v19276_v29 }
 0xcf8   :  { %19271 = vst [vmem:[#allocation7_spill] sm:$0xff] %v18527_v46  ;;  %19272 = vst [vmem:[#allocation25_spill] sm:$0xff] %v18531_v3  ;;  %v19278_v46 = vld [vmem:[#allocation13_spill] sm:$0xff]  ;;  %v19279_v3 = vld [vmem:[#allocation11_spill] sm:$0xff] }
 0xcf9   :  { %19273 = vst [vmem:[#allocation17_spill] sm:$0xff] %v18535_v21  ;;  %19274 = vst [vmem:[#allocation18_spill] sm:$0xff] %v18539_v10  ;;  %v18551_v20 = vadd.f32 %v18307_v62, %v19278_v46  ;;  %v18555_v47 = vadd.f32 %v18307_v62, %v19279_v3  ;;  %v19280_v21 = vld [vmem:[#allocation6_spill] sm:$0xff]  ;;  %v19281_v10 = vld [vmem:[#allocation4_spill] sm:$0xff]  ;;  %v18575_v3 = vadd.f32 %v18307_v62, %v18319_v15 }
 0xcfa   :  { %19275 = vst [vmem:[#allocation19_spill] sm:$0xff] %v18543_v9  ;;  %19277 = vst [vmem:[#allocation20_spill] sm:$0xff] %v18547_v1  ;;  %v18559_v28 = vadd.f32 %v18307_v62, %v19280_v21  ;;  %v18563_v0 = vadd.f32 %v18307_v62, %v19281_v10  ;;  %v19282_v9 = vld [vmem:[#allocation23_spill] sm:$0xff]  ;;  %v19283_v1 = vld [vmem:[#allocation5_spill] sm:$0xff]  ;;  %v18579_v21 = vadd.f32 %v18307_v62, %v18323_v35  ;;  %v10385_v35 = vmax.f32 %v18347_v7, 0.0 }
 0xcfb   :  { %v18567_v29 = vadd.f32 %v18307_v62, %v19282_v9  ;;  %v18571_v46 = vadd.f32 %v18307_v62, %v19283_v1  ;;  %19284 = vst [vmem:[#allocation9_spill] sm:$0xff] %v18575_v3  ;;  %v18583_v10 = vadd.f32 %v18307_v62, %v18327_v11  ;;  %v18587_v9 = vadd.f32 %v18307_v62, %v18331_v56 }
 0xcfc   :  { %19285 = vst [vmem:[#allocation10_spill] sm:$0xff] %v18579_v21  ;;  %v18591_v1 = vadd.f32 %v18307_v62, %v18335_v38  ;;  %v18595_v15 = vadd.f32 %v18307_v62, %v18339_v26  ;;  %v10384_v3 = vmax.f32 %v18343_v12, 0.0  ;;  %v10386_v21 = vmax.f32 %v18351_v19, 0.0  ;;  %10449 = vst [vmem:[%s18860_s7 + $0x8] sm:$0xff] %v10385_v35 }
 0xcfd   :  { %19286 = vst [vmem:[#allocation12_spill] sm:$0xff] %v18583_v10  ;;  %19287 = vst [vmem:[#allocation16_spill] sm:$0xff] %v18587_v9  ;;  %v10387_v11 = vmax.f32 %v18355_v13, 0.0  ;;  %v10388_v10 = vmax.f32 %v18359_v37, 0.0  ;;  %v10389_v56 = vmax.f32 %v18363_v17, 0.0  ;;  %v10390_v9 = vmax.f32 %v18367_v41, 0.0 }
 0xcfe   :  { %19288 = vst [vmem:[#allocation15_spill] sm:$0xff] %v18591_v1  ;;  %v10391_v38 = vmax.f32 %v18371_v2, 0.0  ;;  %v10392_v1 = vmax.f32 %v18375_v23, 0.0  ;;  %v10393_v62 = vmax.f32 %v18379_v14, 0.0  ;;  %v10394_v26 = vmax.f32 %v18383_v34, 0.0  ;;  %10448 = vst [vmem:[%s18860_s7] sm:$0xff] %v10384_v3 }
 0xcff   :  { %v10395_v12 = vmax.f32 %v18387_v33, 0.0  ;;  %10450 = vst [vmem:[%s18860_s7 + $0x10] sm:$0xff] %v10386_v21  ;;  %10451 = vst [vmem:[%s18860_s7 + $0x18] sm:$0xff] %v10387_v11  ;;  %v10396_v7 = vmax.f32 %v18391_v32, 0.0  ;;  %v10397_v19 = vmax.f32 %v18395_v49, 0.0  ;;  %v10398_v13 = vmax.f32 %v18399_v58, 0.0 }
 0xd00   :  { %v10399_v37 = vmax.f32 %v18403_v51, 0.0  ;;  %10452 = vst [vmem:[%s18860_s7 + $0x20] sm:$0xff] %v10388_v10  ;;  %10453 = vst [vmem:[%s18860_s7 + $0x28] sm:$0xff] %v10389_v56  ;;  %v10400_v17 = vmax.f32 %v18407_v60, 0.0  ;;  %v10401_v41 = vmax.f32 %v18411_v8, 0.0  ;;  %v10402_v2 = vmax.f32 %v18415_v25, 0.0 }
 0xd01   :  { %10454 = vst [vmem:[%s18860_s7 + $0x30] sm:$0xff] %v10390_v9  ;;  %10455 = vst [vmem:[%s18860_s7 + $0x38] sm:$0xff] %v10391_v38  ;;  %v10403_v23 = vmax.f32 %v18419_v6, 0.0  ;;  %v10404_v14 = vmax.f32 %v18423_v63, 0.0  ;;  %v10405_v34 = vmax.f32 %v18427_v54, 0.0  ;;  %v10406_v33 = vmax.f32 %v18431_v45, 0.0 }
 0xd02   :  { %10456 = vst [vmem:[%s18860_s7 + $0x40] sm:$0xff] %v10392_v1  ;;  %10457 = vst [vmem:[%s18860_s7 + $0x48] sm:$0xff] %v10393_v62  ;;  %v10407_v32 = vmax.f32 %v18435_v5, 0.0  ;;  %v10408_v49 = vmax.f32 %v18439_v52, 0.0  ;;  %v10409_v58 = vmax.f32 %v18443_v39, 0.0  ;;  %v10410_v51 = vmax.f32 %v18447_v42, 0.0 }
 0xd03   :  { %10458 = vst [vmem:[%s18860_s7 + $0x50] sm:$0xff] %v10394_v26  ;;  %10459 = vst [vmem:[%s18860_s7 + $0x58] sm:$0xff] %v10395_v12  ;;  %v10411_v60 = vmax.f32 %v18451_v48, 0.0  ;;  %v10412_v8 = vmax.f32 %v18455_v55, 0.0  ;;  %v10413_v25 = vmax.f32 %v18459_v4, 0.0  ;;  %v10414_v6 = vmax.f32 %v18463_v24, 0.0 }
 0xd04   :  { %10460 = vst [vmem:[%s18860_s7 + $0x60] sm:$0xff] %v10396_v7  ;;  %10461 = vst [vmem:[%s18860_s7 + $0x68] sm:$0xff] %v10397_v19  ;;  %v10415_v63 = vmax.f32 %v18467_v36, 0.0  ;;  %v10416_v54 = vmax.f32 %v18471_v18, 0.0  ;;  %v10417_v45 = vmax.f32 %v18475_v27, 0.0  ;;  %v10418_v5 = vmax.f32 %v18479_v57, 0.0 }
 0xd05   :  { %10462 = vst [vmem:[%s18860_s7 + $0x70] sm:$0xff] %v10398_v13  ;;  %10463 = vst [vmem:[%s18860_s7 + $0x78] sm:$0xff] %v10399_v37  ;;  %v10419_v52 = vmax.f32 %v18483_v59, 0.0  ;;  %v10420_v39 = vmax.f32 %v18487_v44, 0.0  ;;  %v10421_v42 = vmax.f32 %v18491_v53, 0.0  ;;  %v10422_v48 = vmax.f32 %v18495_v43, 0.0 }
 0xd06   :  { %10464 = vst [vmem:[%s18860_s7 + $0x80] sm:$0xff] %v10400_v17  ;;  %10465 = vst [vmem:[%s18860_s7 + $0x88] sm:$0xff] %v10401_v41  ;;  %v10423_v55 = vmax.f32 %v18499_v31, 0.0  ;;  %v10424_v4 = vmax.f32 %v18503_v30, 0.0  ;;  %v10425_v24 = vmax.f32 %v18507_v22, 0.0  ;;  %v10426_v36 = vmax.f32 %v18511_v50, 0.0 }
 0xd07   :  { %10466 = vst [vmem:[%s18860_s7 + $0x90] sm:$0xff] %v10402_v2  ;;  %10467 = vst [vmem:[%s18860_s7 + $0x98] sm:$0xff] %v10403_v23  ;;  %v10427_v18 = vmax.f32 %v18515_v16, 0.0  ;;  %v10428_v27 = vmax.f32 %v18519_v61, 0.0  ;;  %v10429_v57 = vmax.f32 %v18523_v40, 0.0  ;;  %v19289_v59 = vld [vmem:[#allocation7_spill] sm:$0xff] }
 0xd08   :  { %10468 = vst [vmem:[%s18860_s7 + $0xa0] sm:$0xff] %v10404_v14  ;;  %10469 = vst [vmem:[%s18860_s7 + $0xa8] sm:$0xff] %v10405_v34  ;;  %v10430_v44 = vmax.f32 %v19289_v59, 0.0  ;;  %v19290_v53 = vld [vmem:[#allocation25_spill] sm:$0xff]  ;;  %v19292_v22 = vld [vmem:[#allocation18_spill] sm:$0xff]  ;;  %v10436_v21 = vmax.f32 %v18551_v20, 0.0 }
 0xd09   :  { %10470 = vst [vmem:[%s18860_s7 + $0xb0] sm:$0xff] %v10406_v33  ;;  %10471 = vst [vmem:[%s18860_s7 + $0xb8] sm:$0xff] %v10407_v32  ;;  %v10431_v43 = vmax.f32 %v19290_v53, 0.0  ;;  %v19291_v31 = vld [vmem:[#allocation17_spill] sm:$0xff]  ;;  %v10433_v50 = vmax.f32 %v19292_v22, 0.0  ;;  %v19293_v16 = vld [vmem:[#allocation19_spill] sm:$0xff] }
 0xd0a   :  { %10472 = vst [vmem:[%s18860_s7 + $0xc0] sm:$0xff] %v10408_v49  ;;  %10473 = vst [vmem:[%s18860_s7 + $0xc8] sm:$0xff] %v10409_v58  ;;  %v10432_v30 = vmax.f32 %v19291_v31, 0.0  ;;  %v10434_v61 = vmax.f32 %v19293_v16, 0.0  ;;  %v19294_v40 = vld [vmem:[#allocation20_spill] sm:$0xff]  ;;  %v10437_v10 = vmax.f32 %v18555_v47, 0.0 }
 0xd0b   :  { %10474 = vst [vmem:[%s18860_s7 + $0xd0] sm:$0xff] %v10410_v51  ;;  %10475 = vst [vmem:[%s18860_s7 + $0xd8] sm:$0xff] %v10411_v60  ;;  %v10435_v3 = vmax.f32 %v19294_v40, 0.0  ;;  %v10438_v9 = vmax.f32 %v18559_v28, 0.0  ;;  %v10439_v1 = vmax.f32 %v18563_v0, 0.0  ;;  %v10440_v20 = vmax.f32 %v18567_v29, 0.0 }
 0xd0c   :  { %10476 = vst [vmem:[%s18860_s7 + $0xe0] sm:$0xff] %v10412_v8  ;;  %10477 = vst [vmem:[%s18860_s7 + $0xe8] sm:$0xff] %v10413_v25  ;;  %v10441_v47 = vmax.f32 %v18571_v46, 0.0  ;;  %v19295_v28 = vld [vmem:[#allocation9_spill] sm:$0xff]  ;;  %v19296_v35 = vld [vmem:[#allocation10_spill] sm:$0xff]  ;;  %v10447_v12 = vmax.f32 %v18595_v15, 0.0 }
 0xd0d   :  { %10478 = vst [vmem:[%s18860_s7 + $0xf0] sm:$0xff] %v10414_v6  ;;  %10479 = vst [vmem:[%s18860_s7 + $0xf8] sm:$0xff] %v10415_v63  ;;  %v10442_v0 = vmax.f32 %v19295_v28, 0.0  ;;  %v10443_v11 = vmax.f32 %v19296_v35, 0.0  ;;  %v19297_v29 = vld [vmem:[#allocation12_spill] sm:$0xff]  ;;  %v19299_v62 = vld [vmem:[#allocation15_spill] sm:$0xff] }
 0xd0e   :  { %10480 = vst [vmem:[%s18860_s7 + $0x100] sm:$0xff] %v10416_v54  ;;  %10481 = vst [vmem:[%s18860_s7 + $0x108] sm:$0xff] %v10417_v45  ;;  %v10444_v46 = vmax.f32 %v19297_v29, 0.0  ;;  %v19298_v56 = vld [vmem:[#allocation16_spill] sm:$0xff]  ;;  %v10446_v26 = vmax.f32 %v19299_v62, 0.0 }
 0xd0f   :  { %10482 = vst [vmem:[%s18860_s7 + $0x110] sm:$0xff] %v10418_v5  ;;  %10483 = vst [vmem:[%s18860_s7 + $0x118] sm:$0xff] %v10419_v52  ;;  %v10445_v38 = vmax.f32 %v19298_v56, 0.0 }
 0xd10   :  { %10484 = vst [vmem:[%s18860_s7 + $0x120] sm:$0xff] %v10420_v39  ;;  %10485 = vst [vmem:[%s18860_s7 + $0x128] sm:$0xff] %v10421_v42 }
 0xd11   :  { %10486 = vst [vmem:[%s18860_s7 + $0x130] sm:$0xff] %v10422_v48  ;;  %10487 = vst [vmem:[%s18860_s7 + $0x138] sm:$0xff] %v10423_v55 }
 0xd12   :  { %10488 = vst [vmem:[%s18860_s7 + $0x140] sm:$0xff] %v10424_v4  ;;  %10489 = vst [vmem:[%s18860_s7 + $0x148] sm:$0xff] %v10425_v24 }
 0xd13   :  { %10490 = vst [vmem:[%s18860_s7 + $0x150] sm:$0xff] %v10426_v36  ;;  %10491 = vst [vmem:[%s18860_s7 + $0x158] sm:$0xff] %v10427_v18 }
 0xd14   :  { %10492 = vst [vmem:[%s18860_s7 + $0x160] sm:$0xff] %v10428_v27  ;;  %10493 = vst [vmem:[%s18860_s7 + $0x168] sm:$0xff] %v10429_v57 }
 0xd15   :  { %10494 = vst [vmem:[%s18860_s7 + $0x170] sm:$0xff] %v10430_v44  ;;  %10495 = vst [vmem:[%s18860_s7 + $0x178] sm:$0xff] %v10431_v43 }
 0xd16   :  { %10496 = vst [vmem:[%s18860_s7 + $0x180] sm:$0xff] %v10432_v30  ;;  %10497 = vst [vmem:[%s18860_s7 + $0x188] sm:$0xff] %v10433_v50 }
 0xd17   :  { %10498 = vst [vmem:[%s18860_s7 + $0x190] sm:$0xff] %v10434_v61  ;;  %10499 = vst [vmem:[%s18860_s7 + $0x198] sm:$0xff] %v10435_v3 }
 0xd18   :  { %10500 = vst [vmem:[%s18860_s7 + $0x1a0] sm:$0xff] %v10436_v21  ;;  %10501 = vst [vmem:[%s18860_s7 + $0x1a8] sm:$0xff] %v10437_v10 }
 0xd19   :  { %10502 = vst [vmem:[%s18860_s7 + $0x1b0] sm:$0xff] %v10438_v9  ;;  %10503 = vst [vmem:[%s18860_s7 + $0x1b8] sm:$0xff] %v10439_v1 }
 0xd1a   :  { %10504 = vst [vmem:[%s18860_s7 + $0x1c0] sm:$0xff] %v10440_v20  ;;  %10505 = vst [vmem:[%s18860_s7 + $0x1c8] sm:$0xff] %v10441_v47 }
 0xd1b   :  { %10506 = vst [vmem:[%s18860_s7 + $0x1d0] sm:$0xff] %v10442_v0  ;;  %10507 = vst [vmem:[%s18860_s7 + $0x1d8] sm:$0xff] %v10443_v11 }
 0xd1c   :  { %10508 = vst [vmem:[%s18860_s7 + $0x1e0] sm:$0xff] %v10444_v46  ;;  %10509 = vst [vmem:[%s18860_s7 + $0x1e8] sm:$0xff] %v10445_v38 }
 0xd1d   :  { %10510 = vst [vmem:[%s18860_s7 + $0x1f0] sm:$0xff] %v10446_v26  ;;  %10511 = vst [vmem:[%s18860_s7 + $0x1f8] sm:$0xff] %v10447_v12 }

</bundles_post_ra>
